<compile_context>
chip_gen: v7x
topology: tpu7x:2x2x1
jax: 0.10.0
libtpu: 0.0.40
codegen_flags: <defaults>
</compile_context>

<pallas_src>
import functools

import jax
import jax.numpy as jnp
from jax.experimental import pallas as pl
from jax.experimental.pallas import tpu as pltpu

LN_EPS = 1e-7                   # reference: LayerNorm((d,), eps=1e-07)
MM_DTYPE = jnp.bfloat16         # MXU operand dtype (accumulation stays f32)

# ---------------------------------------------------------------------------
# slab row indices (must match prepare_params packing order)
# ---------------------------------------------------------------------------
(I_LIN, I_EQ, I_EK, I_EV, I_EO,
 I_SQ, I_SK, I_SV, I_SO,
 I_CQ, I_CK, I_CV, I_CO) = range(13)                 # W_dd slab: (13, d, d)
I_EL1, I_DL1, I_M1 = range(3)                        # W_dh slab: (3, d, hid)
I_EL2, I_DL2, I_M2 = range(3)                        # W_hd slab: (3, hid, d)
(I_LINB, I_ELN1W, I_ELN1B, I_ELN2W, I_ELN2B, I_EL2B,
 I_DLN1W, I_DLN1B, I_DLN2W, I_DLN2B, I_DLN3W, I_DLN3B,
 I_DL2B, I_MB2) = range(14)                          # B_d slab: (14, d)
I_EL1B, I_DL1B, I_MB1 = range(3)                     # B_h slab: (3, hid)


# ---------------------------------------------------------------------------
# small helpers
# ---------------------------------------------------------------------------
def _full_spec(shape):
    nd = len(shape)
    return pl.BlockSpec(shape, lambda *_: (0,) * nd)


def _dot(a, w):
    """x @ W with operands cast to the weight dtype (bf16), f32 accumulation."""
    return jnp.dot(a.astype(w.dtype), w, preferred_element_type=jnp.float32)


def _layer_norm(x, w, b):
    mu = jnp.mean(x, axis=-1, keepdims=True)
    xc = x - mu
    var = jnp.mean(xc * xc, axis=-1, keepdims=True)
    return xc * jax.lax.rsqrt(var + LN_EPS) * w + b


def _mha(q3, k3, v3, wo, ctx_ref, num_heads):
    """Multi-head attention core.

    q3/k3/v3: (b_tile, n, d) already projected, in MM_DTYPE.
    Per-head contexts are stored into static lane slices of the VMEM scratch
    `ctx_ref` (no lane-axis concatenate), then ONE full-width output projection
    runs at M = b_tile * n rows.  Softmax math stays f32.
    """
    b_tile, n, d = q3.shape
    dh = d // num_heads
    scale = 1.0 / float(dh) ** 0.5
    for h in range(num_heads):                                   # static tiny loop
        sl = slice(h * dh, (h + 1) * dh)
        s = jax.lax.dot_general(q3[:, :, sl], k3[:, :, sl],
                                (((2,), (2,)), ((0,), (0,))),
                                preferred_element_type=jnp.float32) * scale
        s = s - jnp.max(s, axis=-1, keepdims=True)
        p = jnp.exp(s)
        p = p * pl.reciprocal(jnp.sum(p, axis=-1, keepdims=True), approx=True)
        ctx = jax.lax.dot_general(p.astype(v3.dtype), v3[:, :, sl],
                                  (((2,), (1,)), ((0,), (0,))),
                                  preferred_element_type=jnp.float32)  # (b, n, dh)
        ctx_ref[:, sl] = ctx.reshape(b_tile * n, dh).astype(ctx_ref.dtype)
    return _dot(ctx_ref[...], wo)                                # single (M,d)@(d,d)


# ---------------------------------------------------------------------------
# the fused VisionTransformer kernel (one grid step == B_TILE batch elements)
# ---------------------------------------------------------------------------
def _vit_kernel(num_heads, num_layers, n,
                xu_ref, qp_ref, w_dd_ref, w_dh_ref, w_hd_ref, b_d_ref, b_h_ref,
                o_ref, ctx_ref):
    M, d = xu_ref.shape                              # M = b_tile * n
    b_tile = M // n

    # slab accessors: loads happen at each use site (vld is cheap; this avoids
    # keeping 30+ matrices live in vregs for the whole kernel -> no spill storm)
    dd = lambda i: w_dd_ref[i]                       # (d, d)   bf16
    dh_ = lambda i: w_dh_ref[i]                      # (d, hid) bf16
    hd = lambda i: w_hd_ref[i]                       # (hid, d) bf16
    bd = lambda i: b_d_ref[i:i + 1, :]               # (1, d)   f32  (broadcasts)
    bh = lambda i: b_h_ref[i:i + 1, :]               # (1, hid) f32  (broadcasts)

    to3 = lambda a: a.astype(MM_DTYPE).reshape(b_tile, n, d)   # tile-aligned (free)

    xu = xu_ref[...]                                 # (M, d) f32
    pos = qp_ref[0]                                  # (M, d) f32, pre-tiled on host
    qe = qp_ref[1]                                   # (M, d) f32, pre-tiled on host

    # ---- linear_encoding + residual, then positional encoding ----
    x = _dot(xu, dd(I_LIN)) + bd(I_LINB) + xu
    x = x + pos

    # ---- encoder: num_layers applications of the shared-weight layer ----
    def enc_layer(_, s):
        s2 = _layer_norm(s, bd(I_ELN1W), bd(I_ELN1B))        # q = k = v = norm1(src)
        q = _dot(s2, dd(I_EQ))
        k = _dot(s2, dd(I_EK))
        v = _dot(s2, dd(I_EV))
        s = s + _mha(to3(q), to3(k), to3(v), dd(I_EO), ctx_ref, num_heads)
        s2 = _layer_norm(s, bd(I_ELN2W), bd(I_ELN2B))        # norm2 + FFN
        h1 = jnp.maximum(_dot(s2, dh_(I_EL1)) + bh(I_EL1B), 0.0)
        return s + _dot(h1, hd(I_EL2)) + bd(I_EL2B)

    x = jax.lax.fori_loop(0, num_layers, enc_layer, x, unroll=True)

    # ---- decoder (memory = encoder output, fixed across layers) ----
    mem = x
    mem_k3 = to3(_dot(mem, dd(I_CK)))                # hoisted: layer-invariant
    mem_v3 = to3(_dot(mem, dd(I_CV)))

    def dec_layer(_, t):
        # self attention: q = k = norm1(tgt) + query_pos, v = norm1(tgt)
        t2 = _layer_norm(t, bd(I_DLN1W), bd(I_DLN1B))
        qk = t2 + qe
        q = _dot(qk, dd(I_SQ))
        k = _dot(qk, dd(I_SK))
        v = _dot(t2, dd(I_SV))
        t = t + _mha(to3(q), to3(k), to3(v), dd(I_SO), ctx_ref, num_heads)
        # cross attention: q = norm2(tgt) + query_pos, k = v = memory (pos is None)
        t2 = _layer_norm(t, bd(I_DLN2W), bd(I_DLN2B))
        q = _dot(t2 + qe, dd(I_CQ))
        t = t + _mha(to3(q), mem_k3, mem_v3, dd(I_CO), ctx_ref, num_heads)
        # feed forward
        t2 = _layer_norm(t, bd(I_DLN3W), bd(I_DLN3B))
        h1 = jnp.maximum(_dot(t2, dh_(I_DL1)) + bh(I_DL1B), 0.0)
        return t + _dot(h1, hd(I_DL2)) + bd(I_DL2B)

    x = jax.lax.fori_loop(0, num_layers, dec_layer, x, unroll=True)

    # ---- mlp_head + residual ----
    h1 = jnp.maximum(_dot(x, dh_(I_M1)) + bh(I_MB1), 0.0)
    x = _dot(h1, hd(I_M2)) + bd(I_MB2) + x

    o_ref[...] = x


# ---------------------------------------------------------------------------
# plain-JAX glue: patch unfold / fold (exact replica of the reference reshapes)
# ---------------------------------------------------------------------------
def unfold(x, k):
    N, C, H, W = x.shape
    numH, numW = H // k, W // k
    y = x[:, :, : numH * k, : numW * k]
    y = y.reshape(N, C, numH, k, W).transpose(0, 1, 2, 4, 3)
    y = y.reshape(N * C, numH, numW, k, k).transpose(0, 1, 2, 4, 3)
    y = y.reshape(N, C, numH * numW, k * k).transpose(0, 2, 1, 3)
    return y.reshape(N, numH * numW, -1)             # (N, num_patches, C*k*k)


def fold(x, k, out_h, out_w):
    # Replicates _fold_ exactly (the reference reshapes `x` directly).
    N, C, L = x.shape
    org_C = L // (k * k)
    numH, numW = out_h // k, out_w // k
    y = x.reshape(N * org_C, k, numH, numW, k).transpose(0, 2, 3, 1, 4)
    return y.reshape(N, org_C, out_h, out_w)


# ---------------------------------------------------------------------------
# parameters: PyTorch-layout init + one-time host-side slab packing
# ---------------------------------------------------------------------------
def init_params(key, d, hid, n, num_queries):
    keys = iter(jax.random.split(key, 16))
    w = lambda k, s: jax.random.normal(k, s, jnp.float32) * 0.02
    zeros = lambda s: jnp.zeros(s, jnp.float32)
    ones = lambda s: jnp.ones(s, jnp.float32)
    enc = dict(in_proj=w(next(keys), (3 * d, d)), out_w=w(next(keys), (d, d)),
               ln1w=ones((1, d)), ln1b=zeros((1, d)),
               ln2w=ones((1, d)), ln2b=zeros((1, d)),
               l1w=w(next(keys), (hid, d)), l1b=zeros((1, hid)),
               l2w=w(next(keys), (d, hid)), l2b=zeros((1, d)))
    dec = dict(sa_in=w(next(keys), (3 * d, d)), sa_out=w(next(keys), (d, d)),
               ca_in=w(next(keys), (3 * d, d)), ca_out=w(next(keys), (d, d)),
               ln1w=ones((1, d)), ln1b=zeros((1, d)),
               ln2w=ones((1, d)), ln2b=zeros((1, d)),
               ln3w=ones((1, d)), ln3b=zeros((1, d)),
               l1w=w(next(keys), (hid, d)), l1b=zeros((1, hid)),
               l2w=w(next(keys), (d, hid)), l2b=zeros((1, d)))
    return dict(
        lin_enc_w=w(next(keys), (d, d)), lin_enc_b=zeros((1, d)),
        mlp_w1=w(next(keys), (hid, d)), mlp_b1=zeros((1, hid)),
        mlp_w2=w(next(keys), (d, hid)), mlp_b2=zeros((1, d)),
        query_w=w(next(keys), (num_queries, d * n)),
        pe_w=w(next(keys), (n, d)),
        enc=enc, dec=dec,
    )


def prepare_params(params, mm_dtype=MM_DTYPE):
    """One-time host-side prep: split stacked in_proj matrices, pre-transpose
    every weight (kernel computes plain x @ W), cast matmul weights to bf16,
    and pack everything into 5 slabs (7 kernel inputs total instead of 36)."""
    d = params["lin_enc_w"].shape[0]
    enc, dec = params["enc"], params["dec"]

    def qkv_t(in_proj):
        return in_proj[0:d].T, in_proj[d:2 * d].T, in_proj[2 * d:].T

    e_wq, e_wk, e_wv = qkv_t(enc["in_proj"])
    s_wq, s_wk, s_wv = qkv_t(dec["sa_in"])
    c_wq, c_wk, c_wv = qkv_t(dec["ca_in"])

    w_dd = jnp.stack([                                   # order: I_LIN..I_CO
        params["lin_enc_w"].T,
        e_wq, e_wk, e_wv, enc["out_w"].T,
        s_wq, s_wk, s_wv, dec["sa_out"].T,
        c_wq, c_wk, c_wv, dec["ca_out"].T,
    ]).astype(mm_dtype)                                  # (13, d, d)
    w_dh = jnp.stack([enc["l1w"].T, dec["l1w"].T, params["mlp_w1"].T]
                     ).astype(mm_dtype)                  # (3, d, hid)
    w_hd = jnp.stack([enc["l2w"].T, dec["l2w"].T, params["mlp_w2"].T]
                     ).astype(mm_dtype)                  # (3, hid, d)
    b_d = jnp.concatenate([                              # order: I_LINB..I_MB2
        params["lin_enc_b"],
        enc["ln1w"], enc["ln1b"], enc["ln2w"], enc["ln2b"], enc["l2b"],
        dec["ln1w"], dec["ln1b"], dec["ln2w"], dec["ln2b"],
        dec["ln3w"], dec["ln3b"], dec["l2b"],
        params["mlp_b2"],
    ], axis=0).astype(jnp.float32)                       # (14, d)
    b_h = jnp.concatenate([enc["l1b"], dec["l1b"], params["mlp_b1"]],
                          axis=0).astype(jnp.float32)    # (3, hid)
    return dict(w_dd=w_dd, w_dh=w_dh, w_hd=w_hd, b_d=b_d, b_h=b_h)


# ---------------------------------------------------------------------------
# batch-tile heuristic + cost estimate
# ---------------------------------------------------------------------------
def _default_target_rows():
    # v5e MXU is 128-row; v6e/v7x are 256-row.
    try:
        kind = jax.devices()[0].device_kind.lower()
    except Exception:
        return 256
    return 128 if ("v5e" in kind or "v5 lite" in kind or "v5litepod" in kind) else 256


def _pick_b_tile(b, n, target_rows, min_grid=2):
    """Largest divisor of b with b_tile*n <= target_rows, keeping grid >= 2
    (both v7x TensorCores busy) whenever the batch allows it."""
    best = 1
    for bt in range(1, b + 1):
        if b % bt:
            continue
        if bt * n > target_rows:
            break
        best = bt
    while best > 1 and (b // best) < min_grid:
        cand = best - 1
        while cand > 1 and b % cand != 0:
            cand -= 1
        best = max(cand, 1)
    return best


def _cost_estimate(b, n, d, hid, num_layers, num_heads):
    rows = b * n
    mm = lambda m, k, nn: 2 * m * k * nn
    attn = 4 * mm(rows, d, d) + 2 * (2 * b * num_heads * n * n * (d // num_heads))
    ffn = mm(rows, d, hid) + mm(rows, hid, d)
    flops = (mm(rows, d, d)                              # linear_encoding
             + num_layers * (attn + ffn)                 # encoder
             + num_layers * (2 * attn + ffn)             # decoder (self + cross)
             + mm(rows, d, hid) + mm(rows, hid, d))      # mlp_head
    transcendentals = 3 * num_layers * b * num_heads * n * n     # softmax exps
    bytes_accessed = (4 * rows * d * 2                   # xu in + out (f32)
                      + 4 * 2 * rows * d                 # pos + query slab
                      + 2 * (13 * d * d + 3 * d * hid + 3 * hid * d)   # bf16 weights
                      + 4 * (14 * d + 3 * hid))          # f32 bias/LN slabs
    return pl.CostEstimate(flops=int(flops), transcendentals=int(transcendentals),
                           bytes_accessed=int(bytes_accessed))


# ---------------------------------------------------------------------------
# VisionTransformer forward (single fused, batch-tiled pallas_call)
# ---------------------------------------------------------------------------
def vision_transformer_forward(x, query_idx, params, slabs, *,
                               patch_dim, img_dim, num_heads, num_layers,
                               b_tile=None, target_rows=None):
    b = x.shape[0]
    xu = unfold(x, patch_dim)                            # (b, n, flatten_dim)
    n, d = xu.shape[1], xu.shape[2]
    hid = slabs["w_dh"].shape[2]

    if target_rows is None:
        target_rows = _default_target_rows()
    if b_tile is None:
        b_tile = _pick_b_tile(b, n, target_rows)
    grid_len = b // b_tile
    rows = b_tile * n                                    # M per grid step

    # 2-D activation layout: (b*n, d) with d on lanes; blocks are (rows, d).
    xu2 = xu.reshape(b * n, d)

    # query embedding + learned positional encoding, pre-tiled over the batch
    # tile on the host (identical for every batch element / grid step).
    qe = jnp.take(params["query_w"], query_idx, axis=0).reshape(n, d)
    pos = params["pe_w"]                                 # (n, d)
    qp = jnp.stack([jnp.tile(pos, (b_tile, 1)), jnp.tile(qe, (b_tile, 1))])  # (2, rows, d)

    kernel = functools.partial(_vit_kernel, num_heads, num_layers, n)
    in_specs = [pl.BlockSpec((rows, d), lambda i: (i, 0)),
                _full_spec(qp.shape),
                _full_spec(slabs["w_dd"].shape),
                _full_spec(slabs["w_dh"].shape),
                _full_spec(slabs["w_hd"].shape),
                _full_spec(slabs["b_d"].shape),
                _full_spec(slabs["b_h"].shape)]

    out2 = pl.pallas_call(
        kernel,
        out_shape=jax.ShapeDtypeStruct((b * n, d), jnp.float32),
        grid=(grid_len,),
        in_specs=in_specs,
        out_specs=pl.BlockSpec((rows, d), lambda i: (i, 0)),
        scratch_shapes=[pltpu.VMEM((rows, d), jnp.float32)],   # per-head ctx slab
        compiler_params=pltpu.CompilerParams(
            dimension_semantics=("parallel",)),          # shard grid across TCs (v7x)
        cost_estimate=_cost_estimate(b, n, d, hid, num_layers, num_heads),
    )(xu2, qp, slabs["w_dd"], slabs["w_dh"], slabs["w_hd"],
      slabs["b_d"], slabs["b_h"])

    # fold back to image (con_loss=False)
    out = out2.reshape(b, n, d)
    return fold(out, patch_dim, img_dim[0], img_dim[1])


if __name__ == "__main__":
    IMG = (16, 16)
    PATCH = 4
    CH = 4
    EMBED = PATCH * PATCH * CH        # 64 (flatten_dim == embedding_dim, residuals need this)
    HEADS = 4
    LAYERS = 2
    HIDDEN = 32
    NUM_QUERIES = 1
    NPATCH = (IMG[0] * IMG[1]) // PATCH ** 2             # 16

    key = jax.random.PRNGKey(0)
    kx, kp = jax.random.split(key)
    x = jax.random.normal(kx, (2, CH, IMG[0], IMG[1]), jnp.float32)   # NCHW
    query_idx = jnp.array(0, dtype=jnp.int32)

    params = init_params(kp, EMBED, HIDDEN, NPATCH, NUM_QUERIES)
    slabs = prepare_params(params)                       # one-time slab packing

    fwd = jax.jit(functools.partial(
        vision_transformer_forward,
        patch_dim=PATCH, img_dim=IMG, num_heads=HEADS, num_layers=LAYERS))

    out = jax.block_until_ready(fwd(x, query_idx, params, slabs))
    assert out.shape == (2, CH, IMG[0], IMG[1]), out.shape
    assert bool(jnp.all(jnp.isfinite(out)))
    print("KERNEL_OK")
</pallas_src>

<mosaic_0001>
module attributes {stable_mosaic.version = 11 : i64} {
  func.func @_vit_kernel(%arg0: i32, %arg1: memref<16x64xf32, #tpu.memory_space<vmem>>, %arg2: memref<2x16x64xf32, #tpu.memory_space<vmem>>, %arg3: memref<13x64x64xbf16, #tpu.memory_space<vmem>>, %arg4: memref<3x64x32xbf16, #tpu.memory_space<vmem>>, %arg5: memref<3x32x64xbf16, #tpu.memory_space<vmem>>, %arg6: memref<14x64xf32, #tpu.memory_space<vmem>>, %arg7: memref<3x32xf32, #tpu.memory_space<vmem>>, %arg8: memref<16x64xf32, #tpu.memory_space<vmem>>, %arg9: memref<16x64xf32, #tpu.memory_space<vmem>>) attributes {dimension_semantics = [#tpu.dimension_semantics<parallel>], iteration_bounds = array<i64: 2>, scalar_prefetch = 0 : i64, scratch_operands = 1 : i64, tpu.core_type = #tpu.core_type<tc>, window_params = [{transform_indices = @transform_0, window_bounds = array<i64: 16, 64>}, {pipeline_mode = #tpu.pipeline_mode<synchronous>, transform_indices = @transform_1, window_bounds = array<i64: 2, 16, 64>}, {pipeline_mode = #tpu.pipeline_mode<synchronous>, transform_indices = @transform_2, window_bounds = array<i64: 13, 64, 64>}, {pipeline_mode = #tpu.pipeline_mode<synchronous>, transform_indices = @transform_3, window_bounds = array<i64: 3, 64, 32>}, {pipeline_mode = #tpu.pipeline_mode<synchronous>, transform_indices = @transform_4, window_bounds = array<i64: 3, 32, 64>}, {pipeline_mode = #tpu.pipeline_mode<synchronous>, transform_indices = @transform_5, window_bounds = array<i64: 14, 64>}, {pipeline_mode = #tpu.pipeline_mode<synchronous>, transform_indices = @transform_6, window_bounds = array<i64: 3, 32>}, {transform_indices = @transform_7, window_bounds = array<i64: 16, 64>}]} {
    %c0 = arith.constant 0 : index
    %c0_0 = arith.constant 0 : index
    %0 = vector.load %arg1[%c0, %c0_0] : memref<16x64xf32, #tpu.memory_space<vmem>>, vector<16x64xf32>
    %c0_1 = arith.constant 0 : index
    %c0_2 = arith.constant 0 : index
    %c0_3 = arith.constant 0 : index
    %1 = vector.load %arg2[%c0_1, %c0_2, %c0_3] : memref<2x16x64xf32, #tpu.memory_space<vmem>>, vector<1x16x64xf32>
    %2 = vector.shape_cast %1 : vector<1x16x64xf32> to vector<16x64xf32>
    %c1 = arith.constant 1 : index
    %c0_4 = arith.constant 0 : index
    %c0_5 = arith.constant 0 : index
    %3 = vector.load %arg2[%c1, %c0_4, %c0_5] : memref<2x16x64xf32, #tpu.memory_space<vmem>>, vector<1x16x64xf32>
    %4 = vector.shape_cast %3 : vector<1x16x64xf32> to vector<16x64xf32>
    %c0_6 = arith.constant 0 : index
    %c0_7 = arith.constant 0 : index
    %c0_8 = arith.constant 0 : index
    %5 = vector.load %arg3[%c0_6, %c0_7, %c0_8] : memref<13x64x64xbf16, #tpu.memory_space<vmem>>, vector<1x64x64xbf16>
    %6 = vector.shape_cast %5 : vector<1x64x64xbf16> to vector<64x64xbf16>
    %7 = arith.truncf %0 : vector<16x64xf32> to vector<16x64xbf16>
    %cst = arith.constant dense<0.000000e+00> : vector<16x64xf32>
    %8 = tpu.matmul %7, %6, %cst {dimension_numbers = #tpu.dot_dimension_numbers<[1], [0], [0], [1], [0, 0, 1, 1], [], []>} : vector<16x64xbf16>, vector<64x64xbf16>, vector<16x64xf32> -> vector<16x64xf32>
    %c0_9 = arith.constant 0 : index
    %c0_10 = arith.constant 0 : index
    %9 = vector.load %arg6[%c0_9, %c0_10] : memref<14x64xf32, #tpu.memory_space<vmem>>, vector<1x64xf32>
    %10 = vector.broadcast %9 : vector<1x64xf32> to vector<16x64xf32>
    %11 = arith.addf %8, %10 : vector<16x64xf32>
    %12 = arith.addf %11, %0 : vector<16x64xf32>
    %13 = arith.addf %12, %2 : vector<16x64xf32>
    %c0_i32 = arith.constant 0 : i32
    %c1_11 = arith.constant 1 : index
    %c0_12 = arith.constant 0 : index
    %14 = vector.load %arg6[%c1_11, %c0_12] : memref<14x64xf32, #tpu.memory_space<vmem>>, vector<1x64xf32>
    %c2 = arith.constant 2 : index
    %c0_13 = arith.constant 0 : index
    %15 = vector.load %arg6[%c2, %c0_13] : memref<14x64xf32, #tpu.memory_space<vmem>>, vector<1x64xf32>
    %cst_14 = arith.constant dense<0.000000e+00> : vector<16xf32>
    %16 = vector.multi_reduction <add>, %13, %cst_14 [1] : vector<16x64xf32> to vector<16xf32>
    %17 = vector.shape_cast %16 : vector<16xf32> to vector<16x1xf32>
    %cst_15 = arith.constant 6.400000e+01 : f32
    %18 = vector.broadcast %cst_15 : f32 to vector<16x1xf32>
    %19 = arith.divf %17, %18 : vector<16x1xf32>
    %20 = vector.broadcast %19 : vector<16x1xf32> to vector<16x64xf32>
    %21 = arith.subf %13, %20 : vector<16x64xf32>
    %22 = arith.mulf %21, %21 : vector<16x64xf32>
    %cst_16 = arith.constant dense<0.000000e+00> : vector<16xf32>
    %23 = vector.multi_reduction <add>, %22, %cst_16 [1] : vector<16x64xf32> to vector<16xf32>
    %24 = vector.shape_cast %23 : vector<16xf32> to vector<16x1xf32>
    %cst_17 = arith.constant 6.400000e+01 : f32
    %25 = vector.broadcast %cst_17 : f32 to vector<16x1xf32>
    %26 = arith.divf %24, %25 : vector<16x1xf32>
    %cst_18 = arith.constant 1.000000e-07 : f32
    %27 = vector.broadcast %cst_18 : f32 to vector<16x1xf32>
    %28 = arith.addf %26, %27 : vector<16x1xf32>
    %29 = math.rsqrt %28 : vector<16x1xf32>
    %30 = vector.broadcast %29 : vector<16x1xf32> to vector<16x64xf32>
    %31 = arith.mulf %21, %30 : vector<16x64xf32>
    %32 = vector.broadcast %14 : vector<1x64xf32> to vector<16x64xf32>
    %33 = arith.mulf %31, %32 : vector<16x64xf32>
    %34 = vector.broadcast %15 : vector<1x64xf32> to vector<16x64xf32>
    %35 = arith.addf %33, %34 : vector<16x64xf32>
    %c1_19 = arith.constant 1 : index
    %c0_20 = arith.constant 0 : index
    %c0_21 = arith.constant 0 : index
    %36 = vector.load %arg3[%c1_19, %c0_20, %c0_21] : memref<13x64x64xbf16, #tpu.memory_space<vmem>>, vector<1x64x64xbf16>
    %37 = vector.shape_cast %36 : vector<1x64x64xbf16> to vector<64x64xbf16>
    %38 = arith.truncf %35 : vector<16x64xf32> to vector<16x64xbf16>
    %cst_22 = arith.constant dense<0.000000e+00> : vector<16x64xf32>
    %39 = tpu.matmul %38, %37, %cst_22 {dimension_numbers = #tpu.dot_dimension_numbers<[1], [0], [0], [1], [0, 0, 1, 1], [], []>} : vector<16x64xbf16>, vector<64x64xbf16>, vector<16x64xf32> -> vector<16x64xf32>
    %c2_23 = arith.constant 2 : index
    %c0_24 = arith.constant 0 : index
    %c0_25 = arith.constant 0 : index
    %40 = vector.load %arg3[%c2_23, %c0_24, %c0_25] : memref<13x64x64xbf16, #tpu.memory_space<vmem>>, vector<1x64x64xbf16>
    %41 = vector.shape_cast %40 : vector<1x64x64xbf16> to vector<64x64xbf16>
    %42 = arith.truncf %35 : vector<16x64xf32> to vector<16x64xbf16>
    %cst_26 = arith.constant dense<0.000000e+00> : vector<16x64xf32>
    %43 = tpu.matmul %42, %41, %cst_26 {dimension_numbers = #tpu.dot_dimension_numbers<[1], [0], [0], [1], [0, 0, 1, 1], [], []>} : vector<16x64xbf16>, vector<64x64xbf16>, vector<16x64xf32> -> vector<16x64xf32>
    %c3 = arith.constant 3 : index
    %c0_27 = arith.constant 0 : index
    %c0_28 = arith.constant 0 : index
    %44 = vector.load %arg3[%c3, %c0_27, %c0_28] : memref<13x64x64xbf16, #tpu.memory_space<vmem>>, vector<1x64x64xbf16>
    %45 = vector.shape_cast %44 : vector<1x64x64xbf16> to vector<64x64xbf16>
    %46 = arith.truncf %35 : vector<16x64xf32> to vector<16x64xbf16>
    %cst_29 = arith.constant dense<0.000000e+00> : vector<16x64xf32>
    %47 = tpu.matmul %46, %45, %cst_29 {dimension_numbers = #tpu.dot_dimension_numbers<[1], [0], [0], [1], [0, 0, 1, 1], [], []>} : vector<16x64xbf16>, vector<64x64xbf16>, vector<16x64xf32> -> vector<16x64xf32>
    %48 = arith.truncf %39 : vector<16x64xf32> to vector<16x64xbf16>
    %49 = vector.shape_cast %48 : vector<16x64xbf16> to vector<1x16x64xbf16>
    %50 = arith.truncf %43 : vector<16x64xf32> to vector<16x64xbf16>
    %51 = vector.shape_cast %50 : vector<16x64xbf16> to vector<1x16x64xbf16>
    %52 = arith.truncf %47 : vector<16x64xf32> to vector<16x64xbf16>
    %53 = vector.shape_cast %52 : vector<16x64xbf16> to vector<1x16x64xbf16>
    %c4 = arith.constant 4 : index
    %c0_30 = arith.constant 0 : index
    %c0_31 = arith.constant 0 : index
    %54 = vector.load %arg3[%c4, %c0_30, %c0_31] : memref<13x64x64xbf16, #tpu.memory_space<vmem>>, vector<1x64x64xbf16>
    %55 = vector.shape_cast %54 : vector<1x64x64xbf16> to vector<64x64xbf16>
    %56 = vector.extract_strided_slice %49 {offsets = [0, 0, 0], sizes = [1, 16, 16], strides = [1, 1, 1]} : vector<1x16x64xbf16> to vector<1x16x16xbf16>
    %57 = vector.extract_strided_slice %51 {offsets = [0, 0, 0], sizes = [1, 16, 16], strides = [1, 1, 1]} : vector<1x16x64xbf16> to vector<1x16x16xbf16>
    %cst_32 = arith.constant dense<0.000000e+00> : vector<1x16x16xf32>
    %58 = tpu.matmul %56, %57, %cst_32 {dimension_numbers = #tpu.dot_dimension_numbers<[2], [2], [1], [1], [0, 0, 0, 1, 1, 1], [0], [0]>} : vector<1x16x16xbf16>, vector<1x16x16xbf16>, vector<1x16x16xf32> -> vector<1x16x16xf32>
    %cst_33 = arith.constant 2.500000e-01 : f32
    %59 = vector.broadcast %cst_33 : f32 to vector<1x16x16xf32>
    %60 = arith.mulf %58, %59 : vector<1x16x16xf32>
    %cst_34 = arith.constant dense<0xFF800000> : vector<1x16xf32>
    %61 = vector.multi_reduction <maximumf>, %60, %cst_34 [2] : vector<1x16x16xf32> to vector<1x16xf32>
    %62 = vector.shape_cast %61 : vector<1x16xf32> to vector<1x16x1xf32>
    %63 = vector.broadcast %62 : vector<1x16x1xf32> to vector<1x16x16xf32>
    %64 = arith.subf %60, %63 : vector<1x16x16xf32>
    %65 = math.exp %64 : vector<1x16x16xf32>
    %cst_35 = arith.constant dense<0.000000e+00> : vector<1x16xf32>
    %66 = vector.multi_reduction <add>, %65, %cst_35 [2] : vector<1x16x16xf32> to vector<1x16xf32>
    %67 = vector.shape_cast %66 : vector<1x16xf32> to vector<1x16x1xf32>
    %68 = tpu.reciprocal %67 {approx = true} : vector<1x16x1xf32> -> vector<1x16x1xf32>
    %69 = vector.broadcast %68 : vector<1x16x1xf32> to vector<1x16x16xf32>
    %70 = arith.mulf %65, %69 : vector<1x16x16xf32>
    %71 = arith.truncf %70 : vector<1x16x16xf32> to vector<1x16x16xbf16>
    %72 = vector.extract_strided_slice %53 {offsets = [0, 0, 0], sizes = [1, 16, 16], strides = [1, 1, 1]} : vector<1x16x64xbf16> to vector<1x16x16xbf16>
    %cst_36 = arith.constant dense<0.000000e+00> : vector<1x16x16xf32>
    %73 = tpu.matmul %71, %72, %cst_36 {dimension_numbers = #tpu.dot_dimension_numbers<[2], [1], [1], [2], [0, 0, 0, 1, 1, 2], [0], [0]>} : vector<1x16x16xbf16>, vector<1x16x16xbf16>, vector<1x16x16xf32> -> vector<1x16x16xf32>
    %74 = vector.shape_cast %73 : vector<1x16x16xf32> to vector<16x16xf32>
    %c0_37 = arith.constant 0 : index
    %c0_38 = arith.constant 0 : index
    %75 = vector.load %arg9[%c0_37, %c0_38] : memref<16x64xf32, #tpu.memory_space<vmem>>, vector<16x16xf32>
    tpu.vector_store %arg9[%c0_37, %c0_38], %74 {strides = array<i32>} : memref<16x64xf32, #tpu.memory_space<vmem>>, vector<16x16xf32>,
    %76 = vector.extract_strided_slice %49 {offsets = [0, 0, 16], sizes = [1, 16, 16], strides = [1, 1, 1]} : vector<1x16x64xbf16> to vector<1x16x16xbf16>
    %77 = vector.extract_strided_slice %51 {offsets = [0, 0, 16], sizes = [1, 16, 16], strides = [1, 1, 1]} : vector<1x16x64xbf16> to vector<1x16x16xbf16>
    %cst_39 = arith.constant dense<0.000000e+00> : vector<1x16x16xf32>
    %78 = tpu.matmul %76, %77, %cst_39 {dimension_numbers = #tpu.dot_dimension_numbers<[2], [2], [1], [1], [0, 0, 0, 1, 1, 1], [0], [0]>} : vector<1x16x16xbf16>, vector<1x16x16xbf16>, vector<1x16x16xf32> -> vector<1x16x16xf32>
    %cst_40 = arith.constant 2.500000e-01 : f32
    %79 = vector.broadcast %cst_40 : f32 to vector<1x16x16xf32>
    %80 = arith.mulf %78, %79 : vector<1x16x16xf32>
    %cst_41 = arith.constant dense<0xFF800000> : vector<1x16xf32>
    %81 = vector.multi_reduction <maximumf>, %80, %cst_41 [2] : vector<1x16x16xf32> to vector<1x16xf32>
    %82 = vector.shape_cast %81 : vector<1x16xf32> to vector<1x16x1xf32>
    %83 = vector.broadcast %82 : vector<1x16x1xf32> to vector<1x16x16xf32>
    %84 = arith.subf %80, %83 : vector<1x16x16xf32>
    %85 = math.exp %84 : vector<1x16x16xf32>
    %cst_42 = arith.constant dense<0.000000e+00> : vector<1x16xf32>
    %86 = vector.multi_reduction <add>, %85, %cst_42 [2] : vector<1x16x16xf32> to vector<1x16xf32>
    %87 = vector.shape_cast %86 : vector<1x16xf32> to vector<1x16x1xf32>
    %88 = tpu.reciprocal %87 {approx = true} : vector<1x16x1xf32> -> vector<1x16x1xf32>
    %89 = vector.broadcast %88 : vector<1x16x1xf32> to vector<1x16x16xf32>
    %90 = arith.mulf %85, %89 : vector<1x16x16xf32>
    %91 = arith.truncf %90 : vector<1x16x16xf32> to vector<1x16x16xbf16>
    %92 = vector.extract_strided_slice %53 {offsets = [0, 0, 16], sizes = [1, 16, 16], strides = [1, 1, 1]} : vector<1x16x64xbf16> to vector<1x16x16xbf16>
    %cst_43 = arith.constant dense<0.000000e+00> : vector<1x16x16xf32>
    %93 = tpu.matmul %91, %92, %cst_43 {dimension_numbers = #tpu.dot_dimension_numbers<[2], [1], [1], [2], [0, 0, 0, 1, 1, 2], [0], [0]>} : vector<1x16x16xbf16>, vector<1x16x16xbf16>, vector<1x16x16xf32> -> vector<1x16x16xf32>
    %94 = vector.shape_cast %93 : vector<1x16x16xf32> to vector<16x16xf32>
    %c0_44 = arith.constant 0 : index
    %c16 = arith.constant 16 : index
    %95 = vector.load %arg9[%c0_44, %c16] : memref<16x64xf32, #tpu.memory_space<vmem>>, vector<16x16xf32>
    tpu.vector_store %arg9[%c0_44, %c16], %94 {strides = array<i32>} : memref<16x64xf32, #tpu.memory_space<vmem>>, vector<16x16xf32>,
    %96 = vector.extract_strided_slice %49 {offsets = [0, 0, 32], sizes = [1, 16, 16], strides = [1, 1, 1]} : vector<1x16x64xbf16> to vector<1x16x16xbf16>
    %97 = vector.extract_strided_slice %51 {offsets = [0, 0, 32], sizes = [1, 16, 16], strides = [1, 1, 1]} : vector<1x16x64xbf16> to vector<1x16x16xbf16>
    %cst_45 = arith.constant dense<0.000000e+00> : vector<1x16x16xf32>
    %98 = tpu.matmul %96, %97, %cst_45 {dimension_numbers = #tpu.dot_dimension_numbers<[2], [2], [1], [1], [0, 0, 0, 1, 1, 1], [0], [0]>} : vector<1x16x16xbf16>, vector<1x16x16xbf16>, vector<1x16x16xf32> -> vector<1x16x16xf32>
    %cst_46 = arith.constant 2.500000e-01 : f32
    %99 = vector.broadcast %cst_46 : f32 to vector<1x16x16xf32>
    %100 = arith.mulf %98, %99 : vector<1x16x16xf32>
    %cst_47 = arith.constant dense<0xFF800000> : vector<1x16xf32>
    %101 = vector.multi_reduction <maximumf>, %100, %cst_47 [2] : vector<1x16x16xf32> to vector<1x16xf32>
    %102 = vector.shape_cast %101 : vector<1x16xf32> to vector<1x16x1xf32>
    %103 = vector.broadcast %102 : vector<1x16x1xf32> to vector<1x16x16xf32>
    %104 = arith.subf %100, %103 : vector<1x16x16xf32>
    %105 = math.exp %104 : vector<1x16x16xf32>
    %cst_48 = arith.constant dense<0.000000e+00> : vector<1x16xf32>
    %106 = vector.multi_reduction <add>, %105, %cst_48 [2] : vector<1x16x16xf32> to vector<1x16xf32>
    %107 = vector.shape_cast %106 : vector<1x16xf32> to vector<1x16x1xf32>
    %108 = tpu.reciprocal %107 {approx = true} : vector<1x16x1xf32> -> vector<1x16x1xf32>
    %109 = vector.broadcast %108 : vector<1x16x1xf32> to vector<1x16x16xf32>
    %110 = arith.mulf %105, %109 : vector<1x16x16xf32>
    %111 = arith.truncf %110 : vector<1x16x16xf32> to vector<1x16x16xbf16>
    %112 = vector.extract_strided_slice %53 {offsets = [0, 0, 32], sizes = [1, 16, 16], strides = [1, 1, 1]} : vector<1x16x64xbf16> to vector<1x16x16xbf16>
    %cst_49 = arith.constant dense<0.000000e+00> : vector<1x16x16xf32>
    %113 = tpu.matmul %111, %112, %cst_49 {dimension_numbers = #tpu.dot_dimension_numbers<[2], [1], [1], [2], [0, 0, 0, 1, 1, 2], [0], [0]>} : vector<1x16x16xbf16>, vector<1x16x16xbf16>, vector<1x16x16xf32> -> vector<1x16x16xf32>
    %114 = vector.shape_cast %113 : vector<1x16x16xf32> to vector<16x16xf32>
    %c0_50 = arith.constant 0 : index
    %c32 = arith.constant 32 : index
    %115 = vector.load %arg9[%c0_50, %c32] : memref<16x64xf32, #tpu.memory_space<vmem>>, vector<16x16xf32>
    tpu.vector_store %arg9[%c0_50, %c32], %114 {strides = array<i32>} : memref<16x64xf32, #tpu.memory_space<vmem>>, vector<16x16xf32>,
    %116 = vector.extract_strided_slice %49 {offsets = [0, 0, 48], sizes = [1, 16, 16], strides = [1, 1, 1]} : vector<1x16x64xbf16> to vector<1x16x16xbf16>
    %117 = vector.extract_strided_slice %51 {offsets = [0, 0, 48], sizes = [1, 16, 16], strides = [1, 1, 1]} : vector<1x16x64xbf16> to vector<1x16x16xbf16>
    %cst_51 = arith.constant dense<0.000000e+00> : vector<1x16x16xf32>
    %118 = tpu.matmul %116, %117, %cst_51 {dimension_numbers = #tpu.dot_dimension_numbers<[2], [2], [1], [1], [0, 0, 0, 1, 1, 1], [0], [0]>} : vector<1x16x16xbf16>, vector<1x16x16xbf16>, vector<1x16x16xf32> -> vector<1x16x16xf32>
    %cst_52 = arith.constant 2.500000e-01 : f32
    %119 = vector.broadcast %cst_52 : f32 to vector<1x16x16xf32>
    %120 = arith.mulf %118, %119 : vector<1x16x16xf32>
    %cst_53 = arith.constant dense<0xFF800000> : vector<1x16xf32>
    %121 = vector.multi_reduction <maximumf>, %120, %cst_53 [2] : vector<1x16x16xf32> to vector<1x16xf32>
    %122 = vector.shape_cast %121 : vector<1x16xf32> to vector<1x16x1xf32>
    %123 = vector.broadcast %122 : vector<1x16x1xf32> to vector<1x16x16xf32>
    %124 = arith.subf %120, %123 : vector<1x16x16xf32>
    %125 = math.exp %124 : vector<1x16x16xf32>
    %cst_54 = arith.constant dense<0.000000e+00> : vector<1x16xf32>
    %126 = vector.multi_reduction <add>, %125, %cst_54 [2] : vector<1x16x16xf32> to vector<1x16xf32>
    %127 = vector.shape_cast %126 : vector<1x16xf32> to vector<1x16x1xf32>
    %128 = tpu.reciprocal %127 {approx = true} : vector<1x16x1xf32> -> vector<1x16x1xf32>
    %129 = vector.broadcast %128 : vector<1x16x1xf32> to vector<1x16x16xf32>
    %130 = arith.mulf %125, %129 : vector<1x16x16xf32>
    %131 = arith.truncf %130 : vector<1x16x16xf32> to vector<1x16x16xbf16>
    %132 = vector.extract_strided_slice %53 {offsets = [0, 0, 48], sizes = [1, 16, 16], strides = [1, 1, 1]} : vector<1x16x64xbf16> to vector<1x16x16xbf16>
    %cst_55 = arith.constant dense<0.000000e+00> : vector<1x16x16xf32>
    %133 = tpu.matmul %131, %132, %cst_55 {dimension_numbers = #tpu.dot_dimension_numbers<[2], [1], [1], [2], [0, 0, 0, 1, 1, 2], [0], [0]>} : vector<1x16x16xbf16>, vector<1x16x16xbf16>, vector<1x16x16xf32> -> vector<1x16x16xf32>
    %134 = vector.shape_cast %133 : vector<1x16x16xf32> to vector<16x16xf32>
    %c0_56 = arith.constant 0 : index
    %c48 = arith.constant 48 : index
    %135 = vector.load %arg9[%c0_56, %c48] : memref<16x64xf32, #tpu.memory_space<vmem>>, vector<16x16xf32>
    tpu.vector_store %arg9[%c0_56, %c48], %134 {strides = array<i32>} : memref<16x64xf32, #tpu.memory_space<vmem>>, vector<16x16xf32>,
    %c0_57 = arith.constant 0 : index
    %c0_58 = arith.constant 0 : index
    %136 = vector.load %arg9[%c0_57, %c0_58] : memref<16x64xf32, #tpu.memory_space<vmem>>, vector<16x64xf32>
    %137 = arith.truncf %136 : vector<16x64xf32> to vector<16x64xbf16>
    %cst_59 = arith.constant dense<0.000000e+00> : vector<16x64xf32>
    %138 = tpu.matmul %137, %55, %cst_59 {dimension_numbers = #tpu.dot_dimension_numbers<[1], [0], [0], [1], [0, 0, 1, 1], [], []>} : vector<16x64xbf16>, vector<64x64xbf16>, vector<16x64xf32> -> vector<16x64xf32>
    %139 = arith.addf %13, %138 : vector<16x64xf32>
    %c3_60 = arith.constant 3 : index
    %c0_61 = arith.constant 0 : index
    %140 = vector.load %arg6[%c3_60, %c0_61] : memref<14x64xf32, #tpu.memory_space<vmem>>, vector<1x64xf32>
    %c4_62 = arith.constant 4 : index
    %c0_63 = arith.constant 0 : index
    %141 = vector.load %arg6[%c4_62, %c0_63] : memref<14x64xf32, #tpu.memory_space<vmem>>, vector<1x64xf32>
    %cst_64 = arith.constant dense<0.000000e+00> : vector<16xf32>
    %142 = vector.multi_reduction <add>, %139, %cst_64 [1] : vector<16x64xf32> to vector<16xf32>
    %143 = vector.shape_cast %142 : vector<16xf32> to vector<16x1xf32>
    %cst_65 = arith.constant 6.400000e+01 : f32
    %144 = vector.broadcast %cst_65 : f32 to vector<16x1xf32>
    %145 = arith.divf %143, %144 : vector<16x1xf32>
    %146 = vector.broadcast %145 : vector<16x1xf32> to vector<16x64xf32>
    %147 = arith.subf %139, %146 : vector<16x64xf32>
    %148 = arith.mulf %147, %147 : vector<16x64xf32>
    %cst_66 = arith.constant dense<0.000000e+00> : vector<16xf32>
    %149 = vector.multi_reduction <add>, %148, %cst_66 [1] : vector<16x64xf32> to vector<16xf32>
    %150 = vector.shape_cast %149 : vector<16xf32> to vector<16x1xf32>
    %cst_67 = arith.constant 6.400000e+01 : f32
    %151 = vector.broadcast %cst_67 : f32 to vector<16x1xf32>
    %152 = arith.divf %150, %151 : vector<16x1xf32>
    %cst_68 = arith.constant 1.000000e-07 : f32
    %153 = vector.broadcast %cst_68 : f32 to vector<16x1xf32>
    %154 = arith.addf %152, %153 : vector<16x1xf32>
    %155 = math.rsqrt %154 : vector<16x1xf32>
    %156 = vector.broadcast %155 : vector<16x1xf32> to vector<16x64xf32>
    %157 = arith.mulf %147, %156 : vector<16x64xf32>
    %158 = vector.broadcast %140 : vector<1x64xf32> to vector<16x64xf32>
    %159 = arith.mulf %157, %158 : vector<16x64xf32>
    %160 = vector.broadcast %141 : vector<1x64xf32> to vector<16x64xf32>
    %161 = arith.addf %159, %160 : vector<16x64xf32>
    %c0_69 = arith.constant 0 : index
    %c0_70 = arith.constant 0 : index
    %c0_71 = arith.constant 0 : index
    %162 = vector.load %arg4[%c0_69, %c0_70, %c0_71] : memref<3x64x32xbf16, #tpu.memory_space<vmem>>, vector<1x64x32xbf16>
    %163 = vector.shape_cast %162 : vector<1x64x32xbf16> to vector<64x32xbf16>
    %164 = arith.truncf %161 : vector<16x64xf32> to vector<16x64xbf16>
    %cst_72 = arith.constant dense<0.000000e+00> : vector<16x32xf32>
    %165 = tpu.matmul %164, %163, %cst_72 {dimension_numbers = #tpu.dot_dimension_numbers<[1], [0], [0], [1], [0, 0, 1, 1], [], []>} : vector<16x64xbf16>, vector<64x32xbf16>, vector<16x32xf32> -> vector<16x32xf32>
    %c0_73 = arith.constant 0 : index
    %c0_74 = arith.constant 0 : index
    %166 = vector.load %arg7[%c0_73, %c0_74] : memref<3x32xf32, #tpu.memory_space<vmem>>, vector<1x32xf32>
    %167 = vector.broadcast %166 : vector<1x32xf32> to vector<16x32xf32>
    %168 = arith.addf %165, %167 : vector<16x32xf32>
    %cst_75 = arith.constant 0.000000e+00 : f32
    %169 = vector.broadcast %cst_75 : f32 to vector<16x32xf32>
    %170 = arith.maximumf %168, %169 : vector<16x32xf32>
    %c0_76 = arith.constant 0 : index
    %c0_77 = arith.constant 0 : index
    %c0_78 = arith.constant 0 : index
    %171 = vector.load %arg5[%c0_76, %c0_77, %c0_78] : memref<3x32x64xbf16, #tpu.memory_space<vmem>>, vector<1x32x64xbf16>
    %172 = vector.shape_cast %171 : vector<1x32x64xbf16> to vector<32x64xbf16>
    %173 = arith.truncf %170 : vector<16x32xf32> to vector<16x32xbf16>
    %cst_79 = arith.constant dense<0.000000e+00> : vector<16x64xf32>
    %174 = tpu.matmul %173, %172, %cst_79 {dimension_numbers = #tpu.dot_dimension_numbers<[1], [0], [0], [1], [0, 0, 1, 1], [], []>} : vector<16x32xbf16>, vector<32x64xbf16>, vector<16x64xf32> -> vector<16x64xf32>
    %175 = arith.addf %139, %174 : vector<16x64xf32>
    %c5 = arith.constant 5 : index
    %c0_80 = arith.constant 0 : index
    %176 = vector.load %arg6[%c5, %c0_80] : memref<14x64xf32, #tpu.memory_space<vmem>>, vector<1x64xf32>
    %177 = vector.broadcast %176 : vector<1x64xf32> to vector<16x64xf32>
    %178 = arith.addf %175, %177 : vector<16x64xf32>
    %c1_i32 = arith.constant 1 : i32
    %c1_81 = arith.constant 1 : index
    %c0_82 = arith.constant 0 : index
    %179 = vector.load %arg6[%c1_81, %c0_82] : memref<14x64xf32, #tpu.memory_space<vmem>>, vector<1x64xf32>
    %c2_83 = arith.constant 2 : index
    %c0_84 = arith.constant 0 : index
    %180 = vector.load %arg6[%c2_83, %c0_84] : memref<14x64xf32, #tpu.memory_space<vmem>>, vector<1x64xf32>
    %cst_85 = arith.constant dense<0.000000e+00> : vector<16xf32>
    %181 = vector.multi_reduction <add>, %178, %cst_85 [1] : vector<16x64xf32> to vector<16xf32>
    %182 = vector.shape_cast %181 : vector<16xf32> to vector<16x1xf32>
    %cst_86 = arith.constant 6.400000e+01 : f32
    %183 = vector.broadcast %cst_86 : f32 to vector<16x1xf32>
    %184 = arith.divf %182, %183 : vector<16x1xf32>
    %185 = vector.broadcast %184 : vector<16x1xf32> to vector<16x64xf32>
    %186 = arith.subf %178, %185 : vector<16x64xf32>
    %187 = arith.mulf %186, %186 : vector<16x64xf32>
    %cst_87 = arith.constant dense<0.000000e+00> : vector<16xf32>
    %188 = vector.multi_reduction <add>, %187, %cst_87 [1] : vector<16x64xf32> to vector<16xf32>
    %189 = vector.shape_cast %188 : vector<16xf32> to vector<16x1xf32>
    %cst_88 = arith.constant 6.400000e+01 : f32
    %190 = vector.broadcast %cst_88 : f32 to vector<16x1xf32>
    %191 = arith.divf %189, %190 : vector<16x1xf32>
    %cst_89 = arith.constant 1.000000e-07 : f32
    %192 = vector.broadcast %cst_89 : f32 to vector<16x1xf32>
    %193 = arith.addf %191, %192 : vector<16x1xf32>
    %194 = math.rsqrt %193 : vector<16x1xf32>
    %195 = vector.broadcast %194 : vector<16x1xf32> to vector<16x64xf32>
    %196 = arith.mulf %186, %195 : vector<16x64xf32>
    %197 = vector.broadcast %179 : vector<1x64xf32> to vector<16x64xf32>
    %198 = arith.mulf %196, %197 : vector<16x64xf32>
    %199 = vector.broadcast %180 : vector<1x64xf32> to vector<16x64xf32>
    %200 = arith.addf %198, %199 : vector<16x64xf32>
    %c1_90 = arith.constant 1 : index
    %c0_91 = arith.constant 0 : index
    %c0_92 = arith.constant 0 : index
    %201 = vector.load %arg3[%c1_90, %c0_91, %c0_92] : memref<13x64x64xbf16, #tpu.memory_space<vmem>>, vector<1x64x64xbf16>
    %202 = vector.shape_cast %201 : vector<1x64x64xbf16> to vector<64x64xbf16>
    %203 = arith.truncf %200 : vector<16x64xf32> to vector<16x64xbf16>
    %cst_93 = arith.constant dense<0.000000e+00> : vector<16x64xf32>
    %204 = tpu.matmul %203, %202, %cst_93 {dimension_numbers = #tpu.dot_dimension_numbers<[1], [0], [0], [1], [0, 0, 1, 1], [], []>} : vector<16x64xbf16>, vector<64x64xbf16>, vector<16x64xf32> -> vector<16x64xf32>
    %c2_94 = arith.constant 2 : index
    %c0_95 = arith.constant 0 : index
    %c0_96 = arith.constant 0 : index
    %205 = vector.load %arg3[%c2_94, %c0_95, %c0_96] : memref<13x64x64xbf16, #tpu.memory_space<vmem>>, vector<1x64x64xbf16>
    %206 = vector.shape_cast %205 : vector<1x64x64xbf16> to vector<64x64xbf16>
    %207 = arith.truncf %200 : vector<16x64xf32> to vector<16x64xbf16>
    %cst_97 = arith.constant dense<0.000000e+00> : vector<16x64xf32>
    %208 = tpu.matmul %207, %206, %cst_97 {dimension_numbers = #tpu.dot_dimension_numbers<[1], [0], [0], [1], [0, 0, 1, 1], [], []>} : vector<16x64xbf16>, vector<64x64xbf16>, vector<16x64xf32> -> vector<16x64xf32>
    %c3_98 = arith.constant 3 : index
    %c0_99 = arith.constant 0 : index
    %c0_100 = arith.constant 0 : index
    %209 = vector.load %arg3[%c3_98, %c0_99, %c0_100] : memref<13x64x64xbf16, #tpu.memory_space<vmem>>, vector<1x64x64xbf16>
    %210 = vector.shape_cast %209 : vector<1x64x64xbf16> to vector<64x64xbf16>
    %211 = arith.truncf %200 : vector<16x64xf32> to vector<16x64xbf16>
    %cst_101 = arith.constant dense<0.000000e+00> : vector<16x64xf32>
    %212 = tpu.matmul %211, %210, %cst_101 {dimension_numbers = #tpu.dot_dimension_numbers<[1], [0], [0], [1], [0, 0, 1, 1], [], []>} : vector<16x64xbf16>, vector<64x64xbf16>, vector<16x64xf32> -> vector<16x64xf32>
    %213 = arith.truncf %204 : vector<16x64xf32> to vector<16x64xbf16>
    %214 = vector.shape_cast %213 : vector<16x64xbf16> to vector<1x16x64xbf16>
    %215 = arith.truncf %208 : vector<16x64xf32> to vector<16x64xbf16>
    %216 = vector.shape_cast %215 : vector<16x64xbf16> to vector<1x16x64xbf16>
    %217 = arith.truncf %212 : vector<16x64xf32> to vector<16x64xbf16>
    %218 = vector.shape_cast %217 : vector<16x64xbf16> to vector<1x16x64xbf16>
    %c4_102 = arith.constant 4 : index
    %c0_103 = arith.constant 0 : index
    %c0_104 = arith.constant 0 : index
    %219 = vector.load %arg3[%c4_102, %c0_103, %c0_104] : memref<13x64x64xbf16, #tpu.memory_space<vmem>>, vector<1x64x64xbf16>
    %220 = vector.shape_cast %219 : vector<1x64x64xbf16> to vector<64x64xbf16>
    %221 = vector.extract_strided_slice %214 {offsets = [0, 0, 0], sizes = [1, 16, 16], strides = [1, 1, 1]} : vector<1x16x64xbf16> to vector<1x16x16xbf16>
    %222 = vector.extract_strided_slice %216 {offsets = [0, 0, 0], sizes = [1, 16, 16], strides = [1, 1, 1]} : vector<1x16x64xbf16> to vector<1x16x16xbf16>
    %cst_105 = arith.constant dense<0.000000e+00> : vector<1x16x16xf32>
    %223 = tpu.matmul %221, %222, %cst_105 {dimension_numbers = #tpu.dot_dimension_numbers<[2], [2], [1], [1], [0, 0, 0, 1, 1, 1], [0], [0]>} : vector<1x16x16xbf16>, vector<1x16x16xbf16>, vector<1x16x16xf32> -> vector<1x16x16xf32>
    %cst_106 = arith.constant 2.500000e-01 : f32
    %224 = vector.broadcast %cst_106 : f32 to vector<1x16x16xf32>
    %225 = arith.mulf %223, %224 : vector<1x16x16xf32>
    %cst_107 = arith.constant dense<0xFF800000> : vector<1x16xf32>
    %226 = vector.multi_reduction <maximumf>, %225, %cst_107 [2] : vector<1x16x16xf32> to vector<1x16xf32>
    %227 = vector.shape_cast %226 : vector<1x16xf32> to vector<1x16x1xf32>
    %228 = vector.broadcast %227 : vector<1x16x1xf32> to vector<1x16x16xf32>
    %229 = arith.subf %225, %228 : vector<1x16x16xf32>
    %230 = math.exp %229 : vector<1x16x16xf32>
    %cst_108 = arith.constant dense<0.000000e+00> : vector<1x16xf32>
    %231 = vector.multi_reduction <add>, %230, %cst_108 [2] : vector<1x16x16xf32> to vector<1x16xf32>
    %232 = vector.shape_cast %231 : vector<1x16xf32> to vector<1x16x1xf32>
    %233 = tpu.reciprocal %232 {approx = true} : vector<1x16x1xf32> -> vector<1x16x1xf32>
    %234 = vector.broadcast %233 : vector<1x16x1xf32> to vector<1x16x16xf32>
    %235 = arith.mulf %230, %234 : vector<1x16x16xf32>
    %236 = arith.truncf %235 : vector<1x16x16xf32> to vector<1x16x16xbf16>
    %237 = vector.extract_strided_slice %218 {offsets = [0, 0, 0], sizes = [1, 16, 16], strides = [1, 1, 1]} : vector<1x16x64xbf16> to vector<1x16x16xbf16>
    %cst_109 = arith.constant dense<0.000000e+00> : vector<1x16x16xf32>
    %238 = tpu.matmul %236, %237, %cst_109 {dimension_numbers = #tpu.dot_dimension_numbers<[2], [1], [1], [2], [0, 0, 0, 1, 1, 2], [0], [0]>} : vector<1x16x16xbf16>, vector<1x16x16xbf16>, vector<1x16x16xf32> -> vector<1x16x16xf32>
    %239 = vector.shape_cast %238 : vector<1x16x16xf32> to vector<16x16xf32>
    %c0_110 = arith.constant 0 : index
    %c0_111 = arith.constant 0 : index
    %240 = vector.load %arg9[%c0_110, %c0_111] : memref<16x64xf32, #tpu.memory_space<vmem>>, vector<16x16xf32>
    tpu.vector_store %arg9[%c0_110, %c0_111], %239 {strides = array<i32>} : memref<16x64xf32, #tpu.memory_space<vmem>>, vector<16x16xf32>,
    %241 = vector.extract_strided_slice %214 {offsets = [0, 0, 16], sizes = [1, 16, 16], strides = [1, 1, 1]} : vector<1x16x64xbf16> to vector<1x16x16xbf16>
    %242 = vector.extract_strided_slice %216 {offsets = [0, 0, 16], sizes = [1, 16, 16], strides = [1, 1, 1]} : vector<1x16x64xbf16> to vector<1x16x16xbf16>
    %cst_112 = arith.constant dense<0.000000e+00> : vector<1x16x16xf32>
    %243 = tpu.matmul %241, %242, %cst_112 {dimension_numbers = #tpu.dot_dimension_numbers<[2], [2], [1], [1], [0, 0, 0, 1, 1, 1], [0], [0]>} : vector<1x16x16xbf16>, vector<1x16x16xbf16>, vector<1x16x16xf32> -> vector<1x16x16xf32>
    %cst_113 = arith.constant 2.500000e-01 : f32
    %244 = vector.broadcast %cst_113 : f32 to vector<1x16x16xf32>
    %245 = arith.mulf %243, %244 : vector<1x16x16xf32>
    %cst_114 = arith.constant dense<0xFF800000> : vector<1x16xf32>
    %246 = vector.multi_reduction <maximumf>, %245, %cst_114 [2] : vector<1x16x16xf32> to vector<1x16xf32>
    %247 = vector.shape_cast %246 : vector<1x16xf32> to vector<1x16x1xf32>
    %248 = vector.broadcast %247 : vector<1x16x1xf32> to vector<1x16x16xf32>
    %249 = arith.subf %245, %248 : vector<1x16x16xf32>
    %250 = math.exp %249 : vector<1x16x16xf32>
    %cst_115 = arith.constant dense<0.000000e+00> : vector<1x16xf32>
    %251 = vector.multi_reduction <add>, %250, %cst_115 [2] : vector<1x16x16xf32> to vector<1x16xf32>
    %252 = vector.shape_cast %251 : vector<1x16xf32> to vector<1x16x1xf32>
    %253 = tpu.reciprocal %252 {approx = true} : vector<1x16x1xf32> -> vector<1x16x1xf32>
    %254 = vector.broadcast %253 : vector<1x16x1xf32> to vector<1x16x16xf32>
    %255 = arith.mulf %250, %254 : vector<1x16x16xf32>
    %256 = arith.truncf %255 : vector<1x16x16xf32> to vector<1x16x16xbf16>
    %257 = vector.extract_strided_slice %218 {offsets = [0, 0, 16], sizes = [1, 16, 16], strides = [1, 1, 1]} : vector<1x16x64xbf16> to vector<1x16x16xbf16>
    %cst_116 = arith.constant dense<0.000000e+00> : vector<1x16x16xf32>
    %258 = tpu.matmul %256, %257, %cst_116 {dimension_numbers = #tpu.dot_dimension_numbers<[2], [1], [1], [2], [0, 0, 0, 1, 1, 2], [0], [0]>} : vector<1x16x16xbf16>, vector<1x16x16xbf16>, vector<1x16x16xf32> -> vector<1x16x16xf32>
    %259 = vector.shape_cast %258 : vector<1x16x16xf32> to vector<16x16xf32>
    %c0_117 = arith.constant 0 : index
    %c16_118 = arith.constant 16 : index
    %260 = vector.load %arg9[%c0_117, %c16_118] : memref<16x64xf32, #tpu.memory_space<vmem>>, vector<16x16xf32>
    tpu.vector_store %arg9[%c0_117, %c16_118], %259 {strides = array<i32>} : memref<16x64xf32, #tpu.memory_space<vmem>>, vector<16x16xf32>,
    %261 = vector.extract_strided_slice %214 {offsets = [0, 0, 32], sizes = [1, 16, 16], strides = [1, 1, 1]} : vector<1x16x64xbf16> to vector<1x16x16xbf16>
    %262 = vector.extract_strided_slice %216 {offsets = [0, 0, 32], sizes = [1, 16, 16], strides = [1, 1, 1]} : vector<1x16x64xbf16> to vector<1x16x16xbf16>
    %cst_119 = arith.constant dense<0.000000e+00> : vector<1x16x16xf32>
    %263 = tpu.matmul %261, %262, %cst_119 {dimension_numbers = #tpu.dot_dimension_numbers<[2], [2], [1], [1], [0, 0, 0, 1, 1, 1], [0], [0]>} : vector<1x16x16xbf16>, vector<1x16x16xbf16>, vector<1x16x16xf32> -> vector<1x16x16xf32>
    %cst_120 = arith.constant 2.500000e-01 : f32
    %264 = vector.broadcast %cst_120 : f32 to vector<1x16x16xf32>
    %265 = arith.mulf %263, %264 : vector<1x16x16xf32>
    %cst_121 = arith.constant dense<0xFF800000> : vector<1x16xf32>
    %266 = vector.multi_reduction <maximumf>, %265, %cst_121 [2] : vector<1x16x16xf32> to vector<1x16xf32>
    %267 = vector.shape_cast %266 : vector<1x16xf32> to vector<1x16x1xf32>
    %268 = vector.broadcast %267 : vector<1x16x1xf32> to vector<1x16x16xf32>
    %269 = arith.subf %265, %268 : vector<1x16x16xf32>
    %270 = math.exp %269 : vector<1x16x16xf32>
    %cst_122 = arith.constant dense<0.000000e+00> : vector<1x16xf32>
    %271 = vector.multi_reduction <add>, %270, %cst_122 [2] : vector<1x16x16xf32> to vector<1x16xf32>
    %272 = vector.shape_cast %271 : vector<1x16xf32> to vector<1x16x1xf32>
    %273 = tpu.reciprocal %272 {approx = true} : vector<1x16x1xf32> -> vector<1x16x1xf32>
    %274 = vector.broadcast %273 : vector<1x16x1xf32> to vector<1x16x16xf32>
    %275 = arith.mulf %270, %274 : vector<1x16x16xf32>
    %276 = arith.truncf %275 : vector<1x16x16xf32> to vector<1x16x16xbf16>
    %277 = vector.extract_strided_slice %218 {offsets = [0, 0, 32], sizes = [1, 16, 16], strides = [1, 1, 1]} : vector<1x16x64xbf16> to vector<1x16x16xbf16>
    %cst_123 = arith.constant dense<0.000000e+00> : vector<1x16x16xf32>
    %278 = tpu.matmul %276, %277, %cst_123 {dimension_numbers = #tpu.dot_dimension_numbers<[2], [1], [1], [2], [0, 0, 0, 1, 1, 2], [0], [0]>} : vector<1x16x16xbf16>, vector<1x16x16xbf16>, vector<1x16x16xf32> -> vector<1x16x16xf32>
    %279 = vector.shape_cast %278 : vector<1x16x16xf32> to vector<16x16xf32>
    %c0_124 = arith.constant 0 : index
    %c32_125 = arith.constant 32 : index
    %280 = vector.load %arg9[%c0_124, %c32_125] : memref<16x64xf32, #tpu.memory_space<vmem>>, vector<16x16xf32>
    tpu.vector_store %arg9[%c0_124, %c32_125], %279 {strides = array<i32>} : memref<16x64xf32, #tpu.memory_space<vmem>>, vector<16x16xf32>,
    %281 = vector.extract_strided_slice %214 {offsets = [0, 0, 48], sizes = [1, 16, 16], strides = [1, 1, 1]} : vector<1x16x64xbf16> to vector<1x16x16xbf16>
    %282 = vector.extract_strided_slice %216 {offsets = [0, 0, 48], sizes = [1, 16, 16], strides = [1, 1, 1]} : vector<1x16x64xbf16> to vector<1x16x16xbf16>
    %cst_126 = arith.constant dense<0.000000e+00> : vector<1x16x16xf32>
    %283 = tpu.matmul %281, %282, %cst_126 {dimension_numbers = #tpu.dot_dimension_numbers<[2], [2], [1], [1], [0, 0, 0, 1, 1, 1], [0], [0]>} : vector<1x16x16xbf16>, vector<1x16x16xbf16>, vector<1x16x16xf32> -> vector<1x16x16xf32>
    %cst_127 = arith.constant 2.500000e-01 : f32
    %284 = vector.broadcast %cst_127 : f32 to vector<1x16x16xf32>
    %285 = arith.mulf %283, %284 : vector<1x16x16xf32>
    %cst_128 = arith.constant dense<0xFF800000> : vector<1x16xf32>
    %286 = vector.multi_reduction <maximumf>, %285, %cst_128 [2] : vector<1x16x16xf32> to vector<1x16xf32>
    %287 = vector.shape_cast %286 : vector<1x16xf32> to vector<1x16x1xf32>
    %288 = vector.broadcast %287 : vector<1x16x1xf32> to vector<1x16x16xf32>
    %289 = arith.subf %285, %288 : vector<1x16x16xf32>
    %290 = math.exp %289 : vector<1x16x16xf32>
    %cst_129 = arith.constant dense<0.000000e+00> : vector<1x16xf32>
    %291 = vector.multi_reduction <add>, %290, %cst_129 [2] : vector<1x16x16xf32> to vector<1x16xf32>
    %292 = vector.shape_cast %291 : vector<1x16xf32> to vector<1x16x1xf32>
    %293 = tpu.reciprocal %292 {approx = true} : vector<1x16x1xf32> -> vector<1x16x1xf32>
    %294 = vector.broadcast %293 : vector<1x16x1xf32> to vector<1x16x16xf32>
    %295 = arith.mulf %290, %294 : vector<1x16x16xf32>
    %296 = arith.truncf %295 : vector<1x16x16xf32> to vector<1x16x16xbf16>
    %297 = vector.extract_strided_slice %218 {offsets = [0, 0, 48], sizes = [1, 16, 16], strides = [1, 1, 1]} : vector<1x16x64xbf16> to vector<1x16x16xbf16>
    %cst_130 = arith.constant dense<0.000000e+00> : vector<1x16x16xf32>
    %298 = tpu.matmul %296, %297, %cst_130 {dimension_numbers = #tpu.dot_dimension_numbers<[2], [1], [1], [2], [0, 0, 0, 1, 1, 2], [0], [0]>} : vector<1x16x16xbf16>, vector<1x16x16xbf16>, vector<1x16x16xf32> -> vector<1x16x16xf32>
    %299 = vector.shape_cast %298 : vector<1x16x16xf32> to vector<16x16xf32>
    %c0_131 = arith.constant 0 : index
    %c48_132 = arith.constant 48 : index
    %300 = vector.load %arg9[%c0_131, %c48_132] : memref<16x64xf32, #tpu.memory_space<vmem>>, vector<16x16xf32>
    tpu.vector_store %arg9[%c0_131, %c48_132], %299 {strides = array<i32>} : memref<16x64xf32, #tpu.memory_space<vmem>>, vector<16x16xf32>,
    %c0_133 = arith.constant 0 : index
    %c0_134 = arith.constant 0 : index
    %301 = vector.load %arg9[%c0_133, %c0_134] : memref<16x64xf32, #tpu.memory_space<vmem>>, vector<16x64xf32>
    %302 = arith.truncf %301 : vector<16x64xf32> to vector<16x64xbf16>
    %cst_135 = arith.constant dense<0.000000e+00> : vector<16x64xf32>
    %303 = tpu.matmul %302, %220, %cst_135 {dimension_numbers = #tpu.dot_dimension_numbers<[1], [0], [0], [1], [0, 0, 1, 1], [], []>} : vector<16x64xbf16>, vector<64x64xbf16>, vector<16x64xf32> -> vector<16x64xf32>
    %304 = arith.addf %178, %303 : vector<16x64xf32>
    %c3_136 = arith.constant 3 : index
    %c0_137 = arith.constant 0 : index
    %305 = vector.load %arg6[%c3_136, %c0_137] : memref<14x64xf32, #tpu.memory_space<vmem>>, vector<1x64xf32>
    %c4_138 = arith.constant 4 : index
    %c0_139 = arith.constant 0 : index
    %306 = vector.load %arg6[%c4_138, %c0_139] : memref<14x64xf32, #tpu.memory_space<vmem>>, vector<1x64xf32>
    %cst_140 = arith.constant dense<0.000000e+00> : vector<16xf32>
    %307 = vector.multi_reduction <add>, %304, %cst_140 [1] : vector<16x64xf32> to vector<16xf32>
    %308 = vector.shape_cast %307 : vector<16xf32> to vector<16x1xf32>
    %cst_141 = arith.constant 6.400000e+01 : f32
    %309 = vector.broadcast %cst_141 : f32 to vector<16x1xf32>
    %310 = arith.divf %308, %309 : vector<16x1xf32>
    %311 = vector.broadcast %310 : vector<16x1xf32> to vector<16x64xf32>
    %312 = arith.subf %304, %311 : vector<16x64xf32>
    %313 = arith.mulf %312, %312 : vector<16x64xf32>
    %cst_142 = arith.constant dense<0.000000e+00> : vector<16xf32>
    %314 = vector.multi_reduction <add>, %313, %cst_142 [1] : vector<16x64xf32> to vector<16xf32>
    %315 = vector.shape_cast %314 : vector<16xf32> to vector<16x1xf32>
    %cst_143 = arith.constant 6.400000e+01 : f32
    %316 = vector.broadcast %cst_143 : f32 to vector<16x1xf32>
    %317 = arith.divf %315, %316 : vector<16x1xf32>
    %cst_144 = arith.constant 1.000000e-07 : f32
    %318 = vector.broadcast %cst_144 : f32 to vector<16x1xf32>
    %319 = arith.addf %317, %318 : vector<16x1xf32>
    %320 = math.rsqrt %319 : vector<16x1xf32>
    %321 = vector.broadcast %320 : vector<16x1xf32> to vector<16x64xf32>
    %322 = arith.mulf %312, %321 : vector<16x64xf32>
    %323 = vector.broadcast %305 : vector<1x64xf32> to vector<16x64xf32>
    %324 = arith.mulf %322, %323 : vector<16x64xf32>
    %325 = vector.broadcast %306 : vector<1x64xf32> to vector<16x64xf32>
    %326 = arith.addf %324, %325 : vector<16x64xf32>
    %c0_145 = arith.constant 0 : index
    %c0_146 = arith.constant 0 : index
    %c0_147 = arith.constant 0 : index
    %327 = vector.load %arg4[%c0_145, %c0_146, %c0_147] : memref<3x64x32xbf16, #tpu.memory_space<vmem>>, vector<1x64x32xbf16>
    %328 = vector.shape_cast %327 : vector<1x64x32xbf16> to vector<64x32xbf16>
    %329 = arith.truncf %326 : vector<16x64xf32> to vector<16x64xbf16>
    %cst_148 = arith.constant dense<0.000000e+00> : vector<16x32xf32>
    %330 = tpu.matmul %329, %328, %cst_148 {dimension_numbers = #tpu.dot_dimension_numbers<[1], [0], [0], [1], [0, 0, 1, 1], [], []>} : vector<16x64xbf16>, vector<64x32xbf16>, vector<16x32xf32> -> vector<16x32xf32>
    %c0_149 = arith.constant 0 : index
    %c0_150 = arith.constant 0 : index
    %331 = vector.load %arg7[%c0_149, %c0_150] : memref<3x32xf32, #tpu.memory_space<vmem>>, vector<1x32xf32>
    %332 = vector.broadcast %331 : vector<1x32xf32> to vector<16x32xf32>
    %333 = arith.addf %330, %332 : vector<16x32xf32>
    %cst_151 = arith.constant 0.000000e+00 : f32
    %334 = vector.broadcast %cst_151 : f32 to vector<16x32xf32>
    %335 = arith.maximumf %333, %334 : vector<16x32xf32>
    %c0_152 = arith.constant 0 : index
    %c0_153 = arith.constant 0 : index
    %c0_154 = arith.constant 0 : index
    %336 = vector.load %arg5[%c0_152, %c0_153, %c0_154] : memref<3x32x64xbf16, #tpu.memory_space<vmem>>, vector<1x32x64xbf16>
    %337 = vector.shape_cast %336 : vector<1x32x64xbf16> to vector<32x64xbf16>
    %338 = arith.truncf %335 : vector<16x32xf32> to vector<16x32xbf16>
    %cst_155 = arith.constant dense<0.000000e+00> : vector<16x64xf32>
    %339 = tpu.matmul %338, %337, %cst_155 {dimension_numbers = #tpu.dot_dimension_numbers<[1], [0], [0], [1], [0, 0, 1, 1], [], []>} : vector<16x32xbf16>, vector<32x64xbf16>, vector<16x64xf32> -> vector<16x64xf32>
    %340 = arith.addf %304, %339 : vector<16x64xf32>
    %c5_156 = arith.constant 5 : index
    %c0_157 = arith.constant 0 : index
    %341 = vector.load %arg6[%c5_156, %c0_157] : memref<14x64xf32, #tpu.memory_space<vmem>>, vector<1x64xf32>
    %342 = vector.broadcast %341 : vector<1x64xf32> to vector<16x64xf32>
    %343 = arith.addf %340, %342 : vector<16x64xf32>
    %c10 = arith.constant 10 : index
    %c0_158 = arith.constant 0 : index
    %c0_159 = arith.constant 0 : index
    %344 = vector.load %arg3[%c10, %c0_158, %c0_159] : memref<13x64x64xbf16, #tpu.memory_space<vmem>>, vector<1x64x64xbf16>
    %345 = vector.shape_cast %344 : vector<1x64x64xbf16> to vector<64x64xbf16>
    %346 = arith.truncf %343 : vector<16x64xf32> to vector<16x64xbf16>
    %cst_160 = arith.constant dense<0.000000e+00> : vector<16x64xf32>
    %347 = tpu.matmul %346, %345, %cst_160 {dimension_numbers = #tpu.dot_dimension_numbers<[1], [0], [0], [1], [0, 0, 1, 1], [], []>} : vector<16x64xbf16>, vector<64x64xbf16>, vector<16x64xf32> -> vector<16x64xf32>
    %348 = arith.truncf %347 : vector<16x64xf32> to vector<16x64xbf16>
    %349 = vector.shape_cast %348 : vector<16x64xbf16> to vector<1x16x64xbf16>
    %c11 = arith.constant 11 : index
    %c0_161 = arith.constant 0 : index
    %c0_162 = arith.constant 0 : index
    %350 = vector.load %arg3[%c11, %c0_161, %c0_162] : memref<13x64x64xbf16, #tpu.memory_space<vmem>>, vector<1x64x64xbf16>
    %351 = vector.shape_cast %350 : vector<1x64x64xbf16> to vector<64x64xbf16>
    %352 = arith.truncf %343 : vector<16x64xf32> to vector<16x64xbf16>
    %cst_163 = arith.constant dense<0.000000e+00> : vector<16x64xf32>
    %353 = tpu.matmul %352, %351, %cst_163 {dimension_numbers = #tpu.dot_dimension_numbers<[1], [0], [0], [1], [0, 0, 1, 1], [], []>} : vector<16x64xbf16>, vector<64x64xbf16>, vector<16x64xf32> -> vector<16x64xf32>
    %354 = arith.truncf %353 : vector<16x64xf32> to vector<16x64xbf16>
    %355 = vector.shape_cast %354 : vector<16x64xbf16> to vector<1x16x64xbf16>
    %c0_i32_164 = arith.constant 0 : i32
    %c6 = arith.constant 6 : index
    %c0_165 = arith.constant 0 : index
    %356 = vector.load %arg6[%c6, %c0_165] : memref<14x64xf32, #tpu.memory_space<vmem>>, vector<1x64xf32>
    %c7 = arith.constant 7 : index
    %c0_166 = arith.constant 0 : index
    %357 = vector.load %arg6[%c7, %c0_166] : memref<14x64xf32, #tpu.memory_space<vmem>>, vector<1x64xf32>
    %cst_167 = arith.constant dense<0.000000e+00> : vector<16xf32>
    %358 = vector.multi_reduction <add>, %343, %cst_167 [1] : vector<16x64xf32> to vector<16xf32>
    %359 = vector.shape_cast %358 : vector<16xf32> to vector<16x1xf32>
    %cst_168 = arith.constant 6.400000e+01 : f32
    %360 = vector.broadcast %cst_168 : f32 to vector<16x1xf32>
    %361 = arith.divf %359, %360 : vector<16x1xf32>
    %362 = vector.broadcast %361 : vector<16x1xf32> to vector<16x64xf32>
    %363 = arith.subf %343, %362 : vector<16x64xf32>
    %364 = arith.mulf %363, %363 : vector<16x64xf32>
    %cst_169 = arith.constant dense<0.000000e+00> : vector<16xf32>
    %365 = vector.multi_reduction <add>, %364, %cst_169 [1] : vector<16x64xf32> to vector<16xf32>
    %366 = vector.shape_cast %365 : vector<16xf32> to vector<16x1xf32>
    %cst_170 = arith.constant 6.400000e+01 : f32
    %367 = vector.broadcast %cst_170 : f32 to vector<16x1xf32>
    %368 = arith.divf %366, %367 : vector<16x1xf32>
    %cst_171 = arith.constant 1.000000e-07 : f32
    %369 = vector.broadcast %cst_171 : f32 to vector<16x1xf32>
    %370 = arith.addf %368, %369 : vector<16x1xf32>
    %371 = math.rsqrt %370 : vector<16x1xf32>
    %372 = vector.broadcast %371 : vector<16x1xf32> to vector<16x64xf32>
    %373 = arith.mulf %363, %372 : vector<16x64xf32>
    %374 = vector.broadcast %356 : vector<1x64xf32> to vector<16x64xf32>
    %375 = arith.mulf %373, %374 : vector<16x64xf32>
    %376 = vector.broadcast %357 : vector<1x64xf32> to vector<16x64xf32>
    %377 = arith.addf %375, %376 : vector<16x64xf32>
    %378 = arith.addf %377, %4 : vector<16x64xf32>
    %c5_172 = arith.constant 5 : index
    %c0_173 = arith.constant 0 : index
    %c0_174 = arith.constant 0 : index
    %379 = vector.load %arg3[%c5_172, %c0_173, %c0_174] : memref<13x64x64xbf16, #tpu.memory_space<vmem>>, vector<1x64x64xbf16>
    %380 = vector.shape_cast %379 : vector<1x64x64xbf16> to vector<64x64xbf16>
    %381 = arith.truncf %378 : vector<16x64xf32> to vector<16x64xbf16>
    %cst_175 = arith.constant dense<0.000000e+00> : vector<16x64xf32>
    %382 = tpu.matmul %381, %380, %cst_175 {dimension_numbers = #tpu.dot_dimension_numbers<[1], [0], [0], [1], [0, 0, 1, 1], [], []>} : vector<16x64xbf16>, vector<64x64xbf16>, vector<16x64xf32> -> vector<16x64xf32>
    %c6_176 = arith.constant 6 : index
    %c0_177 = arith.constant 0 : index
    %c0_178 = arith.constant 0 : index
    %383 = vector.load %arg3[%c6_176, %c0_177, %c0_178] : memref<13x64x64xbf16, #tpu.memory_space<vmem>>, vector<1x64x64xbf16>
    %384 = vector.shape_cast %383 : vector<1x64x64xbf16> to vector<64x64xbf16>
    %385 = arith.truncf %378 : vector<16x64xf32> to vector<16x64xbf16>
    %cst_179 = arith.constant dense<0.000000e+00> : vector<16x64xf32>
    %386 = tpu.matmul %385, %384, %cst_179 {dimension_numbers = #tpu.dot_dimension_numbers<[1], [0], [0], [1], [0, 0, 1, 1], [], []>} : vector<16x64xbf16>, vector<64x64xbf16>, vector<16x64xf32> -> vector<16x64xf32>
    %c7_180 = arith.constant 7 : index
    %c0_181 = arith.constant 0 : index
    %c0_182 = arith.constant 0 : index
    %387 = vector.load %arg3[%c7_180, %c0_181, %c0_182] : memref<13x64x64xbf16, #tpu.memory_space<vmem>>, vector<1x64x64xbf16>
    %388 = vector.shape_cast %387 : vector<1x64x64xbf16> to vector<64x64xbf16>
    %389 = arith.truncf %377 : vector<16x64xf32> to vector<16x64xbf16>
    %cst_183 = arith.constant dense<0.000000e+00> : vector<16x64xf32>
    %390 = tpu.matmul %389, %388, %cst_183 {dimension_numbers = #tpu.dot_dimension_numbers<[1], [0], [0], [1], [0, 0, 1, 1], [], []>} : vector<16x64xbf16>, vector<64x64xbf16>, vector<16x64xf32> -> vector<16x64xf32>
    %391 = arith.truncf %382 : vector<16x64xf32> to vector<16x64xbf16>
    %392 = vector.shape_cast %391 : vector<16x64xbf16> to vector<1x16x64xbf16>
    %393 = arith.truncf %386 : vector<16x64xf32> to vector<16x64xbf16>
    %394 = vector.shape_cast %393 : vector<16x64xbf16> to vector<1x16x64xbf16>
    %395 = arith.truncf %390 : vector<16x64xf32> to vector<16x64xbf16>
    %396 = vector.shape_cast %395 : vector<16x64xbf16> to vector<1x16x64xbf16>
    %c8 = arith.constant 8 : index
    %c0_184 = arith.constant 0 : index
    %c0_185 = arith.constant 0 : index
    %397 = vector.load %arg3[%c8, %c0_184, %c0_185] : memref<13x64x64xbf16, #tpu.memory_space<vmem>>, vector<1x64x64xbf16>
    %398 = vector.shape_cast %397 : vector<1x64x64xbf16> to vector<64x64xbf16>
    %399 = vector.extract_strided_slice %392 {offsets = [0, 0, 0], sizes = [1, 16, 16], strides = [1, 1, 1]} : vector<1x16x64xbf16> to vector<1x16x16xbf16>
    %400 = vector.extract_strided_slice %394 {offsets = [0, 0, 0], sizes = [1, 16, 16], strides = [1, 1, 1]} : vector<1x16x64xbf16> to vector<1x16x16xbf16>
    %cst_186 = arith.constant dense<0.000000e+00> : vector<1x16x16xf32>
    %401 = tpu.matmul %399, %400, %cst_186 {dimension_numbers = #tpu.dot_dimension_numbers<[2], [2], [1], [1], [0, 0, 0, 1, 1, 1], [0], [0]>} : vector<1x16x16xbf16>, vector<1x16x16xbf16>, vector<1x16x16xf32> -> vector<1x16x16xf32>
    %cst_187 = arith.constant 2.500000e-01 : f32
    %402 = vector.broadcast %cst_187 : f32 to vector<1x16x16xf32>
    %403 = arith.mulf %401, %402 : vector<1x16x16xf32>
    %cst_188 = arith.constant dense<0xFF800000> : vector<1x16xf32>
    %404 = vector.multi_reduction <maximumf>, %403, %cst_188 [2] : vector<1x16x16xf32> to vector<1x16xf32>
    %405 = vector.shape_cast %404 : vector<1x16xf32> to vector<1x16x1xf32>
    %406 = vector.broadcast %405 : vector<1x16x1xf32> to vector<1x16x16xf32>
    %407 = arith.subf %403, %406 : vector<1x16x16xf32>
    %408 = math.exp %407 : vector<1x16x16xf32>
    %cst_189 = arith.constant dense<0.000000e+00> : vector<1x16xf32>
    %409 = vector.multi_reduction <add>, %408, %cst_189 [2] : vector<1x16x16xf32> to vector<1x16xf32>
    %410 = vector.shape_cast %409 : vector<1x16xf32> to vector<1x16x1xf32>
    %411 = tpu.reciprocal %410 {approx = true} : vector<1x16x1xf32> -> vector<1x16x1xf32>
    %412 = vector.broadcast %411 : vector<1x16x1xf32> to vector<1x16x16xf32>
    %413 = arith.mulf %408, %412 : vector<1x16x16xf32>
    %414 = arith.truncf %413 : vector<1x16x16xf32> to vector<1x16x16xbf16>
    %415 = vector.extract_strided_slice %396 {offsets = [0, 0, 0], sizes = [1, 16, 16], strides = [1, 1, 1]} : vector<1x16x64xbf16> to vector<1x16x16xbf16>
    %cst_190 = arith.constant dense<0.000000e+00> : vector<1x16x16xf32>
    %416 = tpu.matmul %414, %415, %cst_190 {dimension_numbers = #tpu.dot_dimension_numbers<[2], [1], [1], [2], [0, 0, 0, 1, 1, 2], [0], [0]>} : vector<1x16x16xbf16>, vector<1x16x16xbf16>, vector<1x16x16xf32> -> vector<1x16x16xf32>
    %417 = vector.shape_cast %416 : vector<1x16x16xf32> to vector<16x16xf32>
    %c0_191 = arith.constant 0 : index
    %c0_192 = arith.constant 0 : index
    %418 = vector.load %arg9[%c0_191, %c0_192] : memref<16x64xf32, #tpu.memory_space<vmem>>, vector<16x16xf32>
    tpu.vector_store %arg9[%c0_191, %c0_192], %417 {strides = array<i32>} : memref<16x64xf32, #tpu.memory_space<vmem>>, vector<16x16xf32>,
    %419 = vector.extract_strided_slice %392 {offsets = [0, 0, 16], sizes = [1, 16, 16], strides = [1, 1, 1]} : vector<1x16x64xbf16> to vector<1x16x16xbf16>
    %420 = vector.extract_strided_slice %394 {offsets = [0, 0, 16], sizes = [1, 16, 16], strides = [1, 1, 1]} : vector<1x16x64xbf16> to vector<1x16x16xbf16>
    %cst_193 = arith.constant dense<0.000000e+00> : vector<1x16x16xf32>
    %421 = tpu.matmul %419, %420, %cst_193 {dimension_numbers = #tpu.dot_dimension_numbers<[2], [2], [1], [1], [0, 0, 0, 1, 1, 1], [0], [0]>} : vector<1x16x16xbf16>, vector<1x16x16xbf16>, vector<1x16x16xf32> -> vector<1x16x16xf32>
    %cst_194 = arith.constant 2.500000e-01 : f32
    %422 = vector.broadcast %cst_194 : f32 to vector<1x16x16xf32>
    %423 = arith.mulf %421, %422 : vector<1x16x16xf32>
    %cst_195 = arith.constant dense<0xFF800000> : vector<1x16xf32>
    %424 = vector.multi_reduction <maximumf>, %423, %cst_195 [2] : vector<1x16x16xf32> to vector<1x16xf32>
    %425 = vector.shape_cast %424 : vector<1x16xf32> to vector<1x16x1xf32>
    %426 = vector.broadcast %425 : vector<1x16x1xf32> to vector<1x16x16xf32>
    %427 = arith.subf %423, %426 : vector<1x16x16xf32>
    %428 = math.exp %427 : vector<1x16x16xf32>
    %cst_196 = arith.constant dense<0.000000e+00> : vector<1x16xf32>
    %429 = vector.multi_reduction <add>, %428, %cst_196 [2] : vector<1x16x16xf32> to vector<1x16xf32>
    %430 = vector.shape_cast %429 : vector<1x16xf32> to vector<1x16x1xf32>
    %431 = tpu.reciprocal %430 {approx = true} : vector<1x16x1xf32> -> vector<1x16x1xf32>
    %432 = vector.broadcast %431 : vector<1x16x1xf32> to vector<1x16x16xf32>
    %433 = arith.mulf %428, %432 : vector<1x16x16xf32>
    %434 = arith.truncf %433 : vector<1x16x16xf32> to vector<1x16x16xbf16>
    %435 = vector.extract_strided_slice %396 {offsets = [0, 0, 16], sizes = [1, 16, 16], strides = [1, 1, 1]} : vector<1x16x64xbf16> to vector<1x16x16xbf16>
    %cst_197 = arith.constant dense<0.000000e+00> : vector<1x16x16xf32>
    %436 = tpu.matmul %434, %435, %cst_197 {dimension_numbers = #tpu.dot_dimension_numbers<[2], [1], [1], [2], [0, 0, 0, 1, 1, 2], [0], [0]>} : vector<1x16x16xbf16>, vector<1x16x16xbf16>, vector<1x16x16xf32> -> vector<1x16x16xf32>
    %437 = vector.shape_cast %436 : vector<1x16x16xf32> to vector<16x16xf32>
    %c0_198 = arith.constant 0 : index
    %c16_199 = arith.constant 16 : index
    %438 = vector.load %arg9[%c0_198, %c16_199] : memref<16x64xf32, #tpu.memory_space<vmem>>, vector<16x16xf32>
    tpu.vector_store %arg9[%c0_198, %c16_199], %437 {strides = array<i32>} : memref<16x64xf32, #tpu.memory_space<vmem>>, vector<16x16xf32>,
    %439 = vector.extract_strided_slice %392 {offsets = [0, 0, 32], sizes = [1, 16, 16], strides = [1, 1, 1]} : vector<1x16x64xbf16> to vector<1x16x16xbf16>
    %440 = vector.extract_strided_slice %394 {offsets = [0, 0, 32], sizes = [1, 16, 16], strides = [1, 1, 1]} : vector<1x16x64xbf16> to vector<1x16x16xbf16>
    %cst_200 = arith.constant dense<0.000000e+00> : vector<1x16x16xf32>
    %441 = tpu.matmul %439, %440, %cst_200 {dimension_numbers = #tpu.dot_dimension_numbers<[2], [2], [1], [1], [0, 0, 0, 1, 1, 1], [0], [0]>} : vector<1x16x16xbf16>, vector<1x16x16xbf16>, vector<1x16x16xf32> -> vector<1x16x16xf32>
    %cst_201 = arith.constant 2.500000e-01 : f32
    %442 = vector.broadcast %cst_201 : f32 to vector<1x16x16xf32>
    %443 = arith.mulf %441, %442 : vector<1x16x16xf32>
    %cst_202 = arith.constant dense<0xFF800000> : vector<1x16xf32>
    %444 = vector.multi_reduction <maximumf>, %443, %cst_202 [2] : vector<1x16x16xf32> to vector<1x16xf32>
    %445 = vector.shape_cast %444 : vector<1x16xf32> to vector<1x16x1xf32>
    %446 = vector.broadcast %445 : vector<1x16x1xf32> to vector<1x16x16xf32>
    %447 = arith.subf %443, %446 : vector<1x16x16xf32>
    %448 = math.exp %447 : vector<1x16x16xf32>
    %cst_203 = arith.constant dense<0.000000e+00> : vector<1x16xf32>
    %449 = vector.multi_reduction <add>, %448, %cst_203 [2] : vector<1x16x16xf32> to vector<1x16xf32>
    %450 = vector.shape_cast %449 : vector<1x16xf32> to vector<1x16x1xf32>
    %451 = tpu.reciprocal %450 {approx = true} : vector<1x16x1xf32> -> vector<1x16x1xf32>
    %452 = vector.broadcast %451 : vector<1x16x1xf32> to vector<1x16x16xf32>
    %453 = arith.mulf %448, %452 : vector<1x16x16xf32>
    %454 = arith.truncf %453 : vector<1x16x16xf32> to vector<1x16x16xbf16>
    %455 = vector.extract_strided_slice %396 {offsets = [0, 0, 32], sizes = [1, 16, 16], strides = [1, 1, 1]} : vector<1x16x64xbf16> to vector<1x16x16xbf16>
    %cst_204 = arith.constant dense<0.000000e+00> : vector<1x16x16xf32>
    %456 = tpu.matmul %454, %455, %cst_204 {dimension_numbers = #tpu.dot_dimension_numbers<[2], [1], [1], [2], [0, 0, 0, 1, 1, 2], [0], [0]>} : vector<1x16x16xbf16>, vector<1x16x16xbf16>, vector<1x16x16xf32> -> vector<1x16x16xf32>
    %457 = vector.shape_cast %456 : vector<1x16x16xf32> to vector<16x16xf32>
    %c0_205 = arith.constant 0 : index
    %c32_206 = arith.constant 32 : index
    %458 = vector.load %arg9[%c0_205, %c32_206] : memref<16x64xf32, #tpu.memory_space<vmem>>, vector<16x16xf32>
    tpu.vector_store %arg9[%c0_205, %c32_206], %457 {strides = array<i32>} : memref<16x64xf32, #tpu.memory_space<vmem>>, vector<16x16xf32>,
    %459 = vector.extract_strided_slice %392 {offsets = [0, 0, 48], sizes = [1, 16, 16], strides = [1, 1, 1]} : vector<1x16x64xbf16> to vector<1x16x16xbf16>
    %460 = vector.extract_strided_slice %394 {offsets = [0, 0, 48], sizes = [1, 16, 16], strides = [1, 1, 1]} : vector<1x16x64xbf16> to vector<1x16x16xbf16>
    %cst_207 = arith.constant dense<0.000000e+00> : vector<1x16x16xf32>
    %461 = tpu.matmul %459, %460, %cst_207 {dimension_numbers = #tpu.dot_dimension_numbers<[2], [2], [1], [1], [0, 0, 0, 1, 1, 1], [0], [0]>} : vector<1x16x16xbf16>, vector<1x16x16xbf16>, vector<1x16x16xf32> -> vector<1x16x16xf32>
    %cst_208 = arith.constant 2.500000e-01 : f32
    %462 = vector.broadcast %cst_208 : f32 to vector<1x16x16xf32>
    %463 = arith.mulf %461, %462 : vector<1x16x16xf32>
    %cst_209 = arith.constant dense<0xFF800000> : vector<1x16xf32>
    %464 = vector.multi_reduction <maximumf>, %463, %cst_209 [2] : vector<1x16x16xf32> to vector<1x16xf32>
    %465 = vector.shape_cast %464 : vector<1x16xf32> to vector<1x16x1xf32>
    %466 = vector.broadcast %465 : vector<1x16x1xf32> to vector<1x16x16xf32>
    %467 = arith.subf %463, %466 : vector<1x16x16xf32>
    %468 = math.exp %467 : vector<1x16x16xf32>
    %cst_210 = arith.constant dense<0.000000e+00> : vector<1x16xf32>
    %469 = vector.multi_reduction <add>, %468, %cst_210 [2] : vector<1x16x16xf32> to vector<1x16xf32>
    %470 = vector.shape_cast %469 : vector<1x16xf32> to vector<1x16x1xf32>
    %471 = tpu.reciprocal %470 {approx = true} : vector<1x16x1xf32> -> vector<1x16x1xf32>
    %472 = vector.broadcast %471 : vector<1x16x1xf32> to vector<1x16x16xf32>
    %473 = arith.mulf %468, %472 : vector<1x16x16xf32>
    %474 = arith.truncf %473 : vector<1x16x16xf32> to vector<1x16x16xbf16>
    %475 = vector.extract_strided_slice %396 {offsets = [0, 0, 48], sizes = [1, 16, 16], strides = [1, 1, 1]} : vector<1x16x64xbf16> to vector<1x16x16xbf16>
    %cst_211 = arith.constant dense<0.000000e+00> : vector<1x16x16xf32>
    %476 = tpu.matmul %474, %475, %cst_211 {dimension_numbers = #tpu.dot_dimension_numbers<[2], [1], [1], [2], [0, 0, 0, 1, 1, 2], [0], [0]>} : vector<1x16x16xbf16>, vector<1x16x16xbf16>, vector<1x16x16xf32> -> vector<1x16x16xf32>
    %477 = vector.shape_cast %476 : vector<1x16x16xf32> to vector<16x16xf32>
    %c0_212 = arith.constant 0 : index
    %c48_213 = arith.constant 48 : index
    %478 = vector.load %arg9[%c0_212, %c48_213] : memref<16x64xf32, #tpu.memory_space<vmem>>, vector<16x16xf32>
    tpu.vector_store %arg9[%c0_212, %c48_213], %477 {strides = array<i32>} : memref<16x64xf32, #tpu.memory_space<vmem>>, vector<16x16xf32>,
    %c0_214 = arith.constant 0 : index
    %c0_215 = arith.constant 0 : index
    %479 = vector.load %arg9[%c0_214, %c0_215] : memref<16x64xf32, #tpu.memory_space<vmem>>, vector<16x64xf32>
    %480 = arith.truncf %479 : vector<16x64xf32> to vector<16x64xbf16>
    %cst_216 = arith.constant dense<0.000000e+00> : vector<16x64xf32>
    %481 = tpu.matmul %480, %398, %cst_216 {dimension_numbers = #tpu.dot_dimension_numbers<[1], [0], [0], [1], [0, 0, 1, 1], [], []>} : vector<16x64xbf16>, vector<64x64xbf16>, vector<16x64xf32> -> vector<16x64xf32>
    %482 = arith.addf %343, %481 : vector<16x64xf32>
    %c8_217 = arith.constant 8 : index
    %c0_218 = arith.constant 0 : index
    %483 = vector.load %arg6[%c8_217, %c0_218] : memref<14x64xf32, #tpu.memory_space<vmem>>, vector<1x64xf32>
    %c9 = arith.constant 9 : index
    %c0_219 = arith.constant 0 : index
    %484 = vector.load %arg6[%c9, %c0_219] : memref<14x64xf32, #tpu.memory_space<vmem>>, vector<1x64xf32>
    %cst_220 = arith.constant dense<0.000000e+00> : vector<16xf32>
    %485 = vector.multi_reduction <add>, %482, %cst_220 [1] : vector<16x64xf32> to vector<16xf32>
    %486 = vector.shape_cast %485 : vector<16xf32> to vector<16x1xf32>
    %cst_221 = arith.constant 6.400000e+01 : f32
    %487 = vector.broadcast %cst_221 : f32 to vector<16x1xf32>
    %488 = arith.divf %486, %487 : vector<16x1xf32>
    %489 = vector.broadcast %488 : vector<16x1xf32> to vector<16x64xf32>
    %490 = arith.subf %482, %489 : vector<16x64xf32>
    %491 = arith.mulf %490, %490 : vector<16x64xf32>
    %cst_222 = arith.constant dense<0.000000e+00> : vector<16xf32>
    %492 = vector.multi_reduction <add>, %491, %cst_222 [1] : vector<16x64xf32> to vector<16xf32>
    %493 = vector.shape_cast %492 : vector<16xf32> to vector<16x1xf32>
    %cst_223 = arith.constant 6.400000e+01 : f32
    %494 = vector.broadcast %cst_223 : f32 to vector<16x1xf32>
    %495 = arith.divf %493, %494 : vector<16x1xf32>
    %cst_224 = arith.constant 1.000000e-07 : f32
    %496 = vector.broadcast %cst_224 : f32 to vector<16x1xf32>
    %497 = arith.addf %495, %496 : vector<16x1xf32>
    %498 = math.rsqrt %497 : vector<16x1xf32>
    %499 = vector.broadcast %498 : vector<16x1xf32> to vector<16x64xf32>
    %500 = arith.mulf %490, %499 : vector<16x64xf32>
    %501 = vector.broadcast %483 : vector<1x64xf32> to vector<16x64xf32>
    %502 = arith.mulf %500, %501 : vector<16x64xf32>
    %503 = vector.broadcast %484 : vector<1x64xf32> to vector<16x64xf32>
    %504 = arith.addf %502, %503 : vector<16x64xf32>
    %505 = arith.addf %504, %4 : vector<16x64xf32>
    %c9_225 = arith.constant 9 : index
    %c0_226 = arith.constant 0 : index
    %c0_227 = arith.constant 0 : index
    %506 = vector.load %arg3[%c9_225, %c0_226, %c0_227] : memref<13x64x64xbf16, #tpu.memory_space<vmem>>, vector<1x64x64xbf16>
    %507 = vector.shape_cast %506 : vector<1x64x64xbf16> to vector<64x64xbf16>
    %508 = arith.truncf %505 : vector<16x64xf32> to vector<16x64xbf16>
    %cst_228 = arith.constant dense<0.000000e+00> : vector<16x64xf32>
    %509 = tpu.matmul %508, %507, %cst_228 {dimension_numbers = #tpu.dot_dimension_numbers<[1], [0], [0], [1], [0, 0, 1, 1], [], []>} : vector<16x64xbf16>, vector<64x64xbf16>, vector<16x64xf32> -> vector<16x64xf32>
    %510 = arith.truncf %509 : vector<16x64xf32> to vector<16x64xbf16>
    %511 = vector.shape_cast %510 : vector<16x64xbf16> to vector<1x16x64xbf16>
    %c12 = arith.constant 12 : index
    %c0_229 = arith.constant 0 : index
    %c0_230 = arith.constant 0 : index
    %512 = vector.load %arg3[%c12, %c0_229, %c0_230] : memref<13x64x64xbf16, #tpu.memory_space<vmem>>, vector<1x64x64xbf16>
    %513 = vector.shape_cast %512 : vector<1x64x64xbf16> to vector<64x64xbf16>
    %514 = vector.extract_strided_slice %511 {offsets = [0, 0, 0], sizes = [1, 16, 16], strides = [1, 1, 1]} : vector<1x16x64xbf16> to vector<1x16x16xbf16>
    %515 = vector.extract_strided_slice %349 {offsets = [0, 0, 0], sizes = [1, 16, 16], strides = [1, 1, 1]} : vector<1x16x64xbf16> to vector<1x16x16xbf16>
    %cst_231 = arith.constant dense<0.000000e+00> : vector<1x16x16xf32>
    %516 = tpu.matmul %514, %515, %cst_231 {dimension_numbers = #tpu.dot_dimension_numbers<[2], [2], [1], [1], [0, 0, 0, 1, 1, 1], [0], [0]>} : vector<1x16x16xbf16>, vector<1x16x16xbf16>, vector<1x16x16xf32> -> vector<1x16x16xf32>
    %cst_232 = arith.constant 2.500000e-01 : f32
    %517 = vector.broadcast %cst_232 : f32 to vector<1x16x16xf32>
    %518 = arith.mulf %516, %517 : vector<1x16x16xf32>
    %cst_233 = arith.constant dense<0xFF800000> : vector<1x16xf32>
    %519 = vector.multi_reduction <maximumf>, %518, %cst_233 [2] : vector<1x16x16xf32> to vector<1x16xf32>
    %520 = vector.shape_cast %519 : vector<1x16xf32> to vector<1x16x1xf32>
    %521 = vector.broadcast %520 : vector<1x16x1xf32> to vector<1x16x16xf32>
    %522 = arith.subf %518, %521 : vector<1x16x16xf32>
    %523 = math.exp %522 : vector<1x16x16xf32>
    %cst_234 = arith.constant dense<0.000000e+00> : vector<1x16xf32>
    %524 = vector.multi_reduction <add>, %523, %cst_234 [2] : vector<1x16x16xf32> to vector<1x16xf32>
    %525 = vector.shape_cast %524 : vector<1x16xf32> to vector<1x16x1xf32>
    %526 = tpu.reciprocal %525 {approx = true} : vector<1x16x1xf32> -> vector<1x16x1xf32>
    %527 = vector.broadcast %526 : vector<1x16x1xf32> to vector<1x16x16xf32>
    %528 = arith.mulf %523, %527 : vector<1x16x16xf32>
    %529 = arith.truncf %528 : vector<1x16x16xf32> to vector<1x16x16xbf16>
    %530 = vector.extract_strided_slice %355 {offsets = [0, 0, 0], sizes = [1, 16, 16], strides = [1, 1, 1]} : vector<1x16x64xbf16> to vector<1x16x16xbf16>
    %cst_235 = arith.constant dense<0.000000e+00> : vector<1x16x16xf32>
    %531 = tpu.matmul %529, %530, %cst_235 {dimension_numbers = #tpu.dot_dimension_numbers<[2], [1], [1], [2], [0, 0, 0, 1, 1, 2], [0], [0]>} : vector<1x16x16xbf16>, vector<1x16x16xbf16>, vector<1x16x16xf32> -> vector<1x16x16xf32>
    %532 = vector.shape_cast %531 : vector<1x16x16xf32> to vector<16x16xf32>
    %c0_236 = arith.constant 0 : index
    %c0_237 = arith.constant 0 : index
    %533 = vector.load %arg9[%c0_236, %c0_237] : memref<16x64xf32, #tpu.memory_space<vmem>>, vector<16x16xf32>
    tpu.vector_store %arg9[%c0_236, %c0_237], %532 {strides = array<i32>} : memref<16x64xf32, #tpu.memory_space<vmem>>, vector<16x16xf32>,
    %534 = vector.extract_strided_slice %511 {offsets = [0, 0, 16], sizes = [1, 16, 16], strides = [1, 1, 1]} : vector<1x16x64xbf16> to vector<1x16x16xbf16>
    %535 = vector.extract_strided_slice %349 {offsets = [0, 0, 16], sizes = [1, 16, 16], strides = [1, 1, 1]} : vector<1x16x64xbf16> to vector<1x16x16xbf16>
    %cst_238 = arith.constant dense<0.000000e+00> : vector<1x16x16xf32>
    %536 = tpu.matmul %534, %535, %cst_238 {dimension_numbers = #tpu.dot_dimension_numbers<[2], [2], [1], [1], [0, 0, 0, 1, 1, 1], [0], [0]>} : vector<1x16x16xbf16>, vector<1x16x16xbf16>, vector<1x16x16xf32> -> vector<1x16x16xf32>
    %cst_239 = arith.constant 2.500000e-01 : f32
    %537 = vector.broadcast %cst_239 : f32 to vector<1x16x16xf32>
    %538 = arith.mulf %536, %537 : vector<1x16x16xf32>
    %cst_240 = arith.constant dense<0xFF800000> : vector<1x16xf32>
    %539 = vector.multi_reduction <maximumf>, %538, %cst_240 [2] : vector<1x16x16xf32> to vector<1x16xf32>
    %540 = vector.shape_cast %539 : vector<1x16xf32> to vector<1x16x1xf32>
    %541 = vector.broadcast %540 : vector<1x16x1xf32> to vector<1x16x16xf32>
    %542 = arith.subf %538, %541 : vector<1x16x16xf32>
    %543 = math.exp %542 : vector<1x16x16xf32>
    %cst_241 = arith.constant dense<0.000000e+00> : vector<1x16xf32>
    %544 = vector.multi_reduction <add>, %543, %cst_241 [2] : vector<1x16x16xf32> to vector<1x16xf32>
    %545 = vector.shape_cast %544 : vector<1x16xf32> to vector<1x16x1xf32>
    %546 = tpu.reciprocal %545 {approx = true} : vector<1x16x1xf32> -> vector<1x16x1xf32>
    %547 = vector.broadcast %546 : vector<1x16x1xf32> to vector<1x16x16xf32>
    %548 = arith.mulf %543, %547 : vector<1x16x16xf32>
    %549 = arith.truncf %548 : vector<1x16x16xf32> to vector<1x16x16xbf16>
    %550 = vector.extract_strided_slice %355 {offsets = [0, 0, 16], sizes = [1, 16, 16], strides = [1, 1, 1]} : vector<1x16x64xbf16> to vector<1x16x16xbf16>
    %cst_242 = arith.constant dense<0.000000e+00> : vector<1x16x16xf32>
    %551 = tpu.matmul %549, %550, %cst_242 {dimension_numbers = #tpu.dot_dimension_numbers<[2], [1], [1], [2], [0, 0, 0, 1, 1, 2], [0], [0]>} : vector<1x16x16xbf16>, vector<1x16x16xbf16>, vector<1x16x16xf32> -> vector<1x16x16xf32>
    %552 = vector.shape_cast %551 : vector<1x16x16xf32> to vector<16x16xf32>
    %c0_243 = arith.constant 0 : index
    %c16_244 = arith.constant 16 : index
    %553 = vector.load %arg9[%c0_243, %c16_244] : memref<16x64xf32, #tpu.memory_space<vmem>>, vector<16x16xf32>
    tpu.vector_store %arg9[%c0_243, %c16_244], %552 {strides = array<i32>} : memref<16x64xf32, #tpu.memory_space<vmem>>, vector<16x16xf32>,
    %554 = vector.extract_strided_slice %511 {offsets = [0, 0, 32], sizes = [1, 16, 16], strides = [1, 1, 1]} : vector<1x16x64xbf16> to vector<1x16x16xbf16>
    %555 = vector.extract_strided_slice %349 {offsets = [0, 0, 32], sizes = [1, 16, 16], strides = [1, 1, 1]} : vector<1x16x64xbf16> to vector<1x16x16xbf16>
    %cst_245 = arith.constant dense<0.000000e+00> : vector<1x16x16xf32>
    %556 = tpu.matmul %554, %555, %cst_245 {dimension_numbers = #tpu.dot_dimension_numbers<[2], [2], [1], [1], [0, 0, 0, 1, 1, 1], [0], [0]>} : vector<1x16x16xbf16>, vector<1x16x16xbf16>, vector<1x16x16xf32> -> vector<1x16x16xf32>
    %cst_246 = arith.constant 2.500000e-01 : f32
    %557 = vector.broadcast %cst_246 : f32 to vector<1x16x16xf32>
    %558 = arith.mulf %556, %557 : vector<1x16x16xf32>
    %cst_247 = arith.constant dense<0xFF800000> : vector<1x16xf32>
    %559 = vector.multi_reduction <maximumf>, %558, %cst_247 [2] : vector<1x16x16xf32> to vector<1x16xf32>
    %560 = vector.shape_cast %559 : vector<1x16xf32> to vector<1x16x1xf32>
    %561 = vector.broadcast %560 : vector<1x16x1xf32> to vector<1x16x16xf32>
    %562 = arith.subf %558, %561 : vector<1x16x16xf32>
    %563 = math.exp %562 : vector<1x16x16xf32>
    %cst_248 = arith.constant dense<0.000000e+00> : vector<1x16xf32>
    %564 = vector.multi_reduction <add>, %563, %cst_248 [2] : vector<1x16x16xf32> to vector<1x16xf32>
    %565 = vector.shape_cast %564 : vector<1x16xf32> to vector<1x16x1xf32>
    %566 = tpu.reciprocal %565 {approx = true} : vector<1x16x1xf32> -> vector<1x16x1xf32>
    %567 = vector.broadcast %566 : vector<1x16x1xf32> to vector<1x16x16xf32>
    %568 = arith.mulf %563, %567 : vector<1x16x16xf32>
    %569 = arith.truncf %568 : vector<1x16x16xf32> to vector<1x16x16xbf16>
    %570 = vector.extract_strided_slice %355 {offsets = [0, 0, 32], sizes = [1, 16, 16], strides = [1, 1, 1]} : vector<1x16x64xbf16> to vector<1x16x16xbf16>
    %cst_249 = arith.constant dense<0.000000e+00> : vector<1x16x16xf32>
    %571 = tpu.matmul %569, %570, %cst_249 {dimension_numbers = #tpu.dot_dimension_numbers<[2], [1], [1], [2], [0, 0, 0, 1, 1, 2], [0], [0]>} : vector<1x16x16xbf16>, vector<1x16x16xbf16>, vector<1x16x16xf32> -> vector<1x16x16xf32>
    %572 = vector.shape_cast %571 : vector<1x16x16xf32> to vector<16x16xf32>
    %c0_250 = arith.constant 0 : index
    %c32_251 = arith.constant 32 : index
    %573 = vector.load %arg9[%c0_250, %c32_251] : memref<16x64xf32, #tpu.memory_space<vmem>>, vector<16x16xf32>
    tpu.vector_store %arg9[%c0_250, %c32_251], %572 {strides = array<i32>} : memref<16x64xf32, #tpu.memory_space<vmem>>, vector<16x16xf32>,
    %574 = vector.extract_strided_slice %511 {offsets = [0, 0, 48], sizes = [1, 16, 16], strides = [1, 1, 1]} : vector<1x16x64xbf16> to vector<1x16x16xbf16>
    %575 = vector.extract_strided_slice %349 {offsets = [0, 0, 48], sizes = [1, 16, 16], strides = [1, 1, 1]} : vector<1x16x64xbf16> to vector<1x16x16xbf16>
    %cst_252 = arith.constant dense<0.000000e+00> : vector<1x16x16xf32>
    %576 = tpu.matmul %574, %575, %cst_252 {dimension_numbers = #tpu.dot_dimension_numbers<[2], [2], [1], [1], [0, 0, 0, 1, 1, 1], [0], [0]>} : vector<1x16x16xbf16>, vector<1x16x16xbf16>, vector<1x16x16xf32> -> vector<1x16x16xf32>
    %cst_253 = arith.constant 2.500000e-01 : f32
    %577 = vector.broadcast %cst_253 : f32 to vector<1x16x16xf32>
    %578 = arith.mulf %576, %577 : vector<1x16x16xf32>
    %cst_254 = arith.constant dense<0xFF800000> : vector<1x16xf32>
    %579 = vector.multi_reduction <maximumf>, %578, %cst_254 [2] : vector<1x16x16xf32> to vector<1x16xf32>
    %580 = vector.shape_cast %579 : vector<1x16xf32> to vector<1x16x1xf32>
    %581 = vector.broadcast %580 : vector<1x16x1xf32> to vector<1x16x16xf32>
    %582 = arith.subf %578, %581 : vector<1x16x16xf32>
    %583 = math.exp %582 : vector<1x16x16xf32>
    %cst_255 = arith.constant dense<0.000000e+00> : vector<1x16xf32>
    %584 = vector.multi_reduction <add>, %583, %cst_255 [2] : vector<1x16x16xf32> to vector<1x16xf32>
    %585 = vector.shape_cast %584 : vector<1x16xf32> to vector<1x16x1xf32>
    %586 = tpu.reciprocal %585 {approx = true} : vector<1x16x1xf32> -> vector<1x16x1xf32>
    %587 = vector.broadcast %586 : vector<1x16x1xf32> to vector<1x16x16xf32>
    %588 = arith.mulf %583, %587 : vector<1x16x16xf32>
    %589 = arith.truncf %588 : vector<1x16x16xf32> to vector<1x16x16xbf16>
    %590 = vector.extract_strided_slice %355 {offsets = [0, 0, 48], sizes = [1, 16, 16], strides = [1, 1, 1]} : vector<1x16x64xbf16> to vector<1x16x16xbf16>
    %cst_256 = arith.constant dense<0.000000e+00> : vector<1x16x16xf32>
    %591 = tpu.matmul %589, %590, %cst_256 {dimension_numbers = #tpu.dot_dimension_numbers<[2], [1], [1], [2], [0, 0, 0, 1, 1, 2], [0], [0]>} : vector<1x16x16xbf16>, vector<1x16x16xbf16>, vector<1x16x16xf32> -> vector<1x16x16xf32>
    %592 = vector.shape_cast %591 : vector<1x16x16xf32> to vector<16x16xf32>
    %c0_257 = arith.constant 0 : index
    %c48_258 = arith.constant 48 : index
    %593 = vector.load %arg9[%c0_257, %c48_258] : memref<16x64xf32, #tpu.memory_space<vmem>>, vector<16x16xf32>
    tpu.vector_store %arg9[%c0_257, %c48_258], %592 {strides = array<i32>} : memref<16x64xf32, #tpu.memory_space<vmem>>, vector<16x16xf32>,
    %c0_259 = arith.constant 0 : index
    %c0_260 = arith.constant 0 : index
    %594 = vector.load %arg9[%c0_259, %c0_260] : memref<16x64xf32, #tpu.memory_space<vmem>>, vector<16x64xf32>
    %595 = arith.truncf %594 : vector<16x64xf32> to vector<16x64xbf16>
    %cst_261 = arith.constant dense<0.000000e+00> : vector<16x64xf32>
    %596 = tpu.matmul %595, %513, %cst_261 {dimension_numbers = #tpu.dot_dimension_numbers<[1], [0], [0], [1], [0, 0, 1, 1], [], []>} : vector<16x64xbf16>, vector<64x64xbf16>, vector<16x64xf32> -> vector<16x64xf32>
    %597 = arith.addf %482, %596 : vector<16x64xf32>
    %c10_262 = arith.constant 10 : index
    %c0_263 = arith.constant 0 : index
    %598 = vector.load %arg6[%c10_262, %c0_263] : memref<14x64xf32, #tpu.memory_space<vmem>>, vector<1x64xf32>
    %c11_264 = arith.constant 11 : index
    %c0_265 = arith.constant 0 : index
    %599 = vector.load %arg6[%c11_264, %c0_265] : memref<14x64xf32, #tpu.memory_space<vmem>>, vector<1x64xf32>
    %cst_266 = arith.constant dense<0.000000e+00> : vector<16xf32>
    %600 = vector.multi_reduction <add>, %597, %cst_266 [1] : vector<16x64xf32> to vector<16xf32>
    %601 = vector.shape_cast %600 : vector<16xf32> to vector<16x1xf32>
    %cst_267 = arith.constant 6.400000e+01 : f32
    %602 = vector.broadcast %cst_267 : f32 to vector<16x1xf32>
    %603 = arith.divf %601, %602 : vector<16x1xf32>
    %604 = vector.broadcast %603 : vector<16x1xf32> to vector<16x64xf32>
    %605 = arith.subf %597, %604 : vector<16x64xf32>
    %606 = arith.mulf %605, %605 : vector<16x64xf32>
    %cst_268 = arith.constant dense<0.000000e+00> : vector<16xf32>
    %607 = vector.multi_reduction <add>, %606, %cst_268 [1] : vector<16x64xf32> to vector<16xf32>
    %608 = vector.shape_cast %607 : vector<16xf32> to vector<16x1xf32>
    %cst_269 = arith.constant 6.400000e+01 : f32
    %609 = vector.broadcast %cst_269 : f32 to vector<16x1xf32>
    %610 = arith.divf %608, %609 : vector<16x1xf32>
    %cst_270 = arith.constant 1.000000e-07 : f32
    %611 = vector.broadcast %cst_270 : f32 to vector<16x1xf32>
    %612 = arith.addf %610, %611 : vector<16x1xf32>
    %613 = math.rsqrt %612 : vector<16x1xf32>
    %614 = vector.broadcast %613 : vector<16x1xf32> to vector<16x64xf32>
    %615 = arith.mulf %605, %614 : vector<16x64xf32>
    %616 = vector.broadcast %598 : vector<1x64xf32> to vector<16x64xf32>
    %617 = arith.mulf %615, %616 : vector<16x64xf32>
    %618 = vector.broadcast %599 : vector<1x64xf32> to vector<16x64xf32>
    %619 = arith.addf %617, %618 : vector<16x64xf32>
    %c1_271 = arith.constant 1 : index
    %c0_272 = arith.constant 0 : index
    %c0_273 = arith.constant 0 : index
    %620 = vector.load %arg4[%c1_271, %c0_272, %c0_273] : memref<3x64x32xbf16, #tpu.memory_space<vmem>>, vector<1x64x32xbf16>
    %621 = vector.shape_cast %620 : vector<1x64x32xbf16> to vector<64x32xbf16>
    %622 = arith.truncf %619 : vector<16x64xf32> to vector<16x64xbf16>
    %cst_274 = arith.constant dense<0.000000e+00> : vector<16x32xf32>
    %623 = tpu.matmul %622, %621, %cst_274 {dimension_numbers = #tpu.dot_dimension_numbers<[1], [0], [0], [1], [0, 0, 1, 1], [], []>} : vector<16x64xbf16>, vector<64x32xbf16>, vector<16x32xf32> -> vector<16x32xf32>
    %c1_275 = arith.constant 1 : index
    %c0_276 = arith.constant 0 : index
    %624 = vector.load %arg7[%c1_275, %c0_276] : memref<3x32xf32, #tpu.memory_space<vmem>>, vector<1x32xf32>
    %625 = vector.broadcast %624 : vector<1x32xf32> to vector<16x32xf32>
    %626 = arith.addf %623, %625 : vector<16x32xf32>
    %cst_277 = arith.constant 0.000000e+00 : f32
    %627 = vector.broadcast %cst_277 : f32 to vector<16x32xf32>
    %628 = arith.maximumf %626, %627 : vector<16x32xf32>
    %c1_278 = arith.constant 1 : index
    %c0_279 = arith.constant 0 : index
    %c0_280 = arith.constant 0 : index
    %629 = vector.load %arg5[%c1_278, %c0_279, %c0_280] : memref<3x32x64xbf16, #tpu.memory_space<vmem>>, vector<1x32x64xbf16>
    %630 = vector.shape_cast %629 : vector<1x32x64xbf16> to vector<32x64xbf16>
    %631 = arith.truncf %628 : vector<16x32xf32> to vector<16x32xbf16>
    %cst_281 = arith.constant dense<0.000000e+00> : vector<16x64xf32>
    %632 = tpu.matmul %631, %630, %cst_281 {dimension_numbers = #tpu.dot_dimension_numbers<[1], [0], [0], [1], [0, 0, 1, 1], [], []>} : vector<16x32xbf16>, vector<32x64xbf16>, vector<16x64xf32> -> vector<16x64xf32>
    %633 = arith.addf %597, %632 : vector<16x64xf32>
    %c12_282 = arith.constant 12 : index
    %c0_283 = arith.constant 0 : index
    %634 = vector.load %arg6[%c12_282, %c0_283] : memref<14x64xf32, #tpu.memory_space<vmem>>, vector<1x64xf32>
    %635 = vector.broadcast %634 : vector<1x64xf32> to vector<16x64xf32>
    %636 = arith.addf %633, %635 : vector<16x64xf32>
    %c1_i32_284 = arith.constant 1 : i32
    %c6_285 = arith.constant 6 : index
    %c0_286 = arith.constant 0 : index
    %637 = vector.load %arg6[%c6_285, %c0_286] : memref<14x64xf32, #tpu.memory_space<vmem>>, vector<1x64xf32>
    %c7_287 = arith.constant 7 : index
    %c0_288 = arith.constant 0 : index
    %638 = vector.load %arg6[%c7_287, %c0_288] : memref<14x64xf32, #tpu.memory_space<vmem>>, vector<1x64xf32>
    %cst_289 = arith.constant dense<0.000000e+00> : vector<16xf32>
    %639 = vector.multi_reduction <add>, %636, %cst_289 [1] : vector<16x64xf32> to vector<16xf32>
    %640 = vector.shape_cast %639 : vector<16xf32> to vector<16x1xf32>
    %cst_290 = arith.constant 6.400000e+01 : f32
    %641 = vector.broadcast %cst_290 : f32 to vector<16x1xf32>
    %642 = arith.divf %640, %641 : vector<16x1xf32>
    %643 = vector.broadcast %642 : vector<16x1xf32> to vector<16x64xf32>
    %644 = arith.subf %636, %643 : vector<16x64xf32>
    %645 = arith.mulf %644, %644 : vector<16x64xf32>
    %cst_291 = arith.constant dense<0.000000e+00> : vector<16xf32>
    %646 = vector.multi_reduction <add>, %645, %cst_291 [1] : vector<16x64xf32> to vector<16xf32>
    %647 = vector.shape_cast %646 : vector<16xf32> to vector<16x1xf32>
    %cst_292 = arith.constant 6.400000e+01 : f32
    %648 = vector.broadcast %cst_292 : f32 to vector<16x1xf32>
    %649 = arith.divf %647, %648 : vector<16x1xf32>
    %cst_293 = arith.constant 1.000000e-07 : f32
    %650 = vector.broadcast %cst_293 : f32 to vector<16x1xf32>
    %651 = arith.addf %649, %650 : vector<16x1xf32>
    %652 = math.rsqrt %651 : vector<16x1xf32>
    %653 = vector.broadcast %652 : vector<16x1xf32> to vector<16x64xf32>
    %654 = arith.mulf %644, %653 : vector<16x64xf32>
    %655 = vector.broadcast %637 : vector<1x64xf32> to vector<16x64xf32>
    %656 = arith.mulf %654, %655 : vector<16x64xf32>
    %657 = vector.broadcast %638 : vector<1x64xf32> to vector<16x64xf32>
    %658 = arith.addf %656, %657 : vector<16x64xf32>
    %659 = arith.addf %658, %4 : vector<16x64xf32>
    %c5_294 = arith.constant 5 : index
    %c0_295 = arith.constant 0 : index
    %c0_296 = arith.constant 0 : index
    %660 = vector.load %arg3[%c5_294, %c0_295, %c0_296] : memref<13x64x64xbf16, #tpu.memory_space<vmem>>, vector<1x64x64xbf16>
    %661 = vector.shape_cast %660 : vector<1x64x64xbf16> to vector<64x64xbf16>
    %662 = arith.truncf %659 : vector<16x64xf32> to vector<16x64xbf16>
    %cst_297 = arith.constant dense<0.000000e+00> : vector<16x64xf32>
    %663 = tpu.matmul %662, %661, %cst_297 {dimension_numbers = #tpu.dot_dimension_numbers<[1], [0], [0], [1], [0, 0, 1, 1], [], []>} : vector<16x64xbf16>, vector<64x64xbf16>, vector<16x64xf32> -> vector<16x64xf32>
    %c6_298 = arith.constant 6 : index
    %c0_299 = arith.constant 0 : index
    %c0_300 = arith.constant 0 : index
    %664 = vector.load %arg3[%c6_298, %c0_299, %c0_300] : memref<13x64x64xbf16, #tpu.memory_space<vmem>>, vector<1x64x64xbf16>
    %665 = vector.shape_cast %664 : vector<1x64x64xbf16> to vector<64x64xbf16>
    %666 = arith.truncf %659 : vector<16x64xf32> to vector<16x64xbf16>
    %cst_301 = arith.constant dense<0.000000e+00> : vector<16x64xf32>
    %667 = tpu.matmul %666, %665, %cst_301 {dimension_numbers = #tpu.dot_dimension_numbers<[1], [0], [0], [1], [0, 0, 1, 1], [], []>} : vector<16x64xbf16>, vector<64x64xbf16>, vector<16x64xf32> -> vector<16x64xf32>
    %c7_302 = arith.constant 7 : index
    %c0_303 = arith.constant 0 : index
    %c0_304 = arith.constant 0 : index
    %668 = vector.load %arg3[%c7_302, %c0_303, %c0_304] : memref<13x64x64xbf16, #tpu.memory_space<vmem>>, vector<1x64x64xbf16>
    %669 = vector.shape_cast %668 : vector<1x64x64xbf16> to vector<64x64xbf16>
    %670 = arith.truncf %658 : vector<16x64xf32> to vector<16x64xbf16>
    %cst_305 = arith.constant dense<0.000000e+00> : vector<16x64xf32>
    %671 = tpu.matmul %670, %669, %cst_305 {dimension_numbers = #tpu.dot_dimension_numbers<[1], [0], [0], [1], [0, 0, 1, 1], [], []>} : vector<16x64xbf16>, vector<64x64xbf16>, vector<16x64xf32> -> vector<16x64xf32>
    %672 = arith.truncf %663 : vector<16x64xf32> to vector<16x64xbf16>
    %673 = vector.shape_cast %672 : vector<16x64xbf16> to vector<1x16x64xbf16>
    %674 = arith.truncf %667 : vector<16x64xf32> to vector<16x64xbf16>
    %675 = vector.shape_cast %674 : vector<16x64xbf16> to vector<1x16x64xbf16>
    %676 = arith.truncf %671 : vector<16x64xf32> to vector<16x64xbf16>
    %677 = vector.shape_cast %676 : vector<16x64xbf16> to vector<1x16x64xbf16>
    %c8_306 = arith.constant 8 : index
    %c0_307 = arith.constant 0 : index
    %c0_308 = arith.constant 0 : index
    %678 = vector.load %arg3[%c8_306, %c0_307, %c0_308] : memref<13x64x64xbf16, #tpu.memory_space<vmem>>, vector<1x64x64xbf16>
    %679 = vector.shape_cast %678 : vector<1x64x64xbf16> to vector<64x64xbf16>
    %680 = vector.extract_strided_slice %673 {offsets = [0, 0, 0], sizes = [1, 16, 16], strides = [1, 1, 1]} : vector<1x16x64xbf16> to vector<1x16x16xbf16>
    %681 = vector.extract_strided_slice %675 {offsets = [0, 0, 0], sizes = [1, 16, 16], strides = [1, 1, 1]} : vector<1x16x64xbf16> to vector<1x16x16xbf16>
    %cst_309 = arith.constant dense<0.000000e+00> : vector<1x16x16xf32>
    %682 = tpu.matmul %680, %681, %cst_309 {dimension_numbers = #tpu.dot_dimension_numbers<[2], [2], [1], [1], [0, 0, 0, 1, 1, 1], [0], [0]>} : vector<1x16x16xbf16>, vector<1x16x16xbf16>, vector<1x16x16xf32> -> vector<1x16x16xf32>
    %cst_310 = arith.constant 2.500000e-01 : f32
    %683 = vector.broadcast %cst_310 : f32 to vector<1x16x16xf32>
    %684 = arith.mulf %682, %683 : vector<1x16x16xf32>
    %cst_311 = arith.constant dense<0xFF800000> : vector<1x16xf32>
    %685 = vector.multi_reduction <maximumf>, %684, %cst_311 [2] : vector<1x16x16xf32> to vector<1x16xf32>
    %686 = vector.shape_cast %685 : vector<1x16xf32> to vector<1x16x1xf32>
    %687 = vector.broadcast %686 : vector<1x16x1xf32> to vector<1x16x16xf32>
    %688 = arith.subf %684, %687 : vector<1x16x16xf32>
    %689 = math.exp %688 : vector<1x16x16xf32>
    %cst_312 = arith.constant dense<0.000000e+00> : vector<1x16xf32>
    %690 = vector.multi_reduction <add>, %689, %cst_312 [2] : vector<1x16x16xf32> to vector<1x16xf32>
    %691 = vector.shape_cast %690 : vector<1x16xf32> to vector<1x16x1xf32>
    %692 = tpu.reciprocal %691 {approx = true} : vector<1x16x1xf32> -> vector<1x16x1xf32>
    %693 = vector.broadcast %692 : vector<1x16x1xf32> to vector<1x16x16xf32>
    %694 = arith.mulf %689, %693 : vector<1x16x16xf32>
    %695 = arith.truncf %694 : vector<1x16x16xf32> to vector<1x16x16xbf16>
    %696 = vector.extract_strided_slice %677 {offsets = [0, 0, 0], sizes = [1, 16, 16], strides = [1, 1, 1]} : vector<1x16x64xbf16> to vector<1x16x16xbf16>
    %cst_313 = arith.constant dense<0.000000e+00> : vector<1x16x16xf32>
    %697 = tpu.matmul %695, %696, %cst_313 {dimension_numbers = #tpu.dot_dimension_numbers<[2], [1], [1], [2], [0, 0, 0, 1, 1, 2], [0], [0]>} : vector<1x16x16xbf16>, vector<1x16x16xbf16>, vector<1x16x16xf32> -> vector<1x16x16xf32>
    %698 = vector.shape_cast %697 : vector<1x16x16xf32> to vector<16x16xf32>
    %c0_314 = arith.constant 0 : index
    %c0_315 = arith.constant 0 : index
    %699 = vector.load %arg9[%c0_314, %c0_315] : memref<16x64xf32, #tpu.memory_space<vmem>>, vector<16x16xf32>
    tpu.vector_store %arg9[%c0_314, %c0_315], %698 {strides = array<i32>} : memref<16x64xf32, #tpu.memory_space<vmem>>, vector<16x16xf32>,
    %700 = vector.extract_strided_slice %673 {offsets = [0, 0, 16], sizes = [1, 16, 16], strides = [1, 1, 1]} : vector<1x16x64xbf16> to vector<1x16x16xbf16>
    %701 = vector.extract_strided_slice %675 {offsets = [0, 0, 16], sizes = [1, 16, 16], strides = [1, 1, 1]} : vector<1x16x64xbf16> to vector<1x16x16xbf16>
    %cst_316 = arith.constant dense<0.000000e+00> : vector<1x16x16xf32>
    %702 = tpu.matmul %700, %701, %cst_316 {dimension_numbers = #tpu.dot_dimension_numbers<[2], [2], [1], [1], [0, 0, 0, 1, 1, 1], [0], [0]>} : vector<1x16x16xbf16>, vector<1x16x16xbf16>, vector<1x16x16xf32> -> vector<1x16x16xf32>
    %cst_317 = arith.constant 2.500000e-01 : f32
    %703 = vector.broadcast %cst_317 : f32 to vector<1x16x16xf32>
    %704 = arith.mulf %702, %703 : vector<1x16x16xf32>
    %cst_318 = arith.constant dense<0xFF800000> : vector<1x16xf32>
    %705 = vector.multi_reduction <maximumf>, %704, %cst_318 [2] : vector<1x16x16xf32> to vector<1x16xf32>
    %706 = vector.shape_cast %705 : vector<1x16xf32> to vector<1x16x1xf32>
    %707 = vector.broadcast %706 : vector<1x16x1xf32> to vector<1x16x16xf32>
    %708 = arith.subf %704, %707 : vector<1x16x16xf32>
    %709 = math.exp %708 : vector<1x16x16xf32>
    %cst_319 = arith.constant dense<0.000000e+00> : vector<1x16xf32>
    %710 = vector.multi_reduction <add>, %709, %cst_319 [2] : vector<1x16x16xf32> to vector<1x16xf32>
    %711 = vector.shape_cast %710 : vector<1x16xf32> to vector<1x16x1xf32>
    %712 = tpu.reciprocal %711 {approx = true} : vector<1x16x1xf32> -> vector<1x16x1xf32>
    %713 = vector.broadcast %712 : vector<1x16x1xf32> to vector<1x16x16xf32>
    %714 = arith.mulf %709, %713 : vector<1x16x16xf32>
    %715 = arith.truncf %714 : vector<1x16x16xf32> to vector<1x16x16xbf16>
    %716 = vector.extract_strided_slice %677 {offsets = [0, 0, 16], sizes = [1, 16, 16], strides = [1, 1, 1]} : vector<1x16x64xbf16> to vector<1x16x16xbf16>
    %cst_320 = arith.constant dense<0.000000e+00> : vector<1x16x16xf32>
    %717 = tpu.matmul %715, %716, %cst_320 {dimension_numbers = #tpu.dot_dimension_numbers<[2], [1], [1], [2], [0, 0, 0, 1, 1, 2], [0], [0]>} : vector<1x16x16xbf16>, vector<1x16x16xbf16>, vector<1x16x16xf32> -> vector<1x16x16xf32>
    %718 = vector.shape_cast %717 : vector<1x16x16xf32> to vector<16x16xf32>
    %c0_321 = arith.constant 0 : index
    %c16_322 = arith.constant 16 : index
    %719 = vector.load %arg9[%c0_321, %c16_322] : memref<16x64xf32, #tpu.memory_space<vmem>>, vector<16x16xf32>
    tpu.vector_store %arg9[%c0_321, %c16_322], %718 {strides = array<i32>} : memref<16x64xf32, #tpu.memory_space<vmem>>, vector<16x16xf32>,
    %720 = vector.extract_strided_slice %673 {offsets = [0, 0, 32], sizes = [1, 16, 16], strides = [1, 1, 1]} : vector<1x16x64xbf16> to vector<1x16x16xbf16>
    %721 = vector.extract_strided_slice %675 {offsets = [0, 0, 32], sizes = [1, 16, 16], strides = [1, 1, 1]} : vector<1x16x64xbf16> to vector<1x16x16xbf16>
    %cst_323 = arith.constant dense<0.000000e+00> : vector<1x16x16xf32>
    %722 = tpu.matmul %720, %721, %cst_323 {dimension_numbers = #tpu.dot_dimension_numbers<[2], [2], [1], [1], [0, 0, 0, 1, 1, 1], [0], [0]>} : vector<1x16x16xbf16>, vector<1x16x16xbf16>, vector<1x16x16xf32> -> vector<1x16x16xf32>
    %cst_324 = arith.constant 2.500000e-01 : f32
    %723 = vector.broadcast %cst_324 : f32 to vector<1x16x16xf32>
    %724 = arith.mulf %722, %723 : vector<1x16x16xf32>
    %cst_325 = arith.constant dense<0xFF800000> : vector<1x16xf32>
    %725 = vector.multi_reduction <maximumf>, %724, %cst_325 [2] : vector<1x16x16xf32> to vector<1x16xf32>
    %726 = vector.shape_cast %725 : vector<1x16xf32> to vector<1x16x1xf32>
    %727 = vector.broadcast %726 : vector<1x16x1xf32> to vector<1x16x16xf32>
    %728 = arith.subf %724, %727 : vector<1x16x16xf32>
    %729 = math.exp %728 : vector<1x16x16xf32>
    %cst_326 = arith.constant dense<0.000000e+00> : vector<1x16xf32>
    %730 = vector.multi_reduction <add>, %729, %cst_326 [2] : vector<1x16x16xf32> to vector<1x16xf32>
    %731 = vector.shape_cast %730 : vector<1x16xf32> to vector<1x16x1xf32>
    %732 = tpu.reciprocal %731 {approx = true} : vector<1x16x1xf32> -> vector<1x16x1xf32>
    %733 = vector.broadcast %732 : vector<1x16x1xf32> to vector<1x16x16xf32>
    %734 = arith.mulf %729, %733 : vector<1x16x16xf32>
    %735 = arith.truncf %734 : vector<1x16x16xf32> to vector<1x16x16xbf16>
    %736 = vector.extract_strided_slice %677 {offsets = [0, 0, 32], sizes = [1, 16, 16], strides = [1, 1, 1]} : vector<1x16x64xbf16> to vector<1x16x16xbf16>
    %cst_327 = arith.constant dense<0.000000e+00> : vector<1x16x16xf32>
    %737 = tpu.matmul %735, %736, %cst_327 {dimension_numbers = #tpu.dot_dimension_numbers<[2], [1], [1], [2], [0, 0, 0, 1, 1, 2], [0], [0]>} : vector<1x16x16xbf16>, vector<1x16x16xbf16>, vector<1x16x16xf32> -> vector<1x16x16xf32>
    %738 = vector.shape_cast %737 : vector<1x16x16xf32> to vector<16x16xf32>
    %c0_328 = arith.constant 0 : index
    %c32_329 = arith.constant 32 : index
    %739 = vector.load %arg9[%c0_328, %c32_329] : memref<16x64xf32, #tpu.memory_space<vmem>>, vector<16x16xf32>
    tpu.vector_store %arg9[%c0_328, %c32_329], %738 {strides = array<i32>} : memref<16x64xf32, #tpu.memory_space<vmem>>, vector<16x16xf32>,
    %740 = vector.extract_strided_slice %673 {offsets = [0, 0, 48], sizes = [1, 16, 16], strides = [1, 1, 1]} : vector<1x16x64xbf16> to vector<1x16x16xbf16>
    %741 = vector.extract_strided_slice %675 {offsets = [0, 0, 48], sizes = [1, 16, 16], strides = [1, 1, 1]} : vector<1x16x64xbf16> to vector<1x16x16xbf16>
    %cst_330 = arith.constant dense<0.000000e+00> : vector<1x16x16xf32>
    %742 = tpu.matmul %740, %741, %cst_330 {dimension_numbers = #tpu.dot_dimension_numbers<[2], [2], [1], [1], [0, 0, 0, 1, 1, 1], [0], [0]>} : vector<1x16x16xbf16>, vector<1x16x16xbf16>, vector<1x16x16xf32> -> vector<1x16x16xf32>
    %cst_331 = arith.constant 2.500000e-01 : f32
    %743 = vector.broadcast %cst_331 : f32 to vector<1x16x16xf32>
    %744 = arith.mulf %742, %743 : vector<1x16x16xf32>
    %cst_332 = arith.constant dense<0xFF800000> : vector<1x16xf32>
    %745 = vector.multi_reduction <maximumf>, %744, %cst_332 [2] : vector<1x16x16xf32> to vector<1x16xf32>
    %746 = vector.shape_cast %745 : vector<1x16xf32> to vector<1x16x1xf32>
    %747 = vector.broadcast %746 : vector<1x16x1xf32> to vector<1x16x16xf32>
    %748 = arith.subf %744, %747 : vector<1x16x16xf32>
    %749 = math.exp %748 : vector<1x16x16xf32>
    %cst_333 = arith.constant dense<0.000000e+00> : vector<1x16xf32>
    %750 = vector.multi_reduction <add>, %749, %cst_333 [2] : vector<1x16x16xf32> to vector<1x16xf32>
    %751 = vector.shape_cast %750 : vector<1x16xf32> to vector<1x16x1xf32>
    %752 = tpu.reciprocal %751 {approx = true} : vector<1x16x1xf32> -> vector<1x16x1xf32>
    %753 = vector.broadcast %752 : vector<1x16x1xf32> to vector<1x16x16xf32>
    %754 = arith.mulf %749, %753 : vector<1x16x16xf32>
    %755 = arith.truncf %754 : vector<1x16x16xf32> to vector<1x16x16xbf16>
    %756 = vector.extract_strided_slice %677 {offsets = [0, 0, 48], sizes = [1, 16, 16], strides = [1, 1, 1]} : vector<1x16x64xbf16> to vector<1x16x16xbf16>
    %cst_334 = arith.constant dense<0.000000e+00> : vector<1x16x16xf32>
    %757 = tpu.matmul %755, %756, %cst_334 {dimension_numbers = #tpu.dot_dimension_numbers<[2], [1], [1], [2], [0, 0, 0, 1, 1, 2], [0], [0]>} : vector<1x16x16xbf16>, vector<1x16x16xbf16>, vector<1x16x16xf32> -> vector<1x16x16xf32>
    %758 = vector.shape_cast %757 : vector<1x16x16xf32> to vector<16x16xf32>
    %c0_335 = arith.constant 0 : index
    %c48_336 = arith.constant 48 : index
    %759 = vector.load %arg9[%c0_335, %c48_336] : memref<16x64xf32, #tpu.memory_space<vmem>>, vector<16x16xf32>
    tpu.vector_store %arg9[%c0_335, %c48_336], %758 {strides = array<i32>} : memref<16x64xf32, #tpu.memory_space<vmem>>, vector<16x16xf32>,
    %c0_337 = arith.constant 0 : index
    %c0_338 = arith.constant 0 : index
    %760 = vector.load %arg9[%c0_337, %c0_338] : memref<16x64xf32, #tpu.memory_space<vmem>>, vector<16x64xf32>
    %761 = arith.truncf %760 : vector<16x64xf32> to vector<16x64xbf16>
    %cst_339 = arith.constant dense<0.000000e+00> : vector<16x64xf32>
    %762 = tpu.matmul %761, %679, %cst_339 {dimension_numbers = #tpu.dot_dimension_numbers<[1], [0], [0], [1], [0, 0, 1, 1], [], []>} : vector<16x64xbf16>, vector<64x64xbf16>, vector<16x64xf32> -> vector<16x64xf32>
    %763 = arith.addf %636, %762 : vector<16x64xf32>
    %c8_340 = arith.constant 8 : index
    %c0_341 = arith.constant 0 : index
    %764 = vector.load %arg6[%c8_340, %c0_341] : memref<14x64xf32, #tpu.memory_space<vmem>>, vector<1x64xf32>
    %c9_342 = arith.constant 9 : index
    %c0_343 = arith.constant 0 : index
    %765 = vector.load %arg6[%c9_342, %c0_343] : memref<14x64xf32, #tpu.memory_space<vmem>>, vector<1x64xf32>
    %cst_344 = arith.constant dense<0.000000e+00> : vector<16xf32>
    %766 = vector.multi_reduction <add>, %763, %cst_344 [1] : vector<16x64xf32> to vector<16xf32>
    %767 = vector.shape_cast %766 : vector<16xf32> to vector<16x1xf32>
    %cst_345 = arith.constant 6.400000e+01 : f32
    %768 = vector.broadcast %cst_345 : f32 to vector<16x1xf32>
    %769 = arith.divf %767, %768 : vector<16x1xf32>
    %770 = vector.broadcast %769 : vector<16x1xf32> to vector<16x64xf32>
    %771 = arith.subf %763, %770 : vector<16x64xf32>
    %772 = arith.mulf %771, %771 : vector<16x64xf32>
    %cst_346 = arith.constant dense<0.000000e+00> : vector<16xf32>
    %773 = vector.multi_reduction <add>, %772, %cst_346 [1] : vector<16x64xf32> to vector<16xf32>
    %774 = vector.shape_cast %773 : vector<16xf32> to vector<16x1xf32>
    %cst_347 = arith.constant 6.400000e+01 : f32
    %775 = vector.broadcast %cst_347 : f32 to vector<16x1xf32>
    %776 = arith.divf %774, %775 : vector<16x1xf32>
    %cst_348 = arith.constant 1.000000e-07 : f32
    %777 = vector.broadcast %cst_348 : f32 to vector<16x1xf32>
    %778 = arith.addf %776, %777 : vector<16x1xf32>
    %779 = math.rsqrt %778 : vector<16x1xf32>
    %780 = vector.broadcast %779 : vector<16x1xf32> to vector<16x64xf32>
    %781 = arith.mulf %771, %780 : vector<16x64xf32>
    %782 = vector.broadcast %764 : vector<1x64xf32> to vector<16x64xf32>
    %783 = arith.mulf %781, %782 : vector<16x64xf32>
    %784 = vector.broadcast %765 : vector<1x64xf32> to vector<16x64xf32>
    %785 = arith.addf %783, %784 : vector<16x64xf32>
    %786 = arith.addf %785, %4 : vector<16x64xf32>
    %c9_349 = arith.constant 9 : index
    %c0_350 = arith.constant 0 : index
    %c0_351 = arith.constant 0 : index
    %787 = vector.load %arg3[%c9_349, %c0_350, %c0_351] : memref<13x64x64xbf16, #tpu.memory_space<vmem>>, vector<1x64x64xbf16>
    %788 = vector.shape_cast %787 : vector<1x64x64xbf16> to vector<64x64xbf16>
    %789 = arith.truncf %786 : vector<16x64xf32> to vector<16x64xbf16>
    %cst_352 = arith.constant dense<0.000000e+00> : vector<16x64xf32>
    %790 = tpu.matmul %789, %788, %cst_352 {dimension_numbers = #tpu.dot_dimension_numbers<[1], [0], [0], [1], [0, 0, 1, 1], [], []>} : vector<16x64xbf16>, vector<64x64xbf16>, vector<16x64xf32> -> vector<16x64xf32>
    %791 = arith.truncf %790 : vector<16x64xf32> to vector<16x64xbf16>
    %792 = vector.shape_cast %791 : vector<16x64xbf16> to vector<1x16x64xbf16>
    %c12_353 = arith.constant 12 : index
    %c0_354 = arith.constant 0 : index
    %c0_355 = arith.constant 0 : index
    %793 = vector.load %arg3[%c12_353, %c0_354, %c0_355] : memref<13x64x64xbf16, #tpu.memory_space<vmem>>, vector<1x64x64xbf16>
    %794 = vector.shape_cast %793 : vector<1x64x64xbf16> to vector<64x64xbf16>
    %795 = vector.extract_strided_slice %792 {offsets = [0, 0, 0], sizes = [1, 16, 16], strides = [1, 1, 1]} : vector<1x16x64xbf16> to vector<1x16x16xbf16>
    %796 = vector.extract_strided_slice %349 {offsets = [0, 0, 0], sizes = [1, 16, 16], strides = [1, 1, 1]} : vector<1x16x64xbf16> to vector<1x16x16xbf16>
    %cst_356 = arith.constant dense<0.000000e+00> : vector<1x16x16xf32>
    %797 = tpu.matmul %795, %796, %cst_356 {dimension_numbers = #tpu.dot_dimension_numbers<[2], [2], [1], [1], [0, 0, 0, 1, 1, 1], [0], [0]>} : vector<1x16x16xbf16>, vector<1x16x16xbf16>, vector<1x16x16xf32> -> vector<1x16x16xf32>
    %cst_357 = arith.constant 2.500000e-01 : f32
    %798 = vector.broadcast %cst_357 : f32 to vector<1x16x16xf32>
    %799 = arith.mulf %797, %798 : vector<1x16x16xf32>
    %cst_358 = arith.constant dense<0xFF800000> : vector<1x16xf32>
    %800 = vector.multi_reduction <maximumf>, %799, %cst_358 [2] : vector<1x16x16xf32> to vector<1x16xf32>
    %801 = vector.shape_cast %800 : vector<1x16xf32> to vector<1x16x1xf32>
    %802 = vector.broadcast %801 : vector<1x16x1xf32> to vector<1x16x16xf32>
    %803 = arith.subf %799, %802 : vector<1x16x16xf32>
    %804 = math.exp %803 : vector<1x16x16xf32>
    %cst_359 = arith.constant dense<0.000000e+00> : vector<1x16xf32>
    %805 = vector.multi_reduction <add>, %804, %cst_359 [2] : vector<1x16x16xf32> to vector<1x16xf32>
    %806 = vector.shape_cast %805 : vector<1x16xf32> to vector<1x16x1xf32>
    %807 = tpu.reciprocal %806 {approx = true} : vector<1x16x1xf32> -> vector<1x16x1xf32>
    %808 = vector.broadcast %807 : vector<1x16x1xf32> to vector<1x16x16xf32>
    %809 = arith.mulf %804, %808 : vector<1x16x16xf32>
    %810 = arith.truncf %809 : vector<1x16x16xf32> to vector<1x16x16xbf16>
    %811 = vector.extract_strided_slice %355 {offsets = [0, 0, 0], sizes = [1, 16, 16], strides = [1, 1, 1]} : vector<1x16x64xbf16> to vector<1x16x16xbf16>
    %cst_360 = arith.constant dense<0.000000e+00> : vector<1x16x16xf32>
    %812 = tpu.matmul %810, %811, %cst_360 {dimension_numbers = #tpu.dot_dimension_numbers<[2], [1], [1], [2], [0, 0, 0, 1, 1, 2], [0], [0]>} : vector<1x16x16xbf16>, vector<1x16x16xbf16>, vector<1x16x16xf32> -> vector<1x16x16xf32>
    %813 = vector.shape_cast %812 : vector<1x16x16xf32> to vector<16x16xf32>
    %c0_361 = arith.constant 0 : index
    %c0_362 = arith.constant 0 : index
    %814 = vector.load %arg9[%c0_361, %c0_362] : memref<16x64xf32, #tpu.memory_space<vmem>>, vector<16x16xf32>
    tpu.vector_store %arg9[%c0_361, %c0_362], %813 {strides = array<i32>} : memref<16x64xf32, #tpu.memory_space<vmem>>, vector<16x16xf32>,
    %815 = vector.extract_strided_slice %792 {offsets = [0, 0, 16], sizes = [1, 16, 16], strides = [1, 1, 1]} : vector<1x16x64xbf16> to vector<1x16x16xbf16>
    %816 = vector.extract_strided_slice %349 {offsets = [0, 0, 16], sizes = [1, 16, 16], strides = [1, 1, 1]} : vector<1x16x64xbf16> to vector<1x16x16xbf16>
    %cst_363 = arith.constant dense<0.000000e+00> : vector<1x16x16xf32>
    %817 = tpu.matmul %815, %816, %cst_363 {dimension_numbers = #tpu.dot_dimension_numbers<[2], [2], [1], [1], [0, 0, 0, 1, 1, 1], [0], [0]>} : vector<1x16x16xbf16>, vector<1x16x16xbf16>, vector<1x16x16xf32> -> vector<1x16x16xf32>
    %cst_364 = arith.constant 2.500000e-01 : f32
    %818 = vector.broadcast %cst_364 : f32 to vector<1x16x16xf32>
    %819 = arith.mulf %817, %818 : vector<1x16x16xf32>
    %cst_365 = arith.constant dense<0xFF800000> : vector<1x16xf32>
    %820 = vector.multi_reduction <maximumf>, %819, %cst_365 [2] : vector<1x16x16xf32> to vector<1x16xf32>
    %821 = vector.shape_cast %820 : vector<1x16xf32> to vector<1x16x1xf32>
    %822 = vector.broadcast %821 : vector<1x16x1xf32> to vector<1x16x16xf32>
    %823 = arith.subf %819, %822 : vector<1x16x16xf32>
    %824 = math.exp %823 : vector<1x16x16xf32>
    %cst_366 = arith.constant dense<0.000000e+00> : vector<1x16xf32>
    %825 = vector.multi_reduction <add>, %824, %cst_366 [2] : vector<1x16x16xf32> to vector<1x16xf32>
    %826 = vector.shape_cast %825 : vector<1x16xf32> to vector<1x16x1xf32>
    %827 = tpu.reciprocal %826 {approx = true} : vector<1x16x1xf32> -> vector<1x16x1xf32>
    %828 = vector.broadcast %827 : vector<1x16x1xf32> to vector<1x16x16xf32>
    %829 = arith.mulf %824, %828 : vector<1x16x16xf32>
    %830 = arith.truncf %829 : vector<1x16x16xf32> to vector<1x16x16xbf16>
    %831 = vector.extract_strided_slice %355 {offsets = [0, 0, 16], sizes = [1, 16, 16], strides = [1, 1, 1]} : vector<1x16x64xbf16> to vector<1x16x16xbf16>
    %cst_367 = arith.constant dense<0.000000e+00> : vector<1x16x16xf32>
    %832 = tpu.matmul %830, %831, %cst_367 {dimension_numbers = #tpu.dot_dimension_numbers<[2], [1], [1], [2], [0, 0, 0, 1, 1, 2], [0], [0]>} : vector<1x16x16xbf16>, vector<1x16x16xbf16>, vector<1x16x16xf32> -> vector<1x16x16xf32>
    %833 = vector.shape_cast %832 : vector<1x16x16xf32> to vector<16x16xf32>
    %c0_368 = arith.constant 0 : index
    %c16_369 = arith.constant 16 : index
    %834 = vector.load %arg9[%c0_368, %c16_369] : memref<16x64xf32, #tpu.memory_space<vmem>>, vector<16x16xf32>
    tpu.vector_store %arg9[%c0_368, %c16_369], %833 {strides = array<i32>} : memref<16x64xf32, #tpu.memory_space<vmem>>, vector<16x16xf32>,
    %835 = vector.extract_strided_slice %792 {offsets = [0, 0, 32], sizes = [1, 16, 16], strides = [1, 1, 1]} : vector<1x16x64xbf16> to vector<1x16x16xbf16>
    %836 = vector.extract_strided_slice %349 {offsets = [0, 0, 32], sizes = [1, 16, 16], strides = [1, 1, 1]} : vector<1x16x64xbf16> to vector<1x16x16xbf16>
    %cst_370 = arith.constant dense<0.000000e+00> : vector<1x16x16xf32>
    %837 = tpu.matmul %835, %836, %cst_370 {dimension_numbers = #tpu.dot_dimension_numbers<[2], [2], [1], [1], [0, 0, 0, 1, 1, 1], [0], [0]>} : vector<1x16x16xbf16>, vector<1x16x16xbf16>, vector<1x16x16xf32> -> vector<1x16x16xf32>
    %cst_371 = arith.constant 2.500000e-01 : f32
    %838 = vector.broadcast %cst_371 : f32 to vector<1x16x16xf32>
    %839 = arith.mulf %837, %838 : vector<1x16x16xf32>
    %cst_372 = arith.constant dense<0xFF800000> : vector<1x16xf32>
    %840 = vector.multi_reduction <maximumf>, %839, %cst_372 [2] : vector<1x16x16xf32> to vector<1x16xf32>
    %841 = vector.shape_cast %840 : vector<1x16xf32> to vector<1x16x1xf32>
    %842 = vector.broadcast %841 : vector<1x16x1xf32> to vector<1x16x16xf32>
    %843 = arith.subf %839, %842 : vector<1x16x16xf32>
    %844 = math.exp %843 : vector<1x16x16xf32>
    %cst_373 = arith.constant dense<0.000000e+00> : vector<1x16xf32>
    %845 = vector.multi_reduction <add>, %844, %cst_373 [2] : vector<1x16x16xf32> to vector<1x16xf32>
    %846 = vector.shape_cast %845 : vector<1x16xf32> to vector<1x16x1xf32>
    %847 = tpu.reciprocal %846 {approx = true} : vector<1x16x1xf32> -> vector<1x16x1xf32>
    %848 = vector.broadcast %847 : vector<1x16x1xf32> to vector<1x16x16xf32>
    %849 = arith.mulf %844, %848 : vector<1x16x16xf32>
    %850 = arith.truncf %849 : vector<1x16x16xf32> to vector<1x16x16xbf16>
    %851 = vector.extract_strided_slice %355 {offsets = [0, 0, 32], sizes = [1, 16, 16], strides = [1, 1, 1]} : vector<1x16x64xbf16> to vector<1x16x16xbf16>
    %cst_374 = arith.constant dense<0.000000e+00> : vector<1x16x16xf32>
    %852 = tpu.matmul %850, %851, %cst_374 {dimension_numbers = #tpu.dot_dimension_numbers<[2], [1], [1], [2], [0, 0, 0, 1, 1, 2], [0], [0]>} : vector<1x16x16xbf16>, vector<1x16x16xbf16>, vector<1x16x16xf32> -> vector<1x16x16xf32>
    %853 = vector.shape_cast %852 : vector<1x16x16xf32> to vector<16x16xf32>
    %c0_375 = arith.constant 0 : index
    %c32_376 = arith.constant 32 : index
    %854 = vector.load %arg9[%c0_375, %c32_376] : memref<16x64xf32, #tpu.memory_space<vmem>>, vector<16x16xf32>
    tpu.vector_store %arg9[%c0_375, %c32_376], %853 {strides = array<i32>} : memref<16x64xf32, #tpu.memory_space<vmem>>, vector<16x16xf32>,
    %855 = vector.extract_strided_slice %792 {offsets = [0, 0, 48], sizes = [1, 16, 16], strides = [1, 1, 1]} : vector<1x16x64xbf16> to vector<1x16x16xbf16>
    %856 = vector.extract_strided_slice %349 {offsets = [0, 0, 48], sizes = [1, 16, 16], strides = [1, 1, 1]} : vector<1x16x64xbf16> to vector<1x16x16xbf16>
    %cst_377 = arith.constant dense<0.000000e+00> : vector<1x16x16xf32>
    %857 = tpu.matmul %855, %856, %cst_377 {dimension_numbers = #tpu.dot_dimension_numbers<[2], [2], [1], [1], [0, 0, 0, 1, 1, 1], [0], [0]>} : vector<1x16x16xbf16>, vector<1x16x16xbf16>, vector<1x16x16xf32> -> vector<1x16x16xf32>
    %cst_378 = arith.constant 2.500000e-01 : f32
    %858 = vector.broadcast %cst_378 : f32 to vector<1x16x16xf32>
    %859 = arith.mulf %857, %858 : vector<1x16x16xf32>
    %cst_379 = arith.constant dense<0xFF800000> : vector<1x16xf32>
    %860 = vector.multi_reduction <maximumf>, %859, %cst_379 [2] : vector<1x16x16xf32> to vector<1x16xf32>
    %861 = vector.shape_cast %860 : vector<1x16xf32> to vector<1x16x1xf32>
    %862 = vector.broadcast %861 : vector<1x16x1xf32> to vector<1x16x16xf32>
    %863 = arith.subf %859, %862 : vector<1x16x16xf32>
    %864 = math.exp %863 : vector<1x16x16xf32>
    %cst_380 = arith.constant dense<0.000000e+00> : vector<1x16xf32>
    %865 = vector.multi_reduction <add>, %864, %cst_380 [2] : vector<1x16x16xf32> to vector<1x16xf32>
    %866 = vector.shape_cast %865 : vector<1x16xf32> to vector<1x16x1xf32>
    %867 = tpu.reciprocal %866 {approx = true} : vector<1x16x1xf32> -> vector<1x16x1xf32>
    %868 = vector.broadcast %867 : vector<1x16x1xf32> to vector<1x16x16xf32>
    %869 = arith.mulf %864, %868 : vector<1x16x16xf32>
    %870 = arith.truncf %869 : vector<1x16x16xf32> to vector<1x16x16xbf16>
    %871 = vector.extract_strided_slice %355 {offsets = [0, 0, 48], sizes = [1, 16, 16], strides = [1, 1, 1]} : vector<1x16x64xbf16> to vector<1x16x16xbf16>
    %cst_381 = arith.constant dense<0.000000e+00> : vector<1x16x16xf32>
    %872 = tpu.matmul %870, %871, %cst_381 {dimension_numbers = #tpu.dot_dimension_numbers<[2], [1], [1], [2], [0, 0, 0, 1, 1, 2], [0], [0]>} : vector<1x16x16xbf16>, vector<1x16x16xbf16>, vector<1x16x16xf32> -> vector<1x16x16xf32>
    %873 = vector.shape_cast %872 : vector<1x16x16xf32> to vector<16x16xf32>
    %c0_382 = arith.constant 0 : index
    %c48_383 = arith.constant 48 : index
    %874 = vector.load %arg9[%c0_382, %c48_383] : memref<16x64xf32, #tpu.memory_space<vmem>>, vector<16x16xf32>
    tpu.vector_store %arg9[%c0_382, %c48_383], %873 {strides = array<i32>} : memref<16x64xf32, #tpu.memory_space<vmem>>, vector<16x16xf32>,
    %c0_384 = arith.constant 0 : index
    %c0_385 = arith.constant 0 : index
    %875 = vector.load %arg9[%c0_384, %c0_385] : memref<16x64xf32, #tpu.memory_space<vmem>>, vector<16x64xf32>
    %876 = arith.truncf %875 : vector<16x64xf32> to vector<16x64xbf16>
    %cst_386 = arith.constant dense<0.000000e+00> : vector<16x64xf32>
    %877 = tpu.matmul %876, %794, %cst_386 {dimension_numbers = #tpu.dot_dimension_numbers<[1], [0], [0], [1], [0, 0, 1, 1], [], []>} : vector<16x64xbf16>, vector<64x64xbf16>, vector<16x64xf32> -> vector<16x64xf32>
    %878 = arith.addf %763, %877 : vector<16x64xf32>
    %c10_387 = arith.constant 10 : index
    %c0_388 = arith.constant 0 : index
    %879 = vector.load %arg6[%c10_387, %c0_388] : memref<14x64xf32, #tpu.memory_space<vmem>>, vector<1x64xf32>
    %c11_389 = arith.constant 11 : index
    %c0_390 = arith.constant 0 : index
    %880 = vector.load %arg6[%c11_389, %c0_390] : memref<14x64xf32, #tpu.memory_space<vmem>>, vector<1x64xf32>
    %cst_391 = arith.constant dense<0.000000e+00> : vector<16xf32>
    %881 = vector.multi_reduction <add>, %878, %cst_391 [1] : vector<16x64xf32> to vector<16xf32>
    %882 = vector.shape_cast %881 : vector<16xf32> to vector<16x1xf32>
    %cst_392 = arith.constant 6.400000e+01 : f32
    %883 = vector.broadcast %cst_392 : f32 to vector<16x1xf32>
    %884 = arith.divf %882, %883 : vector<16x1xf32>
    %885 = vector.broadcast %884 : vector<16x1xf32> to vector<16x64xf32>
    %886 = arith.subf %878, %885 : vector<16x64xf32>
    %887 = arith.mulf %886, %886 : vector<16x64xf32>
    %cst_393 = arith.constant dense<0.000000e+00> : vector<16xf32>
    %888 = vector.multi_reduction <add>, %887, %cst_393 [1] : vector<16x64xf32> to vector<16xf32>
    %889 = vector.shape_cast %888 : vector<16xf32> to vector<16x1xf32>
    %cst_394 = arith.constant 6.400000e+01 : f32
    %890 = vector.broadcast %cst_394 : f32 to vector<16x1xf32>
    %891 = arith.divf %889, %890 : vector<16x1xf32>
    %cst_395 = arith.constant 1.000000e-07 : f32
    %892 = vector.broadcast %cst_395 : f32 to vector<16x1xf32>
    %893 = arith.addf %891, %892 : vector<16x1xf32>
    %894 = math.rsqrt %893 : vector<16x1xf32>
    %895 = vector.broadcast %894 : vector<16x1xf32> to vector<16x64xf32>
    %896 = arith.mulf %886, %895 : vector<16x64xf32>
    %897 = vector.broadcast %879 : vector<1x64xf32> to vector<16x64xf32>
    %898 = arith.mulf %896, %897 : vector<16x64xf32>
    %899 = vector.broadcast %880 : vector<1x64xf32> to vector<16x64xf32>
    %900 = arith.addf %898, %899 : vector<16x64xf32>
    %c1_396 = arith.constant 1 : index
    %c0_397 = arith.constant 0 : index
    %c0_398 = arith.constant 0 : index
    %901 = vector.load %arg4[%c1_396, %c0_397, %c0_398] : memref<3x64x32xbf16, #tpu.memory_space<vmem>>, vector<1x64x32xbf16>
    %902 = vector.shape_cast %901 : vector<1x64x32xbf16> to vector<64x32xbf16>
    %903 = arith.truncf %900 : vector<16x64xf32> to vector<16x64xbf16>
    %cst_399 = arith.constant dense<0.000000e+00> : vector<16x32xf32>
    %904 = tpu.matmul %903, %902, %cst_399 {dimension_numbers = #tpu.dot_dimension_numbers<[1], [0], [0], [1], [0, 0, 1, 1], [], []>} : vector<16x64xbf16>, vector<64x32xbf16>, vector<16x32xf32> -> vector<16x32xf32>
    %c1_400 = arith.constant 1 : index
    %c0_401 = arith.constant 0 : index
    %905 = vector.load %arg7[%c1_400, %c0_401] : memref<3x32xf32, #tpu.memory_space<vmem>>, vector<1x32xf32>
    %906 = vector.broadcast %905 : vector<1x32xf32> to vector<16x32xf32>
    %907 = arith.addf %904, %906 : vector<16x32xf32>
    %cst_402 = arith.constant 0.000000e+00 : f32
    %908 = vector.broadcast %cst_402 : f32 to vector<16x32xf32>
    %909 = arith.maximumf %907, %908 : vector<16x32xf32>
    %c1_403 = arith.constant 1 : index
    %c0_404 = arith.constant 0 : index
    %c0_405 = arith.constant 0 : index
    %910 = vector.load %arg5[%c1_403, %c0_404, %c0_405] : memref<3x32x64xbf16, #tpu.memory_space<vmem>>, vector<1x32x64xbf16>
    %911 = vector.shape_cast %910 : vector<1x32x64xbf16> to vector<32x64xbf16>
    %912 = arith.truncf %909 : vector<16x32xf32> to vector<16x32xbf16>
    %cst_406 = arith.constant dense<0.000000e+00> : vector<16x64xf32>
    %913 = tpu.matmul %912, %911, %cst_406 {dimension_numbers = #tpu.dot_dimension_numbers<[1], [0], [0], [1], [0, 0, 1, 1], [], []>} : vector<16x32xbf16>, vector<32x64xbf16>, vector<16x64xf32> -> vector<16x64xf32>
    %914 = arith.addf %878, %913 : vector<16x64xf32>
    %c12_407 = arith.constant 12 : index
    %c0_408 = arith.constant 0 : index
    %915 = vector.load %arg6[%c12_407, %c0_408] : memref<14x64xf32, #tpu.memory_space<vmem>>, vector<1x64xf32>
    %916 = vector.broadcast %915 : vector<1x64xf32> to vector<16x64xf32>
    %917 = arith.addf %914, %916 : vector<16x64xf32>
    %c2_409 = arith.constant 2 : index
    %c0_410 = arith.constant 0 : index
    %c0_411 = arith.constant 0 : index
    %918 = vector.load %arg4[%c2_409, %c0_410, %c0_411] : memref<3x64x32xbf16, #tpu.memory_space<vmem>>, vector<1x64x32xbf16>
    %919 = vector.shape_cast %918 : vector<1x64x32xbf16> to vector<64x32xbf16>
    %920 = arith.truncf %917 : vector<16x64xf32> to vector<16x64xbf16>
    %cst_412 = arith.constant dense<0.000000e+00> : vector<16x32xf32>
    %921 = tpu.matmul %920, %919, %cst_412 {dimension_numbers = #tpu.dot_dimension_numbers<[1], [0], [0], [1], [0, 0, 1, 1], [], []>} : vector<16x64xbf16>, vector<64x32xbf16>, vector<16x32xf32> -> vector<16x32xf32>
    %c2_413 = arith.constant 2 : index
    %c0_414 = arith.constant 0 : index
    %922 = vector.load %arg7[%c2_413, %c0_414] : memref<3x32xf32, #tpu.memory_space<vmem>>, vector<1x32xf32>
    %923 = vector.broadcast %922 : vector<1x32xf32> to vector<16x32xf32>
    %924 = arith.addf %921, %923 : vector<16x32xf32>
    %cst_415 = arith.constant 0.000000e+00 : f32
    %925 = vector.broadcast %cst_415 : f32 to vector<16x32xf32>
    %926 = arith.maximumf %924, %925 : vector<16x32xf32>
    %c2_416 = arith.constant 2 : index
    %c0_417 = arith.constant 0 : index
    %c0_418 = arith.constant 0 : index
    %927 = vector.load %arg5[%c2_416, %c0_417, %c0_418] : memref<3x32x64xbf16, #tpu.memory_space<vmem>>, vector<1x32x64xbf16>
    %928 = vector.shape_cast %927 : vector<1x32x64xbf16> to vector<32x64xbf16>
    %929 = arith.truncf %926 : vector<16x32xf32> to vector<16x32xbf16>
    %cst_419 = arith.constant dense<0.000000e+00> : vector<16x64xf32>
    %930 = tpu.matmul %929, %928, %cst_419 {dimension_numbers = #tpu.dot_dimension_numbers<[1], [0], [0], [1], [0, 0, 1, 1], [], []>} : vector<16x32xbf16>, vector<32x64xbf16>, vector<16x64xf32> -> vector<16x64xf32>
    %c13 = arith.constant 13 : index
    %c0_420 = arith.constant 0 : index
    %931 = vector.load %arg6[%c13, %c0_420] : memref<14x64xf32, #tpu.memory_space<vmem>>, vector<1x64xf32>
    %932 = vector.broadcast %931 : vector<1x64xf32> to vector<16x64xf32>
    %933 = arith.addf %930, %932 : vector<16x64xf32>
    %934 = arith.addf %933, %917 : vector<16x64xf32>
    %c0_421 = arith.constant 0 : index
    %c0_422 = arith.constant 0 : index
    %935 = vector.load %arg8[%c0_421, %c0_422] : memref<16x64xf32, #tpu.memory_space<vmem>>, vector<16x64xf32>
    tpu.vector_store %arg8[%c0_421, %c0_422], %934 {strides = array<i32>} : memref<16x64xf32, #tpu.memory_space<vmem>>, vector<16x64xf32>,
    return
  }
  func.func @transform_0(%arg0: i32) -> (i32, i32) {
    %c0_i32 = arith.constant 0 : i32
    %c0_i32_0 = arith.constant 0 : i32
    return %arg0, %c0_i32 : i32, i32
  }
  func.func @transform_1(%arg0: i32) -> (i32, i32, i32) {
    %c0_i32 = arith.constant 0 : i32
    %c0_i32_0 = arith.constant 0 : i32
    %c0_i32_1 = arith.constant 0 : i32
    %c0_i32_2 = arith.constant 0 : i32
    return %c0_i32, %c0_i32_0, %c0_i32_1 : i32, i32, i32
  }
  func.func @transform_2(%arg0: i32) -> (i32, i32, i32) {
    %c0_i32 = arith.constant 0 : i32
    %c0_i32_0 = arith.constant 0 : i32
    %c0_i32_1 = arith.constant 0 : i32
    %c0_i32_2 = arith.constant 0 : i32
    return %c0_i32, %c0_i32_0, %c0_i32_1 : i32, i32, i32
  }
  func.func @transform_3(%arg0: i32) -> (i32, i32, i32) {
    %c0_i32 = arith.constant 0 : i32
    %c0_i32_0 = arith.constant 0 : i32
    %c0_i32_1 = arith.constant 0 : i32
    %c0_i32_2 = arith.constant 0 : i32
    return %c0_i32, %c0_i32_0, %c0_i32_1 : i32, i32, i32
  }
  func.func @transform_4(%arg0: i32) -> (i32, i32, i32) {
    %c0_i32 = arith.constant 0 : i32
    %c0_i32_0 = arith.constant 0 : i32
    %c0_i32_1 = arith.constant 0 : i32
    %c0_i32_2 = arith.constant 0 : i32
    return %c0_i32, %c0_i32_0, %c0_i32_1 : i32, i32, i32
  }
  func.func @transform_5(%arg0: i32) -> (i32, i32) {
    %c0_i32 = arith.constant 0 : i32
    %c0_i32_0 = arith.constant 0 : i32
    %c0_i32_1 = arith.constant 0 : i32
    return %c0_i32, %c0_i32_0 : i32, i32
  }
  func.func @transform_6(%arg0: i32) -> (i32, i32) {
    %c0_i32 = arith.constant 0 : i32
    %c0_i32_0 = arith.constant 0 : i32
    %c0_i32_1 = arith.constant 0 : i32
    return %c0_i32, %c0_i32_0 : i32, i32
  }
  func.func @transform_7(%arg0: i32) -> (i32, i32) {
    %c0_i32 = arith.constant 0 : i32
    %c0_i32_0 = arith.constant 0 : i32
    return %arg0, %c0_i32 : i32, i32
  }
}

</mosaic_0001>

<bundles_post_ra>
// kernel: vision_transformer_forward.1
= control target key start
LH: loop header
LB: loop body
LE: loop exit
PB: predicated region body
PF: predicated region fallthrough
CT: control target
= control target key end

     0   :  { %s8232_s24 = smov 0   ;;  %s9649_s0 = inlined_call_operand.vmem [shape: f32[32,64], index: 0, kind: input, shape index: {}]   ;;  %s9650_s1 = inlined_call_operand.vmem [shape: f32[2,16,64], index: 1, kind: input, shape index: {}]   ;;  %s9651_s2 = inlined_call_operand.vmem [shape: bf16[13,64,64], index: 2, kind: input, shape index: {}]   ;;  %s9652_s3 = inlined_call_operand.vmem [shape: bf16[3,64,32], index: 3, kind: input, shape index: {}]   ;;  %s9653_s4 = inlined_call_operand.vmem [shape: bf16[3,32,64], index: 4, kind: input, shape index: {}]   ;;  %s9654_s5 = inlined_call_operand.vmem [shape: f32[14,64], index: 5, kind: input, shape index: {}]   ;;  %s9655_s6 = inlined_call_operand.vmem [shape: f32[3,32], index: 6, kind: input, shape index: {}]   ;;  %s9656_s7 = inlined_call_operand.vmem [shape: f32[32,64], index: 7, kind: output, shape index: {}]  }
   0x1 LB: > { %s6430_s25 = sadd.s32 4294967295, %s8182_s24   ;;  %p6434_p0 = scmp.ge.s32.totalorder %s8182_s24, 1  ;;  %s8182_s24 = sphi %s8232_s24, %s17_s24  }
   0x2   : > { %p238_p1 = scmp.lt.s32.totalorder %s8182_s24, 3 }
   0x4   : > { %p239_p2 = pnand %p6434_p0, %p238_p1 }
   0x5   : > { %v7820_v0 = vld [vmem:[%s9651_s2] sm:$0xff] (!%p239_p2)   ;;  %v8184_v1 = vmov (!%p239_p2), 0.0   ;;  %v7821_v2 = vld [vmem:[%s9651_s2 + $0x8] sm:$0xff] (!%p239_p2)   ;;  %vm8185_vm0 = vmmov (!%p239_p2), 0   ;;  %s6435_s30 = sshll.u32 (!%p239_p2), %s6430_s25, 1  ;;  %v7822_v3 = vld [vmem:[%s9651_s2 + $0x10] sm:$0xff] (!%p239_p2)  }
   0x6   : > { %242 = sbr.rel (%p239_p2) target bundleno = 14382 (0x382e), region = 48  ;;  %7140 = vmatprep.subr.bf16.mxu0 (!%p239_p2), %v8184_v1  ;;  %7152 = vmatprep.subr.bf16.mxu1 (!%p239_p2), %v8184_v1  ;;  %p271_p3 = scmp.lt.s32.totalorder (!%p239_p2), %s6435_s30, 3  ;;  %v7823_v4 = vld [vmem:[%s9651_s2 + $0x18] sm:$0xff] (!%p239_p2)   ;;  %vm328_vm1 = vcmask (!%p239_p2), 523264   ;;  %v6441_v8 = vld [vmem:[%s9654_s5] ss:$0 sm:$0xff] (!%p239_p2) }
   0x7   : > { %7141 = vmatpush3.bf16.msra.mxu0 (!%p239_p2), %v7820_v0  ;;  %7148 = vmatprep.mubr.msk.bf16.mxu0 (!%p239_p2), %vm8185_vm0, %v8184_v1  ;;  %v285_v13 = vld [vmem:[%s9650_s1] sm:$0xff] (!%p239_p2)  ;;  %v286_v17 = vld [vmem:[%s9650_s1 + $0x8] sm:$0xff] (!%p239_p2)  ;;  %v7828_v37 = vld [vmem:[%s9651_s2 + $0x30] sm:$0xff] (!%p239_p2)   ;;  %vm656_vm2 = vcmask (!%p239_p2), 130048   ;;  %s8186_s9 = smov (!%p239_p2), 112   ;;  %s8187_s11 = smov (!%p239_p2), 96  }
   0x8   : > { %7142 = vmatprep.subr.bf16.mxu0 (!%p239_p2), %v8184_v1  ;;  %7160 = vmatprep.mubr.msk.bf16.mxu1 (!%p239_p2), %vm8185_vm0, %v8184_v1  ;;  %v7824_v33 = vld [vmem:[%s9651_s2 + $0x20] sm:$0xff] (!%p239_p2)   ;;  %v7826_v35 = vld [vmem:[%s9651_s2 + $0x28] sm:$0xff] (!%p239_p2)   ;;  %v7829_v38 = vld [vmem:[%s9651_s2 + $0x50] sm:$0xff] (!%p239_p2)   ;;  %s8188_s12 = smov (!%p239_p2), 80   ;;  %s8190_s16 = smov (!%p239_p2), 32   ;;  %vm909_vm3 = vcmask (!%p239_p2), 261248  }
   0x9   : > { %v7825_v34 = vld [vmem:[%s9651_s2 + $0x40] sm:$0xff] (!%p239_p2)   ;;  %7153 = vmatpush3.bf16.msra.mxu1 (!%p239_p2), %v7824_v33  ;;  %v7827_v36 = vld [vmem:[%s9651_s2 + $0x48] sm:$0xff] (!%p239_p2)   ;;  %v7830_v39 = vld [vmem:[%s9651_s2 + $0x38] sm:$0xff] (!%p239_p2)   ;;  %s8191_s23 = smov (!%p239_p2), 48   ;;  %vm1043_vm4 = vcmask (!%p239_p2), 392448   ;;  %vm1177_vm5 = vcmask (!%p239_p2), 523648  }
   0xa   : > { %7154 = vmatprep.subr.bf16.mxu1 (!%p239_p2), %v8184_v1  ;;  %v7831_v40 = vld [vmem:[%s9651_s2 + $0x58] sm:$0xff] (!%p239_p2)   ;;  %v8329_v49 = vld [vmem:[%s9654_s5 + $0x1] ss:$0 sm:$0xff] (!%p239_p2)  ;;  %v8335_v53 = vld [vmem:[%s9654_s5 + $0x2] ss:$0 sm:$0xff] (!%p239_p2)  ;;  %vm1394_vm6 = vcmask (!%p239_p2), 261120  }
   0xb   : > { %7143 = vmatpush3.bf16.msra.mxu0 (!%p239_p2), %v7821_v2  ;;  %v7832_v57 = vld [vmem:[%s9651_s2 + $0x60] sm:$0xff] (!%p239_p2)   ;;  %v7833_v59 = vld [vmem:[%s9651_s2 + $0x68] sm:$0xff] (!%p239_p2)   ;;  %v7834_v60 = vld [vmem:[%s9651_s2 + $0x70] sm:$0xff] (!%p239_p2)  }
   0xc   : > { %7144 = vmatprep.subr.bf16.mxu0 (!%p239_p2), %v8184_v1  ;;  %v7835_v61 = vld [vmem:[%s9651_s2 + $0x78] sm:$0xff] (!%p239_p2)  }
   0xd   : > { %s9658_s30 = smov (!%p271_p3, %s6435_s30), 3  ;;  %7155 = vmatpush3.bf16.msra.mxu1 %v7826_v35 }
   0xe   : > { %s6436_s10 = sshll.u32 %s9658_s30, 3  ;;  %7156 = vmatprep.subr.bf16.mxu1 %v8184_v1 }
   0xf   : > { %s274_s15 = scalar_lea.vmem %s9649_s0, %s6436_s10  ;;  %7145 = vmatpush3.bf16.msra.mxu0 %v7822_v3 }
  0x10   : > { %v283_v5 = vld [vmem:[%s274_s15] sm:$0xff]  ;;  %v284_v6 = vld [vmem:[%s274_s15 + $0x8] sm:$0xff]  ;;  %7146 = vmatprep.subr.bf16.mxu0 %v8184_v1  ;;  %s8189_s15 = smov 16  }
  0x11   : > { %v298_v7 = vpack.c.bf16 %v284_v6, %v283_v5  ;;  %7157 = vmatpush3.bf16.msra.mxu1 %v7828_v37 }
  0x12   : > { %7158 = vmatprep.subr.bf16.mxu1 %v8184_v1 }
  0x13   : > { %7147 = vmatpush3.bf16.msra.mxu0 %v7823_v4 }
  0x14   : > { %7164 = vmatprep.subr.bf16.mxu0 %v8184_v1 }
  0x15   : > { %7159 = vmatpush3.bf16.msra.mxu1 %v7830_v39 }
  0x16   : > { %7149 = vmatmul.mubr.msk.bf16.vlgmr.msra.gmra.mrb[0].mxu0 %vm328_vm1, %v298_v7  ;;  %7176 = vmatprep.subr.bf16.mxu1 %v8184_v1 }
  0x17   : > { %7172 = vmatprep.mubr.msk.bf16.mxu0 %vm8185_vm0, %v8184_v1  ;;  %7165 = vmatpush3.bf16.msra.mxu0 %v7825_v34 }
  0x18   : > { %7166 = vmatprep.subr.bf16.mxu0 %v8184_v1 }
  0x1b   : > { %7167 = vmatpush3.bf16.msra.mxu0 %v7827_v36 }
  0x1c   : > { %7168 = vmatprep.subr.bf16.mxu0 %v8184_v1 }
  0x1f   : > { %7169 = vmatpush3.bf16.msra.mxu0 %v7829_v38 }
  0x20   : > { %7170 = vmatprep.subr.bf16.mxu0 %v8184_v1 }
  0x23   : > { %7171 = vmatpush3.bf16.msra.mxu0 %v7831_v40 }
  0x24   : > { %7188 = vmatprep.subr.bf16.mxu0 %v8184_v1 }
  0xe9   : > { %v366_v9 = vpop.f32.mrb[0].mxu0 }
  0xea   : > { %v367_v10 = vadd.f32 %v6441_v8, %v366_v9  ;;  %v7150_v11 = vpop.f32.mrb[1].mxu0 }
  0xeb   : > { %v369_v12 = vpop.f32.mrb[2].mxu0 }
  0xec   : > { %v373_v14 = vadd.f32 %v367_v10, %v283_v5  ;;  %v370_v15 = vadd.f32 %v6441_v8, %v369_v12  ;;  %v7151_v16 = vpop.f32.mrb[3].mxu0 }
  0xee   : > { %v374_v18 = vadd.f32 %v370_v15, %v284_v6  ;;  %v8282_v19 = vadd.f32 %v373_v14, %v285_v13 }
  0xf0   : > { %v8284_v20 = vadd.f32 %v374_v18, %v286_v17  ;;  %v379_v21 = vsel %vm328_vm1, %v8282_v19, 0.0 }
  0xf1   : > { %380 = vadd.xlane.f32.xlu0 %v379_v21 }
  0xf2   : > { %v382_v22 = vsel %vm328_vm1, %v8284_v20, 0.0 }
  0xf5   : > { %383 = vadd.xlane.f32.xlu0 %v382_v22 }
 0x17e   : > { %v381_v23 = vpop.xlane.xlu0 %380 }
 0x17f   : > { %v386_v24 = vmul.f32 0.015625, %v381_v23 }
 0x181   : > { %v388_v25 = vsub.f32 %v8282_v19, %v386_v24 }
 0x182   : > { %v384_v26 = vpop.xlane.xlu0 %383 }
 0x183   : > { %v387_v27 = vmul.f32 0.015625, %v384_v26  ;;  %v390_v28 = vmul.f32 %v388_v25, %v388_v25 }
 0x185   : > { %v389_v29 = vsub.f32 %v8284_v20, %v387_v27  ;;  %v392_v30 = vsel %vm328_vm1, %v390_v28, 0.0 }
 0x186   : > { %393 = vadd.xlane.f32.xlu1 %v392_v30 }
 0x187   : > { %v391_v31 = vmul.f32 %v389_v29, %v389_v29 }
 0x189   : > { %v395_v32 = vsel %vm328_vm1, %v391_v31, 0.0 }
 0x18a   : > { %396 = vadd.xlane.f32.xlu1 %v395_v32 }
 0x213   : > { %v394_v41 = vpop.xlane.xlu1 %393 }
 0x214   : > { %v398_v42 = vmul.f32 0.015625, %v394_v41 }
 0x216   : > { %v400_v43 = vadd.f32 1e-07, %v398_v42 }
 0x217   : > { %v397_v44 = vpop.xlane.xlu1 %396 }
 0x218   : > { %7942 = vrsqrt.f32 %v400_v43  ;;  %v399_v45 = vmul.f32 0.015625, %v397_v44 }
 0x21a   : > { %v401_v46 = vadd.f32 1e-07, %v399_v45 }
 0x21c   : > { %7944 = vrsqrt.f32 %v401_v46 }
 0x222   : > { %v7943_v47 = vpop.eup %7942 }
 0x223   : > { %v404_v48 = vmul.f32 %v7943_v47, %v388_v25 }
 0x225   : > { %v410_v52 = vmul.f32 %v8329_v49, %v404_v48 }
 0x226   : > { %v7945_v50 = vpop.eup %7944 }
 0x227   : > { %v405_v51 = vmul.f32 %v7945_v50, %v389_v29  ;;  %v416_v55 = vadd.f32 %v8335_v53, %v410_v52 }
 0x229   : > { %v411_v54 = vmul.f32 %v8329_v49, %v405_v51 }
 0x22b   : > { %v417_v56 = vadd.f32 %v8335_v53, %v411_v54 }
 0x22d   : > { %v427_v58 = vpack.c.bf16 %v417_v56, %v416_v55 }
 0x22f   : > { %7161 = vmatmul.mubr.msk.bf16.vlgmr.msra.gmra.mrb[0].mxu1 %vm328_vm1, %v427_v58  ;;  %7173 = vmatmul.mubr.msk.bf16.vlgmr.msra.gmra.mrb[4].mxu0 %vm328_vm1, %v427_v58 }
 0x230   : > { %7177 = vmatpush3.bf16.msra.mxu1 %v7832_v57  ;;  %7184 = vmatprep.mubr.msk.bf16.mxu1 %vm8185_vm0, %v8184_v1 }
 0x231   : > { %7178 = vmatprep.subr.bf16.mxu1 %v8184_v1  ;;  %7190 = vmatprep.mubr.msk.bf16.mxu0 %vm8185_vm0, %v8184_v1 }
 0x234   : > { %7179 = vmatpush3.bf16.msra.mxu1 %v7833_v59 }
 0x235   : > { %7180 = vmatprep.subr.bf16.mxu1 %v8184_v1 }
 0x238   : > { %7181 = vmatpush3.bf16.msra.mxu1 %v7834_v60 }
 0x239   : > { %7182 = vmatprep.subr.bf16.mxu1 %v8184_v1 }
 0x23c   : > { %7183 = vmatpush3.bf16.msra.mxu1 %v7835_v61 }
 0x23d   : > { %7194 = vmatprep.subr.bf16.mxu1 %v8184_v1 }
 0x23f   : > { %7185 = vmatmul.mubr.msk.bf16.vlgmr.msra.gmra.mrb[4].mxu1 %vm328_vm1, %v427_v58 }
 0x240   : > { %7196 = vmatprep.mubr.msk.bf16.mxu1 %vm8185_vm0, %v8184_v1 }
 0x302   : > { %v489_v62 = vpop.f32.mrb[0].mxu1  ;;  %v563_v63 = vpop.f32.mrb[4].mxu0 }
 0x303   : > { %v7162_v0 = vpop.f32.mrb[1].mxu1  ;;  %v7174_v2 = vpop.f32.mrb[5].mxu0 }
 0x304   : > { %v492_v3 = vpop.f32.mrb[2].mxu1  ;;  %v566_v4 = vpop.f32.mrb[6].mxu0 }
 0x305   : > { %v644_v5 = vpack.c.bf16 %v492_v3, %v489_v62  ;;  %v645_v6 = vpack.c.bf16 %v566_v4, %v563_v63  ;;  %v7163_v7 = vpop.f32.mrb[3].mxu1  ;;  %v7175_v8 = vpop.f32.mrb[7].mxu0 }
 0x307   : > { %776 = vrot.lane.b32.xlu1 %v644_v5, %s8186_s9  ;;  %779 = vrot.lane.b32.xlu0 %v645_v6, %s8186_s9  ;;  %v661_v9 = vsel %vm656_vm2, %v645_v6, 0 }
 0x308   : > { %7189 = vmatpush3.bf16.xpose.msra.mxu0 %v661_v9 }
 0x309   : > { %7200 = vmatprep.subr.bf16.mxu0 %v8184_v1 }
 0x30b   : > { %914 = vrot.lane.b32.xlu1 %v645_v6, %s8187_s11  ;;  %1048 = vrot.lane.b32.xlu0 %v645_v6, %s8188_s12 }
 0x30f   : > { %912 = vrot.lane.b32.xlu1 %v644_v5, %s8187_s11  ;;  %7191 = vmatmul.mubr.msk.bf16.vlgmr.msra.gmra.mrb[8].mxu0 %vm656_vm2, %v644_v5 }
 0x310   : > { %7202 = vmatprep.mubr.msk.bf16.mxu0 %vm8185_vm0, %v8184_v1 }
 0x312   : > { %v637_v10 = vpop.f32.mrb[4].mxu1 }
 0x313   : > { %v7186_v11 = vpop.f32.mrb[5].mxu1  ;;  %1046 = vrot.lane.b32.xlu1 %v644_v5, %s8188_s12 }
 0x314   : > { %v640_v12 = vpop.f32.mrb[6].mxu1 }
 0x315   : > { %v8376_v13 = vpack.c.bf16 %v640_v12, %v637_v10  ;;  %v7187_v14 = vpop.f32.mrb[7].mxu1 }
 0x317   : > { %7195 = vmatpush3.bf16.msra.mxu1 %v8376_v13 }
 0x318   : > { %7206 = vmatprep.subr.bf16.mxu1 %v8184_v1 }
 0x379   : > { %v777_v15 = vpop.permute.xlu1 %776  ;;  %v780_v16 = vpop.permute.xlu0 %779 }
 0x37a   : > { %v785_v17 = vsel %vm656_vm2, %v780_v16, 0 }
 0x37b   : > { %7201 = vmatpush3.bf16.xpose.msra.mxu0 %v785_v17 }
 0x37c   : > { %7212 = vmatprep.subr.bf16.mxu0 %v8184_v1 }
 0x37d   : > { %v915_v18 = vpop.permute.xlu1 %914  ;;  %v1049_v22 = vpop.permute.xlu0 %1048 }
 0x37e   : > { %v920_v21 = vsel %vm656_vm2, %v915_v18, 0  ;;  %v1054_v24 = vsel %vm656_vm2, %v1049_v22, 0 }
 0x381   : > { %v913_v23 = vpop.permute.xlu1 %912 }
 0x382   : > { %7203 = vmatmul.mubr.msk.bf16.vlgmr.msra.gmra.mrb[12].mxu0 %vm656_vm2, %v777_v15 }
 0x383   : > { %7213 = vmatpush3.bf16.xpose.msra.mxu0 %v920_v21  ;;  %7214 = vmatprep.mubr.msk.bf16.mxu0 %vm8185_vm0, %v8184_v1 }
 0x384   : > { %7224 = vmatprep.subr.bf16.mxu0 %v8184_v1 }
 0x385   : > { %v1047_v25 = vpop.permute.xlu1 %1046 }
 0x38a   : > { %7215 = vmatmul.mubr.msk.bf16.vlgmr.msra.gmra.mrb[16].mxu0 %vm656_vm2, %v913_v23 }
 0x38b   : > { %7225 = vmatpush3.bf16.xpose.msra.mxu0 %v1054_v24  ;;  %7226 = vmatprep.mubr.msk.bf16.mxu0 %vm8185_vm0, %v8184_v1 }
 0x38c   : > { %7236 = vmatprep.subr.bf16.mxu0 %v8184_v1 }
 0x392   : > { %7227 = vmatmul.mubr.msk.bf16.vlgmr.msra.gmra.mrb[20].mxu0 %vm656_vm2, %v1047_v25 }
 0x393   : > { %7244 = vmatprep.mubr.msk.bf16.mxu0 %vm8185_vm0, %v8184_v1 }
 0x3e2   : > { %v697_v26 = vpop.f32.mrb[8].mxu0 }
 0x3e3   : > { %v704_v27 = vmul.f32 0.25, %v697_v26  ;;  %v7192_v28 = vpop.f32.mrb[9].mxu0 }
 0x3e4   : > { %v700_v29 = vpop.f32.mrb[10].mxu0 }
 0x3e5   : > { %v705_v30 = vmul.f32 0.25, %v700_v29  ;;  %v7193_v31 = vpop.f32.mrb[11].mxu0  ;;  %v706_v32 = vsel %vm656_vm2, %v704_v27, -inf }
 0x3e6   : > { %707 = vmax.xlane.f32.xlu0 %v706_v32 }
 0x3e7   : > { %v709_v33 = vsel %vm656_vm2, %v705_v30, -inf }
 0x3e8   : > { %710 = vmax.xlane.f32.xlu1 %v709_v33 }
 0x455   : > { %v821_v34 = vpop.f32.mrb[12].mxu0 }
 0x456   : > { %v828_v35 = vmul.f32 0.25, %v821_v34  ;;  %v7204_v36 = vpop.f32.mrb[13].mxu0 }
 0x457   : > { %v824_v37 = vpop.f32.mrb[14].mxu0 }
 0x458   : > { %v829_v38 = vmul.f32 0.25, %v824_v37  ;;  %v7205_v39 = vpop.f32.mrb[15].mxu0  ;;  %v830_v40 = vsel %vm656_vm2, %v828_v35, -inf }
 0x459   : > { %831 = vmax.xlane.f32.xlu0 %v830_v40 }
 0x45a   : > { %v833_v41 = vsel %vm656_vm2, %v829_v38, -inf }
 0x45d   : > { %834 = vmax.xlane.f32.xlu0 %v833_v41  ;;  %v956_v42 = vpop.f32.mrb[16].mxu0 }
 0x45e   : > { %v963_v43 = vmul.f32 0.25, %v956_v42  ;;  %v7216_v44 = vpop.f32.mrb[17].mxu0 }
 0x45f   : > { %v959_v45 = vpop.f32.mrb[18].mxu0 }
 0x460   : > { %v964_v46 = vmul.f32 0.25, %v959_v45  ;;  %v7217_v47 = vpop.f32.mrb[19].mxu0  ;;  %v965_v48 = vsel %vm656_vm2, %v963_v43, -inf }
 0x461   : > { %966 = vmax.xlane.f32.xlu0 %v965_v48 }
 0x462   : > { %v968_v50 = vsel %vm656_vm2, %v964_v46, -inf }
 0x463   : > { %969 = vmax.xlane.f32.xlu1 %v968_v50 }
 0x465   : > { %v1090_v51 = vpop.f32.mrb[20].mxu0 }
 0x466   : > { %v1097_v52 = vmul.f32 0.25, %v1090_v51  ;;  %v7228_v54 = vpop.f32.mrb[21].mxu0 }
 0x467   : > { %v1093_v55 = vpop.f32.mrb[22].mxu0 }
 0x468   : > { %v8401_v56 = vmul.f32 0.25, %v1093_v55  ;;  %v7229_v57 = vpop.f32.mrb[23].mxu0  ;;  %v1099_v58 = vsel %vm656_vm2, %v1097_v52, -inf }
 0x469   : > { %1100 = vmax.xlane.f32.xlu0 %v1099_v58 }
 0x46a   : > { %v1102_v59 = vsel %vm656_vm2, %v8401_v56, -inf }
 0x46b   : > { %1103 = vmax.xlane.f32.xlu1 %v1102_v59 }
 0x473   : > { %v708_v60 = vpop.xlane.xlu0 %707 }
 0x474   : > { %v712_v61 = vsub.f32 %v704_v27, %v708_v60 }
 0x475   : > { %v711_v62 = vpop.xlane.xlu1 %710 }
 0x476   : > { %v714_v63 = vmul.f32 1.442695, %v712_v61  ;;  %v713_v0 = vsub.f32 %v705_v30, %v711_v62 }
 0x478   : > { %7946 = vpow2.f32 %v714_v63  ;;  %v716_v2 = vmul.f32 1.442695, %v713_v0 }
 0x47a   : > { %7948 = vpow2.f32 %v716_v2 }
 0x482   : > { %v7947_v3 = vpop.eup %7946 }
 0x483   : > { %v718_v4 = vsel %vm656_vm2, %v7947_v3, 0.0 }
 0x484   : > { %v7949_v5 = vpop.eup %7948  ;;  %719 = vadd.xlane.f32.xlu0 %v718_v4 }
 0x485   : > { %v721_v6 = vsel %vm656_vm2, %v7949_v5, 0.0 }
 0x486   : > { %722 = vadd.xlane.f32.xlu1 %v721_v6 }
 0x4e6   : > { %v832_v7 = vpop.xlane.xlu0 %831 }
 0x4e7   : > { %v836_v8 = vsub.f32 %v828_v35, %v832_v7 }
 0x4e9   : > { %v838_v9 = vmul.f32 1.442695, %v836_v8 }
 0x4ea   : > { %v835_v10 = vpop.xlane.xlu0 %834 }
 0x4eb   : > { %7950 = vpow2.f32 %v838_v9  ;;  %v837_v11 = vsub.f32 %v829_v38, %v835_v10 }
 0x4ed   : > { %v840_v12 = vmul.f32 1.442695, %v837_v11 }
 0x4ee   : > { %v967_v14 = vpop.xlane.xlu0 %966 }
 0x4ef   : > { %7952 = vpow2.f32 %v840_v12  ;;  %v971_v15 = vsub.f32 %v963_v43, %v967_v14  ;;  %v7836_v14 = vld [vmem:[%s9651_s2 + $0x80] sm:$0xff]  }
 0x4f0   : > { %v970_v16 = vpop.xlane.xlu1 %969  ;;  %7237 = vmatpush3.bf16.msra.mxu0 %v7836_v14 }
 0x4f1   : > { %v973_v17 = vmul.f32 1.442695, %v971_v15  ;;  %v972_v18 = vsub.f32 %v964_v46, %v970_v16  ;;  %7238 = vmatprep.subr.bf16.mxu0 %v8184_v1 }
 0x4f3   : > { %7954 = vpow2.f32 %v973_v17  ;;  %v975_v21 = vmul.f32 1.442695, %v972_v18 }
 0x4f5   : > { %v7951_v22 = vpop.eup %7950  ;;  %7956 = vpow2.f32 %v975_v21 }
 0x4f6   : > { %v1101_v23 = vpop.xlane.xlu0 %1100  ;;  %v842_v24 = vsel %vm656_vm2, %v7951_v22, 0.0 }
 0x4f7   : > { %v1105_v25 = vsub.f32 %v1097_v52, %v1101_v23  ;;  %843 = vadd.xlane.f32.xlu0 %v842_v24 }
 0x4f8   : > { %v1104_v35 = vpop.xlane.xlu1 %1103 }
 0x4f9   : > { %v7953_v26 = vpop.eup %7952  ;;  %v1107_v27 = vmul.f32 1.442695, %v1105_v25  ;;  %v1106_v42 = vsub.f32 %v8401_v56, %v1104_v35  ;;  %v7837_v25 = vld [vmem:[%s9651_s2 + $0x88] sm:$0xff]  }
 0x4fa   : > { %v845_v28 = vsel %vm656_vm2, %v7953_v26, 0.0  ;;  %7239 = vmatpush3.bf16.msra.mxu0 %v7837_v25 }
 0x4fb   : > { %7958 = vpow2.f32 %v1107_v27  ;;  %846 = vadd.xlane.f32.xlu1 %v845_v28  ;;  %v1109_v44 = vmul.f32 1.442695, %v1106_v42  ;;  %7240 = vmatprep.subr.bf16.mxu0 %v8184_v1  ;;  %v7839_v27 = vld [vmem:[%s9651_s2 + $0x98] sm:$0xff]  }
 0x4fd   : > { %v7955_v29 = vpop.eup %7954 }
 0x4fe   : > { %v977_v30 = vsel %vm656_vm2, %v7955_v29, 0.0 }
 0x4ff   : > { %v7957_v31 = vpop.eup %7956  ;;  %978 = vadd.xlane.f32.xlu0 %v977_v30 }
 0x500   : > { %v980_v32 = vsel %vm656_vm2, %v7957_v31, 0.0 }
 0x501   : > { %981 = vadd.xlane.f32.xlu1 %v980_v32 }
 0x505   : > { %v7959_v33 = vpop.eup %7958 }
 0x506   : > { %v1111_v34 = vsel %vm656_vm2, %v7959_v33, 0.0 }
 0x507   : > { %1112 = vadd.xlane.f32.xlu0 %v1111_v34 }
 0x511   : > { %v720_v36 = vpop.xlane.xlu0 %719 }
 0x512   : > { %7960 = vrcp.f32 %v720_v36  ;;  %988 = vrot.lane.b32.xlu1 %v8376_v13, %s8187_s11 }
 0x513   : > { %v723_v37 = vpop.xlane.xlu1 %722 }
 0x514   : > { %7962 = vrcp.f32 %v723_v37 }
 0x515   : > { %7964 = vpow2.f32 %v1109_v44 }
 0x51c   : > { %v7961_v38 = vpop.eup %7960 }
 0x51d   : > { %854 = vrot.lane.b32.xlu0 %v8376_v13, %s8186_s9  ;;  %v726_v40 = vmul.f32 %v7961_v38, %v7947_v3 }
 0x51e   : > { %v7963_v39 = vpop.eup %7962 }
 0x51f   : > { %v727_v41 = vmul.f32 %v7963_v39, %v7949_v5  ;;  %v7965_v45 = vpop.eup %7964 }
 0x520   : > { %v1114_v46 = vsel %vm656_vm2, %v7965_v45, 0.0 }
 0x521   : > { %v728_v43 = vpack.c.bf16 %v727_v41, %v726_v40 }
 0x523   : > { %7197 = vmatmul.mubr.msk.bf16.vlgmr.msra.gmra.mrb[8].mxu1 %vm656_vm2, %v728_v43 }
 0x524   : > { %7208 = vmatprep.mubr.msk.bf16.mxu1 %vm8185_vm0, %v8184_v1 }
 0x536   : > { %1115 = vadd.xlane.f32.xlu1 %v1114_v46 }
 0x547   : > { %1122 = vrot.lane.b32.xlu1 %v8376_v13, %s8188_s12 }
 0x584   : > { %v844_v47 = vpop.xlane.xlu0 %843 }
 0x588   : > { %v847_v48 = vpop.xlane.xlu1 %846 }
 0x589   : > { %7966 = vrcp.f32 %v847_v48 }
 0x58a   : > { %7968 = vrcp.f32 %v844_v47 }
 0x58c   : > { %v979_v51 = vpop.xlane.xlu0 %978 }
 0x58e   : > { %v982_v50 = vpop.xlane.xlu1 %981 }
 0x58f   : > { %7970 = vrcp.f32 %v982_v50 }
 0x590   : > { %7972 = vrcp.f32 %v979_v51 }
 0x592   : > { %v989_v13 = vpop.permute.xlu1 %988 }
 0x593   : > { %v7967_v52 = vpop.eup %7966 }
 0x594   : > { %v1113_v54 = vpop.xlane.xlu0 %1112  ;;  %v7969_v55 = vpop.eup %7968  ;;  %v851_v56 = vmul.f32 %v7967_v52, %v7953_v26  ;;  %v7838_v26 = vld [vmem:[%s9651_s2 + $0x90] sm:$0xff]  }
 0x595   : > { %v850_v57 = vmul.f32 %v7969_v55, %v7951_v22  ;;  %7974 = vrcp.f32 %v1113_v54  ;;  %7241 = vmatpush3.bf16.msra.mxu0 %v7838_v26 }
 0x596   : > { %7242 = vmatprep.subr.bf16.mxu0 %v8184_v1 }
 0x597   : > { %v852_v59 = vpack.c.bf16 %v851_v56, %v850_v57 }
 0x598   : > { %v855_v58 = vpop.permute.xlu0 %854 }
 0x599   : > { %7207 = vmatpush3.bf16.msra.mxu1 %v855_v58  ;;  %v7971_v60 = vpop.eup %7970  ;;  %7243 = vmatpush3.bf16.msra.mxu0 %v7839_v27 }
 0x59a   : > { %7218 = vmatprep.subr.bf16.mxu1 %v8184_v1  ;;  %v7973_v61 = vpop.eup %7972  ;;  %v986_v62 = vmul.f32 %v7971_v60, %v7957_v31  ;;  %7260 = vmatprep.subr.bf16.mxu0 %v8184_v1  ;;  %v7841_v60 = vld [vmem:[%s9652_s3 + $0x8] sm:$0xff]  }
 0x59b   : > { %v985_v63 = vmul.f32 %v7973_v61, %v7955_v29  ;;  %v7843_v61 = vld [vmem:[%s9652_s3 + $0x18] sm:$0xff]  }
 0x59c   : > { %7209 = vmatmul.mubr.msk.bf16.vlgmr.msra.gmra.mrb[12].mxu1 %vm656_vm2, %v852_v59  ;;  %v7840_v59 = vld [vmem:[%s9652_s3] sm:$0xff]  }
 0x59d   : > { %7219 = vmatpush3.bf16.msra.mxu1 %v989_v13  ;;  %7220 = vmatprep.mubr.msk.bf16.mxu1 %vm8185_vm0, %v8184_v1  ;;  %v987_v0 = vpack.c.bf16 %v986_v62, %v985_v63  ;;  %v7842_v13 = vld [vmem:[%s9652_s3 + $0x10] sm:$0xff]  }
 0x59e   : > { %7230 = vmatprep.subr.bf16.mxu1 %v8184_v1 }
 0x59f   : > { %v7975_v4 = vpop.eup %7974 }
 0x5a0   : > { %v1119_v6 = vmul.f32 %v7975_v4, %v7959_v33 }
 0x5a4   : > { %7221 = vmatmul.mubr.msk.bf16.vlgmr.msra.gmra.mrb[16].mxu1 %vm656_vm2, %v987_v0 }
 0x5a5   : > { %7232 = vmatprep.mubr.msk.bf16.mxu1 %vm8185_vm0, %v8184_v1 }
 0x5c3   : > { %v1116_v2 = vpop.xlane.xlu1 %1115 }
 0x5c4   : > { %7976 = vrcp.f32 %v1116_v2 }
 0x5c7   : > { %v1123_v3 = vpop.permute.xlu1 %1122 }
 0x5c8   : > { %7231 = vmatpush3.bf16.msra.mxu1 %v1123_v3 }
 0x5c9   : > { %7248 = vmatprep.subr.bf16.mxu1 %v8184_v1 }
 0x5ce   : > { %v7977_v5 = vpop.eup %7976 }
 0x5cf   : > { %v1120_v7 = vmul.f32 %v7977_v5, %v7965_v45 }
 0x5d1   : > { %v1121_v8 = vpack.c.bf16 %v1120_v7, %v1119_v6  ;;  %v8502_v7 = vld [vmem:[%s9654_s5 + $0x3] ss:$0 sm:$0xff] }
 0x5d3   : > { %7233 = vmatmul.mubr.msk.bf16.vlgmr.msra.gmra.mrb[20].mxu1 %vm656_vm2, %v1121_v8 }
 0x5d4   : > { %7256 = vmatprep.mubr.msk.bf16.mxu1 %vm8185_vm0, %v8184_v1  ;;  %7249 = vmatpush3.bf16.msra.mxu1 %v7840_v59  ;;  %v7853_v59 = vld [vmem:[%s9651_s2 + $0x58] sm:$0xff]  }
 0x5d5   : > { %7250 = vmatprep.subr.bf16.mxu1 %v8184_v1 }
 0x5d8   : > { %7251 = vmatpush3.bf16.msra.mxu1 %v7841_v60 }
 0x5d9   : > { %7252 = vmatprep.subr.bf16.mxu1 %v8184_v1 }
 0x5dc   : > { %7253 = vmatpush3.bf16.msra.mxu1 %v7842_v13 }
 0x5dd   : > { %7254 = vmatprep.subr.bf16.mxu1 %v8184_v1 }
 0x5e0   : > { %7255 = vmatpush3.bf16.msra.mxu1 %v7843_v61 }
 0x5e1   : > { %7268 = vmatprep.subr.bf16.mxu1 %v8184_v1 }
 0x5f6   : > { %v766_v9 = vpop.f32.mrb[8].mxu1 }
 0x5f7   : > { %773 = vst.msk [vmem:[#allocation2] sm:$0xff] %vm656_vm2, %v766_v9  ;;  %v7198_v10 = vpop.f32.mrb[9].mxu1 }
 0x5f8   : > { %v769_v11 = vpop.f32.mrb[10].mxu1 }
 0x5f9   : > { %774 = vst.msk [vmem:[#allocation2 + $0x8] sm:$0xff] %vm656_vm2, %v769_v11  ;;  %v7199_v12 = vpop.f32.mrb[11].mxu1  ;;  %v8508_v11 = vld [vmem:[%s9654_s5 + $0x4] ss:$0 sm:$0xff] }
 0x66f   : > { %v894_v15 = vpop.f32.mrb[12].mxu1 }
 0x670   : > { %903 = vrot.lane.b32.xlu1 %v894_v15, %s8189_s15  ;;  %v7210_v16 = vpop.f32.mrb[13].mxu1 }
 0x671   : > { %v897_v17 = vpop.f32.mrb[14].mxu1 }
 0x672   : > { %905 = vrot.lane.b32.xlu0 %v897_v17, %s8189_s15  ;;  %v7211_v18 = vpop.f32.mrb[15].mxu1  ;;  %v7844_v17 = vld [vmem:[%s9653_s4] sm:$0xff]  }
 0x673   : > { %v7845_v18 = vld [vmem:[%s9653_s4 + $0x8] sm:$0xff]  }
 0x677   : > { %v1028_v21 = vpop.f32.mrb[16].mxu1 }
 0x678   : > { %1037 = vrot.lane.b32.xlu1 %v1028_v21, %s8190_s16  ;;  %v7222_v22 = vpop.f32.mrb[17].mxu1  ;;  %v8527_v21 = vld [vmem:[%s9655_s6] ss:$0 sm:$0xff] }
 0x679   : > { %v1031_v23 = vpop.f32.mrb[18].mxu1 }
 0x67a   : > { %1039 = vrot.lane.b32.xlu0 %v1031_v23, %s8190_s16  ;;  %v7223_v24 = vpop.f32.mrb[19].mxu1 }
 0x6a6   : > { %v1162_v28 = vpop.f32.mrb[20].mxu1 }
 0x6a7   : > { %1171 = vrot.lane.b32.xlu1 %v1162_v28, %s8191_s23  ;;  %v7234_v29 = vpop.f32.mrb[21].mxu1 }
 0x6a8   : > { %v1165_v30 = vpop.f32.mrb[22].mxu1 }
 0x6a9   : > { %1173 = vrot.lane.b32.xlu0 %v1165_v30, %s8191_s23  ;;  %v7235_v31 = vpop.f32.mrb[23].mxu1 }
 0x6e2   : > { %v904_v32 = vpop.permute.xlu1 %903 }
 0x6e3   : > { %910 = vst.msk [vmem:[#allocation2] sm:$0xff] %vm909_vm3, %v904_v32  ;;  %v8537_v32 = vld [vmem:[%s9654_s5 + $0x5] ss:$0 sm:$0xff] }
 0x6e4   : > { %v906_v33 = vpop.permute.xlu0 %905 }
 0x6e5   : > { %911 = vst.msk [vmem:[#allocation2 + $0x8] sm:$0xff] %vm909_vm3, %v906_v33 }
 0x6ea   : > { %v1038_v34 = vpop.permute.xlu1 %1037 }
 0x6eb   : > { %1044 = vst.msk [vmem:[#allocation2] sm:$0xff] %vm1043_vm4, %v1038_v34 }
 0x6ec   : > { %v1040_v35 = vpop.permute.xlu0 %1039 }
 0x6ed   : > { %1045 = vst.msk [vmem:[#allocation2 + $0x8] sm:$0xff] %vm1043_vm4, %v1040_v35 }
 0x719   : > { %v1172_v36 = vpop.permute.xlu1 %1171 }
 0x71a   : > { %1178 = vst.msk [vmem:[#allocation2] sm:$0xff] %vm1177_vm5, %v1172_v36 }
 0x71b   : > { %v1174_v37 = vpop.permute.xlu0 %1173 }
 0x71c   : > { %1179 = vst.msk [vmem:[#allocation2 + $0x8] sm:$0xff] %vm1177_vm5, %v1174_v37 }
 0x721   : > { %v1180_v38 = vld [vmem:[#allocation2] sm:$0xff] }
 0x723   : > { %v1181_v39 = vld [vmem:[#allocation2 + $0x8] sm:$0xff] }
 0x724   : > { %v1182_v40 = vpack.c.bf16 %v1181_v39, %v1180_v38 }
 0x726   : > { %7245 = vmatmul.mubr.msk.bf16.vlgmr.msra.gmra.mrb[24].mxu0 %vm328_vm1, %v1182_v40 }
 0x727   : > { %7264 = vmatprep.mubr.msk.bf16.mxu0 %vm8185_vm0, %v8184_v1  ;;  %7261 = vmatpush3.bf16.msra.mxu0 %v7844_v17 }
 0x728   : > { %7262 = vmatprep.subr.bf16.mxu0 %v8184_v1 }
 0x72b   : > { %7263 = vmatpush3.bf16.msra.mxu0 %v7845_v18 }
 0x72c   : > { %7280 = vmatprep.subr.bf16.mxu0 %v8184_v1 }
 0x7f9   : > { %v1244_v41 = vpop.f32.mrb[24].mxu0 }
 0x7fa   : > { %v8470_v42 = vadd.f32 %v1244_v41, %v8282_v19  ;;  %v7246_v43 = vpop.f32.mrb[25].mxu0 }
 0x7fb   : > { %v1247_v44 = vpop.f32.mrb[26].mxu0 }
 0x7fc   : > { %v8473_v45 = vadd.f32 %v1247_v44, %v8284_v20  ;;  %v7247_v46 = vpop.f32.mrb[27].mxu0  ;;  %v1255_v47 = vsel %vm328_vm1, %v8470_v42, 0.0 }
 0x7fd   : > { %1256 = vadd.xlane.f32.xlu1 %v1255_v47 }
 0x7fe   : > { %v1258_v48 = vsel %vm328_vm1, %v8473_v45, 0.0 }
 0x7ff   : > { %1259 = vadd.xlane.f32.xlu0 %v1258_v48 }
 0x88a   : > { %v1257_v50 = vpop.xlane.xlu1 %1256 }
 0x88b   : > { %v1261_v51 = vmul.f32 0.015625, %v1257_v50 }
 0x88c   : > { %v1260_v52 = vpop.xlane.xlu0 %1259 }
 0x88d   : > { %v1263_v19 = vsub.f32 %v8470_v42, %v1261_v51  ;;  %v1262_v54 = vmul.f32 0.015625, %v1260_v52 }
 0x88f   : > { %v1264_v55 = vsub.f32 %v8473_v45, %v1262_v54  ;;  %v1265_v56 = vmul.f32 %v1263_v19, %v1263_v19  ;;  %v7847_v54 = vld [vmem:[%s9651_s2 + $0x40] sm:$0xff]  }
 0x891   : > { %v1267_v20 = vsel %vm328_vm1, %v1265_v56, 0.0  ;;  %v1266_v57 = vmul.f32 %v1264_v55, %v1264_v55  ;;  %v7849_v56 = vld [vmem:[%s9651_s2 + $0x48] sm:$0xff]  }
 0x892   : > { %1268 = vadd.xlane.f32.xlu0 %v1267_v20  ;;  %v7850_v20 = vld [vmem:[%s9651_s2 + $0x30] sm:$0xff]  }
 0x893   : > { %v1270_v58 = vsel %vm328_vm1, %v1266_v57, 0.0  ;;  %v7851_v57 = vld [vmem:[%s9651_s2 + $0x50] sm:$0xff]  }
 0x896   : > { %1271 = vadd.xlane.f32.xlu0 %v1270_v58  ;;  %v7852_v58 = vld [vmem:[%s9651_s2 + $0x38] sm:$0xff]  }
 0x91f   : > { %v1269_v62 = vpop.xlane.xlu0 %1268 }
 0x920   : > { %v1273_v63 = vmul.f32 0.015625, %v1269_v62 }
 0x922   : > { %v1275_v0 = vadd.f32 1e-07, %v1273_v63 }
 0x923   : > { %v1272_v2 = vpop.xlane.xlu0 %1271 }
 0x924   : > { %7978 = vrsqrt.f32 %v1275_v0  ;;  %v1274_v3 = vmul.f32 0.015625, %v1272_v2 }
 0x926   : > { %v1276_v4 = vadd.f32 1e-07, %v1274_v3 }
 0x928   : > { %7980 = vrsqrt.f32 %v1276_v4 }
 0x92e   : > { %v7979_v5 = vpop.eup %7978 }
 0x92f   : > { %v1279_v6 = vmul.f32 %v7979_v5, %v1263_v19  ;;  %v7846_v19 = vld [vmem:[%s9651_s2 + $0x20] sm:$0xff]  }
 0x931   : > { %v1285_v9 = vmul.f32 %v8502_v7, %v1279_v6 }
 0x932   : > { %v7981_v8 = vpop.eup %7980 }
 0x933   : > { %v1280_v10 = vmul.f32 %v7981_v8, %v1264_v55  ;;  %v1291_v14 = vadd.f32 %v8508_v11, %v1285_v9  ;;  %v7848_v55 = vld [vmem:[%s9651_s2 + $0x28] sm:$0xff]  }
 0x935   : > { %v1286_v12 = vmul.f32 %v8502_v7, %v1280_v10 }
 0x937   : > { %v1292_v15 = vadd.f32 %v8508_v11, %v1286_v12  ;;  %v7854_v12 = vld [vmem:[%s9651_s2 + $0x60] sm:$0xff]  }
 0x939   : > { %v1301_v16 = vpack.c.bf16 %v1292_v15, %v1291_v14  ;;  %v7855_v15 = vld [vmem:[%s9651_s2 + $0x68] sm:$0xff]  }
 0x93b   : > { %7257 = vmatmul.mubr.msk.bf16.vlgmr.msra.gmra.mrb[24].mxu1 %vm328_vm1, %v1301_v16 }
 0x93c   : > { %7276 = vmatprep.mubr.msk.bf16.mxu1 %vm8185_vm0, %v8184_v1  ;;  %7269 = vmatpush3.bf16.msra.mxu1 %v7846_v19 }
 0x93d   : > { %7270 = vmatprep.subr.bf16.mxu1 %v8184_v1 }
 0x940   : > { %7271 = vmatpush3.bf16.msra.mxu1 %v7848_v55 }
 0x941   : > { %7272 = vmatprep.subr.bf16.mxu1 %v8184_v1 }
 0x944   : > { %7273 = vmatpush3.bf16.msra.mxu1 %v7850_v20 }
 0x945   : > { %7274 = vmatprep.subr.bf16.mxu1 %v8184_v1 }
 0x948   : > { %7275 = vmatpush3.bf16.msra.mxu1 %v7852_v58 }
 0x949   : > { %7292 = vmatprep.subr.bf16.mxu1 %v8184_v1 }
 0xa0e   : > { %v1368_v22 = vpop.f32.mrb[24].mxu1 }
 0xa0f   : > { %v1369_v23 = vadd.f32 %v8527_v21, %v1368_v22  ;;  %v7258_v24 = vpop.f32.mrb[25].mxu1 }
 0xa10   : > { %v1371_v25 = vpop.f32.mrb[26].mxu1 }
 0xa11   : > { %v1372_v26 = vadd.f32 %v8527_v21, %v1371_v25  ;;  %v7259_v27 = vpop.f32.mrb[27].mxu1  ;;  %v1375_v28 = vmax.f32 %v1369_v23, 0.0 }
 0xa13   : > { %v1376_v29 = vmax.f32 %v1372_v26, 0.0 }
 0xa15   : > { %v1381_v30 = vpack.c.bf16 %v1376_v29, %v1375_v28 }
 0xa17   : > { %7265 = vmatmul.mubr.msk.bf16.vlgmr.msra.gmra.mrb[28].mxu0 %vm1394_vm6, %v1381_v30 }
 0xa18   : > { %7288 = vmatprep.mubr.msk.bf16.mxu0 %vm8185_vm0, %v8184_v1  ;;  %7281 = vmatpush3.bf16.msra.mxu0 %v7847_v54 }
 0xa19   : > { %7282 = vmatprep.subr.bf16.mxu0 %v8184_v1 }
 0xa1c   : > { %7283 = vmatpush3.bf16.msra.mxu0 %v7849_v56 }
 0xa1d   : > { %7284 = vmatprep.subr.bf16.mxu0 %v8184_v1 }
 0xa20   : > { %7285 = vmatpush3.bf16.msra.mxu0 %v7851_v57 }
 0xa21   : > { %7286 = vmatprep.subr.bf16.mxu0 %v8184_v1 }
 0xa24   : > { %7287 = vmatpush3.bf16.msra.mxu0 %v7853_v59 }
 0xa25   : > { %7304 = vmatprep.subr.bf16.mxu0 %v8184_v1 }
 0xaea   : > { %v1432_v31 = vpop.f32.mrb[28].mxu0 }
 0xaeb   : > { %v1439_v33 = vadd.f32 %v1432_v31, %v8470_v42  ;;  %v7266_v34 = vpop.f32.mrb[29].mxu0 }
 0xaec   : > { %v1435_v35 = vpop.f32.mrb[30].mxu0 }
 0xaed   : > { %v8541_v36 = vadd.f32 %v8537_v32, %v1439_v33  ;;  %v1440_v37 = vadd.f32 %v1435_v35, %v8473_v45  ;;  %v7267_v38 = vpop.f32.mrb[31].mxu0 }
 0xaef   : > { %v8545_v39 = vadd.f32 %v8537_v32, %v1440_v37  ;;  %v1450_v40 = vsel %vm328_vm1, %v8541_v36, 0.0 }
 0xaf0   : > { %1451 = vadd.xlane.f32.xlu1 %v1450_v40 }
 0xaf1   : > { %v1453_v41 = vsel %vm328_vm1, %v8545_v39, 0.0 }
 0xaf2   : > { %1454 = vadd.xlane.f32.xlu0 %v1453_v41 }
 0xb7d   : > { %v1452_v42 = vpop.xlane.xlu1 %1451 }
 0xb7e   : > { %v1456_v43 = vmul.f32 0.015625, %v1452_v42 }
 0xb7f   : > { %v1455_v44 = vpop.xlane.xlu0 %1454 }
 0xb80   : > { %v1458_v46 = vsub.f32 %v8541_v36, %v1456_v43  ;;  %v1457_v47 = vmul.f32 0.015625, %v1455_v44 }
 0xb82   : > { %v1459_v45 = vsub.f32 %v8545_v39, %v1457_v47  ;;  %v1460_v48 = vmul.f32 %v1458_v46, %v1458_v46 }
 0xb84   : > { %v1462_v50 = vsel %vm328_vm1, %v1460_v48, 0.0  ;;  %v1461_v51 = vmul.f32 %v1459_v45, %v1459_v45 }
 0xb85   : > { %1463 = vadd.xlane.f32.xlu1 %v1462_v50 }
 0xb86   : > { %v1465_v52 = vsel %vm328_vm1, %v1461_v51, 0.0 }
 0xb87   : > { %1466 = vadd.xlane.f32.xlu0 %v1465_v52 }
 0xc12   : > { %v1464_v60 = vpop.xlane.xlu1 %1463 }
 0xc13   : > { %v1468_v13 = vmul.f32 0.015625, %v1464_v60 }
 0xc14   : > { %v1467_v61 = vpop.xlane.xlu0 %1466 }
 0xc15   : > { %v1470_v62 = vadd.f32 1e-07, %v1468_v13  ;;  %v1469_v63 = vmul.f32 0.015625, %v1467_v61 }
 0xc17   : > { %7982 = vrsqrt.f32 %v1470_v62  ;;  %v1471_v0 = vadd.f32 1e-07, %v1469_v63 }
 0xc19   : > { %7984 = vrsqrt.f32 %v1471_v0 }
 0xc21   : > { %v7983_v2 = vpop.eup %7982 }
 0xc22   : > { %v1474_v3 = vmul.f32 %v7983_v2, %v1458_v46 }
 0xc23   : > { %v7985_v4 = vpop.eup %7984 }
 0xc24   : > { %v1480_v5 = vmul.f32 %v8329_v49, %v1474_v3  ;;  %v1475_v6 = vmul.f32 %v7985_v4, %v1459_v45 }
 0xc26   : > { %v1481_v8 = vmul.f32 %v8329_v49, %v1475_v6  ;;  %v1486_v9 = vadd.f32 %v8335_v53, %v1480_v5  ;;  %v7856_v49 = vld [vmem:[%s9651_s2 + $0x70] sm:$0xff]  }
 0xc28   : > { %v1487_v10 = vadd.f32 %v8335_v53, %v1481_v8  ;;  %v7857_v53 = vld [vmem:[%s9651_s2 + $0x78] sm:$0xff]  }
 0xc2a   : > { %v1496_v14 = vpack.c.bf16 %v1487_v10, %v1486_v9 }
 0xc2c   : > { %7277 = vmatmul.mubr.msk.bf16.vlgmr.msra.gmra.mrb[28].mxu1 %vm328_vm1, %v1496_v14  ;;  %7289 = vmatmul.mubr.msk.bf16.vlgmr.msra.gmra.mrb[32].mxu0 %vm328_vm1, %v1496_v14 }
 0xc2d   : > { %7293 = vmatpush3.bf16.msra.mxu1 %v7854_v12  ;;  %7300 = vmatprep.mubr.msk.bf16.mxu1 %vm8185_vm0, %v8184_v1 }
 0xc2e   : > { %7294 = vmatprep.subr.bf16.mxu1 %v8184_v1  ;;  %7306 = vmatprep.mubr.msk.bf16.mxu0 %vm8185_vm0, %v8184_v1 }
 0xc31   : > { %7295 = vmatpush3.bf16.msra.mxu1 %v7855_v15 }
 0xc32   : > { %7296 = vmatprep.subr.bf16.mxu1 %v8184_v1 }
 0xc35   : > { %7297 = vmatpush3.bf16.msra.mxu1 %v7856_v49 }
 0xc36   : > { %7298 = vmatprep.subr.bf16.mxu1 %v8184_v1 }
 0xc39   : > { %7299 = vmatpush3.bf16.msra.mxu1 %v7857_v53 }
 0xc3a   : > { %7316 = vmatprep.subr.bf16.mxu1 %v8184_v1 }
 0xc3c   : > { %7301 = vmatmul.mubr.msk.bf16.vlgmr.msra.gmra.mrb[32].mxu1 %vm328_vm1, %v1496_v14 }
 0xc3d   : > { %7318 = vmatprep.mubr.msk.bf16.mxu1 %vm8185_vm0, %v8184_v1 }
 0xcff   : > { %v1558_v16 = vpop.f32.mrb[28].mxu1  ;;  %v1631_v17 = vpop.f32.mrb[32].mxu0 }
 0xd00   : > { %v7278_v18 = vpop.f32.mrb[29].mxu1  ;;  %v7290_v22 = vpop.f32.mrb[33].mxu0 }
 0xd01   : > { %v1561_v23 = vpop.f32.mrb[30].mxu1  ;;  %v1634_v24 = vpop.f32.mrb[34].mxu0 }
 0xd02   : > { %v1711_v25 = vpack.c.bf16 %v1561_v23, %v1558_v16  ;;  %v1712_v26 = vpack.c.bf16 %v1634_v24, %v1631_v17  ;;  %v7279_v27 = vpop.f32.mrb[31].mxu1  ;;  %v7291_v28 = vpop.f32.mrb[35].mxu0 }
 0xd04   : > { %1841 = vrot.lane.b32.xlu0 %v1711_v25, %s8186_s9  ;;  %1844 = vrot.lane.b32.xlu1 %v1712_v26, %s8186_s9  ;;  %v1726_v29 = vsel %vm656_vm2, %v1712_v26, 0 }
 0xd05   : > { %7305 = vmatpush3.bf16.xpose.msra.mxu0 %v1726_v29 }
 0xd06   : > { %7310 = vmatprep.subr.bf16.mxu0 %v8184_v1 }
 0xd08   : > { %2109 = vrot.lane.b32.xlu0 %v1711_v25, %s8188_s12  ;;  %1978 = vrot.lane.b32.xlu1 %v1712_v26, %s8187_s11 }
 0xd0c   : > { %1976 = vrot.lane.b32.xlu1 %v1711_v25, %s8187_s11  ;;  %7307 = vmatmul.mubr.msk.bf16.vlgmr.msra.gmra.mrb[36].mxu0 %vm656_vm2, %v1711_v25 }
 0xd0d   : > { %7312 = vmatprep.mubr.msk.bf16.mxu0 %vm8185_vm0, %v8184_v1 }
 0xd0f   : > { %v1704_v30 = vpop.f32.mrb[32].mxu1 }
 0xd10   : > { %v7302_v31 = vpop.f32.mrb[33].mxu1  ;;  %2111 = vrot.lane.b32.xlu1 %v1712_v26, %s8188_s12 }
 0xd11   : > { %v1707_v33 = vpop.f32.mrb[34].mxu1 }
 0xd12   : > { %v8627_v34 = vpack.c.bf16 %v1707_v33, %v1704_v30  ;;  %v7303_v35 = vpop.f32.mrb[35].mxu1 }
 0xd14   : > { %7311 = vmatpush3.bf16.msra.mxu0 %v8627_v34 }
 0xd15   : > { %7322 = vmatprep.subr.bf16.mxu0 %v8184_v1 }
 0xd76   : > { %v1845_v37 = vpop.permute.xlu1 %1844  ;;  %v1842_v41 = vpop.permute.xlu0 %1841 }
 0xd77   : > { %v1850_v38 = vsel %vm656_vm2, %v1845_v37, 0 }
 0xd78   : > { %7317 = vmatpush3.bf16.xpose.msra.mxu1 %v1850_v38 }
 0xd79   : > { %7328 = vmatprep.subr.bf16.mxu1 %v8184_v1 }
 0xd7a   : > { %v1979_v40 = vpop.permute.xlu1 %1978  ;;  %v2110_v47 = vpop.permute.xlu0 %2109 }
 0xd7b   : > { %v1984_v43 = vsel %vm656_vm2, %v1979_v40, 0 }
 0xd7e   : > { %v1977_v42 = vpop.permute.xlu1 %1976 }
 0xd7f   : > { %7319 = vmatmul.mubr.msk.bf16.vlgmr.msra.gmra.mrb[36].mxu1 %vm656_vm2, %v1842_v41 }
 0xd80   : > { %7329 = vmatpush3.bf16.xpose.msra.mxu1 %v1984_v43  ;;  %7330 = vmatprep.mubr.msk.bf16.mxu1 %vm8185_vm0, %v8184_v1 }
 0xd81   : > { %7340 = vmatprep.subr.bf16.mxu1 %v8184_v1 }
 0xd82   : > { %v2112_v44 = vpop.permute.xlu1 %2111 }
 0xd83   : > { %v2117_v46 = vsel %vm656_vm2, %v2112_v44, 0 }
 0xd87   : > { %7331 = vmatmul.mubr.msk.bf16.vlgmr.msra.gmra.mrb[40].mxu1 %vm656_vm2, %v1977_v42 }
 0xd88   : > { %7341 = vmatpush3.bf16.xpose.msra.mxu1 %v2117_v46  ;;  %7342 = vmatprep.mubr.msk.bf16.mxu1 %vm8185_vm0, %v8184_v1 }
 0xd89   : > { %7352 = vmatprep.subr.bf16.mxu1 %v8184_v1 }
 0xd8f   : > { %7343 = vmatmul.mubr.msk.bf16.vlgmr.msra.gmra.mrb[44].mxu1 %vm656_vm2, %v2110_v47 }
 0xd90   : > { %7360 = vmatprep.mubr.msk.bf16.mxu1 %vm8185_vm0, %v8184_v1 }
 0xddf   : > { %v1762_v45 = vpop.f32.mrb[36].mxu0 }
 0xde0   : > { %v1769_v48 = vmul.f32 0.25, %v1762_v45  ;;  %v7308_v50 = vpop.f32.mrb[37].mxu0 }
 0xde1   : > { %v1765_v51 = vpop.f32.mrb[38].mxu0 }
 0xde2   : > { %v1770_v52 = vmul.f32 0.25, %v1765_v51  ;;  %v7309_v19 = vpop.f32.mrb[39].mxu0  ;;  %v1771_v54 = vsel %vm656_vm2, %v1769_v48, -inf }
 0xde3   : > { %1772 = vmax.xlane.f32.xlu1 %v1771_v54 }
 0xde4   : > { %v1774_v55 = vsel %vm656_vm2, %v1770_v52, -inf }
 0xde5   : > { %1775 = vmax.xlane.f32.xlu0 %v1774_v55 }
 0xe52   : > { %v1886_v56 = vpop.f32.mrb[36].mxu1 }
 0xe53   : > { %v1893_v20 = vmul.f32 0.25, %v1886_v56  ;;  %v7320_v57 = vpop.f32.mrb[37].mxu1 }
 0xe54   : > { %v1889_v58 = vpop.f32.mrb[38].mxu1 }
 0xe55   : > { %v1894_v59 = vmul.f32 0.25, %v1889_v58  ;;  %v7321_v60 = vpop.f32.mrb[39].mxu1  ;;  %v1895_v13 = vsel %vm656_vm2, %v1893_v20, -inf }
 0xe56   : > { %1896 = vmax.xlane.f32.xlu0 %v1895_v13 }
 0xe57   : > { %v1898_v61 = vsel %vm656_vm2, %v1894_v59, -inf }
 0xe5a   : > { %v2020_v62 = vpop.f32.mrb[40].mxu1  ;;  %1899 = vmax.xlane.f32.xlu0 %v1898_v61 }
 0xe5b   : > { %v2027_v63 = vmul.f32 0.25, %v2020_v62  ;;  %v7332_v0 = vpop.f32.mrb[41].mxu1 }
 0xe5c   : > { %v2023_v2 = vpop.f32.mrb[42].mxu1 }
 0xe5d   : > { %v2028_v3 = vmul.f32 0.25, %v2023_v2  ;;  %v7333_v4 = vpop.f32.mrb[43].mxu1  ;;  %v2029_v5 = vsel %vm656_vm2, %v2027_v63, -inf }
 0xe5e   : > { %2030 = vmax.xlane.f32.xlu1 %v2029_v5 }
 0xe5f   : > { %v2032_v6 = vsel %vm656_vm2, %v2028_v3, -inf }
 0xe60   : > { %2033 = vmax.xlane.f32.xlu0 %v2032_v6 }
 0xe62   : > { %v2153_v8 = vpop.f32.mrb[44].mxu1 }
 0xe63   : > { %v2160_v9 = vmul.f32 0.25, %v2153_v8  ;;  %v7344_v10 = vpop.f32.mrb[45].mxu1 }
 0xe64   : > { %v2156_v12 = vpop.f32.mrb[46].mxu1 }
 0xe65   : > { %v2161_v14 = vmul.f32 0.25, %v2156_v12  ;;  %v7345_v15 = vpop.f32.mrb[47].mxu1  ;;  %v2162_v49 = vsel %vm656_vm2, %v2160_v9, -inf }
 0xe66   : > { %2163 = vmax.xlane.f32.xlu1 %v2162_v49 }
 0xe67   : > { %v2165_v53 = vsel %vm656_vm2, %v2161_v14, -inf }
 0xe68   : > { %2166 = vmax.xlane.f32.xlu0 %v2165_v53 }
 0xe70   : > { %v1773_v16 = vpop.xlane.xlu1 %1772 }
 0xe71   : > { %v1777_v17 = vsub.f32 %v1769_v48, %v1773_v16 }
 0xe72   : > { %v1776_v18 = vpop.xlane.xlu0 %1775 }
 0xe73   : > { %v1779_v22 = vmul.f32 1.442695, %v1777_v17  ;;  %v1778_v23 = vsub.f32 %v1770_v52, %v1776_v18 }
 0xe75   : > { %7986 = vpow2.f32 %v1779_v22  ;;  %v1781_v24 = vmul.f32 1.442695, %v1778_v23 }
 0xe77   : > { %7988 = vpow2.f32 %v1781_v24 }
 0xe7f   : > { %v7987_v25 = vpop.eup %7986 }
 0xe80   : > { %v1783_v26 = vsel %vm656_vm2, %v7987_v25, 0.0 }
 0xe81   : > { %v7989_v27 = vpop.eup %7988  ;;  %1784 = vadd.xlane.f32.xlu1 %v1783_v26 }
 0xe82   : > { %v1786_v28 = vsel %vm656_vm2, %v7989_v27, 0.0 }
 0xe83   : > { %1787 = vadd.xlane.f32.xlu0 %v1786_v28 }
 0xe92   : > { %1919 = vrot.lane.b32.xlu1 %v8627_v34, %s8186_s9 }
 0xee3   : > { %v1897_v29 = vpop.xlane.xlu0 %1896 }
 0xee4   : > { %v1901_v30 = vsub.f32 %v1893_v20, %v1897_v29 }
 0xee6   : > { %v1903_v31 = vmul.f32 1.442695, %v1901_v30 }
 0xee7   : > { %v1900_v33 = vpop.xlane.xlu0 %1899 }
 0xee8   : > { %7990 = vpow2.f32 %v1903_v31  ;;  %v1902_v35 = vsub.f32 %v1894_v59, %v1900_v33 }
 0xeea   : > { %v1905_v37 = vmul.f32 1.442695, %v1902_v35 }
 0xeeb   : > { %v2031_v38 = vpop.xlane.xlu1 %2030 }
 0xeec   : > { %7992 = vpow2.f32 %v1905_v37  ;;  %v2035_v40 = vsub.f32 %v2027_v63, %v2031_v38 }
 0xeed   : > { %v2034_v41 = vpop.xlane.xlu0 %2033 }
 0xeee   : > { %v2037_v42 = vmul.f32 1.442695, %v2035_v40  ;;  %v2036_v43 = vsub.f32 %v2028_v3, %v2034_v41  ;;  %v7858_v41 = vld [vmem:[%s9651_s2 + $0x80] sm:$0xff]  }
 0xeef   : > { %7353 = vmatpush3.bf16.msra.mxu1 %v7858_v41 }
 0xef0   : > { %7994 = vpow2.f32 %v2037_v42  ;;  %v2039_v44 = vmul.f32 1.442695, %v2036_v43  ;;  %7354 = vmatprep.subr.bf16.mxu1 %v8184_v1 }
 0xef2   : > { %v7991_v46 = vpop.eup %7990  ;;  %7996 = vpow2.f32 %v2039_v44 }
 0xef3   : > { %v2164_v47 = vpop.xlane.xlu1 %2163  ;;  %v1907_v45 = vsel %vm656_vm2, %v7991_v46, 0.0 }
 0xef4   : > { %v2168_v48 = vsub.f32 %v2160_v9, %v2164_v47  ;;  %1908 = vadd.xlane.f32.xlu1 %v1907_v45  ;;  %v7859_v47 = vld [vmem:[%s9651_s2 + $0x88] sm:$0xff]   ;;  %v7860_v45 = vld [vmem:[%s9651_s2 + $0x90] sm:$0xff]  }
 0xef5   : > { %v2167_v50 = vpop.xlane.xlu0 %2166  ;;  %7355 = vmatpush3.bf16.msra.mxu1 %v7859_v47 }
 0xef6   : > { %v7993_v51 = vpop.eup %7992  ;;  %v2170_v52 = vmul.f32 1.442695, %v2168_v48  ;;  %v2169_v19 = vsub.f32 %v2161_v14, %v2167_v50  ;;  %7356 = vmatprep.subr.bf16.mxu1 %v8184_v1 }
 0xef7   : > { %v1910_v54 = vsel %vm656_vm2, %v7993_v51, 0.0 }
 0xef8   : > { %7998 = vpow2.f32 %v2170_v52  ;;  %v2172_v55 = vmul.f32 1.442695, %v2169_v19  ;;  %1911 = vadd.xlane.f32.xlu0 %v1910_v54  ;;  %v7861_v52 = vld [vmem:[%s9651_s2 + $0x98] sm:$0xff]  }
 0xef9   : > { %7357 = vmatpush3.bf16.msra.mxu1 %v7860_v45 }
 0xefa   : > { %v7995_v56 = vpop.eup %7994  ;;  %8000 = vpow2.f32 %v2172_v55  ;;  %7358 = vmatprep.subr.bf16.mxu1 %v8184_v1 }
 0xefb   : > { %v2041_v20 = vsel %vm656_vm2, %v7995_v56, 0.0 }
 0xefc   : > { %v7997_v57 = vpop.eup %7996  ;;  %2042 = vadd.xlane.f32.xlu1 %v2041_v20 }
 0xefd   : > { %v2044_v58 = vsel %vm656_vm2, %v7997_v57, 0.0  ;;  %7359 = vmatpush3.bf16.msra.mxu1 %v7861_v52 }
 0xefe   : > { %2045 = vadd.xlane.f32.xlu0 %v2044_v58  ;;  %7376 = vmatprep.subr.bf16.mxu1 %v8184_v1 }
 0xf02   : > { %v7999_v59 = vpop.eup %7998 }
 0xf03   : > { %v2174_v60 = vsel %vm656_vm2, %v7999_v59, 0.0 }
 0xf04   : > { %v8001_v13 = vpop.eup %8000  ;;  %2175 = vadd.xlane.f32.xlu1 %v2174_v60 }
 0xf05   : > { %v2177_v61 = vsel %vm656_vm2, %v8001_v13, 0.0 }
 0xf06   : > { %2178 = vadd.xlane.f32.xlu0 %v2177_v61 }
 0xf0e   : > { %v1785_v62 = vpop.xlane.xlu1 %1784 }
 0xf0f   : > { %8002 = vrcp.f32 %v1785_v62 }
 0xf10   : > { %v1788_v63 = vpop.xlane.xlu0 %1787 }
 0xf11   : > { %8004 = vrcp.f32 %v1788_v63 }
 0xf12   : > { %v1920_v6 = vpop.permute.xlu1 %1919 }
 0xf15   : > { %2185 = vrot.lane.b32.xlu1 %v8627_v34, %s8188_s12 }
 0xf19   : > { %v8003_v0 = vpop.eup %8002 }
 0xf1a   : > { %v1791_v3 = vmul.f32 %v8003_v0, %v7987_v25 }
 0xf1b   : > { %v8005_v2 = vpop.eup %8004 }
 0xf1c   : > { %v1792_v4 = vmul.f32 %v8005_v2, %v7989_v27  ;;  %2052 = vrot.lane.b32.xlu0 %v8627_v34, %s8187_s11 }
 0xf1e   : > { %v1793_v5 = vpack.c.bf16 %v1792_v4, %v1791_v3 }
 0xf20   : > { %7313 = vmatmul.mubr.msk.bf16.vlgmr.msra.gmra.mrb[40].mxu0 %vm656_vm2, %v1793_v5 }
 0xf21   : > { %7323 = vmatpush3.bf16.msra.mxu0 %v1920_v6  ;;  %7324 = vmatprep.mubr.msk.bf16.mxu0 %vm8185_vm0, %v8184_v1 }
 0xf22   : > { %7334 = vmatprep.subr.bf16.mxu0 %v8184_v1 }
 0xf81   : > { %v1909_v8 = vpop.xlane.xlu1 %1908 }
 0xf82   : > { %8006 = vrcp.f32 %v1909_v8 }
 0xf85   : > { %v1912_v9 = vpop.xlane.xlu0 %1911 }
 0xf86   : > { %8008 = vrcp.f32 %v1912_v9 }
 0xf89   : > { %v2043_v10 = vpop.xlane.xlu1 %2042 }
 0xf8a   : > { %8010 = vrcp.f32 %v2043_v10 }
 0xf8b   : > { %v2046_v12 = vpop.xlane.xlu0 %2045 }
 0xf8c   : > { %8012 = vrcp.f32 %v2046_v12  ;;  %v8007_v14 = vpop.eup %8006 }
 0xf8d   : > { %v1915_v15 = vmul.f32 %v8007_v14, %v7991_v46 }
 0xf90   : > { %v8009_v34 = vpop.eup %8008 }
 0xf91   : > { %v1916_v49 = vmul.f32 %v8009_v34, %v7993_v51  ;;  %v2176_v53 = vpop.xlane.xlu1 %2175 }
 0xf92   : > { %8014 = vrcp.f32 %v2176_v53 }
 0xf93   : > { %v2179_v16 = vpop.xlane.xlu0 %2178  ;;  %v1917_v17 = vpack.c.bf16 %v1916_v49, %v1915_v15 }
 0xf94   : > { %8016 = vrcp.f32 %v2179_v16  ;;  %v8011_v18 = vpop.eup %8010 }
 0xf95   : > { %7325 = vmatmul.mubr.msk.bf16.vlgmr.msra.gmra.mrb[44].mxu0 %vm656_vm2, %v1917_v17  ;;  %v2049_v25 = vmul.f32 %v8011_v18, %v7995_v56  ;;  %v2186_v28 = vpop.permute.xlu1 %2185  ;;  %v7862_v18 = vld [vmem:[%s9652_s3] sm:$0xff]  }
 0xf96   : > { %v8013_v22 = vpop.eup %8012  ;;  %7336 = vmatprep.mubr.msk.bf16.mxu0 %vm8185_vm0, %v8184_v1 }
 0xf97   : > { %v2050_v23 = vmul.f32 %v8013_v22, %v7997_v57  ;;  %v2053_v24 = vpop.permute.xlu0 %2052  ;;  %v7863_v22 = vld [vmem:[%s9652_s3 + $0x8] sm:$0xff]  }
 0xf98   : > { %7335 = vmatpush3.bf16.msra.mxu0 %v2053_v24  ;;  %v7865_v24 = vld [vmem:[%s9652_s3 + $0x18] sm:$0xff]  }
 0xf99   : > { %7346 = vmatprep.subr.bf16.mxu0 %v8184_v1  ;;  %v2051_v26 = vpack.c.bf16 %v2050_v23, %v2049_v25  ;;  %v7864_v23 = vld [vmem:[%s9652_s3 + $0x10] sm:$0xff]  }
 0xf9c   : > { %v8015_v27 = vpop.eup %8014 }
 0xf9d   : > { %7337 = vmatmul.mubr.msk.bf16.vlgmr.msra.gmra.mrb[48].mxu0 %vm656_vm2, %v2051_v26  ;;  %v2182_v31 = vmul.f32 %v8015_v27, %v7999_v59 }
 0xf9e   : > { %v8017_v29 = vpop.eup %8016  ;;  %7347 = vmatpush3.bf16.msra.mxu0 %v2186_v28  ;;  %7348 = vmatprep.mubr.msk.bf16.mxu0 %vm8185_vm0, %v8184_v1 }
 0xf9f   : > { %v2183_v30 = vmul.f32 %v8017_v29, %v8001_v13  ;;  %7364 = vmatprep.subr.bf16.mxu0 %v8184_v1 }
 0xfa1   : > { %v2184_v33 = vpack.c.bf16 %v2183_v30, %v2182_v31 }
 0xfa5   : > { %7349 = vmatmul.mubr.msk.bf16.vlgmr.msra.gmra.mrb[52].mxu0 %vm656_vm2, %v2184_v33 }
 0xfa6   : > { %7372 = vmatprep.mubr.msk.bf16.mxu0 %vm8185_vm0, %v8184_v1  ;;  %7365 = vmatpush3.bf16.msra.mxu0 %v7862_v18  ;;  %v7880_v18 = vld [vmem:[%s9651_s2 + $0xb0] sm:$0xff]  }
 0xfa7   : > { %7366 = vmatprep.subr.bf16.mxu0 %v8184_v1 }
 0xfaa   : > { %7367 = vmatpush3.bf16.msra.mxu0 %v7863_v22  ;;  %v7881_v22 = vld [vmem:[%s9651_s2 + $0xd0] sm:$0xff]  }
 0xfab   : > { %7368 = vmatprep.subr.bf16.mxu0 %v8184_v1 }
 0xfae   : > { %7369 = vmatpush3.bf16.msra.mxu0 %v7864_v23  ;;  %v7882_v23 = vld [vmem:[%s9651_s2 + $0xb8] sm:$0xff]  }
 0xfaf   : > { %7370 = vmatprep.subr.bf16.mxu0 %v8184_v1 }
 0xfb2   : > { %7371 = vmatpush3.bf16.msra.mxu0 %v7865_v24  ;;  %v7883_v24 = vld [vmem:[%s9651_s2 + $0xd8] sm:$0xff]  }
 0xfb3   : > { %7384 = vmatprep.subr.bf16.mxu0 %v8184_v1 }
 0xff3   : > { %v1831_v35 = vpop.f32.mrb[40].mxu0 }
 0xff4   : > { %1838 = vst.msk [vmem:[#allocation2] sm:$0xff] %vm656_vm2, %v1831_v35  ;;  %v7314_v37 = vpop.f32.mrb[41].mxu0 }
 0xff5   : > { %v1834_v38 = vpop.f32.mrb[42].mxu0 }
 0xff6   : > { %1839 = vst.msk [vmem:[#allocation2 + $0x8] sm:$0xff] %vm656_vm2, %v1834_v38  ;;  %v7315_v40 = vpop.f32.mrb[43].mxu0 }
0x1068   : > { %v1959_v42 = vpop.f32.mrb[44].mxu0 }
0x1069   : > { %1968 = vrot.lane.b32.xlu1 %v1959_v42, %s8189_s15  ;;  %v7326_v43 = vpop.f32.mrb[45].mxu0 }
0x106a   : > { %v1962_v44 = vpop.f32.mrb[46].mxu0 }
0x106b   : > { %v7327_v46 = vpop.f32.mrb[47].mxu0 }
0x106c   : > { %v7870_v46 = vld [vmem:[%s9651_s2 + $0x148] sm:$0xff]  }
0x106d   : > { %1970 = vrot.lane.b32.xlu1 %v1962_v44, %s8189_s15  ;;  %v7866_v44 = vld [vmem:[%s9653_s4] sm:$0xff]  }
0x1070   : > { %v2092_v48 = vpop.f32.mrb[48].mxu0 }
0x1071   : > { %2101 = vrot.lane.b32.xlu0 %v2092_v48, %s8190_s16  ;;  %v7338_v50 = vpop.f32.mrb[49].mxu0 }
0x1072   : > { %v2095_v51 = vpop.f32.mrb[50].mxu0 }
0x1073   : > { %2103 = vrot.lane.b32.xlu1 %v2095_v51, %s8190_s16  ;;  %v7339_v19 = vpop.f32.mrb[51].mxu0 }
0x1078   : > { %v2225_v54 = vpop.f32.mrb[52].mxu0 }
0x1079   : > { %2234 = vrot.lane.b32.xlu0 %v2225_v54, %s8191_s23  ;;  %v7350_v55 = vpop.f32.mrb[53].mxu0 }
0x107a   : > { %v2228_v56 = vpop.f32.mrb[54].mxu0  ;;  %v7869_v55 = vld [vmem:[%s9651_s2 + $0x160] sm:$0xff]  }
0x107b   : > { %2236 = vrot.lane.b32.xlu1 %v2228_v56, %s8191_s23  ;;  %v7351_v20 = vpop.f32.mrb[55].mxu0 }
0x107c   : > { %v7871_v20 = vld [vmem:[%s9651_s2 + $0x168] sm:$0xff]  }
0x10db   : > { %v1969_v57 = vpop.permute.xlu1 %1968 }
0x10dc   : > { %1974 = vst.msk [vmem:[#allocation2] sm:$0xff] %vm909_vm3, %v1969_v57  ;;  %v7873_v57 = vld [vmem:[%s9651_s2 + $0x170] sm:$0xff]  }
0x10df   : > { %v1971_v58 = vpop.permute.xlu1 %1970 }
0x10e0   : > { %1975 = vst.msk [vmem:[#allocation2 + $0x8] sm:$0xff] %vm909_vm3, %v1971_v58  ;;  %v7874_v58 = vld [vmem:[%s9651_s2 + $0x158] sm:$0xff]  }
0x10e3   : > { %v2102_v59 = vpop.permute.xlu0 %2101 }
0x10e4   : > { %2107 = vst.msk [vmem:[#allocation2] sm:$0xff] %vm1043_vm4, %v2102_v59  ;;  %v7875_v59 = vld [vmem:[%s9651_s2 + $0x178] sm:$0xff]  }
0x10e5   : > { %v2104_v60 = vpop.permute.xlu1 %2103 }
0x10e6   : > { %2108 = vst.msk [vmem:[#allocation2 + $0x8] sm:$0xff] %vm1043_vm4, %v2104_v60 }
0x10eb   : > { %v2235_v13 = vpop.permute.xlu0 %2234 }
0x10ec   : > { %2240 = vst.msk [vmem:[#allocation2] sm:$0xff] %vm1177_vm5, %v2235_v13 }
0x10ed   : > { %v2237_v61 = vpop.permute.xlu1 %2236 }
0x10ee   : > { %2241 = vst.msk [vmem:[#allocation2 + $0x8] sm:$0xff] %vm1177_vm5, %v2237_v61 }
0x10f3   : > { %v2242_v62 = vld [vmem:[#allocation2] sm:$0xff] }
0x10f5   : > { %v2243_v63 = vld [vmem:[#allocation2 + $0x8] sm:$0xff] }
0x10f6   : > { %v2244_v0 = vpack.c.bf16 %v2243_v63, %v2242_v62 }
0x10f8   : > { %7361 = vmatmul.mubr.msk.bf16.vlgmr.msra.gmra.mrb[48].mxu1 %vm328_vm1, %v2244_v0 }
0x10f9   : > { %7380 = vmatprep.mubr.msk.bf16.mxu1 %vm8185_vm0, %v8184_v1  ;;  %7377 = vmatpush3.bf16.msra.mxu1 %v7866_v44 }
0x10fa   : > { %7378 = vmatprep.subr.bf16.mxu1 %v8184_v1 }
0x11cb   : > { %v2306_v2 = vpop.f32.mrb[48].mxu1 }
0x11cc   : > { %v8717_v3 = vadd.f32 %v2306_v2, %v8541_v36  ;;  %v7362_v4 = vpop.f32.mrb[49].mxu1 }
0x11cd   : > { %v2309_v5 = vpop.f32.mrb[50].mxu1 }
0x11ce   : > { %v8720_v6 = vadd.f32 %v2309_v5, %v8545_v39  ;;  %v7363_v8 = vpop.f32.mrb[51].mxu1  ;;  %v2317_v9 = vsel %vm328_vm1, %v8717_v3, 0.0 }
0x11cf   : > { %2318 = vadd.xlane.f32.xlu0 %v2317_v9 }
0x11d0   : > { %v2320_v10 = vsel %vm328_vm1, %v8720_v6, 0.0 }
0x11d1   : > { %2321 = vadd.xlane.f32.xlu1 %v2320_v10 }
0x125c   : > { %v2319_v12 = vpop.xlane.xlu0 %2318 }
0x125d   : > { %v2323_v14 = vmul.f32 0.015625, %v2319_v12 }
0x125e   : > { %v2322_v34 = vpop.xlane.xlu1 %2321 }
0x125f   : > { %v2325_v36 = vsub.f32 %v8717_v3, %v2323_v14  ;;  %v2324_v15 = vmul.f32 0.015625, %v2322_v34 }
0x1261   : > { %v2326_v49 = vsub.f32 %v8720_v6, %v2324_v15  ;;  %v2327_v53 = vmul.f32 %v2325_v36, %v2325_v36 }
0x1263   : > { %v2329_v39 = vsel %vm328_vm1, %v2327_v53, 0.0  ;;  %v2328_v16 = vmul.f32 %v2326_v49, %v2326_v49  ;;  %v7876_v53 = vld [vmem:[%s9651_s2 + $0xa0] sm:$0xff]  }
0x1264   : > { %2330 = vadd.xlane.f32.xlu0 %v2329_v39  ;;  %v7877_v39 = vld [vmem:[%s9651_s2 + $0xc0] sm:$0xff]  }
0x1265   : > { %v2332_v17 = vsel %vm328_vm1, %v2328_v16, 0.0  ;;  %v7878_v16 = vld [vmem:[%s9651_s2 + $0xa8] sm:$0xff]  }
0x1268   : > { %2333 = vadd.xlane.f32.xlu0 %v2332_v17  ;;  %v7879_v17 = vld [vmem:[%s9651_s2 + $0xc8] sm:$0xff]  }
0x12f1   : > { %v2331_v25 = vpop.xlane.xlu0 %2330 }
0x12f2   : > { %v2335_v26 = vmul.f32 0.015625, %v2331_v25 }
0x12f4   : > { %v2337_v27 = vadd.f32 1e-07, %v2335_v26 }
0x12f5   : > { %v2334_v28 = vpop.xlane.xlu0 %2333 }
0x12f6   : > { %8018 = vrsqrt.f32 %v2337_v27  ;;  %v2336_v29 = vmul.f32 0.015625, %v2334_v28 }
0x12f8   : > { %v2338_v30 = vadd.f32 1e-07, %v2336_v29 }
0x12fa   : > { %8020 = vrsqrt.f32 %v2338_v30 }
0x1300   : > { %v8019_v31 = vpop.eup %8018 }
0x1301   : > { %v2341_v33 = vmul.f32 %v8019_v31, %v2325_v36 }
0x1303   : > { %v2347_v37 = vmul.f32 %v8502_v7, %v2341_v33 }
0x1304   : > { %v8021_v35 = vpop.eup %8020 }
0x1305   : > { %v2342_v38 = vmul.f32 %v8021_v35, %v2326_v49  ;;  %v2353_v41 = vadd.f32 %v8508_v11, %v2347_v37 }
0x1307   : > { %v2348_v40 = vmul.f32 %v8502_v7, %v2342_v38  ;;  %v7867_v7 = vld [vmem:[%s9653_s4 + $0x8] sm:$0xff]  }
0x1308   : > { %7379 = vmatpush3.bf16.msra.mxu1 %v7867_v7 }
0x1309   : > { %v2354_v42 = vadd.f32 %v8508_v11, %v2348_v40  ;;  %7396 = vmatprep.subr.bf16.mxu1 %v8184_v1  ;;  %v7868_v11 = vld [vmem:[%s9651_s2 + $0x140] sm:$0xff]  }
0x130b   : > { %v2363_v43 = vpack.c.bf16 %v2354_v42, %v2353_v41 }
0x130d   : > { %7373 = vmatmul.mubr.msk.bf16.vlgmr.msra.gmra.mrb[56].mxu0 %vm328_vm1, %v2363_v43 }
0x130e   : > { %7392 = vmatprep.mubr.msk.bf16.mxu0 %vm8185_vm0, %v8184_v1  ;;  %7385 = vmatpush3.bf16.msra.mxu0 %v7868_v11  ;;  %v6621_v11 = vld [vmem:[%s9654_s5 + $0x6] ss:$0 sm:$0xff] }
0x130f   : > { %7386 = vmatprep.subr.bf16.mxu0 %v8184_v1 }
0x1312   : > { %7387 = vmatpush3.bf16.msra.mxu0 %v7870_v46 }
0x1313   : > { %7388 = vmatprep.subr.bf16.mxu0 %v8184_v1 }
0x13e0   : > { %v2430_v47 = vpop.f32.mrb[56].mxu0 }
0x13e1   : > { %v2431_v45 = vadd.f32 %v8527_v21, %v2430_v47  ;;  %v7374_v48 = vpop.f32.mrb[57].mxu0 }
0x13e2   : > { %v2433_v50 = vpop.f32.mrb[58].mxu0 }
0x13e3   : > { %v2434_v51 = vadd.f32 %v8527_v21, %v2433_v50  ;;  %v7375_v52 = vpop.f32.mrb[59].mxu0  ;;  %v2437_v19 = vmax.f32 %v2431_v45, 0.0  ;;  %v7872_v21 = vld [vmem:[%s9651_s2 + $0x150] sm:$0xff]   ;;  %v6622_v45 = vld [vmem:[%s9654_s5 + $0x7] ss:$0 sm:$0xff] }
0x13e4   : > { %7389 = vmatpush3.bf16.msra.mxu0 %v7872_v21  ;;  %v7884_v21 = vld [vmem:[%s9651_s2 + $0xe0] sm:$0xff]  }
0x13e5   : > { %v2438_v54 = vmax.f32 %v2434_v51, 0.0  ;;  %7390 = vmatprep.subr.bf16.mxu0 %v8184_v1 }
0x13e7   : > { %v2443_v56 = vpack.c.bf16 %v2438_v54, %v2437_v19  ;;  %v8867_v19 = vld [vmem:[%s9650_s1 + $0x10] sm:$0xff]  ;;  %v8872_v54 = vld [vmem:[%s9650_s1 + $0x18] sm:$0xff] }
0x13e8   : > { %7391 = vmatpush3.bf16.msra.mxu0 %v7874_v58  ;;  %v7885_v58 = vld [vmem:[%s9651_s2 + $0xe8] sm:$0xff]  }
0x13e9   : > { %7381 = vmatmul.mubr.msk.bf16.vlgmr.msra.gmra.mrb[52].mxu1 %vm1394_vm6, %v2443_v56  ;;  %7408 = vmatprep.subr.bf16.mxu0 %v8184_v1 }
0x13ea   : > { %7397 = vmatpush3.bf16.msra.mxu1 %v7869_v55  ;;  %7404 = vmatprep.mubr.msk.bf16.mxu1 %vm8185_vm0, %v8184_v1 }
0x13eb   : > { %7398 = vmatprep.subr.bf16.mxu1 %v8184_v1 }
0x13ee   : > { %7399 = vmatpush3.bf16.msra.mxu1 %v7871_v20 }
0x13ef   : > { %7400 = vmatprep.subr.bf16.mxu1 %v8184_v1 }
0x13f2   : > { %7401 = vmatpush3.bf16.msra.mxu1 %v7873_v57 }
0x13f3   : > { %7402 = vmatprep.subr.bf16.mxu1 %v8184_v1 }
0x13f6   : > { %7403 = vmatpush3.bf16.msra.mxu1 %v7875_v59  ;;  %v7886_v59 = vld [vmem:[%s9651_s2 + $0xf0] sm:$0xff]  }
0x13f7   : > { %7420 = vmatprep.subr.bf16.mxu1 %v8184_v1 }
0x14bc   : > { %v2493_v60 = vpop.f32.mrb[52].mxu1 }
0x14bd   : > { %v2500_v13 = vadd.f32 %v2493_v60, %v8717_v3  ;;  %v7382_v61 = vpop.f32.mrb[53].mxu1  ;;  %v7887_v60 = vld [vmem:[%s9651_s2 + $0xf8] sm:$0xff]  }
0x14be   : > { %v2496_v62 = vpop.f32.mrb[54].mxu1 }
0x14bf   : > { %v8800_v63 = vadd.f32 %v8537_v32, %v2500_v13  ;;  %v2501_v0 = vadd.f32 %v2496_v62, %v8720_v6  ;;  %v7383_v2 = vpop.f32.mrb[55].mxu1 }
0x14c1   : > { %v8804_v4 = vadd.f32 %v8537_v32, %v2501_v0  ;;  %v2665_v5 = vsel %vm328_vm1, %v8800_v63, 0.0 }
0x14c2   : > { %2666 = vadd.xlane.f32.xlu0 %v2665_v5 }
0x14c3   : > { %v2518_v8 = vpack.c.bf16 %v8804_v4, %v8800_v63  ;;  %v2668_v3 = vsel %vm328_vm1, %v8804_v4, 0.0 }
0x14c4   : > { %2669 = vadd.xlane.f32.xlu1 %v2668_v3 }
0x14c5   : > { %7393 = vmatmul.mubr.msk.bf16.vlgmr.msra.gmra.mrb[60].mxu0 %vm328_vm1, %v2518_v8  ;;  %7405 = vmatmul.mubr.msk.bf16.vlgmr.msra.gmra.mrb[56].mxu1 %vm328_vm1, %v2518_v8 }
0x14c6   : > { %7416 = vmatprep.mubr.msk.bf16.mxu0 %vm8185_vm0, %v8184_v1  ;;  %7428 = vmatprep.mubr.msk.bf16.mxu1 %vm8185_vm0, %v8184_v1 }
0x14c7   : > { %7409 = vmatpush3.bf16.msra.mxu0 %v7876_v53  ;;  %7421 = vmatpush3.bf16.msra.mxu1 %v7877_v39 }
0x14c8   : > { %7410 = vmatprep.subr.bf16.mxu0 %v8184_v1  ;;  %7422 = vmatprep.subr.bf16.mxu1 %v8184_v1 }
0x14cb   : > { %7411 = vmatpush3.bf16.msra.mxu0 %v7878_v16  ;;  %7423 = vmatpush3.bf16.msra.mxu1 %v7879_v17 }
0x14cc   : > { %7412 = vmatprep.subr.bf16.mxu0 %v8184_v1  ;;  %7424 = vmatprep.subr.bf16.mxu1 %v8184_v1 }
0x14cf   : > { %7413 = vmatpush3.bf16.msra.mxu0 %v7880_v18  ;;  %7425 = vmatpush3.bf16.msra.mxu1 %v7881_v22 }
0x14d0   : > { %7414 = vmatprep.subr.bf16.mxu0 %v8184_v1  ;;  %7426 = vmatprep.subr.bf16.mxu1 %v8184_v1 }
0x14d3   : > { %7415 = vmatpush3.bf16.msra.mxu0 %v7882_v23  ;;  %7427 = vmatpush3.bf16.msra.mxu1 %v7883_v24 }
0x14d4   : > { %7432 = vmatprep.subr.bf16.mxu0 %v8184_v1  ;;  %7444 = vmatprep.subr.bf16.mxu1 %v8184_v1 }
0x154f   : > { %v2667_v32 = vpop.xlane.xlu0 %2666 }
0x1550   : > { %v2671_v6 = vmul.f32 0.015625, %v2667_v32 }
0x1551   : > { %v2670_v9 = vpop.xlane.xlu1 %2669 }
0x1552   : > { %v2673_v10 = vsub.f32 %v8800_v63, %v2671_v6  ;;  %v2672_v12 = vmul.f32 0.015625, %v2670_v9 }
0x1554   : > { %v2674_v14 = vsub.f32 %v8804_v4, %v2672_v12  ;;  %v2675_v34 = vmul.f32 %v2673_v10, %v2673_v10 }
0x1556   : > { %v2677_v36 = vsel %vm328_vm1, %v2675_v34, 0.0  ;;  %v2676_v15 = vmul.f32 %v2674_v14, %v2674_v14 }
0x1557   : > { %2678 = vadd.xlane.f32.xlu0 %v2677_v36 }
0x1558   : > { %v2680_v49 = vsel %vm328_vm1, %v2676_v15, 0.0 }
0x1559   : > { %2681 = vadd.xlane.f32.xlu1 %v2680_v49 }
0x1598   : > { %v2580_v25 = vpop.f32.mrb[60].mxu0  ;;  %v2655_v26 = vpop.f32.mrb[56].mxu1 }
0x1599   : > { %v7394_v27 = vpop.f32.mrb[61].mxu0  ;;  %v7406_v28 = vpop.f32.mrb[57].mxu1 }
0x159a   : > { %v2583_v29 = vpop.f32.mrb[62].mxu0  ;;  %v2658_v30 = vpop.f32.mrb[58].mxu1 }
0x159b   : > { %v8854_v31 = vpack.c.bf16 %v2583_v29, %v2580_v25  ;;  %v8856_v33 = vpack.c.bf16 %v2658_v30, %v2655_v26  ;;  %v7395_v35 = vpop.f32.mrb[63].mxu0  ;;  %v7407_v37 = vpop.f32.mrb[59].mxu1 }
0x15e4   : > { %v2679_v38 = vpop.xlane.xlu0 %2678 }
0x15e5   : > { %v2683_v40 = vmul.f32 0.015625, %v2679_v38 }
0x15e6   : > { %v2682_v41 = vpop.xlane.xlu1 %2681 }
0x15e7   : > { %v2685_v42 = vadd.f32 1e-07, %v2683_v40  ;;  %v2684_v43 = vmul.f32 0.015625, %v2682_v41 }
0x15e9   : > { %8022 = vrsqrt.f32 %v2685_v42  ;;  %v2686_v44 = vadd.f32 1e-07, %v2684_v43 }
0x15eb   : > { %8024 = vrsqrt.f32 %v2686_v44 }
0x15f3   : > { %v8023_v7 = vpop.eup %8022 }
0x15f4   : > { %v2689_v46 = vmul.f32 %v8023_v7, %v2673_v10 }
0x15f5   : > { %v8025_v47 = vpop.eup %8024 }
0x15f6   : > { %v2695_v48 = vmul.f32 %v6621_v11, %v2689_v46  ;;  %v2690_v50 = vmul.f32 %v8025_v47, %v2674_v14 }
0x15f8   : > { %v2696_v51 = vmul.f32 %v6621_v11, %v2690_v50  ;;  %v2701_v52 = vadd.f32 %v6622_v45, %v2695_v48 }
0x15fa   : > { %v2702_v55 = vadd.f32 %v6622_v45, %v2696_v51  ;;  %v2703_v56 = vadd.f32 %v8867_v19, %v2701_v52 }
0x15fc   : > { %v2704_v20 = vadd.f32 %v8872_v54, %v2702_v55  ;;  %v2866_v13 = vpack.c.bf16 %v2702_v55, %v2701_v52 }
0x15fe   : > { %v2714_v57 = vpack.c.bf16 %v2704_v20, %v2703_v56 }
0x1600   : > { %7417 = vmatmul.mubr.msk.bf16.vlgmr.msra.gmra.mrb[64].mxu0 %vm328_vm1, %v2714_v57  ;;  %7429 = vmatmul.mubr.msk.bf16.vlgmr.msra.gmra.mrb[60].mxu1 %vm328_vm1, %v2714_v57 }
0x1601   : > { %7433 = vmatpush3.bf16.msra.mxu0 %v7884_v21  ;;  %7440 = vmatprep.mubr.msk.bf16.mxu0 %vm8185_vm0, %v8184_v1 }
0x1602   : > { %7434 = vmatprep.subr.bf16.mxu0 %v8184_v1  ;;  %7446 = vmatprep.mubr.msk.bf16.mxu1 %vm8185_vm0, %v8184_v1 }
0x1605   : > { %7435 = vmatpush3.bf16.msra.mxu0 %v7885_v58 }
0x1606   : > { %7436 = vmatprep.subr.bf16.mxu0 %v8184_v1 }
0x1609   : > { %7437 = vmatpush3.bf16.msra.mxu0 %v7886_v59 }
0x160a   : > { %7438 = vmatprep.subr.bf16.mxu0 %v8184_v1 }
0x160d   : > { %7439 = vmatpush3.bf16.msra.mxu0 %v7887_v60 }
0x160e   : > { %7456 = vmatprep.subr.bf16.mxu0 %v8184_v1 }
0x1610   : > { %7441 = vmatmul.mubr.msk.bf16.vlgmr.msra.gmra.mrb[68].mxu0 %vm328_vm1, %v2866_v13 }
0x1611   : > { %7458 = vmatprep.mubr.msk.bf16.mxu0 %vm8185_vm0, %v8184_v1 }
0x16d3   : > { %v2776_v61 = vpop.f32.mrb[64].mxu0  ;;  %v2850_v62 = vpop.f32.mrb[60].mxu1 }
0x16d4   : > { %v7418_v0 = vpop.f32.mrb[65].mxu0  ;;  %v7430_v2 = vpop.f32.mrb[61].mxu1 }
0x16d5   : > { %v2779_v5 = vpop.f32.mrb[66].mxu0  ;;  %v2853_v8 = vpop.f32.mrb[62].mxu1 }
0x16d6   : > { %v2935_v3 = vpack.c.bf16 %v2779_v5, %v2776_v61  ;;  %v2936_v32 = vpack.c.bf16 %v2853_v8, %v2850_v62  ;;  %v7419_v6 = vpop.f32.mrb[67].mxu0  ;;  %v7431_v9 = vpop.f32.mrb[63].mxu1 }
0x16d8   : > { %3069 = vrot.lane.b32.xlu0 %v2936_v32, %s8186_s9  ;;  %3066 = vrot.lane.b32.xlu1 %v2935_v3, %s8186_s9  ;;  %v2951_v10 = vsel %vm656_vm2, %v2936_v32, 0 }
0x16d9   : > { %7445 = vmatpush3.bf16.xpose.msra.mxu1 %v2951_v10 }
0x16da   : > { %7450 = vmatprep.subr.bf16.mxu1 %v8184_v1 }
0x16dc   : > { %3336 = vrot.lane.b32.xlu0 %v2936_v32, %s8188_s12  ;;  %3203 = vrot.lane.b32.xlu1 %v2936_v32, %s8187_s11 }
0x16e0   : > { %3201 = vrot.lane.b32.xlu1 %v2935_v3, %s8187_s11  ;;  %7447 = vmatmul.mubr.msk.bf16.vlgmr.msra.gmra.mrb[64].mxu1 %vm656_vm2, %v2935_v3 }
0x16e1   : > { %7452 = vmatprep.mubr.msk.bf16.mxu1 %vm8185_vm0, %v8184_v1 }
0x16e3   : > { %v2928_v12 = vpop.f32.mrb[68].mxu0 }
0x16e4   : > { %v7442_v14 = vpop.f32.mrb[69].mxu0  ;;  %3334 = vrot.lane.b32.xlu1 %v2935_v3, %s8188_s12 }
0x16e5   : > { %v2931_v34 = vpop.f32.mrb[70].mxu0 }
0x16e6   : > { %v8912_v36 = vpack.c.bf16 %v2931_v34, %v2928_v12  ;;  %v7443_v15 = vpop.f32.mrb[71].mxu0 }
0x16e8   : > { %7451 = vmatpush3.bf16.msra.mxu1 %v8912_v36 }
0x16e9   : > { %7462 = vmatprep.subr.bf16.mxu1 %v8184_v1 }
0x174a   : > { %v3070_v49 = vpop.permute.xlu0 %3069  ;;  %v3067_v53 = vpop.permute.xlu1 %3066 }
0x174b   : > { %v3075_v39 = vsel %vm656_vm2, %v3070_v49, 0 }
0x174c   : > { %7457 = vmatpush3.bf16.xpose.msra.mxu0 %v3075_v39 }
0x174d   : > { %7468 = vmatprep.subr.bf16.mxu0 %v8184_v1 }
0x174e   : > { %v3204_v16 = vpop.permute.xlu1 %3203  ;;  %v3337_v18 = vpop.permute.xlu0 %3336 }
0x174f   : > { %v3209_v17 = vsel %vm656_vm2, %v3204_v16, 0  ;;  %v3342_v23 = vsel %vm656_vm2, %v3337_v18, 0 }
0x1752   : > { %v3202_v22 = vpop.permute.xlu1 %3201 }
0x1753   : > { %7459 = vmatmul.mubr.msk.bf16.vlgmr.msra.gmra.mrb[72].mxu0 %vm656_vm2, %v3067_v53 }
0x1754   : > { %7469 = vmatpush3.bf16.xpose.msra.mxu0 %v3209_v17  ;;  %7470 = vmatprep.mubr.msk.bf16.mxu0 %vm8185_vm0, %v8184_v1 }
0x1755   : > { %7480 = vmatprep.subr.bf16.mxu0 %v8184_v1 }
0x1756   : > { %v3335_v24 = vpop.permute.xlu1 %3334 }
0x175b   : > { %7471 = vmatmul.mubr.msk.bf16.vlgmr.msra.gmra.mrb[76].mxu0 %vm656_vm2, %v3202_v22 }
0x175c   : > { %7481 = vmatpush3.bf16.xpose.msra.mxu0 %v3342_v23  ;;  %7482 = vmatprep.mubr.msk.bf16.mxu0 %vm8185_vm0, %v8184_v1 }
0x175d   : > { %7492 = vmatprep.subr.bf16.mxu0 %v8184_v1 }
0x1763   : > { %7483 = vmatmul.mubr.msk.bf16.vlgmr.msra.gmra.mrb[80].mxu0 %vm656_vm2, %v3335_v24 }
0x1764   : > { %7500 = vmatprep.mubr.msk.bf16.mxu0 %vm8185_vm0, %v8184_v1 }
0x17b3   : > { %v2987_v25 = vpop.f32.mrb[64].mxu1 }
0x17b4   : > { %v2994_v26 = vmul.f32 0.25, %v2987_v25  ;;  %v7448_v27 = vpop.f32.mrb[65].mxu1 }
0x17b5   : > { %v2990_v28 = vpop.f32.mrb[66].mxu1 }
0x17b6   : > { %v2995_v29 = vmul.f32 0.25, %v2990_v28  ;;  %v7449_v30 = vpop.f32.mrb[67].mxu1  ;;  %v2996_v35 = vsel %vm656_vm2, %v2994_v26, -inf }
0x17b7   : > { %2997 = vmax.xlane.f32.xlu0 %v2996_v35 }
0x17b8   : > { %v2999_v37 = vsel %vm656_vm2, %v2995_v29, -inf }
0x17b9   : > { %3000 = vmax.xlane.f32.xlu1 %v2999_v37 }
0x1826   : > { %v3111_v38 = vpop.f32.mrb[72].mxu0 }
0x1827   : > { %v3118_v40 = vmul.f32 0.25, %v3111_v38  ;;  %v7460_v41 = vpop.f32.mrb[73].mxu0 }
0x1828   : > { %v3114_v42 = vpop.f32.mrb[74].mxu0 }
0x1829   : > { %v3119_v43 = vmul.f32 0.25, %v3114_v42  ;;  %v7461_v44 = vpop.f32.mrb[75].mxu0  ;;  %v3120_v7 = vsel %vm656_vm2, %v3118_v40, -inf }
0x182a   : > { %3121 = vmax.xlane.f32.xlu0 %v3120_v7 }
0x182b   : > { %v3123_v11 = vsel %vm656_vm2, %v3119_v43, -inf }
0x182e   : > { %3124 = vmax.xlane.f32.xlu0 %v3123_v11  ;;  %v3245_v46 = vpop.f32.mrb[76].mxu0 }
0x182f   : > { %v3252_v47 = vmul.f32 0.25, %v3245_v46  ;;  %v7472_v45 = vpop.f32.mrb[77].mxu0 }
0x1830   : > { %v3248_v48 = vpop.f32.mrb[78].mxu0 }
0x1831   : > { %v3253_v50 = vmul.f32 0.25, %v3248_v48  ;;  %v7473_v51 = vpop.f32.mrb[79].mxu0  ;;  %v3254_v52 = vsel %vm656_vm2, %v3252_v47, -inf }
0x1832   : > { %3255 = vmax.xlane.f32.xlu0 %v3254_v52 }
0x1833   : > { %v3257_v55 = vsel %vm656_vm2, %v3253_v50, -inf }
0x1834   : > { %3258 = vmax.xlane.f32.xlu1 %v3257_v55 }
0x1836   : > { %v3378_v56 = vpop.f32.mrb[80].mxu0 }
0x1837   : > { %v3385_v20 = vmul.f32 0.25, %v3378_v56  ;;  %v7484_v21 = vpop.f32.mrb[81].mxu0 }
0x1838   : > { %v3381_v57 = vpop.f32.mrb[82].mxu0 }
0x1839   : > { %v8937_v58 = vmul.f32 0.25, %v3381_v57  ;;  %v7485_v59 = vpop.f32.mrb[83].mxu0  ;;  %v3387_v60 = vsel %vm656_vm2, %v3385_v20, -inf }
0x183a   : > { %3388 = vmax.xlane.f32.xlu0 %v3387_v60 }
0x183b   : > { %v3390_v13 = vsel %vm656_vm2, %v8937_v58, -inf }
0x183c   : > { %3391 = vmax.xlane.f32.xlu1 %v3390_v13 }
0x1844   : > { %v2998_v61 = vpop.xlane.xlu0 %2997 }
0x1845   : > { %v3002_v62 = vsub.f32 %v2994_v26, %v2998_v61 }
0x1846   : > { %v3001_v0 = vpop.xlane.xlu1 %3000 }
0x1847   : > { %v3004_v2 = vmul.f32 1.442695, %v3002_v62  ;;  %v3003_v5 = vsub.f32 %v2995_v29, %v3001_v0 }
0x1849   : > { %8026 = vpow2.f32 %v3004_v2  ;;  %v3006_v8 = vmul.f32 1.442695, %v3003_v5 }
0x184b   : > { %8028 = vpow2.f32 %v3006_v8 }
0x1853   : > { %v8027_v3 = vpop.eup %8026 }
0x1854   : > { %v3008_v32 = vsel %vm656_vm2, %v8027_v3, 0.0 }
0x1855   : > { %v8029_v6 = vpop.eup %8028  ;;  %3009 = vadd.xlane.f32.xlu0 %v3008_v32 }
0x1856   : > { %v3011_v9 = vsel %vm656_vm2, %v8029_v6, 0.0 }
0x1857   : > { %3012 = vadd.xlane.f32.xlu1 %v3011_v9 }
0x18b7   : > { %v3122_v10 = vpop.xlane.xlu0 %3121 }
0x18b8   : > { %v3126_v12 = vsub.f32 %v3118_v40, %v3122_v10 }
0x18ba   : > { %v3128_v14 = vmul.f32 1.442695, %v3126_v12 }
0x18bb   : > { %v3125_v34 = vpop.xlane.xlu0 %3124 }
0x18bc   : > { %8030 = vpow2.f32 %v3128_v14  ;;  %v3127_v15 = vsub.f32 %v3119_v43, %v3125_v34 }
0x18be   : > { %v3130_v49 = vmul.f32 1.442695, %v3127_v15 }
0x18bf   : > { %v3256_v53 = vpop.xlane.xlu0 %3255 }
0x18c0   : > { %8032 = vpow2.f32 %v3130_v49  ;;  %v3260_v39 = vsub.f32 %v3252_v47, %v3256_v53 }
0x18c1   : > { %v3259_v16 = vpop.xlane.xlu1 %3258 }
0x18c2   : > { %v3262_v17 = vmul.f32 1.442695, %v3260_v39  ;;  %v3261_v18 = vsub.f32 %v3253_v50, %v3259_v16  ;;  %v7888_v16 = vld [vmem:[%s9651_s2 + $0x100] sm:$0xff]  }
0x18c3   : > { %7493 = vmatpush3.bf16.msra.mxu0 %v7888_v16  ;;  %v6684_v16 = vld [vmem:[%s9654_s5 + $0x9] ss:$0 sm:$0xff] }
0x18c4   : > { %8034 = vpow2.f32 %v3262_v17  ;;  %v3264_v22 = vmul.f32 1.442695, %v3261_v18  ;;  %v7889_v18 = vld [vmem:[%s9651_s2 + $0x108] sm:$0xff]   ;;  %7494 = vmatprep.subr.bf16.mxu0 %v8184_v1 }
0x18c6   : > { %v8031_v23 = vpop.eup %8030  ;;  %8036 = vpow2.f32 %v3264_v22 }
0x18c7   : > { %v3389_v24 = vpop.xlane.xlu0 %3388  ;;  %v3132_v25 = vsel %vm656_vm2, %v8031_v23, 0.0  ;;  %7495 = vmatpush3.bf16.msra.mxu0 %v7889_v18 }
0x18c8   : > { %v3393_v26 = vsub.f32 %v3385_v20, %v3389_v24  ;;  %3133 = vadd.xlane.f32.xlu0 %v3132_v25  ;;  %v7890_v25 = vld [vmem:[%s9651_s2 + $0x110] sm:$0xff]   ;;  %7496 = vmatprep.subr.bf16.mxu0 %v8184_v1 }
0x18c9   : > { %v3392_v42 = vpop.xlane.xlu1 %3391 }
0x18ca   : > { %v8033_v27 = vpop.eup %8032  ;;  %v3395_v28 = vmul.f32 1.442695, %v3393_v26  ;;  %v3394_v45 = vsub.f32 %v8937_v58, %v3392_v42 }
0x18cb   : > { %v3135_v29 = vsel %vm656_vm2, %v8033_v27, 0.0  ;;  %7497 = vmatpush3.bf16.msra.mxu0 %v7890_v25 }
0x18cc   : > { %8038 = vpow2.f32 %v3395_v28  ;;  %3136 = vadd.xlane.f32.xlu1 %v3135_v29  ;;  %v3397_v50 = vmul.f32 1.442695, %v3394_v45  ;;  %7498 = vmatprep.subr.bf16.mxu0 %v8184_v1 }
0x18ce   : > { %v8035_v30 = vpop.eup %8034 }
0x18cf   : > { %v3266_v35 = vsel %vm656_vm2, %v8035_v30, 0.0 }
0x18d0   : > { %v8037_v37 = vpop.eup %8036  ;;  %3267 = vadd.xlane.f32.xlu0 %v3266_v35 }
0x18d1   : > { %v3269_v38 = vsel %vm656_vm2, %v8037_v37, 0.0 }
0x18d2   : > { %3270 = vadd.xlane.f32.xlu1 %v3269_v38 }
0x18d6   : > { %v8039_v40 = vpop.eup %8038 }
0x18d7   : > { %v3399_v41 = vsel %vm656_vm2, %v8039_v40, 0.0 }
0x18d8   : > { %3400 = vadd.xlane.f32.xlu0 %v3399_v41 }
0x18e2   : > { %v3010_v43 = vpop.xlane.xlu0 %3009 }
0x18e3   : > { %8040 = vrcp.f32 %v3010_v43  ;;  %3277 = vrot.lane.b32.xlu1 %v8912_v36, %s8187_s11 }
0x18e4   : > { %v3013_v44 = vpop.xlane.xlu1 %3012 }
0x18e5   : > { %8042 = vrcp.f32 %v3013_v44 }
0x18e6   : > { %8044 = vpow2.f32 %v3397_v50 }
0x18ed   : > { %v8041_v7 = vpop.eup %8040 }
0x18ee   : > { %3144 = vrot.lane.b32.xlu0 %v8912_v36, %s8186_s9  ;;  %v3016_v46 = vmul.f32 %v8041_v7, %v8027_v3 }
0x18ef   : > { %v8043_v11 = vpop.eup %8042 }
0x18f0   : > { %v3017_v47 = vmul.f32 %v8043_v11, %v8029_v6  ;;  %v8045_v51 = vpop.eup %8044 }
0x18f1   : > { %v3402_v52 = vsel %vm656_vm2, %v8045_v51, 0.0 }
0x18f2   : > { %v3018_v48 = vpack.c.bf16 %v3017_v47, %v3016_v46 }
0x18f4   : > { %7453 = vmatmul.mubr.msk.bf16.vlgmr.msra.gmra.mrb[68].mxu1 %vm656_vm2, %v3018_v48  ;;  %v9005_v48 = vsel %vm656_vm2, %v8854_v31, 0 }
0x18f5   : > { %7464 = vmatprep.mubr.msk.bf16.mxu1 %vm8185_vm0, %v8184_v1 }
0x1907   : > { %3403 = vadd.xlane.f32.xlu1 %v3402_v52 }
0x1918   : > { %3410 = vrot.lane.b32.xlu1 %v8912_v36, %s8188_s12 }
0x1955   : > { %v3134_v55 = vpop.xlane.xlu0 %3133 }
0x1959   : > { %v3137_v56 = vpop.xlane.xlu1 %3136 }
0x195a   : > { %8046 = vrcp.f32 %v3137_v56 }
0x195b   : > { %8048 = vrcp.f32 %v3134_v55 }
0x195d   : > { %v3268_v21 = vpop.xlane.xlu0 %3267 }
0x195f   : > { %v3271_v20 = vpop.xlane.xlu1 %3270 }
0x1960   : > { %8050 = vrcp.f32 %v3271_v20 }
0x1961   : > { %8052 = vrcp.f32 %v3268_v21 }
0x1963   : > { %v3278_v36 = vpop.permute.xlu1 %3277 }
0x1964   : > { %v8047_v57 = vpop.eup %8046 }
0x1965   : > { %v3401_v58 = vpop.xlane.xlu0 %3400  ;;  %v8049_v59 = vpop.eup %8048  ;;  %v3141_v60 = vmul.f32 %v8047_v57, %v8033_v27 }
0x1966   : > { %v3140_v13 = vmul.f32 %v8049_v59, %v8031_v23  ;;  %8054 = vrcp.f32 %v3401_v58 }
0x1968   : > { %v3142_v62 = vpack.c.bf16 %v3141_v60, %v3140_v13 }
0x1969   : > { %v3145_v61 = vpop.permute.xlu0 %3144 }
0x196a   : > { %7463 = vmatpush3.bf16.msra.mxu1 %v3145_v61  ;;  %v8051_v0 = vpop.eup %8050 }
0x196b   : > { %7474 = vmatprep.subr.bf16.mxu1 %v8184_v1  ;;  %v8053_v2 = vpop.eup %8052  ;;  %v3275_v5 = vmul.f32 %v8051_v0, %v8037_v37 }
0x196c   : > { %v3274_v8 = vmul.f32 %v8053_v2, %v8035_v30  ;;  %v7891_v30 = vld [vmem:[%s9651_s2 + $0x118] sm:$0xff]   ;;  %v7892_v2 = vld [vmem:[%s9651_s2 + $0x120] sm:$0xff]  }
0x196d   : > { %7465 = vmatmul.mubr.msk.bf16.vlgmr.msra.gmra.mrb[72].mxu1 %vm656_vm2, %v3142_v62  ;;  %7499 = vmatpush3.bf16.msra.mxu0 %v7891_v30 }
0x196e   : > { %7475 = vmatpush3.bf16.msra.mxu1 %v3278_v36  ;;  %7476 = vmatprep.mubr.msk.bf16.mxu1 %vm8185_vm0, %v8184_v1  ;;  %v3276_v3 = vpack.c.bf16 %v3275_v5, %v3274_v8  ;;  %v7893_v5 = vld [vmem:[%s9651_s2 + $0x128] sm:$0xff]   ;;  %v7894_v8 = vld [vmem:[%s9651_s2 + $0x130] sm:$0xff]  }
0x196f   : > { %7486 = vmatprep.subr.bf16.mxu1 %v8184_v1  ;;  %7516 = vmatprep.subr.bf16.mxu0 %v8184_v1 }
0x1970   : > { %v8055_v9 = vpop.eup %8054 }
0x1971   : > { %v3407_v12 = vmul.f32 %v8055_v9, %v8039_v40 }
0x1975   : > { %7477 = vmatmul.mubr.msk.bf16.vlgmr.msra.gmra.mrb[76].mxu1 %vm656_vm2, %v3276_v3  ;;  %v7895_v3 = vld [vmem:[%s9651_s2 + $0x138] sm:$0xff]  }
0x1976   : > { %7488 = vmatprep.mubr.msk.bf16.mxu1 %vm8185_vm0, %v8184_v1 }
0x1994   : > { %v3404_v32 = vpop.xlane.xlu1 %3403 }
0x1995   : > { %8056 = vrcp.f32 %v3404_v32 }
0x1998   : > { %v3411_v6 = vpop.permute.xlu1 %3410 }
0x1999   : > { %7487 = vmatpush3.bf16.msra.mxu1 %v3411_v6 }
0x199a   : > { %7504 = vmatprep.subr.bf16.mxu1 %v8184_v1 }
0x199f   : > { %v8057_v10 = vpop.eup %8056 }
0x19a0   : > { %v3408_v14 = vmul.f32 %v8057_v10, %v8045_v51 }
0x19a2   : > { %v3409_v34 = vpack.c.bf16 %v3408_v14, %v3407_v12 }
0x19a4   : > { %7489 = vmatmul.mubr.msk.bf16.vlgmr.msra.gmra.mrb[80].mxu1 %vm656_vm2, %v3409_v34 }
0x19a5   : > { %7512 = vmatprep.mubr.msk.bf16.mxu1 %vm8185_vm0, %v8184_v1  ;;  %7505 = vmatpush3.bf16.msra.mxu1 %v7892_v2 }
0x19a6   : > { %7506 = vmatprep.subr.bf16.mxu1 %v8184_v1 }
0x19a9   : > { %7507 = vmatpush3.bf16.msra.mxu1 %v7893_v5 }
0x19aa   : > { %7508 = vmatprep.subr.bf16.mxu1 %v8184_v1 }
0x19ad   : > { %7509 = vmatpush3.bf16.msra.mxu1 %v7894_v8 }
0x19ae   : > { %7510 = vmatprep.subr.bf16.mxu1 %v8184_v1 }
0x19b1   : > { %7511 = vmatpush3.bf16.msra.mxu1 %v7895_v3 }
0x19b2   : > { %7522 = vmatprep.subr.bf16.mxu1 %v8184_v1 }
0x19c7   : > { %v3056_v15 = vpop.f32.mrb[68].mxu1 }
0x19c8   : > { %3063 = vst.msk [vmem:[#allocation2] sm:$0xff] %vm656_vm2, %v3056_v15  ;;  %v7454_v49 = vpop.f32.mrb[69].mxu1  ;;  %v6683_v15 = vld [vmem:[%s9654_s5 + $0x8] ss:$0 sm:$0xff] }
0x19c9   : > { %v3059_v53 = vpop.f32.mrb[70].mxu1 }
0x19ca   : > { %3064 = vst.msk [vmem:[#allocation2 + $0x8] sm:$0xff] %vm656_vm2, %v3059_v53  ;;  %v7455_v39 = vpop.f32.mrb[71].mxu1 }
0x1a40   : > { %v3184_v17 = vpop.f32.mrb[72].mxu1 }
0x1a41   : > { %3193 = vrot.lane.b32.xlu1 %v3184_v17, %s8189_s15  ;;  %v7466_v22 = vpop.f32.mrb[73].mxu1 }
0x1a42   : > { %v3187_v23 = vpop.f32.mrb[74].mxu1 }
0x1a43   : > { %3195 = vrot.lane.b32.xlu0 %v3187_v23, %s8189_s15  ;;  %v7467_v24 = vpop.f32.mrb[75].mxu1 }
0x1a48   : > { %v3317_v26 = vpop.f32.mrb[76].mxu1 }
0x1a49   : > { %3326 = vrot.lane.b32.xlu1 %v3317_v26, %s8190_s16  ;;  %v7478_v27 = vpop.f32.mrb[77].mxu1 }
0x1a4a   : > { %v3320_v28 = vpop.f32.mrb[78].mxu1 }
0x1a4b   : > { %3328 = vrot.lane.b32.xlu0 %v3320_v28, %s8190_s16  ;;  %v7479_v29 = vpop.f32.mrb[79].mxu1 }
0x1a77   : > { %v3450_v35 = vpop.f32.mrb[80].mxu1 }
0x1a78   : > { %3459 = vrot.lane.b32.xlu1 %v3450_v35, %s8191_s23  ;;  %v7490_v37 = vpop.f32.mrb[81].mxu1 }
0x1a79   : > { %v3453_v38 = vpop.f32.mrb[82].mxu1 }
0x1a7a   : > { %3461 = vrot.lane.b32.xlu0 %v3453_v38, %s8191_s23  ;;  %v7491_v40 = vpop.f32.mrb[83].mxu1 }
0x1ab3   : > { %v3194_v41 = vpop.permute.xlu1 %3193 }
0x1ab4   : > { %3199 = vst.msk [vmem:[#allocation2] sm:$0xff] %vm909_vm3, %v3194_v41 }
0x1ab5   : > { %v3196_v42 = vpop.permute.xlu0 %3195 }
0x1ab6   : > { %3200 = vst.msk [vmem:[#allocation2 + $0x8] sm:$0xff] %vm909_vm3, %v3196_v42 }
0x1abb   : > { %v3327_v43 = vpop.permute.xlu1 %3326 }
0x1abc   : > { %3332 = vst.msk [vmem:[#allocation2] sm:$0xff] %vm1043_vm4, %v3327_v43 }
0x1abd   : > { %v3329_v44 = vpop.permute.xlu0 %3328 }
0x1abe   : > { %3333 = vst.msk [vmem:[#allocation2 + $0x8] sm:$0xff] %vm1043_vm4, %v3329_v44 }
0x1aea   : > { %v3460_v7 = vpop.permute.xlu1 %3459 }
0x1aeb   : > { %3465 = vst.msk [vmem:[#allocation2] sm:$0xff] %vm1177_vm5, %v3460_v7 }
0x1aec   : > { %v3462_v11 = vpop.permute.xlu0 %3461 }
0x1aed   : > { %3466 = vst.msk [vmem:[#allocation2 + $0x8] sm:$0xff] %vm1177_vm5, %v3462_v11 }
0x1af2   : > { %v3467_v46 = vld [vmem:[#allocation2] sm:$0xff] }
0x1af4   : > { %v3468_v47 = vld [vmem:[#allocation2 + $0x8] sm:$0xff] }
0x1af5   : > { %v3469_v45 = vpack.c.bf16 %v3468_v47, %v3467_v46 }
0x1af7   : > { %7501 = vmatmul.mubr.msk.bf16.vlgmr.msra.gmra.mrb[84].mxu0 %vm328_vm1, %v3469_v45 }
0x1af8   : > { %7517 = vmatpush3.bf16.xpose.msra.mxu0 %v9005_v48  ;;  %7518 = vmatprep.mubr.msk.bf16.mxu0 %vm8185_vm0, %v8184_v1 }
0x1af9   : > { %7528 = vmatprep.subr.bf16.mxu0 %v8184_v1 }
0x1bca   : > { %v3531_v50 = vpop.f32.mrb[84].mxu0 }
0x1bcb   : > { %v9012_v51 = vadd.f32 %v3531_v50, %v8800_v63  ;;  %v7502_v52 = vpop.f32.mrb[85].mxu0 }
0x1bcc   : > { %v3534_v55 = vpop.f32.mrb[86].mxu0 }
0x1bcd   : > { %v9015_v56 = vadd.f32 %v3534_v55, %v8804_v4  ;;  %v7503_v20 = vpop.f32.mrb[87].mxu0  ;;  %v3542_v21 = vsel %vm328_vm1, %v9012_v51, 0.0 }
0x1bce   : > { %3543 = vadd.xlane.f32.xlu1 %v3542_v21 }
0x1bcf   : > { %v3545_v57 = vsel %vm328_vm1, %v9015_v56, 0.0 }
0x1bd0   : > { %3546 = vadd.xlane.f32.xlu0 %v3545_v57 }
0x1bdf   : > { %3792 = vrot.lane.b32.xlu1 %v8854_v31, %s8186_s9 }
0x1be3   : > { %3926 = vrot.lane.b32.xlu1 %v8854_v31, %s8187_s11 }
0x1c5b   : > { %v3544_v63 = vpop.xlane.xlu1 %3543 }
0x1c5c   : > { %v3548_v58 = vmul.f32 0.015625, %v3544_v63 }
0x1c5d   : > { %v3547_v59 = vpop.xlane.xlu0 %3546 }
0x1c5e   : > { %v3550_v4 = vsub.f32 %v9012_v51, %v3548_v58  ;;  %v3549_v60 = vmul.f32 0.015625, %v3547_v59 }
0x1c5f   : > { %v3793_v30 = vpop.permute.xlu1 %3792 }
0x1c60   : > { %v3551_v13 = vsub.f32 %v9015_v56, %v3549_v60  ;;  %v3552_v61 = vmul.f32 %v3550_v4, %v3550_v4 }
0x1c62   : > { %v3554_v62 = vsel %vm328_vm1, %v3552_v61, 0.0  ;;  %v3553_v0 = vmul.f32 %v3551_v13, %v3551_v13 }
0x1c63   : > { %3555 = vadd.xlane.f32.xlu0 %v3554_v62 }
0x1c64   : > { %v3557_v36 = vsel %vm328_vm1, %v3553_v0, 0.0 }
0x1c67   : > { %3558 = vadd.xlane.f32.xlu0 %v3557_v36 }
0x1cf0   : > { %v3556_v32 = vpop.xlane.xlu0 %3555 }
0x1cf1   : > { %v3560_v6 = vmul.f32 0.015625, %v3556_v32 }
0x1cf3   : > { %v3562_v9 = vadd.f32 1e-07, %v3560_v6 }
0x1cf4   : > { %v3559_v10 = vpop.xlane.xlu0 %3558 }
0x1cf5   : > { %8058 = vrsqrt.f32 %v3562_v9  ;;  %v3561_v12 = vmul.f32 0.015625, %v3559_v10 }
0x1cf7   : > { %v3563_v14 = vadd.f32 1e-07, %v3561_v12 }
0x1cf9   : > { %8060 = vrsqrt.f32 %v3563_v14 }
0x1cff   : > { %v8059_v34 = vpop.eup %8058 }
0x1d00   : > { %v3566_v49 = vmul.f32 %v8059_v34, %v3550_v4 }
0x1d02   : > { %v3572_v53 = vmul.f32 %v6683_v15, %v3566_v49 }
0x1d03   : > { %v8061_v39 = vpop.eup %8060 }
0x1d04   : > { %v3567_v17 = vmul.f32 %v8061_v39, %v3551_v13  ;;  %v3578_v22 = vadd.f32 %v6684_v16, %v3572_v53 }
0x1d06   : > { %v3573_v18 = vmul.f32 %v6683_v15, %v3567_v17  ;;  %v3580_v24 = vadd.f32 %v8867_v19, %v3578_v22  ;;  %v9061_v19 = vsel %vm656_vm2, %v3793_v30, 0 }
0x1d08   : > { %v3579_v23 = vadd.f32 %v6684_v16, %v3573_v18 }
0x1d0a   : > { %v3581_v25 = vadd.f32 %v8872_v54, %v3579_v23  ;;  %v3927_v54 = vpop.permute.xlu1 %3926 }
0x1d0b   : > { %v9072_v41 = vsel %vm656_vm2, %v3927_v54, 0 }
0x1d0c   : > { %v3591_v26 = vpack.c.bf16 %v3581_v25, %v3580_v24 }
0x1d0e   : > { %7513 = vmatmul.mubr.msk.bf16.vlgmr.msra.gmra.mrb[84].mxu1 %vm328_vm1, %v3591_v26 }
0x1d0f   : > { %7523 = vmatpush3.bf16.msra.mxu1 %v8856_v33  ;;  %7524 = vmatprep.mubr.msk.bf16.mxu1 %vm8185_vm0, %v8184_v1 }
0x1d10   : > { %7534 = vmatprep.subr.bf16.mxu1 %v8184_v1 }
0x1de1   : > { %v3653_v27 = vpop.f32.mrb[84].mxu1 }
0x1de2   : > { %v7514_v28 = vpop.f32.mrb[85].mxu1 }
0x1de3   : > { %v3656_v29 = vpop.f32.mrb[86].mxu1 }
0x1de4   : > { %v3660_v35 = vpack.c.bf16 %v3656_v29, %v3653_v27  ;;  %v7515_v37 = vpop.f32.mrb[87].mxu1 }
0x1de6   : > { %3924 = vrot.lane.b32.xlu1 %v3660_v35, %s8187_s11  ;;  %3789 = vrot.lane.b32.xlu0 %v3660_v35, %s8186_s9 }
0x1de7   : > { %7519 = vmatmul.mubr.msk.bf16.vlgmr.msra.gmra.mrb[88].mxu0 %vm656_vm2, %v3660_v35 }
0x1de8   : > { %7529 = vmatpush3.bf16.xpose.msra.mxu0 %v9061_v19  ;;  %7530 = vmatprep.mubr.msk.bf16.mxu0 %vm8185_vm0, %v8184_v1 }
0x1de9   : > { %7540 = vmatprep.subr.bf16.mxu0 %v8184_v1 }
0x1dea   : > { %4059 = vrot.lane.b32.xlu1 %v8854_v31, %s8188_s12  ;;  %4057 = vrot.lane.b32.xlu0 %v3660_v35, %s8188_s12 }
0x1e58   : > { %v3925_v38 = vpop.permute.xlu1 %3924  ;;  %v3790_v40 = vpop.permute.xlu0 %3789 }
0x1e59   : > { %7531 = vmatmul.mubr.msk.bf16.vlgmr.msra.gmra.mrb[92].mxu0 %vm656_vm2, %v3790_v40 }
0x1e5a   : > { %7541 = vmatpush3.bf16.xpose.msra.mxu0 %v9072_v41  ;;  %7542 = vmatprep.mubr.msk.bf16.mxu0 %vm8185_vm0, %v8184_v1 }
0x1e5b   : > { %7552 = vmatprep.subr.bf16.mxu0 %v8184_v1 }
0x1e5c   : > { %v4060_v42 = vpop.permute.xlu1 %4059  ;;  %v4058_v43 = vpop.permute.xlu0 %4057 }
0x1e5d   : > { %v9080_v31 = vsel %vm656_vm2, %v4060_v42, 0 }
0x1e61   : > { %7543 = vmatmul.mubr.msk.bf16.vlgmr.msra.gmra.mrb[96].mxu0 %vm656_vm2, %v3925_v38 }
0x1e62   : > { %7553 = vmatpush3.bf16.xpose.msra.mxu0 %v9080_v31  ;;  %7554 = vmatprep.mubr.msk.bf16.mxu0 %vm8185_vm0, %v8184_v1 }
0x1e63   : > { %7564 = vmatprep.subr.bf16.mxu0 %v8184_v1 }
0x1e69   : > { %7555 = vmatmul.mubr.msk.bf16.vlgmr.msra.gmra.mrb[100].mxu0 %vm656_vm2, %v4058_v43 }
0x1e6a   : > { %7572 = vmatprep.mubr.msk.bf16.mxu0 %vm8185_vm0, %v8184_v1 }
0x1eba   : > { %v3710_v44 = vpop.f32.mrb[88].mxu0 }
0x1ebb   : > { %v3717_v7 = vmul.f32 0.25, %v3710_v44  ;;  %v7520_v11 = vpop.f32.mrb[89].mxu0 }
0x1ebc   : > { %v3713_v46 = vpop.f32.mrb[90].mxu0 }
0x1ebd   : > { %v3718_v47 = vmul.f32 0.25, %v3713_v46  ;;  %v7521_v45 = vpop.f32.mrb[91].mxu0  ;;  %v3719_v50 = vsel %vm656_vm2, %v3717_v7, -inf }
0x1ebe   : > { %3720 = vmax.xlane.f32.xlu1 %v3719_v50 }
0x1ebf   : > { %v3722_v52 = vsel %vm656_vm2, %v3718_v47, -inf }
0x1ec0   : > { %3723 = vmax.xlane.f32.xlu0 %v3722_v52 }
0x1f2c   : > { %v3834_v55 = vpop.f32.mrb[92].mxu0 }
0x1f2d   : > { %v3841_v20 = vmul.f32 0.25, %v3834_v55  ;;  %v7532_v21 = vpop.f32.mrb[93].mxu0 }
0x1f2e   : > { %v3837_v57 = vpop.f32.mrb[94].mxu0 }
0x1f2f   : > { %v3842_v63 = vmul.f32 0.25, %v3837_v57  ;;  %v7533_v58 = vpop.f32.mrb[95].mxu0  ;;  %v3843_v59 = vsel %vm656_vm2, %v3841_v20, -inf }
0x1f30   : > { %3844 = vmax.xlane.f32.xlu0 %v3843_v59 }
0x1f31   : > { %v3846_v4 = vsel %vm656_vm2, %v3842_v63, -inf }
0x1f34   : > { %3847 = vmax.xlane.f32.xlu0 %v3846_v4  ;;  %v3968_v60 = vpop.f32.mrb[96].mxu0 }
0x1f35   : > { %v3975_v13 = vmul.f32 0.25, %v3968_v60  ;;  %v7544_v61 = vpop.f32.mrb[97].mxu0 }
0x1f36   : > { %v3971_v62 = vpop.f32.mrb[98].mxu0 }
0x1f37   : > { %v3976_v0 = vmul.f32 0.25, %v3971_v62  ;;  %v7545_v36 = vpop.f32.mrb[99].mxu0  ;;  %v3977_v2 = vsel %vm656_vm2, %v3975_v13, -inf }
0x1f38   : > { %3978 = vmax.xlane.f32.xlu1 %v3977_v2 }
0x1f39   : > { %v3980_v5 = vsel %vm656_vm2, %v3976_v0, -inf }
0x1f3a   : > { %3981 = vmax.xlane.f32.xlu0 %v3980_v5 }
0x1f3c   : > { %v4101_v8 = vpop.f32.mrb[100].mxu0 }
0x1f3d   : > { %v4108_v3 = vmul.f32 0.25, %v4101_v8  ;;  %v7556_v32 = vpop.f32.mrb[101].mxu0 }
0x1f3e   : > { %v4104_v6 = vpop.f32.mrb[102].mxu0 }
0x1f3f   : > { %v4109_v9 = vmul.f32 0.25, %v4104_v6  ;;  %v7557_v10 = vpop.f32.mrb[103].mxu0  ;;  %v4110_v12 = vsel %vm656_vm2, %v4108_v3, -inf }
0x1f40   : > { %4111 = vmax.xlane.f32.xlu1 %v4110_v12 }
0x1f41   : > { %v4113_v14 = vsel %vm656_vm2, %v4109_v9, -inf }
0x1f42   : > { %4114 = vmax.xlane.f32.xlu0 %v4113_v14 }
0x1f4b   : > { %v3721_v34 = vpop.xlane.xlu1 %3720 }
0x1f4c   : > { %v3725_v15 = vsub.f32 %v3717_v7, %v3721_v34 }
0x1f4d   : > { %v3724_v49 = vpop.xlane.xlu0 %3723 }
0x1f4e   : > { %v3727_v53 = vmul.f32 1.442695, %v3725_v15  ;;  %v3726_v39 = vsub.f32 %v3718_v47, %v3724_v49 }
0x1f50   : > { %8062 = vpow2.f32 %v3727_v53  ;;  %v3729_v16 = vmul.f32 1.442695, %v3726_v39 }
0x1f52   : > { %8064 = vpow2.f32 %v3729_v16 }
0x1f5a   : > { %v8063_v17 = vpop.eup %8062 }
0x1f5b   : > { %v3731_v18 = vsel %vm656_vm2, %v8063_v17, 0.0 }
0x1f5c   : > { %v8065_v22 = vpop.eup %8064  ;;  %3732 = vadd.xlane.f32.xlu1 %v3731_v18 }
0x1f5d   : > { %v3734_v23 = vsel %vm656_vm2, %v8065_v22, 0.0 }
0x1f5e   : > { %3735 = vadd.xlane.f32.xlu0 %v3734_v23 }
0x1f6d   : > { %3867 = vrot.lane.b32.xlu1 %v8856_v33, %s8186_s9 }
0x1fbd   : > { %v3845_v24 = vpop.xlane.xlu0 %3844 }
0x1fbe   : > { %v3849_v25 = vsub.f32 %v3841_v20, %v3845_v24 }
0x1fc0   : > { %v3851_v26 = vmul.f32 1.442695, %v3849_v25 }
0x1fc1   : > { %v3848_v27 = vpop.xlane.xlu0 %3847 }
0x1fc2   : > { %8066 = vpow2.f32 %v3851_v26  ;;  %v3850_v28 = vsub.f32 %v3842_v63, %v3848_v27 }
0x1fc4   : > { %v3853_v29 = vmul.f32 1.442695, %v3850_v28 }
0x1fc5   : > { %v3979_v30 = vpop.xlane.xlu1 %3978 }
0x1fc6   : > { %8068 = vpow2.f32 %v3853_v29  ;;  %v3983_v35 = vsub.f32 %v3975_v13, %v3979_v30 }
0x1fc7   : > { %v3982_v37 = vpop.xlane.xlu0 %3981 }
0x1fc8   : > { %v3985_v54 = vmul.f32 1.442695, %v3983_v35  ;;  %v3984_v38 = vsub.f32 %v3976_v0, %v3982_v37 }
0x1fca   : > { %8070 = vpow2.f32 %v3985_v54  ;;  %v3987_v40 = vmul.f32 1.442695, %v3984_v38  ;;  %v7896_v54 = vld [vmem:[%s9651_s2 + $0x180] sm:$0xff]  }
0x1fcb   : > { %7565 = vmatpush3.bf16.msra.mxu0 %v7896_v54  ;;  %v6719_v54 = vld [vmem:[%s9654_s5 + $0xa] ss:$0 sm:$0xff] }
0x1fcc   : > { %v8067_v42 = vpop.eup %8066  ;;  %8072 = vpow2.f32 %v3987_v40  ;;  %7566 = vmatprep.subr.bf16.mxu0 %v8184_v1 }
0x1fcd   : > { %v4112_v43 = vpop.xlane.xlu1 %4111  ;;  %v3855_v44 = vsel %vm656_vm2, %v8067_v42, 0.0 }
0x1fce   : > { %v4116_v7 = vsub.f32 %v4108_v3, %v4112_v43  ;;  %3856 = vadd.xlane.f32.xlu1 %v3855_v44  ;;  %v7897_v44 = vld [vmem:[%s9651_s2 + $0x188] sm:$0xff]  }
0x1fcf   : > { %v4115_v11 = vpop.xlane.xlu0 %4114  ;;  %7567 = vmatpush3.bf16.msra.mxu0 %v7897_v44 }
0x1fd0   : > { %v8069_v46 = vpop.eup %8068  ;;  %v4118_v47 = vmul.f32 1.442695, %v4116_v7  ;;  %v4117_v45 = vsub.f32 %v4109_v9, %v4115_v11  ;;  %v7898_v7 = vld [vmem:[%s9651_s2 + $0x190] sm:$0xff]   ;;  %7568 = vmatprep.subr.bf16.mxu0 %v8184_v1 }
0x1fd1   : > { %v3858_v50 = vsel %vm656_vm2, %v8069_v46, 0.0 }
0x1fd2   : > { %8074 = vpow2.f32 %v4118_v47  ;;  %v4120_v52 = vmul.f32 1.442695, %v4117_v45  ;;  %3859 = vadd.xlane.f32.xlu0 %v3858_v50  ;;  %v7899_v45 = vld [vmem:[%s9651_s2 + $0x198] sm:$0xff]  }
0x1fd3   : > { %7569 = vmatpush3.bf16.msra.mxu0 %v7898_v7 }
0x1fd4   : > { %v8071_v55 = vpop.eup %8070  ;;  %8076 = vpow2.f32 %v4120_v52  ;;  %7570 = vmatprep.subr.bf16.mxu0 %v8184_v1 }
0x1fd5   : > { %v3989_v20 = vsel %vm656_vm2, %v8071_v55, 0.0 }
0x1fd6   : > { %v8073_v21 = vpop.eup %8072  ;;  %3990 = vadd.xlane.f32.xlu1 %v3989_v20 }
0x1fd7   : > { %v3992_v57 = vsel %vm656_vm2, %v8073_v21, 0.0  ;;  %7571 = vmatpush3.bf16.msra.mxu0 %v7899_v45  ;;  %v7905_v45 = vld [vmem:[%s9653_s4 + $0x18] sm:$0xff]  }
0x1fd8   : > { %3993 = vadd.xlane.f32.xlu0 %v3992_v57  ;;  %7588 = vmatprep.subr.bf16.mxu0 %v8184_v1 }
0x1fdc   : > { %v8075_v63 = vpop.eup %8074 }
0x1fdd   : > { %v4122_v58 = vsel %vm656_vm2, %v8075_v63, 0.0 }
0x1fde   : > { %v8077_v59 = vpop.eup %8076  ;;  %4123 = vadd.xlane.f32.xlu1 %v4122_v58 }
0x1fdf   : > { %v4125_v4 = vsel %vm656_vm2, %v8077_v59, 0.0 }
0x1fe0   : > { %4126 = vadd.xlane.f32.xlu0 %v4125_v4 }
0x1fe9   : > { %v3733_v60 = vpop.xlane.xlu1 %3732 }
0x1fea   : > { %8078 = vrcp.f32 %v3733_v60 }
0x1feb   : > { %v3736_v13 = vpop.xlane.xlu0 %3735 }
0x1fec   : > { %8080 = vrcp.f32 %v3736_v13 }
0x1fed   : > { %v9112_v5 = vpop.permute.xlu1 %3867 }
0x1fef   : > { %4133 = vrot.lane.b32.xlu1 %v8856_v33, %s8188_s12 }
0x1ff4   : > { %v8079_v61 = vpop.eup %8078 }
0x1ff5   : > { %v3739_v0 = vmul.f32 %v8079_v61, %v8063_v17 }
0x1ff6   : > { %v8081_v62 = vpop.eup %8080  ;;  %4000 = vrot.lane.b32.xlu0 %v8856_v33, %s8187_s11 }
0x1ff7   : > { %v3740_v36 = vmul.f32 %v8081_v62, %v8065_v22 }
0x1ff9   : > { %v3741_v2 = vpack.c.bf16 %v3740_v36, %v3739_v0 }
0x1ffb   : > { %7525 = vmatmul.mubr.msk.bf16.vlgmr.msra.gmra.mrb[88].mxu1 %vm656_vm2, %v3741_v2 }
0x1ffc   : > { %7535 = vmatpush3.bf16.msra.mxu1 %v9112_v5  ;;  %7536 = vmatprep.mubr.msk.bf16.mxu1 %vm8185_vm0, %v8184_v1 }
0x1ffd   : > { %7546 = vmatprep.subr.bf16.mxu1 %v8184_v1 }
0x205b   : > { %v3857_v8 = vpop.xlane.xlu1 %3856 }
0x205c   : > { %8082 = vrcp.f32 %v3857_v8 }
0x205f   : > { %v3860_v3 = vpop.xlane.xlu0 %3859 }
0x2060   : > { %8084 = vrcp.f32 %v3860_v3 }
0x2063   : > { %v3991_v32 = vpop.xlane.xlu1 %3990 }
0x2064   : > { %8086 = vrcp.f32 %v3991_v32 }
0x2065   : > { %v3994_v6 = vpop.xlane.xlu0 %3993 }
0x2066   : > { %8088 = vrcp.f32 %v3994_v6  ;;  %v8083_v9 = vpop.eup %8082 }
0x2067   : > { %v3863_v12 = vmul.f32 %v8083_v9, %v8067_v42 }
0x206a   : > { %v8085_v10 = vpop.eup %8084 }
0x206b   : > { %v3864_v14 = vmul.f32 %v8085_v10, %v8069_v46  ;;  %v4124_v34 = vpop.xlane.xlu1 %4123 }
0x206c   : > { %8090 = vrcp.f32 %v4124_v34 }
0x206d   : > { %v4127_v15 = vpop.xlane.xlu0 %4126  ;;  %v3865_v49 = vpack.c.bf16 %v3864_v14, %v3863_v12 }
0x206e   : > { %8092 = vrcp.f32 %v4127_v15  ;;  %v8087_v53 = vpop.eup %8086 }
0x206f   : > { %7537 = vmatmul.mubr.msk.bf16.vlgmr.msra.gmra.mrb[92].mxu1 %vm656_vm2, %v3865_v49  ;;  %v3997_v18 = vmul.f32 %v8087_v53, %v8071_v55  ;;  %v9126_v24 = vpop.permute.xlu1 %4133 }
0x2070   : > { %v8089_v39 = vpop.eup %8088  ;;  %7548 = vmatprep.mubr.msk.bf16.mxu1 %vm8185_vm0, %v8184_v1 }
0x2071   : > { %v3998_v16 = vmul.f32 %v8089_v39, %v8073_v21  ;;  %v9122_v17 = vpop.permute.xlu0 %4000 }
0x2072   : > { %7547 = vmatpush3.bf16.msra.mxu1 %v9122_v17 }
0x2073   : > { %7558 = vmatprep.subr.bf16.mxu1 %v8184_v1  ;;  %v3999_v22 = vpack.c.bf16 %v3998_v16, %v3997_v18  ;;  %v7900_v16 = vld [vmem:[%s9652_s3 + $0x20] sm:$0xff]   ;;  %v7901_v18 = vld [vmem:[%s9652_s3 + $0x28] sm:$0xff]  }
0x2076   : > { %v8091_v23 = vpop.eup %8090 }
0x2077   : > { %7549 = vmatmul.mubr.msk.bf16.vlgmr.msra.gmra.mrb[96].mxu1 %vm656_vm2, %v3999_v22  ;;  %v4130_v27 = vmul.f32 %v8091_v23, %v8075_v63  ;;  %v7902_v22 = vld [vmem:[%s9652_s3 + $0x30] sm:$0xff]   ;;  %v7903_v23 = vld [vmem:[%s9652_s3 + $0x38] sm:$0xff]  }
0x2078   : > { %v8093_v25 = vpop.eup %8092  ;;  %7559 = vmatpush3.bf16.msra.mxu1 %v9126_v24  ;;  %7560 = vmatprep.mubr.msk.bf16.mxu1 %vm8185_vm0, %v8184_v1 }
0x2079   : > { %v4131_v26 = vmul.f32 %v8093_v25, %v8077_v59  ;;  %7576 = vmatprep.subr.bf16.mxu1 %v8184_v1 }
0x207b   : > { %v4132_v28 = vpack.c.bf16 %v4131_v26, %v4130_v27 }
0x207f   : > { %7561 = vmatmul.mubr.msk.bf16.vlgmr.msra.gmra.mrb[100].mxu1 %vm656_vm2, %v4132_v28 }
0x2080   : > { %7584 = vmatprep.mubr.msk.bf16.mxu1 %vm8185_vm0, %v8184_v1  ;;  %7577 = vmatpush3.bf16.msra.mxu1 %v7900_v16  ;;  %v7907_v16 = vld [vmem:[%s9651_s2 + $0xc0] sm:$0xff]  }
0x2081   : > { %7578 = vmatprep.subr.bf16.mxu1 %v8184_v1 }
0x2084   : > { %7579 = vmatpush3.bf16.msra.mxu1 %v7901_v18  ;;  %v7908_v18 = vld [vmem:[%s9651_s2 + $0xa8] sm:$0xff]  }
0x2085   : > { %7580 = vmatprep.subr.bf16.mxu1 %v8184_v1 }
0x2088   : > { %7581 = vmatpush3.bf16.msra.mxu1 %v7902_v22  ;;  %v7909_v22 = vld [vmem:[%s9651_s2 + $0xc8] sm:$0xff]  }
0x2089   : > { %7582 = vmatprep.subr.bf16.mxu1 %v8184_v1 }
0x208c   : > { %7583 = vmatpush3.bf16.msra.mxu1 %v7903_v23  ;;  %v7910_v23 = vld [vmem:[%s9651_s2 + $0xb0] sm:$0xff]  }
0x208d   : > { %7596 = vmatprep.subr.bf16.mxu1 %v8184_v1 }
0x20ce   : > { %v3779_v29 = vpop.f32.mrb[88].mxu1 }
0x20cf   : > { %3786 = vst.msk [vmem:[#allocation2] sm:$0xff] %vm656_vm2, %v3779_v29  ;;  %v7526_v30 = vpop.f32.mrb[89].mxu1 }
0x20d0   : > { %v3782_v35 = vpop.f32.mrb[90].mxu1 }
0x20d1   : > { %3787 = vst.msk [vmem:[#allocation2 + $0x8] sm:$0xff] %vm656_vm2, %v3782_v35  ;;  %v7527_v37 = vpop.f32.mrb[91].mxu1 }
0x2142   : > { %v3907_v38 = vpop.f32.mrb[92].mxu1 }
0x2143   : > { %3916 = vrot.lane.b32.xlu1 %v3907_v38, %s8189_s15  ;;  %v7538_v40 = vpop.f32.mrb[93].mxu1 }
0x2144   : > { %v3910_v42 = vpop.f32.mrb[94].mxu1 }
0x2145   : > { %v7539_v43 = vpop.f32.mrb[95].mxu1 }
0x2146   : > { %v6720_v43 = vld [vmem:[%s9654_s5 + $0xb] ss:$0 sm:$0xff] }
0x2147   : > { %3918 = vrot.lane.b32.xlu1 %v3910_v42, %s8189_s15 }
0x214a   : > { %v4040_v11 = vpop.f32.mrb[96].mxu1 }
0x214b   : > { %4049 = vrot.lane.b32.xlu0 %v4040_v11, %s8190_s16  ;;  %v7550_v46 = vpop.f32.mrb[97].mxu1 }
0x214c   : > { %v4043_v47 = vpop.f32.mrb[98].mxu1 }
0x214d   : > { %4051 = vrot.lane.b32.xlu1 %v4043_v47, %s8190_s16  ;;  %v7551_v50 = vpop.f32.mrb[99].mxu1  ;;  %v7904_v47 = vld [vmem:[%s9653_s4 + $0x10] sm:$0xff]  }
0x214e   : > { %v6729_v50 = vld [vmem:[%s9655_s6 + $0x1] ss:$0 sm:$0xff] }
0x2152   : > { %v4173_v52 = vpop.f32.mrb[100].mxu1 }
0x2153   : > { %4182 = vrot.lane.b32.xlu0 %v4173_v52, %s8191_s23  ;;  %v7562_v55 = vpop.f32.mrb[101].mxu1 }
0x2154   : > { %v4176_v20 = vpop.f32.mrb[102].mxu1 }
0x2155   : > { %4184 = vrot.lane.b32.xlu1 %v4176_v20, %s8191_s23  ;;  %v7563_v21 = vpop.f32.mrb[103].mxu1 }
0x21b5   : > { %v3917_v57 = vpop.permute.xlu1 %3916 }
0x21b6   : > { %3922 = vst.msk [vmem:[#allocation2] sm:$0xff] %vm909_vm3, %v3917_v57 }
0x21b9   : > { %v3919_v63 = vpop.permute.xlu1 %3918 }
0x21ba   : > { %3923 = vst.msk [vmem:[#allocation2 + $0x8] sm:$0xff] %vm909_vm3, %v3919_v63 }
0x21bd   : > { %v4050_v58 = vpop.permute.xlu0 %4049 }
0x21be   : > { %4055 = vst.msk [vmem:[#allocation2] sm:$0xff] %vm1043_vm4, %v4050_v58 }
0x21bf   : > { %v4052_v59 = vpop.permute.xlu1 %4051 }
0x21c0   : > { %4056 = vst.msk [vmem:[#allocation2 + $0x8] sm:$0xff] %vm1043_vm4, %v4052_v59 }
0x21c5   : > { %v4183_v4 = vpop.permute.xlu0 %4182 }
0x21c6   : > { %4188 = vst.msk [vmem:[#allocation2] sm:$0xff] %vm1177_vm5, %v4183_v4 }
0x21c7   : > { %v4185_v60 = vpop.permute.xlu1 %4184 }
0x21c8   : > { %4189 = vst.msk [vmem:[#allocation2 + $0x8] sm:$0xff] %vm1177_vm5, %v4185_v60 }
0x21cd   : > { %v4190_v13 = vld [vmem:[#allocation2] sm:$0xff] }
0x21cf   : > { %v4191_v61 = vld [vmem:[#allocation2 + $0x8] sm:$0xff] }
0x21d0   : > { %v4192_v62 = vpack.c.bf16 %v4191_v61, %v4190_v13  ;;  %v6742_v13 = vld [vmem:[%s9654_s5 + $0xc] ss:$0 sm:$0xff] }
0x21d2   : > { %7573 = vmatmul.mubr.msk.bf16.vlgmr.msra.gmra.mrb[104].mxu0 %vm328_vm1, %v4192_v62 }
0x21d3   : > { %7592 = vmatprep.mubr.msk.bf16.mxu0 %vm8185_vm0, %v8184_v1  ;;  %7589 = vmatpush3.bf16.msra.mxu0 %v7904_v47 }
0x21d4   : > { %7590 = vmatprep.subr.bf16.mxu0 %v8184_v1 }
0x21d7   : > { %7591 = vmatpush3.bf16.msra.mxu0 %v7905_v45 }
0x21d8   : > { %7608 = vmatprep.subr.bf16.mxu0 %v8184_v1 }
0x22a5   : > { %v4254_v0 = vpop.f32.mrb[104].mxu0 }
0x22a6   : > { %v9170_v36 = vadd.f32 %v4254_v0, %v9012_v51  ;;  %v7574_v2 = vpop.f32.mrb[105].mxu0 }
0x22a7   : > { %v4257_v8 = vpop.f32.mrb[106].mxu0 }
0x22a8   : > { %v9173_v3 = vadd.f32 %v4257_v8, %v9015_v56  ;;  %v7575_v32 = vpop.f32.mrb[107].mxu0  ;;  %v4265_v6 = vsel %vm328_vm1, %v9170_v36, 0.0 }
0x22a9   : > { %4266 = vadd.xlane.f32.xlu0 %v4265_v6 }
0x22aa   : > { %v4268_v9 = vsel %vm328_vm1, %v9173_v3, 0.0 }
0x22ab   : > { %4269 = vadd.xlane.f32.xlu1 %v4268_v9 }
0x2336   : > { %v4267_v10 = vpop.xlane.xlu0 %4266 }
0x2337   : > { %v4271_v12 = vmul.f32 0.015625, %v4267_v10 }
0x2338   : > { %v4270_v14 = vpop.xlane.xlu1 %4269 }
0x2339   : > { %v4273_v51 = vsub.f32 %v9170_v36, %v4271_v12  ;;  %v4272_v34 = vmul.f32 0.015625, %v4270_v14 }
0x233b   : > { %v4274_v15 = vsub.f32 %v9173_v3, %v4272_v34  ;;  %v4275_v49 = vmul.f32 %v4273_v51, %v4273_v51 }
0x233d   : > { %v4277_v56 = vsel %vm328_vm1, %v4275_v49, 0.0  ;;  %v4276_v53 = vmul.f32 %v4274_v15, %v4274_v15 }
0x233e   : > { %4278 = vadd.xlane.f32.xlu0 %v4277_v56 }
0x233f   : > { %v4280_v39 = vsel %vm328_vm1, %v4276_v53, 0.0 }
0x2342   : > { %4281 = vadd.xlane.f32.xlu0 %v4280_v39  ;;  %v7906_v39 = vld [vmem:[%s9651_s2 + $0xa0] sm:$0xff]  }
0x23cb   : > { %v4279_v25 = vpop.xlane.xlu0 %4278 }
0x23cc   : > { %v4283_v26 = vmul.f32 0.015625, %v4279_v25  ;;  %v7911_v25 = vld [vmem:[%s9651_s2 + $0xd0] sm:$0xff]  }
0x23ce   : > { %v4285_v27 = vadd.f32 1e-07, %v4283_v26  ;;  %v7912_v26 = vld [vmem:[%s9651_s2 + $0xb8] sm:$0xff]  }
0x23cf   : > { %v4282_v28 = vpop.xlane.xlu0 %4281 }
0x23d0   : > { %8094 = vrsqrt.f32 %v4285_v27  ;;  %v4284_v29 = vmul.f32 0.015625, %v4282_v28  ;;  %v7913_v27 = vld [vmem:[%s9651_s2 + $0xd8] sm:$0xff]  }
0x23d2   : > { %v4286_v30 = vadd.f32 1e-07, %v4284_v29 }
0x23d4   : > { %8096 = vrsqrt.f32 %v4286_v30 }
0x23da   : > { %v8095_v35 = vpop.eup %8094 }
0x23db   : > { %v4289_v37 = vmul.f32 %v8095_v35, %v4273_v51 }
0x23dd   : > { %v4295_v40 = vmul.f32 %v6719_v54, %v4289_v37 }
0x23de   : > { %v8097_v38 = vpop.eup %8096 }
0x23df   : > { %v4290_v42 = vmul.f32 %v8097_v38, %v4274_v15  ;;  %v4301_v7 = vadd.f32 %v6720_v43, %v4295_v40  ;;  %v6743_v40 = vld [vmem:[%s9654_s5 + $0x6] ss:$0 sm:$0xff] }
0x23e1   : > { %v4296_v44 = vmul.f32 %v6719_v54, %v4290_v42 }
0x23e3   : > { %v4302_v11 = vadd.f32 %v6720_v43, %v4296_v44  ;;  %v6744_v44 = vld [vmem:[%s9654_s5 + $0x7] ss:$0 sm:$0xff] }
0x23e5   : > { %v4312_v46 = vpack.c.bf16 %v4302_v11, %v4301_v7 }
0x23e7   : > { %7585 = vmatmul.mubr.msk.bf16.vlgmr.msra.gmra.mrb[104].mxu1 %vm328_vm1, %v4312_v46 }
0x23e8   : > { %7604 = vmatprep.mubr.msk.bf16.mxu1 %vm8185_vm0, %v8184_v1  ;;  %7597 = vmatpush3.bf16.msra.mxu1 %v7906_v39 }
0x23e9   : > { %7598 = vmatprep.subr.bf16.mxu1 %v8184_v1 }
0x23ec   : > { %7599 = vmatpush3.bf16.msra.mxu1 %v7908_v18 }
0x23ed   : > { %7600 = vmatprep.subr.bf16.mxu1 %v8184_v1 }
0x23f0   : > { %7601 = vmatpush3.bf16.msra.mxu1 %v7910_v23 }
0x23f1   : > { %7602 = vmatprep.subr.bf16.mxu1 %v8184_v1 }
0x23f4   : > { %7603 = vmatpush3.bf16.msra.mxu1 %v7912_v26 }
0x23f5   : > { %7620 = vmatprep.subr.bf16.mxu1 %v8184_v1 }
0x24ba   : > { %v4379_v52 = vpop.f32.mrb[104].mxu1 }
0x24bb   : > { %v4380_v55 = vadd.f32 %v6729_v50, %v4379_v52  ;;  %v7586_v20 = vpop.f32.mrb[105].mxu1 }
0x24bc   : > { %v4382_v21 = vpop.f32.mrb[106].mxu1 }
0x24bd   : > { %v4383_v57 = vadd.f32 %v6729_v50, %v4382_v21  ;;  %v7587_v63 = vpop.f32.mrb[107].mxu1  ;;  %v4386_v58 = vmax.f32 %v4380_v55, 0.0  ;;  %v9280_v50 = vld [vmem:[%s9650_s1 + $0x10] sm:$0xff]  ;;  %v9286_v55 = vld [vmem:[%s9650_s1 + $0x18] sm:$0xff]  ;;  %v7914_v21 = vld [vmem:[%s9651_s2 + $0xe0] sm:$0xff]  }
0x24be   : > { %v7915_v63 = vld [vmem:[%s9651_s2 + $0xe8] sm:$0xff]  }
0x24bf   : > { %v4387_v59 = vmax.f32 %v4383_v57, 0.0 }
0x24c1   : > { %v4393_v4 = vpack.c.bf16 %v4387_v59, %v4386_v58  ;;  %v7916_v58 = vld [vmem:[%s9651_s2 + $0xf0] sm:$0xff]   ;;  %v7917_v59 = vld [vmem:[%s9651_s2 + $0xf8] sm:$0xff]  }
0x24c3   : > { %7593 = vmatmul.mubr.msk.bf16.vlgmr.msra.gmra.mrb[108].mxu0 %vm1394_vm6, %v4393_v4 }
0x24c4   : > { %7616 = vmatprep.mubr.msk.bf16.mxu0 %vm8185_vm0, %v8184_v1  ;;  %7609 = vmatpush3.bf16.msra.mxu0 %v7907_v16 }
0x24c5   : > { %7610 = vmatprep.subr.bf16.mxu0 %v8184_v1 }
0x24c8   : > { %7611 = vmatpush3.bf16.msra.mxu0 %v7909_v22 }
0x24c9   : > { %7612 = vmatprep.subr.bf16.mxu0 %v8184_v1 }
0x24cc   : > { %7613 = vmatpush3.bf16.msra.mxu0 %v7911_v25 }
0x24cd   : > { %7614 = vmatprep.subr.bf16.mxu0 %v8184_v1 }
0x24d0   : > { %7615 = vmatpush3.bf16.msra.mxu0 %v7913_v27 }
0x24d1   : > { %7632 = vmatprep.subr.bf16.mxu0 %v8184_v1 }
0x2596   : > { %v4443_v60 = vpop.f32.mrb[108].mxu0 }
0x2597   : > { %v4450_v61 = vadd.f32 %v4443_v60, %v9170_v36  ;;  %v7594_v62 = vpop.f32.mrb[109].mxu0 }
0x2598   : > { %v4446_v0 = vpop.f32.mrb[110].mxu0 }
0x2599   : > { %v9226_v2 = vadd.f32 %v6742_v13, %v4450_v61  ;;  %v4451_v8 = vadd.f32 %v4446_v0, %v9173_v3  ;;  %v7595_v32 = vpop.f32.mrb[111].mxu0 }
0x259b   : > { %v9229_v6 = vadd.f32 %v6742_v13, %v4451_v8  ;;  %v4461_v9 = vsel %vm328_vm1, %v9226_v2, 0.0 }
0x259c   : > { %4462 = vadd.xlane.f32.xlu0 %v4461_v9 }
0x259d   : > { %v4464_v10 = vsel %vm328_vm1, %v9229_v6, 0.0 }
0x259e   : > { %4465 = vadd.xlane.f32.xlu1 %v4464_v10 }
0x2629   : > { %v4463_v12 = vpop.xlane.xlu0 %4462 }
0x262a   : > { %v4467_v14 = vmul.f32 0.015625, %v4463_v12 }
0x262b   : > { %v4466_v36 = vpop.xlane.xlu1 %4465 }
0x262c   : > { %v4469_v51 = vsub.f32 %v9226_v2, %v4467_v14  ;;  %v4468_v34 = vmul.f32 0.015625, %v4466_v36 }
0x262e   : > { %v4470_v15 = vsub.f32 %v9229_v6, %v4468_v34  ;;  %v4471_v3 = vmul.f32 %v4469_v51, %v4469_v51 }
0x2630   : > { %v4473_v49 = vsel %vm328_vm1, %v4471_v3, 0.0  ;;  %v4472_v56 = vmul.f32 %v4470_v15, %v4470_v15 }
0x2631   : > { %4474 = vadd.xlane.f32.xlu0 %v4473_v49 }
0x2632   : > { %v4476_v53 = vsel %vm328_vm1, %v4472_v56, 0.0 }
0x2633   : > { %4477 = vadd.xlane.f32.xlu1 %v4476_v53 }
0x26be   : > { %v4475_v28 = vpop.xlane.xlu0 %4474 }
0x26bf   : > { %v4479_v29 = vmul.f32 0.015625, %v4475_v28 }
0x26c0   : > { %v4478_v30 = vpop.xlane.xlu1 %4477 }
0x26c1   : > { %v4481_v35 = vadd.f32 1e-07, %v4479_v29  ;;  %v4480_v37 = vmul.f32 0.015625, %v4478_v30 }
0x26c3   : > { %8098 = vrsqrt.f32 %v4481_v35  ;;  %v4482_v54 = vadd.f32 1e-07, %v4480_v37 }
0x26c5   : > { %8100 = vrsqrt.f32 %v4482_v54 }
0x26cd   : > { %v8099_v38 = vpop.eup %8098 }
0x26ce   : > { %v4485_v42 = vmul.f32 %v8099_v38, %v4469_v51 }
0x26cf   : > { %v8101_v43 = vpop.eup %8100 }
0x26d0   : > { %v4491_v7 = vmul.f32 %v6743_v40, %v4485_v42  ;;  %v4486_v11 = vmul.f32 %v8101_v43, %v4470_v15 }
0x26d2   : > { %v4492_v46 = vmul.f32 %v6743_v40, %v4486_v11  ;;  %v4497_v47 = vadd.f32 %v6744_v44, %v4491_v7 }
0x26d4   : > { %v4498_v45 = vadd.f32 %v6744_v44, %v4492_v46  ;;  %v4499_v52 = vadd.f32 %v9280_v50, %v4497_v47 }
0x26d6   : > { %v4500_v20 = vadd.f32 %v9286_v55, %v4498_v45  ;;  %v4659_v4 = vpack.c.bf16 %v4498_v45, %v4497_v47 }
0x26d8   : > { %v4509_v57 = vpack.c.bf16 %v4500_v20, %v4499_v52 }
0x26da   : > { %7605 = vmatmul.mubr.msk.bf16.vlgmr.msra.gmra.mrb[108].mxu1 %vm328_vm1, %v4509_v57  ;;  %7617 = vmatmul.mubr.msk.bf16.vlgmr.msra.gmra.mrb[112].mxu0 %vm328_vm1, %v4509_v57 }
0x26db   : > { %7621 = vmatpush3.bf16.msra.mxu1 %v7914_v21  ;;  %7628 = vmatprep.mubr.msk.bf16.mxu1 %vm8185_vm0, %v8184_v1 }
0x26dc   : > { %7622 = vmatprep.subr.bf16.mxu1 %v8184_v1  ;;  %7634 = vmatprep.mubr.msk.bf16.mxu0 %vm8185_vm0, %v8184_v1 }
0x26df   : > { %7623 = vmatpush3.bf16.msra.mxu1 %v7915_v63 }
0x26e0   : > { %7624 = vmatprep.subr.bf16.mxu1 %v8184_v1 }
0x26e3   : > { %7625 = vmatpush3.bf16.msra.mxu1 %v7916_v58 }
0x26e4   : > { %7626 = vmatprep.subr.bf16.mxu1 %v8184_v1 }
0x26e7   : > { %7627 = vmatpush3.bf16.msra.mxu1 %v7917_v59 }
0x26e8   : > { %7644 = vmatprep.subr.bf16.mxu1 %v8184_v1 }
0x26ea   : > { %7629 = vmatmul.mubr.msk.bf16.vlgmr.msra.gmra.mrb[112].mxu1 %vm328_vm1, %v4659_v4 }
0x26eb   : > { %7646 = vmatprep.mubr.msk.bf16.mxu1 %vm8185_vm0, %v8184_v1 }
0x27ad   : > { %v4571_v60 = vpop.f32.mrb[108].mxu1  ;;  %v4644_v13 = vpop.f32.mrb[112].mxu0 }
0x27ae   : > { %v7606_v61 = vpop.f32.mrb[109].mxu1  ;;  %v7618_v62 = vpop.f32.mrb[113].mxu0 }
0x27af   : > { %v4574_v0 = vpop.f32.mrb[110].mxu1  ;;  %v4647_v8 = vpop.f32.mrb[114].mxu0 }
0x27b0   : > { %v4728_v32 = vpack.c.bf16 %v4574_v0, %v4571_v60  ;;  %v4729_v9 = vpack.c.bf16 %v4647_v8, %v4644_v13  ;;  %v7607_v10 = vpop.f32.mrb[111].mxu1  ;;  %v7619_v12 = vpop.f32.mrb[115].mxu0 }
0x27b2   : > { %4858 = vrot.lane.b32.xlu1 %v4728_v32, %s8186_s9  ;;  %4861 = vrot.lane.b32.xlu0 %v4729_v9, %s8186_s9  ;;  %v4743_v14 = vsel %vm656_vm2, %v4729_v9, 0 }
0x27b3   : > { %7633 = vmatpush3.bf16.xpose.msra.mxu0 %v4743_v14 }
0x27b4   : > { %7638 = vmatprep.subr.bf16.mxu0 %v8184_v1 }
0x27b6   : > { %4995 = vrot.lane.b32.xlu1 %v4729_v9, %s8187_s11  ;;  %5128 = vrot.lane.b32.xlu0 %v4729_v9, %s8188_s12 }
0x27ba   : > { %4993 = vrot.lane.b32.xlu1 %v4728_v32, %s8187_s11  ;;  %7635 = vmatmul.mubr.msk.bf16.vlgmr.msra.gmra.mrb[116].mxu0 %vm656_vm2, %v4728_v32 }
0x27bb   : > { %7640 = vmatprep.mubr.msk.bf16.mxu0 %vm8185_vm0, %v8184_v1 }
0x27bd   : > { %v4721_v36 = vpop.f32.mrb[112].mxu1 }
0x27be   : > { %v7630_v51 = vpop.f32.mrb[113].mxu1  ;;  %5126 = vrot.lane.b32.xlu1 %v4728_v32, %s8188_s12 }
0x27bf   : > { %v4724_v34 = vpop.f32.mrb[114].mxu1 }
0x27c0   : > { %v9325_v15 = vpack.c.bf16 %v4724_v34, %v4721_v36  ;;  %v7631_v3 = vpop.f32.mrb[115].mxu1 }
0x27c2   : > { %7639 = vmatpush3.bf16.msra.mxu0 %v9325_v15 }
0x27c3   : > { %7650 = vmatprep.subr.bf16.mxu0 %v8184_v1 }
0x2824   : > { %v4859_v49 = vpop.permute.xlu1 %4858  ;;  %v4862_v56 = vpop.permute.xlu0 %4861 }
0x2825   : > { %v4867_v53 = vsel %vm656_vm2, %v4862_v56, 0 }
0x2826   : > { %7645 = vmatpush3.bf16.xpose.msra.mxu1 %v4867_v53 }
0x2827   : > { %7656 = vmatprep.subr.bf16.mxu1 %v8184_v1 }
0x2828   : > { %v4996_v39 = vpop.permute.xlu1 %4995  ;;  %v5129_v18 = vpop.permute.xlu0 %5128 }
0x2829   : > { %v5001_v16 = vsel %vm656_vm2, %v4996_v39, 0  ;;  %v5134_v23 = vsel %vm656_vm2, %v5129_v18, 0 }
0x282c   : > { %v4994_v22 = vpop.permute.xlu1 %4993 }
0x282d   : > { %7647 = vmatmul.mubr.msk.bf16.vlgmr.msra.gmra.mrb[116].mxu1 %vm656_vm2, %v4859_v49 }
0x282e   : > { %7657 = vmatpush3.bf16.xpose.msra.mxu1 %v5001_v16  ;;  %7658 = vmatprep.mubr.msk.bf16.mxu1 %vm8185_vm0, %v8184_v1 }
0x282f   : > { %7668 = vmatprep.subr.bf16.mxu1 %v8184_v1 }
0x2830   : > { %v5127_v25 = vpop.permute.xlu1 %5126 }
0x2835   : > { %7659 = vmatmul.mubr.msk.bf16.vlgmr.msra.gmra.mrb[120].mxu1 %vm656_vm2, %v4994_v22 }
0x2836   : > { %7669 = vmatpush3.bf16.xpose.msra.mxu1 %v5134_v23  ;;  %7670 = vmatprep.mubr.msk.bf16.mxu1 %vm8185_vm0, %v8184_v1 }
0x2837   : > { %7680 = vmatprep.subr.bf16.mxu1 %v8184_v1 }
0x283d   : > { %7671 = vmatmul.mubr.msk.bf16.vlgmr.msra.gmra.mrb[124].mxu1 %vm656_vm2, %v5127_v25 }
0x283e   : > { %7688 = vmatprep.mubr.msk.bf16.mxu1 %vm8185_vm0, %v8184_v1 }
0x288d   : > { %v4779_v26 = vpop.f32.mrb[116].mxu0 }
0x288e   : > { %v4786_v27 = vmul.f32 0.25, %v4779_v26  ;;  %v7636_v28 = vpop.f32.mrb[117].mxu0 }
0x288f   : > { %v4782_v29 = vpop.f32.mrb[118].mxu0 }
0x2890   : > { %v4787_v30 = vmul.f32 0.25, %v4782_v29  ;;  %v7637_v35 = vpop.f32.mrb[119].mxu0  ;;  %v4788_v37 = vsel %vm656_vm2, %v4786_v27, -inf }
0x2891   : > { %4789 = vmax.xlane.f32.xlu0 %v4788_v37 }
0x2892   : > { %v4791_v54 = vsel %vm656_vm2, %v4787_v30, -inf }
0x2893   : > { %4792 = vmax.xlane.f32.xlu1 %v4791_v54 }
0x2900   : > { %v4903_v38 = vpop.f32.mrb[116].mxu1 }
0x2901   : > { %v4910_v40 = vmul.f32 0.25, %v4903_v38  ;;  %v7648_v42 = vpop.f32.mrb[117].mxu1 }
0x2902   : > { %v4906_v43 = vpop.f32.mrb[118].mxu1 }
0x2903   : > { %v4911_v44 = vmul.f32 0.25, %v4906_v43  ;;  %v7649_v7 = vpop.f32.mrb[119].mxu1  ;;  %v4912_v11 = vsel %vm656_vm2, %v4910_v40, -inf }
0x2904   : > { %4913 = vmax.xlane.f32.xlu0 %v4912_v11 }
0x2905   : > { %v4915_v46 = vsel %vm656_vm2, %v4911_v44, -inf }
0x2908   : > { %v5037_v47 = vpop.f32.mrb[120].mxu1  ;;  %4916 = vmax.xlane.f32.xlu0 %v4915_v46 }
0x2909   : > { %v5044_v45 = vmul.f32 0.25, %v5037_v47  ;;  %v7660_v52 = vpop.f32.mrb[121].mxu1 }
0x290a   : > { %v5040_v20 = vpop.f32.mrb[122].mxu1 }
0x290b   : > { %v5045_v21 = vmul.f32 0.25, %v5040_v20  ;;  %v7661_v57 = vpop.f32.mrb[123].mxu1  ;;  %v5046_v63 = vsel %vm656_vm2, %v5044_v45, -inf }
0x290c   : > { %5047 = vmax.xlane.f32.xlu0 %v5046_v63 }
0x290d   : > { %v5049_v58 = vsel %vm656_vm2, %v5045_v21, -inf }
0x290e   : > { %5050 = vmax.xlane.f32.xlu1 %v5049_v58 }
0x2910   : > { %v5170_v59 = vpop.f32.mrb[124].mxu1 }
0x2911   : > { %v5177_v4 = vmul.f32 0.25, %v5170_v59  ;;  %v7672_v60 = vpop.f32.mrb[125].mxu1 }
0x2912   : > { %v5173_v13 = vpop.f32.mrb[126].mxu1 }
0x2913   : > { %v9350_v61 = vmul.f32 0.25, %v5173_v13  ;;  %v7673_v62 = vpop.f32.mrb[127].mxu1  ;;  %v5179_v0 = vsel %vm656_vm2, %v5177_v4, -inf }
0x2914   : > { %5180 = vmax.xlane.f32.xlu0 %v5179_v0 }
0x2915   : > { %v5182_v8 = vsel %vm656_vm2, %v9350_v61, -inf }
0x2916   : > { %5183 = vmax.xlane.f32.xlu1 %v5182_v8 }
0x291e   : > { %v4790_v32 = vpop.xlane.xlu0 %4789 }
0x291f   : > { %v4794_v9 = vsub.f32 %v4786_v27, %v4790_v32 }
0x2920   : > { %v4793_v10 = vpop.xlane.xlu1 %4792 }
0x2921   : > { %v4796_v12 = vmul.f32 1.442695, %v4794_v9  ;;  %v4795_v14 = vsub.f32 %v4787_v30, %v4793_v10 }
0x2923   : > { %8102 = vpow2.f32 %v4796_v12  ;;  %v4798_v36 = vmul.f32 1.442695, %v4795_v14 }
0x2925   : > { %8104 = vpow2.f32 %v4798_v36 }
0x292d   : > { %v8103_v51 = vpop.eup %8102 }
0x292e   : > { %v4800_v34 = vsel %vm656_vm2, %v8103_v51, 0.0 }
0x292f   : > { %v8105_v3 = vpop.eup %8104  ;;  %4801 = vadd.xlane.f32.xlu0 %v4800_v34 }
0x2930   : > { %v4803_v49 = vsel %vm656_vm2, %v8105_v3, 0.0 }
0x2931   : > { %4804 = vadd.xlane.f32.xlu1 %v4803_v49 }
0x2991   : > { %v4914_v56 = vpop.xlane.xlu0 %4913 }
0x2992   : > { %v4918_v53 = vsub.f32 %v4910_v40, %v4914_v56 }
0x2994   : > { %v4920_v39 = vmul.f32 1.442695, %v4918_v53 }
0x2995   : > { %v4917_v16 = vpop.xlane.xlu0 %4916 }
0x2996   : > { %8106 = vpow2.f32 %v4920_v39  ;;  %v4919_v18 = vsub.f32 %v4911_v44, %v4917_v16 }
0x2998   : > { %v4922_v22 = vmul.f32 1.442695, %v4919_v18 }
0x2999   : > { %v5048_v23 = vpop.xlane.xlu0 %5047 }
0x299a   : > { %8108 = vpow2.f32 %v4922_v22  ;;  %v5052_v25 = vsub.f32 %v5044_v45, %v5048_v23 }
0x299b   : > { %v5051_v26 = vpop.xlane.xlu1 %5050 }
0x299c   : > { %v5054_v27 = vmul.f32 1.442695, %v5052_v25  ;;  %v5053_v28 = vsub.f32 %v5045_v21, %v5051_v26 }
0x299e   : > { %8110 = vpow2.f32 %v5054_v27  ;;  %v5056_v29 = vmul.f32 1.442695, %v5053_v28 }
0x29a0   : > { %v8107_v30 = vpop.eup %8106  ;;  %8112 = vpow2.f32 %v5056_v29 }
0x29a1   : > { %v5181_v35 = vpop.xlane.xlu0 %5180  ;;  %v4924_v37 = vsel %vm656_vm2, %v8107_v30, 0.0 }
0x29a2   : > { %v5185_v54 = vsub.f32 %v5177_v4, %v5181_v35  ;;  %4925 = vadd.xlane.f32.xlu0 %v4924_v37  ;;  %v7918_v37 = vld [vmem:[%s9651_s2 + $0x100] sm:$0xff]  }
0x29a3   : > { %v5184_v45 = vpop.xlane.xlu1 %5183  ;;  %7681 = vmatpush3.bf16.msra.mxu1 %v7918_v37  ;;  %v6805_v37 = vld [vmem:[%s9654_s5 + $0x8] ss:$0 sm:$0xff] }
0x29a4   : > { %v8109_v38 = vpop.eup %8108  ;;  %v5187_v40 = vmul.f32 1.442695, %v5185_v54  ;;  %v5186_v59 = vsub.f32 %v9350_v61, %v5184_v45  ;;  %7682 = vmatprep.subr.bf16.mxu1 %v8184_v1  ;;  %v7921_v45 = vld [vmem:[%s9651_s2 + $0x118] sm:$0xff]  }
0x29a5   : > { %v4927_v42 = vsel %vm656_vm2, %v8109_v38, 0.0 }
0x29a6   : > { %8114 = vpow2.f32 %v5187_v40  ;;  %4928 = vadd.xlane.f32.xlu1 %v4927_v42  ;;  %v5189_v60 = vmul.f32 1.442695, %v5186_v59 }
0x29a8   : > { %v8111_v43 = vpop.eup %8110 }
0x29a9   : > { %v5058_v44 = vsel %vm656_vm2, %v8111_v43, 0.0 }
0x29aa   : > { %v8113_v7 = vpop.eup %8112  ;;  %5059 = vadd.xlane.f32.xlu0 %v5058_v44  ;;  %v7920_v44 = vld [vmem:[%s9651_s2 + $0x110] sm:$0xff]  }
0x29ab   : > { %v5061_v11 = vsel %vm656_vm2, %v8113_v7, 0.0 }
0x29ac   : > { %5062 = vadd.xlane.f32.xlu1 %v5061_v11 }
0x29b0   : > { %v8115_v46 = vpop.eup %8114 }
0x29b1   : > { %v5191_v47 = vsel %vm656_vm2, %v8115_v46, 0.0 }
0x29b2   : > { %5192 = vadd.xlane.f32.xlu0 %v5191_v47 }
0x29bc   : > { %v4802_v52 = vpop.xlane.xlu0 %4801 }
0x29bd   : > { %8116 = vrcp.f32 %v4802_v52  ;;  %5069 = vrot.lane.b32.xlu1 %v9325_v15, %s8187_s11 }
0x29be   : > { %v4805_v20 = vpop.xlane.xlu1 %4804 }
0x29bf   : > { %8118 = vrcp.f32 %v4805_v20 }
0x29c0   : > { %8120 = vpow2.f32 %v5189_v60 }
0x29c7   : > { %v8117_v21 = vpop.eup %8116 }
0x29c8   : > { %4936 = vrot.lane.b32.xlu0 %v9325_v15, %s8186_s9  ;;  %v4808_v63 = vmul.f32 %v8117_v21, %v8103_v51 }
0x29c9   : > { %v8119_v57 = vpop.eup %8118 }
0x29ca   : > { %v4809_v58 = vmul.f32 %v8119_v57, %v8105_v3  ;;  %v8121_v13 = vpop.eup %8120 }
0x29cb   : > { %v5194_v62 = vsel %vm656_vm2, %v8121_v13, 0.0 }
0x29cc   : > { %v4810_v4 = vpack.c.bf16 %v4809_v58, %v4808_v63 }
0x29ce   : > { %7641 = vmatmul.mubr.msk.bf16.vlgmr.msra.gmra.mrb[120].mxu0 %vm656_vm2, %v4810_v4 }
0x29cf   : > { %7652 = vmatprep.mubr.msk.bf16.mxu0 %vm8185_vm0, %v8184_v1 }
0x29e1   : > { %5195 = vadd.xlane.f32.xlu1 %v5194_v62 }
0x29f2   : > { %5202 = vrot.lane.b32.xlu1 %v9325_v15, %s8188_s12 }
0x2a2f   : > { %v4926_v0 = vpop.xlane.xlu0 %4925 }
0x2a33   : > { %v4929_v8 = vpop.xlane.xlu1 %4928 }
0x2a34   : > { %8122 = vrcp.f32 %v4929_v8 }
0x2a35   : > { %8124 = vrcp.f32 %v4926_v0 }
0x2a37   : > { %v5060_v32 = vpop.xlane.xlu0 %5059 }
0x2a39   : > { %v5063_v61 = vpop.xlane.xlu1 %5062 }
0x2a3a   : > { %8126 = vrcp.f32 %v5063_v61 }
0x2a3b   : > { %8128 = vrcp.f32 %v5060_v32 }
0x2a3d   : > { %v5070_v15 = vpop.permute.xlu1 %5069 }
0x2a3e   : > { %v8123_v9 = vpop.eup %8122 }
0x2a3f   : > { %v5193_v10 = vpop.xlane.xlu0 %5192  ;;  %v8125_v12 = vpop.eup %8124  ;;  %v4933_v14 = vmul.f32 %v8123_v9, %v8109_v38  ;;  %v7919_v38 = vld [vmem:[%s9651_s2 + $0x108] sm:$0xff]  }
0x2a40   : > { %v4932_v36 = vmul.f32 %v8125_v12, %v8107_v30  ;;  %8130 = vrcp.f32 %v5193_v10  ;;  %7683 = vmatpush3.bf16.msra.mxu1 %v7919_v38 }
0x2a41   : > { %7684 = vmatprep.subr.bf16.mxu1 %v8184_v1 }
0x2a42   : > { %v4934_v34 = vpack.c.bf16 %v4933_v14, %v4932_v36 }
0x2a43   : > { %v4937_v51 = vpop.permute.xlu0 %4936 }
0x2a44   : > { %7651 = vmatpush3.bf16.msra.mxu0 %v4937_v51  ;;  %v8127_v3 = vpop.eup %8126  ;;  %7685 = vmatpush3.bf16.msra.mxu1 %v7920_v44 }
0x2a45   : > { %7662 = vmatprep.subr.bf16.mxu0 %v8184_v1  ;;  %v8129_v49 = vpop.eup %8128  ;;  %v5067_v56 = vmul.f32 %v8127_v3, %v8113_v7  ;;  %7686 = vmatprep.subr.bf16.mxu1 %v8184_v1 }
0x2a46   : > { %v5066_v53 = vmul.f32 %v8129_v49, %v8111_v43 }
0x2a47   : > { %7653 = vmatmul.mubr.msk.bf16.vlgmr.msra.gmra.mrb[124].mxu0 %vm656_vm2, %v4934_v34 }
0x2a48   : > { %7663 = vmatpush3.bf16.msra.mxu0 %v5070_v15  ;;  %7664 = vmatprep.mubr.msk.bf16.mxu0 %vm8185_vm0, %v8184_v1  ;;  %v5068_v39 = vpack.c.bf16 %v5067_v56, %v5066_v53 }
0x2a49   : > { %7674 = vmatprep.subr.bf16.mxu0 %v8184_v1  ;;  %7687 = vmatpush3.bf16.msra.mxu1 %v7921_v45 }
0x2a4a   : > { %v8131_v22 = vpop.eup %8130  ;;  %7704 = vmatprep.subr.bf16.mxu1 %v8184_v1 }
0x2a4b   : > { %v5199_v25 = vmul.f32 %v8131_v22, %v8115_v46  ;;  %v7924_v22 = vld [vmem:[%s9651_s2 + $0x130] sm:$0xff]  }
0x2a4f   : > { %7665 = vmatmul.mubr.msk.bf16.vlgmr.msra.gmra.mrb[128].mxu0 %vm656_vm2, %v5068_v39 }
0x2a50   : > { %7676 = vmatprep.mubr.msk.bf16.mxu0 %vm8185_vm0, %v8184_v1 }
0x2a6e   : > { %v5196_v16 = vpop.xlane.xlu1 %5195 }
0x2a6f   : > { %8132 = vrcp.f32 %v5196_v16  ;;  %v7922_v16 = vld [vmem:[%s9651_s2 + $0x120] sm:$0xff]  }
0x2a72   : > { %v5203_v18 = vpop.permute.xlu1 %5202 }
0x2a73   : > { %7675 = vmatpush3.bf16.msra.mxu0 %v5203_v18  ;;  %v7923_v18 = vld [vmem:[%s9651_s2 + $0x128] sm:$0xff]  }
0x2a74   : > { %7692 = vmatprep.subr.bf16.mxu0 %v8184_v1 }
0x2a79   : > { %v8133_v23 = vpop.eup %8132 }
0x2a7a   : > { %v5200_v26 = vmul.f32 %v8133_v23, %v8121_v13  ;;  %v7925_v23 = vld [vmem:[%s9651_s2 + $0x138] sm:$0xff]  }
0x2a7c   : > { %v5201_v27 = vpack.c.bf16 %v5200_v26, %v5199_v25 }
0x2a7e   : > { %7677 = vmatmul.mubr.msk.bf16.vlgmr.msra.gmra.mrb[132].mxu0 %vm656_vm2, %v5201_v27 }
0x2a7f   : > { %7700 = vmatprep.mubr.msk.bf16.mxu0 %vm8185_vm0, %v8184_v1  ;;  %7693 = vmatpush3.bf16.msra.mxu0 %v7922_v16 }
0x2a80   : > { %7694 = vmatprep.subr.bf16.mxu0 %v8184_v1 }
0x2a83   : > { %7695 = vmatpush3.bf16.msra.mxu0 %v7923_v18 }
0x2a84   : > { %7696 = vmatprep.subr.bf16.mxu0 %v8184_v1 }
0x2a87   : > { %7697 = vmatpush3.bf16.msra.mxu0 %v7924_v22 }
0x2a88   : > { %7698 = vmatprep.subr.bf16.mxu0 %v8184_v1 }
0x2a8b   : > { %7699 = vmatpush3.bf16.msra.mxu0 %v7925_v23 }
0x2a8c   : > { %7710 = vmatprep.subr.bf16.mxu0 %v8184_v1 }
0x2aa1   : > { %v4848_v28 = vpop.f32.mrb[120].mxu0 }
0x2aa2   : > { %4855 = vst.msk [vmem:[#allocation2] sm:$0xff] %vm656_vm2, %v4848_v28  ;;  %v7642_v29 = vpop.f32.mrb[121].mxu0 }
0x2aa3   : > { %v4851_v30 = vpop.f32.mrb[122].mxu0 }
0x2aa4   : > { %4856 = vst.msk [vmem:[#allocation2 + $0x8] sm:$0xff] %vm656_vm2, %v4851_v30  ;;  %v7643_v35 = vpop.f32.mrb[123].mxu0 }
0x2b1a   : > { %v4976_v54 = vpop.f32.mrb[124].mxu0 }
0x2b1b   : > { %4985 = vrot.lane.b32.xlu1 %v4976_v54, %s8189_s15  ;;  %v7654_v40 = vpop.f32.mrb[125].mxu0 }
0x2b1c   : > { %v4979_v42 = vpop.f32.mrb[126].mxu0 }
0x2b1d   : > { %4987 = vrot.lane.b32.xlu0 %v4979_v42, %s8189_s15  ;;  %v7655_v43 = vpop.f32.mrb[127].mxu0  ;;  %v6806_v42 = vld [vmem:[%s9654_s5 + $0x9] ss:$0 sm:$0xff] }
0x2b22   : > { %v5109_v7 = vpop.f32.mrb[128].mxu0 }
0x2b23   : > { %5118 = vrot.lane.b32.xlu1 %v5109_v7, %s8190_s16  ;;  %v7666_v11 = vpop.f32.mrb[129].mxu0 }
0x2b24   : > { %v5112_v46 = vpop.f32.mrb[130].mxu0 }
0x2b25   : > { %5120 = vrot.lane.b32.xlu0 %v5112_v46, %s8190_s16  ;;  %v7667_v47 = vpop.f32.mrb[131].mxu0 }
0x2b51   : > { %v5242_v52 = vpop.f32.mrb[132].mxu0 }
0x2b52   : > { %5251 = vrot.lane.b32.xlu1 %v5242_v52, %s8191_s23  ;;  %v7678_v20 = vpop.f32.mrb[133].mxu0 }
0x2b53   : > { %v5245_v21 = vpop.f32.mrb[134].mxu0 }
0x2b54   : > { %5253 = vrot.lane.b32.xlu0 %v5245_v21, %s8191_s23  ;;  %v7679_v57 = vpop.f32.mrb[135].mxu0 }
0x2b8d   : > { %v4986_v63 = vpop.permute.xlu1 %4985 }
0x2b8e   : > { %4991 = vst.msk [vmem:[#allocation2] sm:$0xff] %vm909_vm3, %v4986_v63 }
0x2b8f   : > { %v4988_v58 = vpop.permute.xlu0 %4987 }
0x2b90   : > { %4992 = vst.msk [vmem:[#allocation2 + $0x8] sm:$0xff] %vm909_vm3, %v4988_v58 }
0x2b95   : > { %v5119_v59 = vpop.permute.xlu1 %5118 }
0x2b96   : > { %5124 = vst.msk [vmem:[#allocation2] sm:$0xff] %vm1043_vm4, %v5119_v59 }
0x2b97   : > { %v5121_v4 = vpop.permute.xlu0 %5120 }
0x2b98   : > { %5125 = vst.msk [vmem:[#allocation2 + $0x8] sm:$0xff] %vm1043_vm4, %v5121_v4 }
0x2bc4   : > { %v5252_v60 = vpop.permute.xlu1 %5251 }
0x2bc5   : > { %5257 = vst.msk [vmem:[#allocation2] sm:$0xff] %vm1177_vm5, %v5252_v60 }
0x2bc6   : > { %v5254_v13 = vpop.permute.xlu0 %5253 }
0x2bc7   : > { %5258 = vst.msk [vmem:[#allocation2 + $0x8] sm:$0xff] %vm1177_vm5, %v5254_v13 }
0x2bcc   : > { %v5259_v62 = vld [vmem:[#allocation2] sm:$0xff] }
0x2bce   : > { %v5260_v0 = vld [vmem:[#allocation2 + $0x8] sm:$0xff] }
0x2bcf   : > { %v5261_v8 = vpack.c.bf16 %v5260_v0, %v5259_v62 }
0x2bd1   : > { %7689 = vmatmul.mubr.msk.bf16.vlgmr.msra.gmra.mrb[128].mxu1 %vm328_vm1, %v5261_v8 }
0x2bd2   : > { %7705 = vmatpush3.bf16.xpose.msra.mxu1 %v9005_v48  ;;  %7706 = vmatprep.mubr.msk.bf16.mxu1 %vm8185_vm0, %v8184_v1 }
0x2bd3   : > { %7716 = vmatprep.subr.bf16.mxu1 %v8184_v1 }
0x2ca4   : > { %v5323_v61 = vpop.f32.mrb[128].mxu1 }
0x2ca5   : > { %v9421_v32 = vadd.f32 %v5323_v61, %v9226_v2  ;;  %v7690_v9 = vpop.f32.mrb[129].mxu1 }
0x2ca6   : > { %v5326_v10 = vpop.f32.mrb[130].mxu1 }
0x2ca7   : > { %v9424_v12 = vadd.f32 %v5326_v10, %v9229_v6  ;;  %v7691_v14 = vpop.f32.mrb[131].mxu1  ;;  %v5334_v36 = vsel %vm328_vm1, %v9421_v32, 0.0 }
0x2ca8   : > { %5335 = vadd.xlane.f32.xlu1 %v5334_v36 }
0x2ca9   : > { %v5337_v48 = vsel %vm328_vm1, %v9424_v12, 0.0 }
0x2caa   : > { %5338 = vadd.xlane.f32.xlu0 %v5337_v48 }
0x2d35   : > { %v5336_v51 = vpop.xlane.xlu1 %5335 }
0x2d36   : > { %v5340_v34 = vmul.f32 0.015625, %v5336_v51 }
0x2d37   : > { %v5339_v3 = vpop.xlane.xlu0 %5338 }
0x2d38   : > { %v5342_v2 = vsub.f32 %v9421_v32, %v5340_v34  ;;  %v5341_v15 = vmul.f32 0.015625, %v5339_v3 }
0x2d3a   : > { %v5343_v49 = vsub.f32 %v9424_v12, %v5341_v15  ;;  %v5344_v56 = vmul.f32 %v5342_v2, %v5342_v2 }
0x2d3c   : > { %v5346_v6 = vsel %vm328_vm1, %v5344_v56, 0.0  ;;  %v5345_v53 = vmul.f32 %v5343_v49, %v5343_v49 }
0x2d3d   : > { %5347 = vadd.xlane.f32.xlu0 %v5346_v6 }
0x2d3e   : > { %v5349_v39 = vsel %vm328_vm1, %v5345_v53, 0.0 }
0x2d41   : > { %5350 = vadd.xlane.f32.xlu0 %v5349_v39 }
0x2dca   : > { %v5348_v25 = vpop.xlane.xlu0 %5347 }
0x2dcb   : > { %v5352_v26 = vmul.f32 0.015625, %v5348_v25 }
0x2dcd   : > { %v5354_v27 = vadd.f32 1e-07, %v5352_v26 }
0x2dce   : > { %v5351_v28 = vpop.xlane.xlu0 %5350 }
0x2dcf   : > { %8134 = vrsqrt.f32 %v5354_v27  ;;  %v5353_v29 = vmul.f32 0.015625, %v5351_v28 }
0x2dd1   : > { %v5355_v30 = vadd.f32 1e-07, %v5353_v29 }
0x2dd3   : > { %8136 = vrsqrt.f32 %v5355_v30 }
0x2dd9   : > { %v8135_v35 = vpop.eup %8134 }
0x2dda   : > { %v5358_v54 = vmul.f32 %v8135_v35, %v5342_v2 }
0x2ddc   : > { %v5364_v38 = vmul.f32 %v6805_v37, %v5358_v54 }
0x2ddd   : > { %v8137_v40 = vpop.eup %8136 }
0x2dde   : > { %v5359_v43 = vmul.f32 %v8137_v40, %v5343_v49  ;;  %v5370_v7 = vadd.f32 %v6806_v42, %v5364_v38 }
0x2de0   : > { %v5365_v44 = vmul.f32 %v6805_v37, %v5359_v43  ;;  %v5372_v46 = vadd.f32 %v9280_v50, %v5370_v7 }
0x2de2   : > { %v5371_v11 = vadd.f32 %v6806_v42, %v5365_v44 }
0x2de4   : > { %v5373_v47 = vadd.f32 %v9286_v55, %v5371_v11 }
0x2de6   : > { %v5382_v45 = vpack.c.bf16 %v5373_v47, %v5372_v46 }
0x2de8   : > { %7701 = vmatmul.mubr.msk.bf16.vlgmr.msra.gmra.mrb[136].mxu0 %vm328_vm1, %v5382_v45 }
0x2de9   : > { %7711 = vmatpush3.bf16.msra.mxu0 %v8856_v33  ;;  %7712 = vmatprep.mubr.msk.bf16.mxu0 %vm8185_vm0, %v8184_v1 }
0x2dea   : > { %7722 = vmatprep.subr.bf16.mxu0 %v8184_v1 }
0x2ebb   : > { %v5444_v52 = vpop.f32.mrb[136].mxu0 }
0x2ebc   : > { %v7702_v20 = vpop.f32.mrb[137].mxu0 }
0x2ebd   : > { %v5447_v21 = vpop.f32.mrb[138].mxu0 }
0x2ebe   : > { %v5451_v57 = vpack.c.bf16 %v5447_v21, %v5444_v52  ;;  %v7703_v63 = vpop.f32.mrb[139].mxu0 }
0x2ec0   : > { %5701 = vrot.lane.b32.xlu0 %v5451_v57, %s8187_s11  ;;  %5576 = vrot.lane.b32.xlu1 %v5451_v57, %s8186_s9 }
0x2ec1   : > { %7707 = vmatmul.mubr.msk.bf16.vlgmr.msra.gmra.mrb[132].mxu1 %vm656_vm2, %v5451_v57 }
0x2ec2   : > { %7717 = vmatpush3.bf16.xpose.msra.mxu1 %v9061_v19  ;;  %7718 = vmatprep.mubr.msk.bf16.mxu1 %vm8185_vm0, %v8184_v1 }
0x2ec3   : > { %7728 = vmatprep.subr.bf16.mxu1 %v8184_v1 }
0x2ec4   : > { %5826 = vrot.lane.b32.xlu1 %v5451_v57, %s8188_s12 }
0x2f32   : > { %v5577_v33 = vpop.permute.xlu1 %5576  ;;  %v5702_v50 = vpop.permute.xlu0 %5701 }
0x2f33   : > { %7719 = vmatmul.mubr.msk.bf16.vlgmr.msra.gmra.mrb[136].mxu1 %vm656_vm2, %v5577_v33 }
0x2f34   : > { %7729 = vmatpush3.bf16.xpose.msra.mxu1 %v9072_v41  ;;  %7730 = vmatprep.mubr.msk.bf16.mxu1 %vm8185_vm0, %v8184_v1 }
0x2f35   : > { %7740 = vmatprep.subr.bf16.mxu1 %v8184_v1 }
0x2f36   : > { %v5827_v19 = vpop.permute.xlu1 %5826 }
0x2f3b   : > { %7731 = vmatmul.mubr.msk.bf16.vlgmr.msra.gmra.mrb[140].mxu1 %vm656_vm2, %v5702_v50 }
0x2f3c   : > { %7741 = vmatpush3.bf16.xpose.msra.mxu1 %v9080_v31  ;;  %7742 = vmatprep.mubr.msk.bf16.mxu1 %vm8185_vm0, %v8184_v1 }
0x2f3d   : > { %7752 = vmatprep.subr.bf16.mxu1 %v8184_v1 }
0x2f43   : > { %7743 = vmatmul.mubr.msk.bf16.vlgmr.msra.gmra.mrb[144].mxu1 %vm656_vm2, %v5827_v19 }
0x2f44   : > { %7760 = vmatprep.mubr.msk.bf16.mxu1 %vm8185_vm0, %v8184_v1 }
0x2f94   : > { %v5497_v41 = vpop.f32.mrb[132].mxu1 }
0x2f95   : > { %v5504_v55 = vmul.f32 0.25, %v5497_v41  ;;  %v7708_v58 = vpop.f32.mrb[133].mxu1 }
0x2f96   : > { %v5500_v59 = vpop.f32.mrb[134].mxu1 }
0x2f97   : > { %v5505_v4 = vmul.f32 0.25, %v5500_v59  ;;  %v7709_v60 = vpop.f32.mrb[135].mxu1  ;;  %v5506_v13 = vsel %vm656_vm2, %v5504_v55, -inf }
0x2f98   : > { %5507 = vmax.xlane.f32.xlu1 %v5506_v13 }
0x2f99   : > { %v5509_v31 = vsel %vm656_vm2, %v5505_v4, -inf }
0x2f9a   : > { %5510 = vmax.xlane.f32.xlu0 %v5509_v31 }
0x3006   : > { %v5615_v62 = vpop.f32.mrb[136].mxu1 }
0x3007   : > { %v5622_v0 = vmul.f32 0.25, %v5615_v62  ;;  %v7720_v8 = vpop.f32.mrb[137].mxu1 }
0x3008   : > { %v5618_v61 = vpop.f32.mrb[138].mxu1 }
0x3009   : > { %v5623_v9 = vmul.f32 0.25, %v5618_v61  ;;  %v7721_v10 = vpop.f32.mrb[139].mxu1  ;;  %v5624_v14 = vsel %vm656_vm2, %v5622_v0, -inf }
0x300a   : > { %5625 = vmax.xlane.f32.xlu0 %v5624_v14 }
0x300b   : > { %v5627_v36 = vsel %vm656_vm2, %v5623_v9, -inf }
0x300c   : > { %5628 = vmax.xlane.f32.xlu1 %v5627_v36 }
0x300e   : > { %v5740_v48 = vpop.f32.mrb[140].mxu1 }
0x300f   : > { %v5747_v51 = vmul.f32 0.25, %v5740_v48  ;;  %v7732_v34 = vpop.f32.mrb[141].mxu1 }
0x3010   : > { %v5743_v3 = vpop.f32.mrb[142].mxu1 }
0x3011   : > { %v5748_v2 = vmul.f32 0.25, %v5743_v3  ;;  %v7733_v15 = vpop.f32.mrb[143].mxu1  ;;  %v5749_v49 = vsel %vm656_vm2, %v5747_v51, -inf }
0x3012   : > { %5750 = vmax.xlane.f32.xlu0 %v5749_v49 }
0x3013   : > { %v5752_v56 = vsel %vm656_vm2, %v5748_v2, -inf }
0x3014   : > { %5753 = vmax.xlane.f32.xlu1 %v5752_v56 }
0x3016   : > { %v5865_v6 = vpop.f32.mrb[144].mxu1 }
0x3017   : > { %v5872_v53 = vmul.f32 0.25, %v5865_v6  ;;  %v7744_v39 = vpop.f32.mrb[145].mxu1 }
0x3018   : > { %v5868_v16 = vpop.f32.mrb[146].mxu1 }
0x3019   : > { %v5873_v18 = vmul.f32 0.25, %v5868_v16  ;;  %v7745_v22 = vpop.f32.mrb[147].mxu1  ;;  %v5874_v23 = vsel %vm656_vm2, %v5872_v53, -inf }
0x301a   : > { %5875 = vmax.xlane.f32.xlu0 %v5874_v23 }
0x301b   : > { %v5877_v25 = vsel %vm656_vm2, %v5873_v18, -inf }
0x301c   : > { %5878 = vmax.xlane.f32.xlu1 %v5877_v25 }
0x3025   : > { %v5508_v26 = vpop.xlane.xlu1 %5507 }
0x3026   : > { %v5512_v27 = vsub.f32 %v5504_v55, %v5508_v26 }
0x3027   : > { %v5511_v28 = vpop.xlane.xlu0 %5510 }
0x3028   : > { %v5514_v29 = vmul.f32 1.442695, %v5512_v27  ;;  %v5513_v30 = vsub.f32 %v5505_v4, %v5511_v28 }
0x302a   : > { %8138 = vpow2.f32 %v5514_v29  ;;  %v5516_v35 = vmul.f32 1.442695, %v5513_v30 }
0x302c   : > { %8140 = vpow2.f32 %v5516_v35 }
0x3034   : > { %v8139_v37 = vpop.eup %8138 }
0x3035   : > { %v5518_v54 = vsel %vm656_vm2, %v8139_v37, 0.0 }
0x3036   : > { %v8141_v38 = vpop.eup %8140  ;;  %5519 = vadd.xlane.f32.xlu0 %v5518_v54 }
0x3037   : > { %v5521_v40 = vsel %vm656_vm2, %v8141_v38, 0.0 }
0x3038   : > { %5522 = vadd.xlane.f32.xlu1 %v5521_v40 }
0x3097   : > { %v5626_v42 = vpop.xlane.xlu0 %5625 }
0x3098   : > { %v5630_v43 = vsub.f32 %v5622_v0, %v5626_v42 }
0x3099   : > { %v5629_v44 = vpop.xlane.xlu1 %5628 }
0x309a   : > { %v5632_v7 = vmul.f32 1.442695, %v5630_v43  ;;  %v5631_v11 = vsub.f32 %v5623_v9, %v5629_v44  ;;  %v7926_v44 = vld [vmem:[%s9651_s2 + $0x180] sm:$0xff]  }
0x309b   : > { %7753 = vmatpush3.bf16.msra.mxu1 %v7926_v44  ;;  %v7934_v44 = vld [vmem:[%s9653_s4 + $0x10] sm:$0xff]  }
0x309c   : > { %8142 = vpow2.f32 %v5632_v7  ;;  %v5634_v46 = vmul.f32 1.442695, %v5631_v11  ;;  %7754 = vmatprep.subr.bf16.mxu1 %v8184_v1 }
0x309e   : > { %8144 = vpow2.f32 %v5634_v46 }
0x309f   : > { %v5751_v47 = vpop.xlane.xlu0 %5750 }
0x30a0   : > { %v5755_v45 = vsub.f32 %v5747_v51, %v5751_v47  ;;  %v7927_v47 = vld [vmem:[%s9651_s2 + $0x188] sm:$0xff]  }
0x30a1   : > { %v5754_v52 = vpop.xlane.xlu1 %5753  ;;  %7755 = vmatpush3.bf16.msra.mxu1 %v7927_v47  ;;  %v6851_v47 = vld [vmem:[%s9655_s6 + $0x1] ss:$0 sm:$0xff] }
0x30a2   : > { %v5757_v20 = vmul.f32 1.442695, %v5755_v45  ;;  %v5756_v21 = vsub.f32 %v5748_v2, %v5754_v52  ;;  %v7928_v45 = vld [vmem:[%s9651_s2 + $0x190] sm:$0xff]   ;;  %7756 = vmatprep.subr.bf16.mxu1 %v8184_v1 }
0x30a4   : > { %8146 = vpow2.f32 %v5757_v20  ;;  %v5759_v57 = vmul.f32 1.442695, %v5756_v21 }
0x30a5   : > { %7757 = vmatpush3.bf16.msra.mxu1 %v7928_v45 }
0x30a6   : > { %v8143_v63 = vpop.eup %8142  ;;  %8148 = vpow2.f32 %v5759_v57  ;;  %v7929_v57 = vld [vmem:[%s9651_s2 + $0x198] sm:$0xff]   ;;  %7758 = vmatprep.subr.bf16.mxu1 %v8184_v1 }
0x30a7   : > { %v5876_v33 = vpop.xlane.xlu0 %5875  ;;  %v5636_v50 = vsel %vm656_vm2, %v8143_v63, 0.0 }
0x30a8   : > { %v8145_v19 = vpop.eup %8144  ;;  %v5880_v41 = vsub.f32 %v5872_v53, %v5876_v33  ;;  %5637 = vadd.xlane.f32.xlu0 %v5636_v50 }
0x30a9   : > { %v5879_v55 = vpop.xlane.xlu1 %5878  ;;  %v5639_v58 = vsel %vm656_vm2, %v8145_v19, 0.0  ;;  %7759 = vmatpush3.bf16.msra.mxu1 %v7929_v57 }
0x30aa   : > { %v5882_v59 = vmul.f32 1.442695, %v5880_v41  ;;  %v5881_v4 = vsub.f32 %v5873_v18, %v5879_v55  ;;  %5640 = vadd.xlane.f32.xlu1 %v5639_v58  ;;  %7776 = vmatprep.subr.bf16.mxu1 %v8184_v1 }
0x30ac   : > { %8150 = vpow2.f32 %v5882_v59  ;;  %v5884_v60 = vmul.f32 1.442695, %v5881_v4 }
0x30ae   : > { %v8147_v13 = vpop.eup %8146  ;;  %8152 = vpow2.f32 %v5884_v60 }
0x30af   : > { %v5761_v31 = vsel %vm656_vm2, %v8147_v13, 0.0 }
0x30b0   : > { %v8149_v62 = vpop.eup %8148  ;;  %5762 = vadd.xlane.f32.xlu0 %v5761_v31 }
0x30b1   : > { %v5764_v0 = vsel %vm656_vm2, %v8149_v62, 0.0 }
0x30b2   : > { %5765 = vadd.xlane.f32.xlu1 %v5764_v0 }
0x30b6   : > { %v8151_v8 = vpop.eup %8150 }
0x30b7   : > { %v5886_v61 = vsel %vm656_vm2, %v8151_v8, 0.0 }
0x30b8   : > { %v8153_v9 = vpop.eup %8152  ;;  %5887 = vadd.xlane.f32.xlu0 %v5886_v61 }
0x30b9   : > { %v5889_v10 = vsel %vm656_vm2, %v8153_v9, 0.0 }
0x30ba   : > { %5890 = vadd.xlane.f32.xlu1 %v5889_v10 }
0x30c3   : > { %v5520_v14 = vpop.xlane.xlu0 %5519 }
0x30c4   : > { %8154 = vrcp.f32 %v5520_v14 }
0x30c5   : > { %v5523_v36 = vpop.xlane.xlu1 %5522 }
0x30c6   : > { %8156 = vrcp.f32 %v5523_v36 }
0x30ce   : > { %v8155_v48 = vpop.eup %8154 }
0x30cf   : > { %v5526_v34 = vmul.f32 %v8155_v48, %v8139_v37 }
0x30d0   : > { %v8157_v51 = vpop.eup %8156 }
0x30d1   : > { %v5527_v3 = vmul.f32 %v8157_v51, %v8141_v38 }
0x30d3   : > { %v5528_v2 = vpack.c.bf16 %v5527_v3, %v5526_v34 }
0x30d5   : > { %7713 = vmatmul.mubr.msk.bf16.vlgmr.msra.gmra.mrb[140].mxu0 %vm656_vm2, %v5528_v2 }
0x30d6   : > { %7723 = vmatpush3.bf16.msra.mxu0 %v9112_v5  ;;  %7724 = vmatprep.mubr.msk.bf16.mxu0 %vm8185_vm0, %v8184_v1 }
0x30d7   : > { %7734 = vmatprep.subr.bf16.mxu0 %v8184_v1 }
0x3135   : > { %v5638_v15 = vpop.xlane.xlu0 %5637 }
0x3136   : > { %8158 = vrcp.f32 %v5638_v15 }
0x3137   : > { %v5641_v49 = vpop.xlane.xlu1 %5640 }
0x3138   : > { %8160 = vrcp.f32 %v5641_v49 }
0x313d   : > { %v5763_v56 = vpop.xlane.xlu0 %5762 }
0x313e   : > { %8162 = vrcp.f32 %v5763_v56 }
0x313f   : > { %v5766_v6 = vpop.xlane.xlu1 %5765 }
0x3140   : > { %v8159_v53 = vpop.eup %8158  ;;  %8164 = vrcp.f32 %v5766_v6 }
0x3141   : > { %v5644_v16 = vmul.f32 %v8159_v53, %v8143_v63 }
0x3142   : > { %v8161_v39 = vpop.eup %8160 }
0x3143   : > { %v5645_v18 = vmul.f32 %v8161_v39, %v8145_v19  ;;  %v7930_v39 = vld [vmem:[%s9652_s3 + $0x20] sm:$0xff]  }
0x3145   : > { %v5888_v22 = vpop.xlane.xlu0 %5887  ;;  %v5646_v23 = vpack.c.bf16 %v5645_v18, %v5644_v16  ;;  %v7931_v16 = vld [vmem:[%s9652_s3 + $0x28] sm:$0xff]   ;;  %v7932_v18 = vld [vmem:[%s9652_s3 + $0x30] sm:$0xff]  }
0x3146   : > { %8166 = vrcp.f32 %v5888_v22  ;;  %v7933_v22 = vld [vmem:[%s9652_s3 + $0x38] sm:$0xff]  }
0x3147   : > { %7725 = vmatmul.mubr.msk.bf16.vlgmr.msra.gmra.mrb[144].mxu0 %vm656_vm2, %v5646_v23  ;;  %v5891_v5 = vpop.xlane.xlu1 %5890 }
0x3148   : > { %v8163_v25 = vpop.eup %8162  ;;  %7735 = vmatpush3.bf16.msra.mxu0 %v9122_v17  ;;  %8168 = vrcp.f32 %v5891_v5  ;;  %7736 = vmatprep.mubr.msk.bf16.mxu0 %vm8185_vm0, %v8184_v1 }
0x3149   : > { %7746 = vmatprep.subr.bf16.mxu0 %v8184_v1  ;;  %v5769_v27 = vmul.f32 %v8163_v25, %v8147_v13 }
0x314a   : > { %v8165_v26 = vpop.eup %8164 }
0x314b   : > { %v5770_v28 = vmul.f32 %v8165_v26, %v8149_v62 }
0x314d   : > { %v5771_v29 = vpack.c.bf16 %v5770_v28, %v5769_v27 }
0x314f   : > { %7737 = vmatmul.mubr.msk.bf16.vlgmr.msra.gmra.mrb[148].mxu0 %vm656_vm2, %v5771_v29 }
0x3150   : > { %v8167_v30 = vpop.eup %8166  ;;  %7747 = vmatpush3.bf16.msra.mxu0 %v9126_v24  ;;  %7748 = vmatprep.mubr.msk.bf16.mxu0 %vm8185_vm0, %v8184_v1 }
0x3151   : > { %7764 = vmatprep.subr.bf16.mxu0 %v8184_v1  ;;  %v5894_v35 = vmul.f32 %v8167_v30, %v8151_v8 }
0x3152   : > { %v8169_v17 = vpop.eup %8168 }
0x3153   : > { %v5895_v37 = vmul.f32 %v8169_v17, %v8153_v9  ;;  %v6841_v17 = vld [vmem:[%s9654_s5 + $0xa] ss:$0 sm:$0xff] }
0x3155   : > { %v5896_v54 = vpack.c.bf16 %v5895_v37, %v5894_v35 }
0x3157   : > { %7749 = vmatmul.mubr.msk.bf16.vlgmr.msra.gmra.mrb[152].mxu0 %vm656_vm2, %v5896_v54 }
0x3158   : > { %7772 = vmatprep.mubr.msk.bf16.mxu0 %vm8185_vm0, %v8184_v1  ;;  %7765 = vmatpush3.bf16.msra.mxu0 %v7930_v39 }
0x3159   : > { %7766 = vmatprep.subr.bf16.mxu0 %v8184_v1 }
0x315c   : > { %7767 = vmatpush3.bf16.msra.mxu0 %v7931_v16 }
0x315d   : > { %7768 = vmatprep.subr.bf16.mxu0 %v8184_v1 }
0x3160   : > { %7769 = vmatpush3.bf16.msra.mxu0 %v7932_v18 }
0x3161   : > { %7770 = vmatprep.subr.bf16.mxu0 %v8184_v1 }
0x3164   : > { %7771 = vmatpush3.bf16.msra.mxu0 %v7933_v22 }
0x3165   : > { %7784 = vmatprep.subr.bf16.mxu0 %v8184_v1 }
0x31a8   : > { %v5566_v38 = vpop.f32.mrb[140].mxu0 }
0x31a9   : > { %5573 = vst.msk [vmem:[#allocation2] sm:$0xff] %vm656_vm2, %v5566_v38  ;;  %v7714_v40 = vpop.f32.mrb[141].mxu0  ;;  %v6842_v38 = vld [vmem:[%s9654_s5 + $0xb] ss:$0 sm:$0xff] }
0x31aa   : > { %v5569_v42 = vpop.f32.mrb[142].mxu0 }
0x31ab   : > { %5574 = vst.msk [vmem:[#allocation2 + $0x8] sm:$0xff] %vm656_vm2, %v5569_v42  ;;  %v7715_v24 = vpop.f32.mrb[143].mxu0 }
0x321a   : > { %v5684_v43 = vpop.f32.mrb[144].mxu0 }
0x321b   : > { %5693 = vrot.lane.b32.xlu0 %v5684_v43, %s8189_s15  ;;  %v7726_v7 = vpop.f32.mrb[145].mxu0 }
0x321c   : > { %v5687_v11 = vpop.f32.mrb[146].mxu0  ;;  %v7935_v7 = vld [vmem:[%s9653_s4 + $0x18] sm:$0xff]  }
0x321d   : > { %5695 = vrot.lane.b32.xlu1 %v5687_v11, %s8189_s15  ;;  %v7727_v46 = vpop.f32.mrb[147].mxu0  ;;  %v7936_v11 = vld [vmem:[%s9652_s3 + $0x40] sm:$0xff]   ;;  %s280_s15 = scalar_lea.vmem %s9656_s7, %s6436_s10 }
0x321e   : > { %v7937_v46 = vld [vmem:[%s9652_s3 + $0x48] sm:$0xff]  }
0x3222   : > { %v5809_v52 = vpop.f32.mrb[148].mxu0 }
0x3223   : > { %5818 = vrot.lane.b32.xlu1 %v5809_v52, %s8190_s16  ;;  %v7738_v20 = vpop.f32.mrb[149].mxu0 }
0x3224   : > { %v5812_v21 = vpop.f32.mrb[150].mxu0 }
0x3225   : > { %v7739_v63 = vpop.f32.mrb[151].mxu0 }
0x3227   : > { %5820 = vrot.lane.b32.xlu1 %v5812_v21, %s8190_s16 }
0x322a   : > { %v5934_v33 = vpop.f32.mrb[152].mxu0 }
0x322b   : > { %5943 = vrot.lane.b32.xlu0 %v5934_v33, %s8191_s23  ;;  %v7750_v50 = vpop.f32.mrb[153].mxu0 }
0x322c   : > { %v5937_v19 = vpop.f32.mrb[154].mxu0 }
0x322d   : > { %5945 = vrot.lane.b32.xlu1 %v5937_v19, %s8191_s23  ;;  %v7751_v41 = vpop.f32.mrb[155].mxu0 }
0x322e   : > { %v7938_v41 = vld [vmem:[%s9652_s3 + $0x50] sm:$0xff]  }
0x328d   : > { %v5694_v55 = vpop.permute.xlu0 %5693 }
0x328e   : > { %5699 = vst.msk [vmem:[#allocation2] sm:$0xff] %vm909_vm3, %v5694_v55  ;;  %v7939_v55 = vld [vmem:[%s9652_s3 + $0x58] sm:$0xff]  }
0x328f   : > { %v5696_v58 = vpop.permute.xlu1 %5695 }
0x3290   : > { %5700 = vst.msk [vmem:[#allocation2 + $0x8] sm:$0xff] %vm909_vm3, %v5696_v58 }
0x3295   : > { %v5819_v59 = vpop.permute.xlu1 %5818 }
0x3296   : > { %5824 = vst.msk [vmem:[#allocation2] sm:$0xff] %vm1043_vm4, %v5819_v59 }
0x3299   : > { %v5821_v4 = vpop.permute.xlu1 %5820 }
0x329a   : > { %5825 = vst.msk [vmem:[#allocation2 + $0x8] sm:$0xff] %vm1043_vm4, %v5821_v4 }
0x329d   : > { %v5944_v60 = vpop.permute.xlu0 %5943 }
0x329e   : > { %5949 = vst.msk [vmem:[#allocation2] sm:$0xff] %vm1177_vm5, %v5944_v60  ;;  %v6864_v60 = vld [vmem:[%s9654_s5 + $0xc] ss:$0 sm:$0xff] }
0x329f   : > { %v5946_v13 = vpop.permute.xlu1 %5945 }
0x32a0   : > { %5950 = vst.msk [vmem:[#allocation2 + $0x8] sm:$0xff] %vm1177_vm5, %v5946_v13 }
0x32a5   : > { %v5951_v31 = vld [vmem:[#allocation2] sm:$0xff] }
0x32a7   : > { %v5952_v62 = vld [vmem:[#allocation2 + $0x8] sm:$0xff] }
0x32a8   : > { %v5953_v0 = vpack.c.bf16 %v5952_v62, %v5951_v31 }
0x32aa   : > { %7761 = vmatmul.mubr.msk.bf16.vlgmr.msra.gmra.mrb[148].mxu1 %vm328_vm1, %v5953_v0 }
0x32ab   : > { %7780 = vmatprep.mubr.msk.bf16.mxu1 %vm8185_vm0, %v8184_v1  ;;  %7777 = vmatpush3.bf16.msra.mxu1 %v7934_v44 }
0x32ac   : > { %7778 = vmatprep.subr.bf16.mxu1 %v8184_v1 }
0x32af   : > { %7779 = vmatpush3.bf16.msra.mxu1 %v7935_v7 }
0x32b0   : > { %7796 = vmatprep.subr.bf16.mxu1 %v8184_v1 }
0x337d   : > { %v6015_v8 = vpop.f32.mrb[148].mxu1 }
0x337e   : > { %v9552_v61 = vadd.f32 %v6015_v8, %v9421_v32  ;;  %v7762_v9 = vpop.f32.mrb[149].mxu1 }
0x337f   : > { %v6018_v10 = vpop.f32.mrb[150].mxu1 }
0x3380   : > { %v9555_v14 = vadd.f32 %v6018_v10, %v9424_v12  ;;  %v7763_v36 = vpop.f32.mrb[151].mxu1  ;;  %v6026_v48 = vsel %vm328_vm1, %v9552_v61, 0.0  ;;  %v7940_v10 = vld [vmem:[%s9653_s4 + $0x20] sm:$0xff]  }
0x3381   : > { %6027 = vadd.xlane.f32.xlu0 %v6026_v48 }
0x3382   : > { %v6029_v51 = vsel %vm328_vm1, %v9555_v14, 0.0 }
0x3383   : > { %6030 = vadd.xlane.f32.xlu1 %v6029_v51 }
0x340e   : > { %v6028_v34 = vpop.xlane.xlu0 %6027 }
0x340f   : > { %v6032_v3 = vmul.f32 0.015625, %v6028_v34 }
0x3410   : > { %v6031_v2 = vpop.xlane.xlu1 %6030 }
0x3411   : > { %v6034_v32 = vsub.f32 %v9552_v61, %v6032_v3  ;;  %v6033_v15 = vmul.f32 0.015625, %v6031_v2 }
0x3413   : > { %v6035_v49 = vsub.f32 %v9555_v14, %v6033_v15  ;;  %v6036_v56 = vmul.f32 %v6034_v32, %v6034_v32 }
0x3415   : > { %v6038_v12 = vsel %vm328_vm1, %v6036_v56, 0.0  ;;  %v6037_v6 = vmul.f32 %v6035_v49, %v6035_v49 }
0x3416   : > { %6039 = vadd.xlane.f32.xlu0 %v6038_v12 }
0x3417   : > { %v6041_v53 = vsel %vm328_vm1, %v6037_v6, 0.0 }
0x341a   : > { %6042 = vadd.xlane.f32.xlu0 %v6041_v53 }
0x34a3   : > { %v6040_v23 = vpop.xlane.xlu0 %6039 }
0x34a4   : > { %v6044_v5 = vmul.f32 0.015625, %v6040_v23 }
0x34a6   : > { %v6046_v25 = vadd.f32 1e-07, %v6044_v5 }
0x34a7   : > { %v6043_v26 = vpop.xlane.xlu0 %6042 }
0x34a8   : > { %8170 = vrsqrt.f32 %v6046_v25  ;;  %v6045_v27 = vmul.f32 0.015625, %v6043_v26 }
0x34aa   : > { %v6047_v28 = vadd.f32 1e-07, %v6045_v27 }
0x34ac   : > { %8172 = vrsqrt.f32 %v6047_v28 }
0x34b2   : > { %v8171_v29 = vpop.eup %8170 }
0x34b3   : > { %v6050_v30 = vmul.f32 %v8171_v29, %v6034_v32 }
0x34b5   : > { %v6056_v37 = vmul.f32 %v6841_v17, %v6050_v30 }
0x34b6   : > { %v8173_v35 = vpop.eup %8172 }
0x34b7   : > { %v6051_v54 = vmul.f32 %v8173_v35, %v6035_v49  ;;  %v6062_v42 = vadd.f32 %v6842_v38, %v6056_v37 }
0x34b9   : > { %v6057_v40 = vmul.f32 %v6841_v17, %v6051_v54 }
0x34bb   : > { %v6063_v24 = vadd.f32 %v6842_v38, %v6057_v40 }
0x34bd   : > { %v6072_v43 = vpack.c.bf16 %v6063_v24, %v6062_v42 }
0x34bf   : > { %7773 = vmatmul.mubr.msk.bf16.vlgmr.msra.gmra.mrb[156].mxu0 %vm328_vm1, %v6072_v43 }
0x34c0   : > { %7792 = vmatprep.mubr.msk.bf16.mxu0 %vm8185_vm0, %v8184_v1  ;;  %7785 = vmatpush3.bf16.msra.mxu0 %v7936_v11 }
0x34c1   : > { %7786 = vmatprep.subr.bf16.mxu0 %v8184_v1 }
0x34c4   : > { %7787 = vmatpush3.bf16.msra.mxu0 %v7937_v46 }
0x34c5   : > { %7788 = vmatprep.subr.bf16.mxu0 %v8184_v1 }
0x34c8   : > { %7789 = vmatpush3.bf16.msra.mxu0 %v7938_v41 }
0x34c9   : > { %7790 = vmatprep.subr.bf16.mxu0 %v8184_v1 }
0x34cc   : > { %7791 = vmatpush3.bf16.msra.mxu0 %v7939_v55 }
0x3592   : > { %v6139_v45 = vpop.f32.mrb[156].mxu0 }
0x3593   : > { %v6140_v52 = vadd.f32 %v6851_v47, %v6139_v45  ;;  %v7774_v20 = vpop.f32.mrb[157].mxu0 }
0x3594   : > { %v6142_v21 = vpop.f32.mrb[158].mxu0 }
0x3595   : > { %v6143_v57 = vadd.f32 %v6851_v47, %v6142_v21  ;;  %v7775_v63 = vpop.f32.mrb[159].mxu0  ;;  %v6146_v33 = vmax.f32 %v6140_v52, 0.0 }
0x3597   : > { %v6147_v50 = vmax.f32 %v6143_v57, 0.0 }
0x3599   : > { %v6152_v19 = vpack.c.bf16 %v6147_v50, %v6146_v33 }
0x359b   : > { %7781 = vmatmul.mubr.msk.bf16.vlgmr.msra.gmra.mrb[152].mxu1 %vm1394_vm6, %v6152_v19 }
0x359c   : > { %7800 = vmatprep.mubr.msk.bf16.mxu1 %vm8185_vm0, %v8184_v1  ;;  %7797 = vmatpush3.bf16.msra.mxu1 %v7940_v10 }
0x359d   : > { %7798 = vmatprep.subr.bf16.mxu1 %v8184_v1  ;;  %v6883_v1 = vld [vmem:[%s9654_s5 + $0xd] ss:$0 sm:$0xff] }
0x366e   : > { %v6202_v58 = vpop.f32.mrb[152].mxu1 }
0x366f   : > { %v6209_v59 = vadd.f32 %v6202_v58, %v9552_v61  ;;  %v7782_v4 = vpop.f32.mrb[153].mxu1  ;;  %v7941_v61 = vld [vmem:[%s9653_s4 + $0x28] sm:$0xff]  }
0x3670   : > { %v6205_v13 = vpop.f32.mrb[154].mxu1  ;;  %7799 = vmatpush3.bf16.msra.mxu1 %v7941_v61 }
0x3671   : > { %v6210_v31 = vadd.f32 %v6205_v13, %v9555_v14  ;;  %v7783_v62 = vpop.f32.mrb[155].mxu1  ;;  %v6216_v0 = vadd.f32 %v6864_v60, %v6209_v59  ;;  %v6873_v14 = vld [vmem:[%s9655_s6 + $0x2] ss:$0 sm:$0xff] }
0x3673   : > { %v6217_v8 = vadd.f32 %v6864_v60, %v6210_v31 }
0x3675   : > { %v6227_v9 = vpack.c.bf16 %v6217_v8, %v6216_v0 }
0x3677   : > { %7793 = vmatmul.mubr.msk.bf16.vlgmr.msra.gmra.mrb[160].mxu0 %vm328_vm1, %v6227_v9 }
0x374a   : > { %v6294_v36 = vpop.f32.mrb[160].mxu0 }
0x374b   : > { %v6295_v48 = vadd.f32 %v6873_v14, %v6294_v36  ;;  %v7794_v51 = vpop.f32.mrb[161].mxu0 }
0x374c   : > { %v6297_v34 = vpop.f32.mrb[162].mxu0 }
0x374d   : > { %v6298_v3 = vadd.f32 %v6873_v14, %v6297_v34  ;;  %v7795_v2 = vpop.f32.mrb[163].mxu0  ;;  %v6301_v32 = vmax.f32 %v6295_v48, 0.0 }
0x374f   : > { %v6302_v15 = vmax.f32 %v6298_v3, 0.0 }
0x3751   : > { %v6308_v49 = vpack.c.bf16 %v6302_v15, %v6301_v32 }
0x3753   : > { %7801 = vmatmul.mubr.msk.bf16.vlgmr.msra.gmra.mrb[156].mxu1 %vm1394_vm6, %v6308_v49 }
0x3826   : > { %v6363_v56 = vpop.f32.mrb[156].mxu1 }
0x3827   : > { %v6364_v12 = vadd.f32 %v6883_v1, %v6363_v56  ;;  %v7802_v6 = vpop.f32.mrb[157].mxu1 }
0x3828   : > { %v6366_v53 = vpop.f32.mrb[158].mxu1 }
0x3829   : > { %v6370_v39 = vadd.f32 %v6364_v12, %v6216_v0  ;;  %v6367_v16 = vadd.f32 %v6883_v1, %v6366_v53  ;;  %v7803_v18 = vpop.f32.mrb[159].mxu1 }
0x382b   : > { %6372 = vst.msk [vmem:[%s280_s15] sm:$0xff] %vm328_vm1, %v6370_v39  ;;  %v6371_v22 = vadd.f32 %v6367_v16, %v6217_v8 }
0x382d   : > { %6373 = vst.msk [vmem:[%s280_s15 + $0x8] sm:$0xff] %vm328_vm1, %v6371_v22 }
0x382e PF: > { %s17_s24 = sadd.s32 1, %s8182_s24  }
0x382f   : > { %p14_p4 = scmp.ge.s32.totalorder %s17_s24, 4  }
0x3831   :  { %16 = sbr.rel (!%p14_p4) target bundleno = 1 (0x1), region = 95 }

</bundles_post_ra>
